<compile_context>
chip_gen: v7x
topology: tpu7x:2x2x1
jax: 0.10.0
libtpu: 0.0.40
codegen_flags: <defaults>
</compile_context>

<pallas_src>
import jax
import jax.numpy as jnp
import numpy as np
from jax import lax
from jax.experimental import pallas as pl
from jax.experimental.pallas import tpu as pltpu

GROUPS = 32          # normalization(channels) == GroupNorm32(32, channels)
EPS = 1e-5


# -----------------------------------------------------------------------------
# Kernel factory (closes over static config: L, group sizes, skip, MXU dtype)
# -----------------------------------------------------------------------------
def _make_resblock_kernel(L, cg_in, cg_out, has_skip, mxu_dtype):
    inv_in = 1.0 / float(cg_in * L)
    inv_out = 1.0 / float(cg_out * L)

    def group_norm_silu(h, gamma, beta, seg, seg_t, inv_count):
        # h: (C, BL) f32.  Per-sample, per-group stats via segment matmuls.
        C, BL = h.shape
        cg = C // GROUPS
        hr = h.reshape(GROUPS, cg, BL)                       # split sublane axis only
        s1 = jnp.sum(hr, axis=1)                             # (G, BL)
        s2 = jnp.sum(hr * hr, axis=1)                        # (G, BL)
        sum1 = jnp.dot(s1, seg, preferred_element_type=jnp.float32)   # (G, B)
        sum2 = jnp.dot(s2, seg, preferred_element_type=jnp.float32)   # (G, B)
        mean = sum1 * inv_count
        var = sum2 * inv_count - mean * mean
        rstd = lax.rsqrt(var + EPS)
        mean_b = jnp.dot(mean, seg_t, preferred_element_type=jnp.float32)  # (G, BL)
        rstd_b = jnp.dot(rstd, seg_t, preferred_element_type=jnp.float32)  # (G, BL)
        hn = (hr - mean_b[:, None, :]) * rstd_b[:, None, :]
        hn = hn.reshape(C, BL) * gamma + beta
        return jax.nn.silu(hn)                               # EUP sigmoid path

    def conv3(h, w, b, mask_l, mask_r):
        # h: (Cin, BL) f32; w: (Cout, 3*Cin) mxu_dtype; b: (Cout, 1) f32.
        BL = h.shape[1]
        h_left = pltpu.roll(h, shift=1, axis=1) * mask_l        # x[l-1], 0 at l==0
        h_right = pltpu.roll(h, shift=BL - 1, axis=1) * mask_r  # x[l+1], 0 at l==L-1
        stacked = jnp.concatenate([h_left, h, h_right], axis=0)  # (3*Cin, BL)
        y = jnp.dot(w, stacked.astype(mxu_dtype),
                    preferred_element_type=jnp.float32)
        return y + b

    def kernel(*refs):
        if has_skip:
            (x_ref, embb_ref,
             g1_ref, bt1_ref, w1_ref, b1_ref,
             g2_ref, bt2_ref, w2_ref, b2_ref,
             ws_ref, bs_ref,
             seg_ref, segt_ref, ml_ref, mr_ref,
             out_ref) = refs
        else:
            (x_ref, embb_ref,
             g1_ref, bt1_ref, w1_ref, b1_ref,
             g2_ref, bt2_ref, w2_ref, b2_ref,
             seg_ref, segt_ref, ml_ref, mr_ref,
             out_ref) = refs

        x = x_ref[...]                                       # (Cin, BL)
        seg = seg_ref[...]                                   # (BL, B)
        seg_t = segt_ref[...]                                # (B, BL)
        mask_l = ml_ref[...]                                 # (1, BL)
        mask_r = mr_ref[...]                                 # (1, BL)

        # ---- in_layers: GroupNorm32 -> SiLU -> Conv1d(k=3, pad=1) ----
        h = group_norm_silu(x, g1_ref[...], bt1_ref[...], seg, seg_t, inv_in)
        h = conv3(h, w1_ref[...], b1_ref[...], mask_l, mask_r)     # (Cout, BL)

        # ---- + emb_layers output (precomputed + broadcast in the wrapper) ----
        h = h + embb_ref[...]

        # ---- out_layers: GroupNorm32 -> SiLU -> Dropout(id) -> Conv1d(k=3) ----
        h = group_norm_silu(h, g2_ref[...], bt2_ref[...], seg, seg_t, inv_out)
        h = conv3(h, w2_ref[...], b2_ref[...], mask_l, mask_r)     # (Cout, BL)

        # ---- skip connection: Identity or 1x1 conv ----
        if has_skip:
            skip = jnp.dot(ws_ref[...], x.astype(mxu_dtype),
                           preferred_element_type=jnp.float32) + bs_ref[...]
        else:
            skip = x

        out_ref[...] = (skip + h).astype(out_ref.dtype)

    return kernel


def _pick_batch_block(n, l):
    """Pick samples-per-block B: N % B == 0 and B*L a multiple of 128 (so the
    lane axis of every block is dense/unmasked); prefer >= 512 lanes."""
    for b in range(1, n + 1):
        if n % b == 0 and (b * l) % 128 == 0 and b * l >= 512:
            return b
    for b in range(1, n + 1):
        if n % b == 0 and (b * l) % 128 == 0:
            return b
    return n          # fall back to the whole batch in one block


# -----------------------------------------------------------------------------
# Wrapper
# -----------------------------------------------------------------------------
def resblock_pallas(x, emb, params, *, mxu_dtype=jnp.bfloat16):
    """x: (N, Cin, L), emb: (N, E).  Returns (N, Cout, L)."""
    N, Cin, L = x.shape
    Cout = params["w1"].shape[0]
    has_skip = "ws" in params

    assert Cin % GROUPS == 0 and Cout % GROUPS == 0, \
        "GroupNorm32 requires channel counts divisible by 32"
    assert has_skip or (Cin == Cout), \
        "1x1 skip conv weights required when out_channels != channels"

    f32 = jnp.float32
    B = _pick_batch_block(N, L)
    NB = N // B
    BL = B * L

    # ---- hoisted emb_layers: SiLU -> Linear for the whole batch (XLA) ----
    emb_out = jax.nn.silu(emb.astype(f32)) @ params["we"].T.astype(f32) \
        + params["be"].astype(f32)                            # (N, Cout)
    emb_b = jnp.broadcast_to(emb_out.T[:, :, None],
                             (Cout, N, L)).reshape(Cout, N * L)

    # ---- lane-dense activation layout: (N, Cin, L) -> (Cin, N*L) ----
    x2 = jnp.transpose(x, (1, 0, 2)).reshape(Cin, N * L).astype(f32)

    # ---- parameters (conv weights folded to K = 3*C, MXU dtype) ----
    g1 = params["g1"].reshape(Cin, 1).astype(f32)
    bt1 = params["bt1"].reshape(Cin, 1).astype(f32)
    w1s = jnp.transpose(params["w1"], (0, 2, 1)).reshape(Cout, 3 * Cin).astype(mxu_dtype)
    b1 = params["b1"].reshape(Cout, 1).astype(f32)
    g2 = params["g2"].reshape(Cout, 1).astype(f32)
    bt2 = params["bt2"].reshape(Cout, 1).astype(f32)
    w2s = jnp.transpose(params["w2"], (0, 2, 1)).reshape(Cout, 3 * Cout).astype(mxu_dtype)
    b2 = params["b2"].reshape(Cout, 1).astype(f32)

    # ---- constants: per-sample segment indicator + conv boundary masks ----
    pos = np.arange(BL)
    seg_np = (pos[:, None] // L == np.arange(B)[None, :]).astype(np.float32)
    seg = jnp.asarray(seg_np)                                 # (BL, B)
    seg_t = jnp.asarray(seg_np.T)                             # (B, BL)
    mask_l = jnp.asarray((pos % L != 0).astype(np.float32)[None, :])       # (1, BL)
    mask_r = jnp.asarray((pos % L != L - 1).astype(np.float32)[None, :])   # (1, BL)

    def invariant(a):
        shape = a.shape
        return pl.BlockSpec(shape, lambda nb: (0,) * len(shape))

    in_specs = [
        pl.BlockSpec((Cin, BL), lambda nb: (0, nb)),          # x slab
        pl.BlockSpec((Cout, BL), lambda nb: (0, nb)),         # emb (pre-broadcast)
        invariant(g1), invariant(bt1), invariant(w1s), invariant(b1),
        invariant(g2), invariant(bt2), invariant(w2s), invariant(b2),
    ]
    args = [x2, emb_b, g1, bt1, w1s, b1, g2, bt2, w2s, b2]
    if has_skip:
        ws = params["ws"].reshape(Cout, Cin).astype(mxu_dtype)
        bs = params["bs"].reshape(Cout, 1).astype(f32)
        in_specs += [invariant(ws), invariant(bs)]
        args += [ws, bs]
    in_specs += [invariant(seg), invariant(seg_t), invariant(mask_l), invariant(mask_r)]
    args += [seg, seg_t, mask_l, mask_r]

    kernel = _make_resblock_kernel(L, Cin // GROUPS, Cout // GROUPS,
                                   has_skip, mxu_dtype)

    # Advisory cost estimate so XLA schedules neighbors around this call.
    conv_flops = 2 * N * L * (3 * Cout * Cin + 3 * Cout * Cout)
    skip_flops = 2 * N * L * Cout * Cin if has_skip else 0
    bytes_acc = sum(int(a.size) * a.dtype.itemsize for a in args) + N * L * Cout * 4
    cost = pl.CostEstimate(flops=int(conv_flops + skip_flops),
                           transcendentals=int(N * L * (Cin + Cout)),
                           bytes_accessed=int(bytes_acc))

    # Explicit VMEM budgeting (matters on v7x: 64 MiB physical / 32 MiB scoped).
    mxu_bytes = jnp.dtype(mxu_dtype).itemsize
    vmem_est = 2 * 4 * BL * (Cin + 2 * Cout)                       # dbl-buffered x/emb/out
    vmem_est += 2 * mxu_bytes * (3 * Cout * Cin + 3 * Cout * Cout
                                 + (Cout * Cin if has_skip else 0))
    vmem_est += 6 * 4 * BL * max(Cin, Cout)                        # in-flight intermediates
    cp_kwargs = dict(dimension_semantics=("parallel",))            # batch blocks -> 2 TCs on v7x
    if vmem_est > 32 * 1024 * 1024:
        cp_kwargs["vmem_limit_bytes"] = min(int(1.25 * vmem_est), 64 * 1024 * 1024)

    out2 = pl.pallas_call(
        kernel,
        out_shape=jax.ShapeDtypeStruct((Cout, N * L), x.dtype),
        grid_spec=pltpu.PrefetchScalarGridSpec(
            num_scalar_prefetch=0,
            grid=(NB,),
            in_specs=in_specs,
            out_specs=pl.BlockSpec((Cout, BL), lambda nb: (0, nb)),
        ),
        compiler_params=pltpu.CompilerParams(**cp_kwargs),
        cost_estimate=cost,
    )(*args)

    return jnp.transpose(out2.reshape(Cout, N, L), (1, 0, 2))


# -----------------------------------------------------------------------------
# Pure-JAX reference (semantics of the PyTorch module, eval mode)
# -----------------------------------------------------------------------------
def resblock_ref(x, emb, params):
    def gn(h, gamma, beta):
        n, c, l = h.shape
        hr = h.reshape(n, GROUPS, -1)
        mean = hr.mean(-1, keepdims=True)
        var = ((hr - mean) ** 2).mean(-1, keepdims=True)
        hn = ((hr - mean) / jnp.sqrt(var + EPS)).reshape(n, c, l)
        return hn * gamma.reshape(1, c, 1) + beta.reshape(1, c, 1)

    def conv1d(h, w, b, pad):
        y = lax.conv_general_dilated(
            h, w, window_strides=(1,), padding=((pad, pad),),
            dimension_numbers=("NCH", "OIH", "NCH"))
        return y + b.reshape(1, -1, 1)

    silu = jax.nn.silu
    h = conv1d(silu(gn(x, params["g1"], params["bt1"])), params["w1"],
               params["b1"], pad=1)
    e_out = silu(emb) @ params["we"].T + params["be"]         # (N, Cout)
    h = h + e_out[:, :, None]
    h = conv1d(silu(gn(h, params["g2"], params["bt2"])), params["w2"],
               params["b2"], pad=1)
    if "ws" in params:
        skip = conv1d(x, params["ws"], params["bs"], pad=0)
    else:
        skip = x
    return skip + h


def make_params(key, cin, cout, e, with_skip):
    ks = jax.random.split(key, 10)
    p = {
        "g1": jnp.ones((cin,), jnp.float32),
        "bt1": jnp.zeros((cin,), jnp.float32),
        "w1": 0.1 * jax.random.normal(ks[0], (cout, cin, 3), jnp.float32),
        "b1": 0.1 * jax.random.normal(ks[1], (cout,), jnp.float32),
        "we": 0.1 * jax.random.normal(ks[2], (cout, e), jnp.float32),
        "be": 0.1 * jax.random.normal(ks[3], (cout,), jnp.float32),
        "g2": 1.0 + 0.1 * jax.random.normal(ks[4], (cout,), jnp.float32),
        "bt2": 0.1 * jax.random.normal(ks[5], (cout,), jnp.float32),
        "w2": 0.1 * jax.random.normal(ks[6], (cout, cout, 3), jnp.float32),
        "b2": 0.1 * jax.random.normal(ks[7], (cout,), jnp.float32),
    }
    if with_skip:
        p["ws"] = 0.1 * jax.random.normal(ks[8], (cout, cin, 1), jnp.float32)
        p["bs"] = 0.1 * jax.random.normal(ks[9], (cout,), jnp.float32)
    return p


# -----------------------------------------------------------------------------
if __name__ == "__main__":
    # Channels must be divisible by the 32 GroupNorm groups; L chosen so the
    # kernel's lane axis (B*L) is 128-dense and the grid has >1 batch block.
    N, Cin, Cout, L, E = 8, 32, 64, 128, 16

    key = jax.random.PRNGKey(0)
    kp, kp_id, kx, ke = jax.random.split(key, 4)
    params = make_params(kp, Cin, Cout, E, with_skip=True)
    x = jax.random.normal(kx, (N, Cin, L), jnp.float32)
    emb = jax.random.normal(ke, (N, E), jnp.float32)

    ref = jax.block_until_ready(resblock_ref(x, emb, params))

    # f32-MXU path: tight check against the reference.
    out_f32 = jax.block_until_ready(
        resblock_pallas(x, emb, params, mxu_dtype=jnp.float32))
    assert out_f32.shape == (N, Cout, L)
    assert jnp.allclose(out_f32, ref, rtol=5e-4, atol=5e-4), "f32 mismatch"

    # Default bf16-MXU-operand path (v6e/v7x optimization); f32 accumulation.
    out_bf16 = jax.block_until_ready(resblock_pallas(x, emb, params))
    assert jnp.allclose(out_bf16, ref, rtol=3e-2, atol=3e-2), "bf16 mismatch"

    # Identity skip branch (out_channels == channels -> nn.Identity).
    params_id = make_params(kp_id, Cin, Cin, E, with_skip=False)
    ref_id = jax.block_until_ready(resblock_ref(x, emb, params_id))
    out_id = jax.block_until_ready(
        resblock_pallas(x, emb, params_id, mxu_dtype=jnp.float32))
    assert jnp.allclose(out_id, ref_id, rtol=5e-4, atol=5e-4), "identity-skip mismatch"

    print("KERNEL_OK")
</pallas_src>

<mosaic_0001>
module attributes {stable_mosaic.version = 11 : i64} {
  func.func @kernel(%arg0: i32, %arg1: memref<32x512xf32, #tpu.memory_space<vmem>>, %arg2: memref<64x512xf32, #tpu.memory_space<vmem>>, %arg3: memref<32x1xf32, #tpu.memory_space<vmem>>, %arg4: memref<32x1xf32, #tpu.memory_space<vmem>>, %arg5: memref<64x96xf32, #tpu.memory_space<vmem>>, %arg6: memref<64x1xf32, #tpu.memory_space<vmem>>, %arg7: memref<64x1xf32, #tpu.memory_space<vmem>>, %arg8: memref<64x1xf32, #tpu.memory_space<vmem>>, %arg9: memref<64x192xf32, #tpu.memory_space<vmem>>, %arg10: memref<64x1xf32, #tpu.memory_space<vmem>>, %arg11: memref<64x32xf32, #tpu.memory_space<vmem>>, %arg12: memref<64x1xf32, #tpu.memory_space<vmem>>, %arg13: memref<512x4xf32, #tpu.memory_space<vmem>>, %arg14: memref<4x512xf32, #tpu.memory_space<vmem>>, %arg15: memref<1x512xf32, #tpu.memory_space<vmem>>, %arg16: memref<1x512xf32, #tpu.memory_space<vmem>>, %arg17: memref<64x512xf32, #tpu.memory_space<vmem>>) attributes {dimension_semantics = [#tpu.dimension_semantics<parallel>], iteration_bounds = array<i64: 2>, scalar_prefetch = 0 : i64, scratch_operands = 0 : i64, tpu.core_type = #tpu.core_type<tc>, window_params = [{transform_indices = @transform_0, window_bounds = array<i64: 32, 512>}, {transform_indices = @transform_1, window_bounds = array<i64: 64, 512>}, {pipeline_mode = #tpu.pipeline_mode<synchronous>, transform_indices = @transform_2, window_bounds = array<i64: 32, 1>}, {pipeline_mode = #tpu.pipeline_mode<synchronous>, transform_indices = @transform_3, window_bounds = array<i64: 32, 1>}, {pipeline_mode = #tpu.pipeline_mode<synchronous>, transform_indices = @transform_4, window_bounds = array<i64: 64, 96>}, {pipeline_mode = #tpu.pipeline_mode<synchronous>, transform_indices = @transform_5, window_bounds = array<i64: 64, 1>}, {pipeline_mode = #tpu.pipeline_mode<synchronous>, transform_indices = @transform_6, window_bounds = array<i64: 64, 1>}, {pipeline_mode = #tpu.pipeline_mode<synchronous>, transform_indices = @transform_7, window_bounds = array<i64: 64, 1>}, {pipeline_mode = #tpu.pipeline_mode<synchronous>, transform_indices = @transform_8, window_bounds = array<i64: 64, 192>}, {pipeline_mode = #tpu.pipeline_mode<synchronous>, transform_indices = @transform_9, window_bounds = array<i64: 64, 1>}, {pipeline_mode = #tpu.pipeline_mode<synchronous>, transform_indices = @transform_10, window_bounds = array<i64: 64, 32>}, {pipeline_mode = #tpu.pipeline_mode<synchronous>, transform_indices = @transform_11, window_bounds = array<i64: 64, 1>}, {pipeline_mode = #tpu.pipeline_mode<synchronous>, transform_indices = @transform_12, window_bounds = array<i64: 512, 4>}, {pipeline_mode = #tpu.pipeline_mode<synchronous>, transform_indices = @transform_13, window_bounds = array<i64: 4, 512>}, {pipeline_mode = #tpu.pipeline_mode<synchronous>, transform_indices = @transform_14, window_bounds = array<i64: 1, 512>}, {pipeline_mode = #tpu.pipeline_mode<synchronous>, transform_indices = @transform_15, window_bounds = array<i64: 1, 512>}, {transform_indices = @transform_16, window_bounds = array<i64: 64, 512>}]} {
    %c0 = arith.constant 0 : index
    %c0_0 = arith.constant 0 : index
    %0 = vector.load %arg1[%c0, %c0_0] : memref<32x512xf32, #tpu.memory_space<vmem>>, vector<32x512xf32>
    %c0_1 = arith.constant 0 : index
    %c0_2 = arith.constant 0 : index
    %1 = vector.load %arg13[%c0_1, %c0_2] : memref<512x4xf32, #tpu.memory_space<vmem>>, vector<512x4xf32>
    %c0_3 = arith.constant 0 : index
    %c0_4 = arith.constant 0 : index
    %2 = vector.load %arg14[%c0_3, %c0_4] : memref<4x512xf32, #tpu.memory_space<vmem>>, vector<4x512xf32>
    %c0_5 = arith.constant 0 : index
    %c0_6 = arith.constant 0 : index
    %3 = vector.load %arg15[%c0_5, %c0_6] : memref<1x512xf32, #tpu.memory_space<vmem>>, vector<1x512xf32>
    %c0_7 = arith.constant 0 : index
    %c0_8 = arith.constant 0 : index
    %4 = vector.load %arg16[%c0_7, %c0_8] : memref<1x512xf32, #tpu.memory_space<vmem>>, vector<1x512xf32>
    %c0_9 = arith.constant 0 : index
    %c0_10 = arith.constant 0 : index
    %5 = vector.load %arg3[%c0_9, %c0_10] : memref<32x1xf32, #tpu.memory_space<vmem>>, vector<32x1xf32>
    %c0_11 = arith.constant 0 : index
    %c0_12 = arith.constant 0 : index
    %6 = vector.load %arg4[%c0_11, %c0_12] : memref<32x1xf32, #tpu.memory_space<vmem>>, vector<32x1xf32>
    %7 = vector.shape_cast %0 : vector<32x512xf32> to vector<32x1x512xf32>
    %cst = arith.constant dense<0.000000e+00> : vector<32x512xf32>
    %8 = vector.multi_reduction <add>, %7, %cst [1] : vector<32x1x512xf32> to vector<32x512xf32>
    %9 = arith.mulf %7, %7 : vector<32x1x512xf32>
    %cst_13 = arith.constant dense<0.000000e+00> : vector<32x512xf32>
    %10 = vector.multi_reduction <add>, %9, %cst_13 [1] : vector<32x1x512xf32> to vector<32x512xf32>
    %cst_14 = arith.constant dense<0.000000e+00> : vector<32x4xf32>
    %11 = tpu.matmul %8, %1, %cst_14 {dimension_numbers = #tpu.dot_dimension_numbers<[1], [0], [0], [1], [0, 0, 1, 1], [], []>} : vector<32x512xf32>, vector<512x4xf32>, vector<32x4xf32> -> vector<32x4xf32>
    %cst_15 = arith.constant dense<0.000000e+00> : vector<32x4xf32>
    %12 = tpu.matmul %10, %1, %cst_15 {dimension_numbers = #tpu.dot_dimension_numbers<[1], [0], [0], [1], [0, 0, 1, 1], [], []>} : vector<32x512xf32>, vector<512x4xf32>, vector<32x4xf32> -> vector<32x4xf32>
    %cst_16 = arith.constant 7.812500e-03 : f32
    %13 = vector.broadcast %cst_16 : f32 to vector<32x4xf32>
    %14 = arith.mulf %11, %13 : vector<32x4xf32>
    %cst_17 = arith.constant 7.812500e-03 : f32
    %15 = vector.broadcast %cst_17 : f32 to vector<32x4xf32>
    %16 = arith.mulf %12, %15 : vector<32x4xf32>
    %17 = arith.mulf %14, %14 : vector<32x4xf32>
    %18 = arith.subf %16, %17 : vector<32x4xf32>
    %cst_18 = arith.constant 9.99999974E-6 : f32
    %19 = vector.broadcast %cst_18 : f32 to vector<32x4xf32>
    %20 = arith.addf %18, %19 : vector<32x4xf32>
    %21 = math.rsqrt %20 : vector<32x4xf32>
    %cst_19 = arith.constant dense<0.000000e+00> : vector<32x512xf32>
    %22 = tpu.matmul %14, %2, %cst_19 {dimension_numbers = #tpu.dot_dimension_numbers<[1], [0], [0], [1], [0, 0, 1, 1], [], []>} : vector<32x4xf32>, vector<4x512xf32>, vector<32x512xf32> -> vector<32x512xf32>
    %cst_20 = arith.constant dense<0.000000e+00> : vector<32x512xf32>
    %23 = tpu.matmul %21, %2, %cst_20 {dimension_numbers = #tpu.dot_dimension_numbers<[1], [0], [0], [1], [0, 0, 1, 1], [], []>} : vector<32x4xf32>, vector<4x512xf32>, vector<32x512xf32> -> vector<32x512xf32>
    %24 = vector.shape_cast %22 : vector<32x512xf32> to vector<32x1x512xf32>
    %25 = arith.subf %7, %24 : vector<32x1x512xf32>
    %26 = vector.shape_cast %23 : vector<32x512xf32> to vector<32x1x512xf32>
    %27 = arith.mulf %25, %26 : vector<32x1x512xf32>
    %28 = vector.shape_cast %27 : vector<32x1x512xf32> to vector<32x512xf32>
    %29 = vector.broadcast %5 : vector<32x1xf32> to vector<32x512xf32>
    %30 = arith.mulf %28, %29 : vector<32x512xf32>
    %31 = vector.broadcast %6 : vector<32x1xf32> to vector<32x512xf32>
    %32 = arith.addf %30, %31 : vector<32x512xf32>
    %33 = arith.negf %32 : vector<32x512xf32>
    %34 = math.exp %33 : vector<32x512xf32>
    %cst_21 = arith.constant 1.000000e+00 : f32
    %35 = vector.broadcast %cst_21 : f32 to vector<32x512xf32>
    %36 = arith.addf %35, %34 : vector<32x512xf32>
    %37 = arith.divf %35, %36 : vector<32x512xf32>
    %38 = arith.mulf %32, %37 : vector<32x512xf32>
    %c0_22 = arith.constant 0 : index
    %c0_23 = arith.constant 0 : index
    %39 = vector.load %arg5[%c0_22, %c0_23] : memref<64x96xf32, #tpu.memory_space<vmem>>, vector<64x96xf32>
    %c0_24 = arith.constant 0 : index
    %c0_25 = arith.constant 0 : index
    %40 = vector.load %arg6[%c0_24, %c0_25] : memref<64x1xf32, #tpu.memory_space<vmem>>, vector<64x1xf32>
    %c1_i32 = arith.constant 1 : i32
    %41 = tpu.dynamic_rotate %38 by %c1_i32 dim 1 : vector<32x512xf32>, i32 -> vector<32x512xf32>
    %42 = vector.broadcast %3 : vector<1x512xf32> to vector<32x512xf32>
    %43 = arith.mulf %41, %42 : vector<32x512xf32>
    %c511_i32 = arith.constant 511 : i32
    %44 = tpu.dynamic_rotate %38 by %c511_i32 dim 1 : vector<32x512xf32>, i32 -> vector<32x512xf32>
    %45 = vector.broadcast %4 : vector<1x512xf32> to vector<32x512xf32>
    %46 = arith.mulf %44, %45 : vector<32x512xf32>
    %47 = tpu.concatenate %43, %38, %46 in 0 : vector<32x512xf32>, vector<32x512xf32>, vector<32x512xf32> -> vector<96x512xf32>
    %cst_26 = arith.constant dense<0.000000e+00> : vector<64x512xf32>
    %48 = tpu.matmul %39, %47, %cst_26 {dimension_numbers = #tpu.dot_dimension_numbers<[1], [0], [0], [1], [0, 0, 1, 1], [], []>} : vector<64x96xf32>, vector<96x512xf32>, vector<64x512xf32> -> vector<64x512xf32>
    %49 = vector.broadcast %40 : vector<64x1xf32> to vector<64x512xf32>
    %50 = arith.addf %48, %49 : vector<64x512xf32>
    %c0_27 = arith.constant 0 : index
    %c0_28 = arith.constant 0 : index
    %51 = vector.load %arg2[%c0_27, %c0_28] : memref<64x512xf32, #tpu.memory_space<vmem>>, vector<64x512xf32>
    %52 = arith.addf %50, %51 : vector<64x512xf32>
    %c0_29 = arith.constant 0 : index
    %c0_30 = arith.constant 0 : index
    %53 = vector.load %arg7[%c0_29, %c0_30] : memref<64x1xf32, #tpu.memory_space<vmem>>, vector<64x1xf32>
    %c0_31 = arith.constant 0 : index
    %c0_32 = arith.constant 0 : index
    %54 = vector.load %arg8[%c0_31, %c0_32] : memref<64x1xf32, #tpu.memory_space<vmem>>, vector<64x1xf32>
    %55 = vector.shape_cast %52 : vector<64x512xf32> to vector<32x2x512xf32>
    %cst_33 = arith.constant dense<0.000000e+00> : vector<32x512xf32>
    %56 = vector.multi_reduction <add>, %55, %cst_33 [1] : vector<32x2x512xf32> to vector<32x512xf32>
    %57 = arith.mulf %55, %55 : vector<32x2x512xf32>
    %cst_34 = arith.constant dense<0.000000e+00> : vector<32x512xf32>
    %58 = vector.multi_reduction <add>, %57, %cst_34 [1] : vector<32x2x512xf32> to vector<32x512xf32>
    %cst_35 = arith.constant dense<0.000000e+00> : vector<32x4xf32>
    %59 = tpu.matmul %56, %1, %cst_35 {dimension_numbers = #tpu.dot_dimension_numbers<[1], [0], [0], [1], [0, 0, 1, 1], [], []>} : vector<32x512xf32>, vector<512x4xf32>, vector<32x4xf32> -> vector<32x4xf32>
    %cst_36 = arith.constant dense<0.000000e+00> : vector<32x4xf32>
    %60 = tpu.matmul %58, %1, %cst_36 {dimension_numbers = #tpu.dot_dimension_numbers<[1], [0], [0], [1], [0, 0, 1, 1], [], []>} : vector<32x512xf32>, vector<512x4xf32>, vector<32x4xf32> -> vector<32x4xf32>
    %cst_37 = arith.constant 3.906250e-03 : f32
    %61 = vector.broadcast %cst_37 : f32 to vector<32x4xf32>
    %62 = arith.mulf %59, %61 : vector<32x4xf32>
    %cst_38 = arith.constant 3.906250e-03 : f32
    %63 = vector.broadcast %cst_38 : f32 to vector<32x4xf32>
    %64 = arith.mulf %60, %63 : vector<32x4xf32>
    %65 = arith.mulf %62, %62 : vector<32x4xf32>
    %66 = arith.subf %64, %65 : vector<32x4xf32>
    %cst_39 = arith.constant 9.99999974E-6 : f32
    %67 = vector.broadcast %cst_39 : f32 to vector<32x4xf32>
    %68 = arith.addf %66, %67 : vector<32x4xf32>
    %69 = math.rsqrt %68 : vector<32x4xf32>
    %cst_40 = arith.constant dense<0.000000e+00> : vector<32x512xf32>
    %70 = tpu.matmul %62, %2, %cst_40 {dimension_numbers = #tpu.dot_dimension_numbers<[1], [0], [0], [1], [0, 0, 1, 1], [], []>} : vector<32x4xf32>, vector<4x512xf32>, vector<32x512xf32> -> vector<32x512xf32>
    %cst_41 = arith.constant dense<0.000000e+00> : vector<32x512xf32>
    %71 = tpu.matmul %69, %2, %cst_41 {dimension_numbers = #tpu.dot_dimension_numbers<[1], [0], [0], [1], [0, 0, 1, 1], [], []>} : vector<32x4xf32>, vector<4x512xf32>, vector<32x512xf32> -> vector<32x512xf32>
    %72 = vector.shape_cast %70 : vector<32x512xf32> to vector<32x1x512xf32>
    %73 = vector.broadcast %72 : vector<32x1x512xf32> to vector<32x2x512xf32>
    %74 = arith.subf %55, %73 : vector<32x2x512xf32>
    %75 = vector.shape_cast %71 : vector<32x512xf32> to vector<32x1x512xf32>
    %76 = vector.broadcast %75 : vector<32x1x512xf32> to vector<32x2x512xf32>
    %77 = arith.mulf %74, %76 : vector<32x2x512xf32>
    %78 = vector.shape_cast %77 : vector<32x2x512xf32> to vector<64x512xf32>
    %79 = vector.broadcast %53 : vector<64x1xf32> to vector<64x512xf32>
    %80 = arith.mulf %78, %79 : vector<64x512xf32>
    %81 = vector.broadcast %54 : vector<64x1xf32> to vector<64x512xf32>
    %82 = arith.addf %80, %81 : vector<64x512xf32>
    %83 = arith.negf %82 : vector<64x512xf32>
    %84 = math.exp %83 : vector<64x512xf32>
    %cst_42 = arith.constant 1.000000e+00 : f32
    %85 = vector.broadcast %cst_42 : f32 to vector<64x512xf32>
    %86 = arith.addf %85, %84 : vector<64x512xf32>
    %87 = arith.divf %85, %86 : vector<64x512xf32>
    %88 = arith.mulf %82, %87 : vector<64x512xf32>
    %c0_43 = arith.constant 0 : index
    %c0_44 = arith.constant 0 : index
    %89 = vector.load %arg9[%c0_43, %c0_44] : memref<64x192xf32, #tpu.memory_space<vmem>>, vector<64x192xf32>
    %c0_45 = arith.constant 0 : index
    %c0_46 = arith.constant 0 : index
    %90 = vector.load %arg10[%c0_45, %c0_46] : memref<64x1xf32, #tpu.memory_space<vmem>>, vector<64x1xf32>
    %c1_i32_47 = arith.constant 1 : i32
    %91 = tpu.dynamic_rotate %88 by %c1_i32_47 dim 1 : vector<64x512xf32>, i32 -> vector<64x512xf32>
    %92 = vector.broadcast %3 : vector<1x512xf32> to vector<64x512xf32>
    %93 = arith.mulf %91, %92 : vector<64x512xf32>
    %c511_i32_48 = arith.constant 511 : i32
    %94 = tpu.dynamic_rotate %88 by %c511_i32_48 dim 1 : vector<64x512xf32>, i32 -> vector<64x512xf32>
    %95 = vector.broadcast %4 : vector<1x512xf32> to vector<64x512xf32>
    %96 = arith.mulf %94, %95 : vector<64x512xf32>
    %97 = tpu.concatenate %93, %88, %96 in 0 : vector<64x512xf32>, vector<64x512xf32>, vector<64x512xf32> -> vector<192x512xf32>
    %cst_49 = arith.constant dense<0.000000e+00> : vector<64x512xf32>
    %98 = tpu.matmul %89, %97, %cst_49 {dimension_numbers = #tpu.dot_dimension_numbers<[1], [0], [0], [1], [0, 0, 1, 1], [], []>} : vector<64x192xf32>, vector<192x512xf32>, vector<64x512xf32> -> vector<64x512xf32>
    %99 = vector.broadcast %90 : vector<64x1xf32> to vector<64x512xf32>
    %100 = arith.addf %98, %99 : vector<64x512xf32>
    %c0_50 = arith.constant 0 : index
    %c0_51 = arith.constant 0 : index
    %101 = vector.load %arg11[%c0_50, %c0_51] : memref<64x32xf32, #tpu.memory_space<vmem>>, vector<64x32xf32>
    %cst_52 = arith.constant dense<0.000000e+00> : vector<64x512xf32>
    %102 = tpu.matmul %101, %0, %cst_52 {dimension_numbers = #tpu.dot_dimension_numbers<[1], [0], [0], [1], [0, 0, 1, 1], [], []>} : vector<64x32xf32>, vector<32x512xf32>, vector<64x512xf32> -> vector<64x512xf32>
    %c0_53 = arith.constant 0 : index
    %c0_54 = arith.constant 0 : index
    %103 = vector.load %arg12[%c0_53, %c0_54] : memref<64x1xf32, #tpu.memory_space<vmem>>, vector<64x1xf32>
    %104 = vector.broadcast %103 : vector<64x1xf32> to vector<64x512xf32>
    %105 = arith.addf %102, %104 : vector<64x512xf32>
    %106 = arith.addf %105, %100 : vector<64x512xf32>
    %c0_55 = arith.constant 0 : index
    %c0_56 = arith.constant 0 : index
    %107 = vector.load %arg17[%c0_55, %c0_56] : memref<64x512xf32, #tpu.memory_space<vmem>>, vector<64x512xf32>
    tpu.vector_store %arg17[%c0_55, %c0_56], %106 {strides = array<i32>} : memref<64x512xf32, #tpu.memory_space<vmem>>, vector<64x512xf32>,
    return
  }
  func.func @transform_0(%arg0: i32) -> (i32, i32) {
    %c0_i32 = arith.constant 0 : i32
    %c0_i32_0 = arith.constant 0 : i32
    return %c0_i32, %arg0 : i32, i32
  }
  func.func @transform_1(%arg0: i32) -> (i32, i32) {
    %c0_i32 = arith.constant 0 : i32
    %c0_i32_0 = arith.constant 0 : i32
    return %c0_i32, %arg0 : i32, i32
  }
  func.func @transform_2(%arg0: i32) -> (i32, i32) {
    %c0_i32 = arith.constant 0 : i32
    %c0_i32_0 = arith.constant 0 : i32
    %c0_i32_1 = arith.constant 0 : i32
    return %c0_i32, %c0_i32_0 : i32, i32
  }
  func.func @transform_3(%arg0: i32) -> (i32, i32) {
    %c0_i32 = arith.constant 0 : i32
    %c0_i32_0 = arith.constant 0 : i32
    %c0_i32_1 = arith.constant 0 : i32
    return %c0_i32, %c0_i32_0 : i32, i32
  }
  func.func @transform_4(%arg0: i32) -> (i32, i32) {
    %c0_i32 = arith.constant 0 : i32
    %c0_i32_0 = arith.constant 0 : i32
    %c0_i32_1 = arith.constant 0 : i32
    return %c0_i32, %c0_i32_0 : i32, i32
  }
  func.func @transform_5(%arg0: i32) -> (i32, i32) {
    %c0_i32 = arith.constant 0 : i32
    %c0_i32_0 = arith.constant 0 : i32
    %c0_i32_1 = arith.constant 0 : i32
    return %c0_i32, %c0_i32_0 : i32, i32
  }
  func.func @transform_6(%arg0: i32) -> (i32, i32) {
    %c0_i32 = arith.constant 0 : i32
    %c0_i32_0 = arith.constant 0 : i32
    %c0_i32_1 = arith.constant 0 : i32
    return %c0_i32, %c0_i32_0 : i32, i32
  }
  func.func @transform_7(%arg0: i32) -> (i32, i32) {
    %c0_i32 = arith.constant 0 : i32
    %c0_i32_0 = arith.constant 0 : i32
    %c0_i32_1 = arith.constant 0 : i32
    return %c0_i32, %c0_i32_0 : i32, i32
  }
  func.func @transform_8(%arg0: i32) -> (i32, i32) {
    %c0_i32 = arith.constant 0 : i32
    %c0_i32_0 = arith.constant 0 : i32
    %c0_i32_1 = arith.constant 0 : i32
    return %c0_i32, %c0_i32_0 : i32, i32
  }
  func.func @transform_9(%arg0: i32) -> (i32, i32) {
    %c0_i32 = arith.constant 0 : i32
    %c0_i32_0 = arith.constant 0 : i32
    %c0_i32_1 = arith.constant 0 : i32
    return %c0_i32, %c0_i32_0 : i32, i32
  }
  func.func @transform_10(%arg0: i32) -> (i32, i32) {
    %c0_i32 = arith.constant 0 : i32
    %c0_i32_0 = arith.constant 0 : i32
    %c0_i32_1 = arith.constant 0 : i32
    return %c0_i32, %c0_i32_0 : i32, i32
  }
  func.func @transform_11(%arg0: i32) -> (i32, i32) {
    %c0_i32 = arith.constant 0 : i32
    %c0_i32_0 = arith.constant 0 : i32
    %c0_i32_1 = arith.constant 0 : i32
    return %c0_i32, %c0_i32_0 : i32, i32
  }
  func.func @transform_12(%arg0: i32) -> (i32, i32) {
    %c0_i32 = arith.constant 0 : i32
    %c0_i32_0 = arith.constant 0 : i32
    %c0_i32_1 = arith.constant 0 : i32
    return %c0_i32, %c0_i32_0 : i32, i32
  }
  func.func @transform_13(%arg0: i32) -> (i32, i32) {
    %c0_i32 = arith.constant 0 : i32
    %c0_i32_0 = arith.constant 0 : i32
    %c0_i32_1 = arith.constant 0 : i32
    return %c0_i32, %c0_i32_0 : i32, i32
  }
  func.func @transform_14(%arg0: i32) -> (i32, i32) {
    %c0_i32 = arith.constant 0 : i32
    %c0_i32_0 = arith.constant 0 : i32
    %c0_i32_1 = arith.constant 0 : i32
    return %c0_i32, %c0_i32_0 : i32, i32
  }
  func.func @transform_15(%arg0: i32) -> (i32, i32) {
    %c0_i32 = arith.constant 0 : i32
    %c0_i32_0 = arith.constant 0 : i32
    %c0_i32_1 = arith.constant 0 : i32
    return %c0_i32, %c0_i32_0 : i32, i32
  }
  func.func @transform_16(%arg0: i32) -> (i32, i32) {
    %c0_i32 = arith.constant 0 : i32
    %c0_i32_0 = arith.constant 0 : i32
    return %c0_i32, %arg0 : i32, i32
  }
}

</mosaic_0001>

<bundles_post_ra>
// kernel: tpu_custom_call.1
= control target key start
LH: loop header
LB: loop body
LE: loop exit
PB: predicated region body
PF: predicated region fallthrough
CT: control target
= control target key end

     0   :  { %s23414_s0 = inlined_call_operand.vmem [shape: f32[32,1024], index: 0, kind: input, shape index: {}]   ;;  %s23415_s1 = inlined_call_operand.vmem [shape: f32[64,1024], index: 1, kind: input, shape index: {}]   ;;  %s23416_s2 = inlined_call_operand.vmem [shape: f32[32,1], index: 2, kind: input, shape index: {}]   ;;  %s23417_s3 = inlined_call_operand.vmem [shape: f32[32,1], index: 3, kind: input, shape index: {}]   ;;  %s23418_s4 = inlined_call_operand.vmem [shape: f32[64,96], index: 4, kind: input, shape index: {}]   ;;  %s23419_s5 = inlined_call_operand.vmem [shape: f32[64,1], index: 5, kind: input, shape index: {}]   ;;  %s23420_s6 = inlined_call_operand.vmem [shape: f32[64,1], index: 6, kind: input, shape index: {}]   ;;  %s23421_s7 = inlined_call_operand.vmem [shape: f32[64,1], index: 7, kind: input, shape index: {}]   ;;  %s23422_s8 = inlined_call_operand.vmem [shape: f32[64,192], index: 8, kind: input, shape index: {}]   ;;  %s23423_s9 = inlined_call_operand.vmem [shape: f32[64,1], index: 9, kind: input, shape index: {}]   ;;  %s23424_s10 = inlined_call_operand.vmem [shape: f32[64,32], index: 10, kind: input, shape index: {}]   ;;  %s23425_s11 = inlined_call_operand.vmem [shape: f32[64,1], index: 11, kind: input, shape index: {}]   ;;  %s23426_s12 = inlined_call_operand.vmem [shape: f32[512,4], index: 12, kind: input, shape index: {}]   ;;  %s23427_s13 = inlined_call_operand.vmem [shape: f32[4,512], index: 13, kind: input, shape index: {}]   ;;  %s23428_s14 = inlined_call_operand.vmem [shape: f32[1,512], index: 14, kind: input, shape index: {}]   ;;  %s23429_s15 = inlined_call_operand.vmem [shape: f32[1,512], index: 15, kind: input, shape index: {}]   ;;  %s23430_s16 = inlined_call_operand.hbm [shape: f32[64,1024], index: 16, kind: output, shape index: {}]  }
   0x1   :  { %23919 = sst [smem:[#allocation212_spill]] %s23414_s0 }
   0x2   :  { %23920 = sst [smem:[#allocation213_spill]] %s23415_s1 }
   0x3   :  { %21 = vsyncpa [#allocation5], 0 }
   0x4   :  { %23 = vsyncpa [#allocation5 + $0x1], 0  ;;  %s15964_s21 = smov 0   ;;  %s15966_s22 = smov 0  }
   0x5   :  { %s15968_s23 = smov 0   ;;  %s15970_s24 = smov 0  }
   0x6 LB: > { %23921 = sst [smem:[#allocation7_spill]] %s15855_s22  ;;  %s23431_s25 = sadd.s32 4294967295, %s15863_s24   ;;  %s15863_s24 = sphi %s15970_s24, %s24965_s24   ;;  %s15859_s23 = sphi %s15968_s23, %s24968_s23   ;;  %s15855_s22 = sphi %s15966_s22, %s24967_s22   ;;  %s15851_s21 = sphi %s15964_s21, %s24966_s21  }
   0x7   : > { %23922 = sst [smem:[#allocation8_spill]] %s15859_s23  ;;  %s14360_s26 = sadd.s32 4294967294, %s15863_s24  }
   0x8   : > { %s15987_s27 = sadd.s32 1, %s15863_s24   ;;  %s36_s28 = sadd.s32 1, %s15859_s23 }
   0x9   : > { %23923 = sst [smem:[#allocation9_spill]] %s15987_s27  ;;  %s33_s29 = ssub.s32 %s15863_s24, %s15987_s27 }
   0xa   : > { %p43_p0 = scmp.ne.s32.totalorder %s15859_s23, %s15855_s22  ;;  %p34_p1 = scmp.eq.s32.totalorder %s33_s29, 0 }
   0xb   : > { %p44_p2 = scmp.eq.s32.totalorder %s15863_s24, 0  ;;  %p393_p3 = scmp.eq.s32.totalorder %s23431_s25, 1 }
   0xc   : > { %p398_p4 = scmp.ne.s32.totalorder %s15855_s22, %s15851_s21  ;;  %p399_p7 = scmp.eq.s32.totalorder %s14360_s26, 1 }
   0xd   : > { %s16000_s30 = scalar_select %p34_p1, %s15859_s23, %s36_s28  }
   0xe   : > { %p16002_p5 = por %p44_p2, %p43_p0  ;;  %p16006_p6 = por %p393_p3, %p43_p0 }
   0xf   : > { %23924 = sst [smem:[#allocation10_spill]] %s16000_s30  ;;  %p16010_p8 = por %p399_p7, %p398_p4 }
  0x10   : > { %p14362_p9 = scmp.ge.s32.totalorder %s15863_s24, 2 }
  0x11   : > { %s23927_s18 = scalar_select %p16010_p8, 1, 0 }
  0x12   : > { %457 = sbr.rel (%p14362_p9) target bundleno = 69 (0x45), region = 72 }
  0x13   : > { %23928 = sst [smem:[#allocation11_spill]] %s23927_s18 }
  0x19   : > { %460 = sbr.rel (!%p16002_p5) target bundleno = 43 (0x2b), region = 76  ;;  %s462_s19 = sand.u32 (%p16002_p5), 1, %s15859_s23  }
  0x1a   : > { %s14570_s20 = sshll.u32 (%p16002_p5), %s15863_s24, 5  ;;  %s14363_s28 = sshll.u32 (%p16002_p5), %s462_s19, 7 }
  0x1b   : > { %s23929_s26 = sld [smem:[#allocation212_spill]] (%p16002_p5)  ;;  %s464_s27 = scalar_lea.vmem (%p16002_p5), [#allocation2], %s14363_s28 }
  0x21   : > { %s16024_s30 = scalar_lea.vmem %s23929_s26, %s14570_s20 }
  0x22   : > { %v480_v0 = vld [vmem:[%s16024_s30] sm:$0xff]  ;;  %v482_v1 = vld [vmem:[%s16024_s30 + $0x8] sm:$0xff]  ;;  %v484_v2 = vld [vmem:[%s16024_s30 + $0x10] sm:$0xff] }
  0x23   : > { %481 = vst [vmem:[%s464_s27] sm:$0xff] %v480_v0  ;;  %483 = vst [vmem:[%s464_s27 + $0x8] sm:$0xff] %v482_v1  ;;  %v486_v3 = vld [vmem:[%s16024_s30 + $0x18] sm:$0xff]  ;;  %v488_v4 = vld [vmem:[%s16024_s30 + $0x40] sm:$0xff] }
  0x24   : > { %485 = vst [vmem:[%s464_s27 + $0x10] sm:$0xff] %v484_v2  ;;  %v490_v5 = vld [vmem:[%s16024_s30 + $0x48] sm:$0xff]  ;;  %487 = vst [vmem:[%s464_s27 + $0x18] sm:$0xff] %v486_v3  ;;  %v492_v6 = vld [vmem:[%s16024_s30 + $0x50] sm:$0xff] }
  0x25   : > { %489 = vst [vmem:[%s464_s27 + $0x20] sm:$0xff] %v488_v4  ;;  %491 = vst [vmem:[%s464_s27 + $0x28] sm:$0xff] %v490_v5  ;;  %v494_v7 = vld [vmem:[%s16024_s30 + $0x58] sm:$0xff]  ;;  %v496_v8 = vld [vmem:[%s16024_s30 + $0x80] sm:$0xff] }
  0x26   : > { %493 = vst [vmem:[%s464_s27 + $0x30] sm:$0xff] %v492_v6  ;;  %495 = vst [vmem:[%s464_s27 + $0x38] sm:$0xff] %v494_v7  ;;  %v498_v9 = vld [vmem:[%s16024_s30 + $0x88] sm:$0xff]  ;;  %v500_v10 = vld [vmem:[%s16024_s30 + $0x90] sm:$0xff] }
  0x27   : > { %497 = vst [vmem:[%s464_s27 + $0x40] sm:$0xff] %v496_v8  ;;  %v502_v11 = vld [vmem:[%s16024_s30 + $0x98] sm:$0xff]  ;;  %499 = vst [vmem:[%s464_s27 + $0x48] sm:$0xff] %v498_v9  ;;  %v504_v12 = vld [vmem:[%s16024_s30 + $0xc0] sm:$0xff] }
  0x28   : > { %501 = vst [vmem:[%s464_s27 + $0x50] sm:$0xff] %v500_v10  ;;  %503 = vst [vmem:[%s464_s27 + $0x58] sm:$0xff] %v502_v11  ;;  %v506_v13 = vld [vmem:[%s16024_s30 + $0xc8] sm:$0xff]  ;;  %v508_v14 = vld [vmem:[%s16024_s30 + $0xd0] sm:$0xff] }
  0x29   : > { %505 = vst [vmem:[%s464_s27 + $0x60] sm:$0xff] %v504_v12  ;;  %507 = vst [vmem:[%s464_s27 + $0x68] sm:$0xff] %v506_v13  ;;  %v510_v15 = vld [vmem:[%s16024_s30 + $0xd8] sm:$0xff] }
  0x2a   : > { %509 = vst [vmem:[%s464_s27 + $0x70] sm:$0xff] %v508_v14  ;;  %511 = vst [vmem:[%s464_s27 + $0x78] sm:$0xff] %v510_v15 }
  0x2b PF: > { %517 = sbr.rel (!%p16002_p5) target bundleno = 69 (0x45), region = 99  ;;  %s519_s25 = sand.u32 (%p16002_p5), 1, %s15859_s23  }
  0x2c   : > { %s14571_s19 = sshll.u32 (%p16002_p5), %s15863_s24, 5  ;;  %s14366_s20 = sshll.u32 (%p16002_p5), %s519_s25, 8 }
  0x2d   : > { %s23930_s1 = sld [smem:[#allocation213_spill]] (%p16002_p5)  ;;  %s16054_s27 = scalar_lea.vmem (%p16002_p5), [#allocation3], %s14366_s20 }
  0x33   : > { %s16049_s26 = scalar_lea.vmem %s23930_s1, %s14571_s19 }
  0x34   : > { %v537_v16 = vld [vmem:[%s16049_s26] sm:$0xff]  ;;  %v539_v17 = vld [vmem:[%s16049_s26 + $0x8] sm:$0xff]  ;;  %v541_v18 = vld [vmem:[%s16049_s26 + $0x10] sm:$0xff] }
  0x35   : > { %538 = vst [vmem:[%s16054_s27] sm:$0xff] %v537_v16  ;;  %540 = vst [vmem:[%s16054_s27 + $0x8] sm:$0xff] %v539_v17  ;;  %v543_v19 = vld [vmem:[%s16049_s26 + $0x18] sm:$0xff]  ;;  %v545_v20 = vld [vmem:[%s16049_s26 + $0x40] sm:$0xff] }
  0x36   : > { %542 = vst [vmem:[%s16054_s27 + $0x10] sm:$0xff] %v541_v18  ;;  %v547_v21 = vld [vmem:[%s16049_s26 + $0x48] sm:$0xff]  ;;  %544 = vst [vmem:[%s16054_s27 + $0x18] sm:$0xff] %v543_v19  ;;  %v549_v22 = vld [vmem:[%s16049_s26 + $0x50] sm:$0xff] }
  0x37   : > { %546 = vst [vmem:[%s16054_s27 + $0x20] sm:$0xff] %v545_v20  ;;  %548 = vst [vmem:[%s16054_s27 + $0x28] sm:$0xff] %v547_v21  ;;  %v551_v23 = vld [vmem:[%s16049_s26 + $0x58] sm:$0xff]  ;;  %v553_v24 = vld [vmem:[%s16049_s26 + $0x80] sm:$0xff] }
  0x38   : > { %550 = vst [vmem:[%s16054_s27 + $0x30] sm:$0xff] %v549_v22  ;;  %552 = vst [vmem:[%s16054_s27 + $0x38] sm:$0xff] %v551_v23  ;;  %v555_v25 = vld [vmem:[%s16049_s26 + $0x88] sm:$0xff]  ;;  %v557_v26 = vld [vmem:[%s16049_s26 + $0x90] sm:$0xff] }
  0x39   : > { %554 = vst [vmem:[%s16054_s27 + $0x40] sm:$0xff] %v553_v24  ;;  %v559_v27 = vld [vmem:[%s16049_s26 + $0x98] sm:$0xff]  ;;  %556 = vst [vmem:[%s16054_s27 + $0x48] sm:$0xff] %v555_v25  ;;  %v561_v28 = vld [vmem:[%s16049_s26 + $0xc0] sm:$0xff] }
  0x3a   : > { %558 = vst [vmem:[%s16054_s27 + $0x50] sm:$0xff] %v557_v26  ;;  %560 = vst [vmem:[%s16054_s27 + $0x58] sm:$0xff] %v559_v27  ;;  %v563_v29 = vld [vmem:[%s16049_s26 + $0xc8] sm:$0xff]  ;;  %v565_v30 = vld [vmem:[%s16049_s26 + $0xd0] sm:$0xff] }
  0x3b   : > { %562 = vst [vmem:[%s16054_s27 + $0x60] sm:$0xff] %v561_v28  ;;  %564 = vst [vmem:[%s16054_s27 + $0x68] sm:$0xff] %v563_v29  ;;  %v567_v31 = vld [vmem:[%s16049_s26 + $0xd8] sm:$0xff]  ;;  %v569_v32 = vld [vmem:[%s16049_s26 + $0x100] sm:$0xff] }
  0x3c   : > { %566 = vst [vmem:[%s16054_s27 + $0x70] sm:$0xff] %v565_v30  ;;  %v571_v33 = vld [vmem:[%s16049_s26 + $0x108] sm:$0xff]  ;;  %568 = vst [vmem:[%s16054_s27 + $0x78] sm:$0xff] %v567_v31  ;;  %v573_v34 = vld [vmem:[%s16049_s26 + $0x110] sm:$0xff] }
  0x3d   : > { %570 = vst [vmem:[%s16054_s27 + $0x80] sm:$0xff] %v569_v32  ;;  %572 = vst [vmem:[%s16054_s27 + $0x88] sm:$0xff] %v571_v33  ;;  %v575_v35 = vld [vmem:[%s16049_s26 + $0x118] sm:$0xff]  ;;  %v577_v36 = vld [vmem:[%s16049_s26 + $0x140] sm:$0xff] }
  0x3e   : > { %574 = vst [vmem:[%s16054_s27 + $0x90] sm:$0xff] %v573_v34  ;;  %576 = vst [vmem:[%s16054_s27 + $0x98] sm:$0xff] %v575_v35  ;;  %v579_v37 = vld [vmem:[%s16049_s26 + $0x148] sm:$0xff]  ;;  %v581_v38 = vld [vmem:[%s16049_s26 + $0x150] sm:$0xff] }
  0x3f   : > { %578 = vst [vmem:[%s16054_s27 + $0xa0] sm:$0xff] %v577_v36  ;;  %v583_v39 = vld [vmem:[%s16049_s26 + $0x158] sm:$0xff]  ;;  %580 = vst [vmem:[%s16054_s27 + $0xa8] sm:$0xff] %v579_v37  ;;  %v585_v40 = vld [vmem:[%s16049_s26 + $0x180] sm:$0xff] }
  0x40   : > { %582 = vst [vmem:[%s16054_s27 + $0xb0] sm:$0xff] %v581_v38  ;;  %584 = vst [vmem:[%s16054_s27 + $0xb8] sm:$0xff] %v583_v39  ;;  %v587_v41 = vld [vmem:[%s16049_s26 + $0x188] sm:$0xff]  ;;  %v589_v42 = vld [vmem:[%s16049_s26 + $0x190] sm:$0xff] }
  0x41   : > { %586 = vst [vmem:[%s16054_s27 + $0xc0] sm:$0xff] %v585_v40  ;;  %588 = vst [vmem:[%s16054_s27 + $0xc8] sm:$0xff] %v587_v41  ;;  %v591_v43 = vld [vmem:[%s16049_s26 + $0x198] sm:$0xff]  ;;  %v593_v44 = vld [vmem:[%s16049_s26 + $0x1c0] sm:$0xff] }
  0x42   : > { %590 = vst [vmem:[%s16054_s27 + $0xd0] sm:$0xff] %v589_v42  ;;  %v595_v45 = vld [vmem:[%s16049_s26 + $0x1c8] sm:$0xff]  ;;  %592 = vst [vmem:[%s16054_s27 + $0xd8] sm:$0xff] %v591_v43  ;;  %v597_v46 = vld [vmem:[%s16049_s26 + $0x1d0] sm:$0xff] }
  0x43   : > { %594 = vst [vmem:[%s16054_s27 + $0xe0] sm:$0xff] %v593_v44  ;;  %596 = vst [vmem:[%s16054_s27 + $0xe8] sm:$0xff] %v595_v45  ;;  %v599_v47 = vld [vmem:[%s16049_s26 + $0x1d8] sm:$0xff] }
  0x44   : > { %598 = vst [vmem:[%s16054_s27 + $0xf0] sm:$0xff] %v597_v46  ;;  %600 = vst [vmem:[%s16054_s27 + $0xf8] sm:$0xff] %v599_v47 }
  0x45 PF: > { %p14369_p10 = scmp.ge.s32.totalorder %s15863_s24, 1  ;;  %p605_p11 = scmp.lt.s32.totalorder %s15863_s24, 3 }
  0x47   : > { %p606_p12 = pnand %p14369_p10, %p605_p11 }
  0x49   : > { %609 = sbr.rel (%p606_p12) target bundleno = 2784 (0xae0), region = 122 }
  0x50   : > { %v707_v48 = vld [vmem:[%s23426_s12 + $0x80] sm:$0xff]  ;;  %v708_v49 = vld [vmem:[%s23426_s12 + $0x88] sm:$0xff]  ;;  %v709_v59 = vld [vmem:[%s23426_s12 + $0x90] sm:$0xff]  ;;  %v15865_v34 = vmov 1966171168   ;;  %v23437_v36 = vlaneseq  ;;  %s16275_s20 = sand.u32 1, %s15855_s22  }
  0x51   : > { %v739_v50 = vld [vmem:[%s23426_s12 + $0x180] sm:$0xff]  ;;  %v16128_v51 = vpack.c.bf16 %v708_v49, %v707_v48  ;;  %v740_v52 = vld [vmem:[%s23426_s12 + $0x188] sm:$0xff]  ;;  %v710_v61 = vld [vmem:[%s23426_s12 + $0x98] sm:$0xff]  ;;  %v788_v35 = vunpack.c.l.s4 %v15865_v34  ;;  %s23962_s1 = sshll.u32 %s16275_s20, 7  ;;  %vm1868_vm0 = vcmask 1043456   ;;  %vm1855_vm1 = vcmask 31744  }
  0x52   : > { %v691_v53 = vld [vmem:[%s23426_s12] sm:$0xff]  ;;  %v692_v54 = vld [vmem:[%s23426_s12 + $0x8] sm:$0xff]  ;;  %v16139_v55 = vpack.c.bf16 %v740_v52, %v739_v50  ;;  %v741_v62 = vld [vmem:[%s23426_s12 + $0x190] sm:$0xff]  ;;  %v16166_v0 = vpack.c.bf16 %v710_v61, %v709_v59  ;;  %s16402_s27 = scalar_lea.vmem [#allocation2], %s23962_s1  ;;  %s15868_s26 = smov 1   ;;  %vm4139_vm4 = vcmask 785408  }
  0x53   : > { %23931 = vst [vmem:[#allocation12_spill] sm:$0xff] %v16128_v51  ;;  %v16141_v56 = vpack.c.bf16 %v692_v54, %v691_v53  ;;  %v723_v57 = vld [vmem:[%s23426_s12 + $0x100] sm:$0xff]  ;;  %v724_v58 = vld [vmem:[%s23426_s12 + $0x108] sm:$0xff]  ;;  %14926 = vmatprep.subr.bf16.mxu0 %v16128_v51  ;;  %v742_v63 = vld [vmem:[%s23426_s12 + $0x198] sm:$0xff]  ;;  %v789_v54 = vunpack.c.0.s8 %v788_v35  ;;  %s23552_s1 = smov 127   ;;  %s14371_s29 = sshll.u32 %s16275_s20, 8 }
  0x54   : > { %23932 = vst [vmem:[#allocation13_spill] sm:$0xff] %v16139_v55  ;;  %v16153_v60 = vpack.c.bf16 %v724_v58, %v723_v57  ;;  %14958 = vmatprep.subr.bf16.mxu1 %v16139_v55  ;;  %23935 = vst [vmem:[#allocation16_spill] sm:$0xff] %v16166_v0  ;;  %v16168_v1 = vpack.c.bf16 %v742_v63, %v741_v62  ;;  %v693_v2 = vld [vmem:[%s23426_s12 + $0x10] sm:$0xff]  ;;  %v694_v3 = vld [vmem:[%s23426_s12 + $0x18] sm:$0xff]  ;;  %v16318_v57 = vshrl.u32 %v23437_v36, 7  ;;  %s18274_s30 = scalar_lea.vmem [#allocation3], %s14371_s29 }
  0x55   : > { %23933 = vst [vmem:[#allocation14_spill] sm:$0xff] %v16141_v56  ;;  %14928 = vmatpush3.bf16.msra.mxu0 %v16141_v56  ;;  %v725_v4 = vld [vmem:[%s23426_s12 + $0x110] sm:$0xff]  ;;  %v16180_v5 = vpack.c.bf16 %v694_v3, %v693_v2  ;;  %v726_v6 = vld [vmem:[%s23426_s12 + $0x118] sm:$0xff]  ;;  %v711_v7 = vld [vmem:[%s23426_s12 + $0xa0] sm:$0xff]  ;;  %vm5494_vm5 = vcmask 1041408   ;;  %vm8151_vm6 = vcmask 1041409  }
  0x56   : > { %23934 = vst [vmem:[#allocation15_spill] sm:$0xff] %v16153_v60  ;;  %23936 = vst [vmem:[#allocation17_spill] sm:$0xff] %v16168_v1  ;;  %14960 = vmatpush3.bf16.msra.mxu1 %v16153_v60  ;;  %v712_v8 = vld [vmem:[%s23426_s12 + $0xa8] sm:$0xff]  ;;  %14930 = vmatprep.subr.bf16.mxu0 %v16166_v0  ;;  %v16193_v9 = vpack.c.bf16 %v726_v6, %v725_v4  ;;  %v743_v11 = vld [vmem:[%s23426_s12 + $0x1a0] sm:$0xff]  ;;  %vm8153_vm7 = vcmask 1042434   ;;  %vm8155_vm8 = vcmask 1043459  }
  0x57   : > { %23937 = vst [vmem:[#allocation18_spill] sm:$0xff] %v16180_v5  ;;  %14962 = vmatprep.subr.bf16.mxu1 %v16168_v1  ;;  %v16195_v10 = vpack.c.bf16 %v712_v8, %v711_v7  ;;  %v744_v12 = vld [vmem:[%s23426_s12 + $0x1a8] sm:$0xff]  ;;  %v695_v13 = vld [vmem:[%s23426_s12 + $0x20] sm:$0xff]  ;;  %v713_v19 = vld [vmem:[%s23426_s12 + $0xb0] sm:$0xff]  ;;  %vm8157_vm9 = vcmask 1044484   ;;  %vm8159_vm10 = vcmask 1045509  }
  0x58   : > { %23938 = vst [vmem:[#allocation19_spill] sm:$0xff] %v16193_v9  ;;  %v16206_v14 = vpack.c.bf16 %v744_v12, %v743_v11  ;;  %v696_v15 = vld [vmem:[%s23426_s12 + $0x28] sm:$0xff]  ;;  %v727_v16 = vld [vmem:[%s23426_s12 + $0x120] sm:$0xff]  ;;  %v714_v20 = vld [vmem:[%s23426_s12 + $0xb8] sm:$0xff]  ;;  %vm8161_vm11 = vcmask 1046534   ;;  %vm8163_vm12 = vcmask 1047559  }
  0x59   : > { %23939 = vst [vmem:[#allocation20_spill] sm:$0xff] %v16195_v10  ;;  %v728_v17 = vld [vmem:[%s23426_s12 + $0x128] sm:$0xff]  ;;  %14932 = vmatpush3.bf16.msra.mxu0 %v16180_v5  ;;  %v16218_v18 = vpack.c.bf16 %v696_v15, %v695_v13  ;;  %v745_v21 = vld [vmem:[%s23426_s12 + $0x1b0] sm:$0xff]  ;;  %v16233_v23 = vpack.c.bf16 %v714_v20, %v713_v19  ;;  %v746_v24 = vld [vmem:[%s23426_s12 + $0x1b8] sm:$0xff]  ;;  %vm13638_vm13 = vcmask 523264   ;;  %vm13945_vm14 = vcmask 261120  }
  0x5a   : > { %23940 = vst [vmem:[#allocation21_spill] sm:$0xff] %v16206_v14  ;;  %14964 = vmatpush3.bf16.msra.mxu1 %v16193_v9  ;;  %14934 = vmatprep.subr.bf16.mxu0 %v16195_v10  ;;  %v16231_v22 = vpack.c.bf16 %v728_v17, %v727_v16  ;;  %v697_v25 = vld [vmem:[%s23426_s12 + $0x30] sm:$0xff]  ;;  %v698_v26 = vld [vmem:[%s23426_s12 + $0x38] sm:$0xff]  ;;  %v16245_v27 = vpack.c.bf16 %v746_v24, %v745_v21  ;;  %v715_v30 = vld [vmem:[%s23426_s12 + $0xc0] sm:$0xff]  ;;  %s14261_s23 = scalar_lea.sflag [#allocation5], %s16275_s20  ;;  %s15875_s22 = smov [#allocation4]  }
  0x5b   : > { %23941 = vst [vmem:[#allocation22_spill] sm:$0xff] %v16218_v18  ;;  %23943 = vst [vmem:[#allocation24_spill] sm:$0xff] %v16233_v23  ;;  %14966 = vmatprep.subr.bf16.mxu1 %v16206_v14  ;;  %v729_v28 = vld [vmem:[%s23426_s12 + $0x130] sm:$0xff]  ;;  %v730_v29 = vld [vmem:[%s23426_s12 + $0x138] sm:$0xff]  ;;  %v16266_v37 = vpack.c.bf16 %v698_v26, %v697_v25  ;;  %v16369_v17 = vsub.s32 %v789_v54, %v16318_v57  ;;  %s15805_s18 = sshll.u32 %s15875_s22, 4  ;;  %s15806_s18 = int_to_ptr.vmem [resolvable:$false] %s15805_s18 }
  0x5c   : > { %23942 = vst [vmem:[#allocation23_spill] sm:$0xff] %v16231_v22  ;;  %23944 = vst [vmem:[#allocation25_spill] sm:$0xff] %v16245_v27  ;;  %v716_v31 = vld [vmem:[%s23426_s12 + $0xc8] sm:$0xff]  ;;  %v747_v32 = vld [vmem:[%s23426_s12 + $0x1c0] sm:$0xff]  ;;  %v16279_v40 = vpack.c.bf16 %v730_v29, %v729_v28 }
  0x5d   : > { %v748_v33 = vld [vmem:[%s23426_s12 + $0x1c8] sm:$0xff]  ;;  %14936 = vmatpush3.bf16.msra.mxu0 %v16218_v18  ;;  %23945 = vst [vmem:[#allocation26_spill] sm:$0xff] %v16266_v37  ;;  %v699_v38 = vld [vmem:[%s23426_s12 + $0x40] sm:$0xff]  ;;  %v16281_v41 = vpack.c.bf16 %v716_v31, %v715_v30  ;;  %v717_v44 = vld [vmem:[%s23426_s12 + $0xd0] sm:$0xff] }
  0x5e   : > { %v700_v39 = vld [vmem:[%s23426_s12 + $0x48] sm:$0xff]  ;;  %14968 = vmatpush3.bf16.msra.mxu1 %v16231_v22  ;;  %14938 = vmatprep.subr.bf16.mxu0 %v16233_v23  ;;  %23946 = vst [vmem:[#allocation27_spill] sm:$0xff] %v16279_v40  ;;  %v731_v42 = vld [vmem:[%s23426_s12 + $0x140] sm:$0xff]  ;;  %v16293_v45 = vpack.c.bf16 %v748_v33, %v747_v32  ;;  %v718_v46 = vld [vmem:[%s23426_s12 + $0xd8] sm:$0xff] }
  0x5f   : > { %23947 = vst [vmem:[#allocation28_spill] sm:$0xff] %v16281_v41  ;;  %v732_v43 = vld [vmem:[%s23426_s12 + $0x148] sm:$0xff]  ;;  %14970 = vmatprep.subr.bf16.mxu1 %v16245_v27  ;;  %v749_v47 = vld [vmem:[%s23426_s12 + $0x1d0] sm:$0xff]  ;;  %v750_v48 = vld [vmem:[%s23426_s12 + $0x1d8] sm:$0xff]  ;;  %v16321_v58 = vpack.c.bf16 %v700_v39, %v699_v38  ;;  %v16336_v2 = vpack.c.bf16 %v718_v46, %v717_v44 }
  0x60   : > { %23948 = vst [vmem:[#allocation29_spill] sm:$0xff] %v16293_v45  ;;  %v701_v49 = vld [vmem:[%s23426_s12 + $0x50] sm:$0xff]  ;;  %v702_v50 = vld [vmem:[%s23426_s12 + $0x58] sm:$0xff]  ;;  %23949 = vst [vmem:[#allocation30_spill] sm:$0xff] %v16318_v57  ;;  %v16334_v63 = vpack.c.bf16 %v732_v43, %v731_v42  ;;  %v16348_v7 = vpack.c.bf16 %v750_v48, %v749_v47 }
  0x61   : > { %v733_v52 = vld [vmem:[%s23426_s12 + $0x150] sm:$0xff]  ;;  %v734_v53 = vld [vmem:[%s23426_s12 + $0x158] sm:$0xff]  ;;  %14940 = vmatpush3.bf16.msra.mxu0 %v16266_v37  ;;  %23950 = vst [vmem:[#allocation31_spill] sm:$0xff] %v16321_v58  ;;  %v719_v59 = vld [vmem:[%s23426_s12 + $0xe0] sm:$0xff]  ;;  %v16372_v19 = vpack.c.bf16 %v702_v50, %v701_v49 }
  0x62   : > { %v720_v61 = vld [vmem:[%s23426_s12 + $0xe8] sm:$0xff]  ;;  %v751_v62 = vld [vmem:[%s23426_s12 + $0x1e0] sm:$0xff]  ;;  %14972 = vmatpush3.bf16.msra.mxu1 %v16279_v40  ;;  %14942 = vmatprep.subr.bf16.mxu0 %v16281_v41  ;;  %23951 = vst [vmem:[#allocation32_spill] sm:$0xff] %v16334_v63  ;;  %23952 = vst [vmem:[#allocation33_spill] sm:$0xff] %v16336_v2  ;;  %v16374_v20 = vpack.c.bf16 %v734_v53, %v733_v52 }
  0x63   : > { %v752_v3 = vld [vmem:[%s23426_s12 + $0x1e8] sm:$0xff]  ;;  %v703_v4 = vld [vmem:[%s23426_s12 + $0x60] sm:$0xff]  ;;  %14974 = vmatprep.subr.bf16.mxu1 %v16293_v45  ;;  %23953 = vst [vmem:[#allocation34_spill] sm:$0xff] %v16348_v7  ;;  %v721_v12 = vld [vmem:[%s23426_s12 + $0xf0] sm:$0xff]  ;;  %v16376_v21 = vpack.c.bf16 %v720_v61, %v719_v59 }
  0x64   : > { %v704_v6 = vld [vmem:[%s23426_s12 + $0x68] sm:$0xff]  ;;  %v735_v8 = vld [vmem:[%s23426_s12 + $0x160] sm:$0xff]  ;;  %v722_v13 = vld [vmem:[%s23426_s12 + $0xf8] sm:$0xff]  ;;  %23954 = vst [vmem:[#allocation35_spill] sm:$0xff] %v16369_v17  ;;  %v16378_v24 = vpack.c.bf16 %v752_v3, %v751_v62 }
  0x65   : > { %v736_v11 = vld [vmem:[%s23426_s12 + $0x168] sm:$0xff]  ;;  %v753_v15 = vld [vmem:[%s23426_s12 + $0x1f0] sm:$0xff]  ;;  %v754_v16 = vld [vmem:[%s23426_s12 + $0x1f8] sm:$0xff]  ;;  %14944 = vmatpush3.bf16.msra.mxu0 %v16321_v58  ;;  %23955 = vst [vmem:[#allocation36_spill] sm:$0xff] %v16372_v19  ;;  %v16391_v29 = vpack.c.bf16 %v704_v6, %v703_v4  ;;  %v16395_v31 = vpack.c.bf16 %v722_v13, %v721_v12 }
  0x66   : > { %23956 = vst [vmem:[#allocation37_spill] sm:$0xff] %v16374_v20  ;;  %23957 = vst [vmem:[#allocation38_spill] sm:$0xff] %v16376_v21  ;;  %v705_v25 = vld [vmem:[%s23426_s12 + $0x70] sm:$0xff]  ;;  %v706_v26 = vld [vmem:[%s23426_s12 + $0x78] sm:$0xff]  ;;  %14976 = vmatpush3.bf16.msra.mxu1 %v16334_v63  ;;  %14946 = vmatprep.subr.bf16.mxu0 %v16336_v2  ;;  %v16393_v30 = vpack.c.bf16 %v736_v11, %v735_v8  ;;  %v16407_v35 = vpack.c.bf16 %v754_v16, %v753_v15 }
  0x67   : > { %23958 = vst [vmem:[#allocation39_spill] sm:$0xff] %v16378_v24  ;;  %v737_v28 = vld [vmem:[%s23426_s12 + $0x170] sm:$0xff]  ;;  %23959 = vst [vmem:[#allocation40_spill] sm:$0xff] %v16391_v29  ;;  %v738_v32 = vld [vmem:[%s23426_s12 + $0x178] sm:$0xff]  ;;  %14978 = vmatprep.subr.bf16.mxu1 %v16348_v7  ;;  %v16409_v38 = vpack.c.bf16 %v706_v26, %v705_v25 }
  0x68   : > { %23960 = vst [vmem:[#allocation41_spill] sm:$0xff] %v16393_v30  ;;  %23961 = vst [vmem:[#allocation42_spill] sm:$0xff] %v16395_v31  ;;  %v676_v33 = vld [vmem:[%s16402_s27 + $0x8] sm:$0xff]  ;;  %v678_v34 = vld [vmem:[%s16402_s27 + $0x18] sm:$0xff]  ;;  %v16411_v39 = vpack.c.bf16 %v738_v32, %v737_v28 }
  0x69   : > { %23963 = vst [vmem:[#allocation43_spill] sm:$0xff] %v16407_v35  ;;  %23964 = vst [vmem:[#allocation44_spill] sm:$0xff] %v16409_v38  ;;  %1231 = vmatprep.mubr.f32.mxu0 %v676_v33  ;;  %v16414_v42 = vld [vmem:[%s16402_s27] sm:$0xff]  ;;  %v16417_v43 = vld [vmem:[%s16402_s27 + $0x10] sm:$0xff]  ;;  %1316 = vmatprep.mubr.f32.mxu1 %v678_v34 }
  0x6a   : > { %23965 = vst [vmem:[#allocation45_spill] sm:$0xff] %v16411_v39  ;;  %v16420_v44 = vld [vmem:[%s16402_s27 + $0x28] sm:$0xff]  ;;  %v783_v46 = vcombine.low %v16414_v42, %v676_v33  ;;  %v784_v47 = vcombine.high %v16414_v42, %v676_v33  ;;  %v785_v48 = vcombine.low %v16417_v43, %v678_v34  ;;  %v786_v49 = vcombine.high %v16417_v43, %v678_v34  ;;  %v16427_v50 = vld [vmem:[%s16402_s27 + $0x38] sm:$0xff]  ;;  %v16430_v52 = vld [vmem:[%s16402_s27 + $0x20] sm:$0xff] }
  0x6b   : > { %v16433_v53 = vld [vmem:[%s16402_s27 + $0x30] sm:$0xff]  ;;  %14948 = vmatpush3.bf16.msra.mxu0 %v16372_v19  ;;  %v851_v54 = vcombine.low %v16430_v52, %v16420_v44  ;;  %v852_v59 = vcombine.high %v16430_v52, %v16420_v44  ;;  %v16445_v3 = vld [vmem:[%s16402_s27 + $0x48] sm:$0xff]  ;;  %v16448_v4 = vld [vmem:[%s16402_s27 + $0x40] sm:$0xff]  ;;  %14980 = vmatpush3.bf16.msra.mxu1 %v16374_v20 }
  0x6c   : > { %v853_v61 = vcombine.low %v16433_v53, %v16427_v50  ;;  %v854_v62 = vcombine.high %v16433_v53, %v16427_v50  ;;  %14950 = vmatprep.subr.bf16.mxu0 %v16376_v21  ;;  %v793_v6 = vrot.slane %v783_v46, %v16369_v17  ;;  %v800_v8 = vrot.slane %v784_v47, %v16369_v17 }
  0x6d   : > { %v807_v11 = vrot.slane %v785_v48, %v16369_v17  ;;  %14982 = vmatprep.subr.bf16.mxu1 %v16378_v24  ;;  %v814_v12 = vrot.slane %v786_v49, %v16369_v17  ;;  %v861_v13 = vrot.slane %v851_v54, %v16369_v17  ;;  %v868_v15 = vrot.slane %v852_v59, %v16369_v17  ;;  %v16465_v48 = vld [vmem:[%s16402_s27 + $0x58] sm:$0xff] }
  0x6e   : > { %v875_v16 = vrot.slane %v853_v61, %v16369_v17  ;;  %v882_v28 = vrot.slane %v854_v62, %v16369_v17  ;;  %v919_v32 = vcombine.low %v16448_v4, %v16445_v3  ;;  %v16476_v61 = vld [vmem:[%s16402_s27 + $0x50] sm:$0xff]  ;;  %v16479_v62 = vld [vmem:[%s16402_s27 + $0x68] sm:$0xff] }
  0x6f   : > { %v815_v25 = vcombine.low %v793_v6, %v807_v11  ;;  %v816_v26 = vcombine.high %v793_v6, %v807_v11  ;;  %14952 = vmatpush3.bf16.msra.mxu0 %v16391_v29  ;;  %v817_v33 = vcombine.low %v800_v8, %v814_v12  ;;  %v818_v34 = vcombine.high %v800_v8, %v814_v12  ;;  %v16482_v6 = vld [vmem:[%s16402_s27 + $0x60] sm:$0xff] }
  0x70   : > { %v883_v46 = vcombine.low %v861_v13, %v875_v16  ;;  %v884_v47 = vcombine.high %v861_v13, %v875_v16  ;;  %14984 = vmatpush3.bf16.msra.mxu1 %v16393_v30  ;;  %14954 = vmatprep.subr.bf16.mxu0 %v16395_v31  ;;  %v885_v59 = vcombine.low %v868_v15, %v882_v28  ;;  %v16495_v16 = vld [vmem:[%s16402_s27 + $0x78] sm:$0xff] }
  0x71   : > { %v16470_v49 = vrot.slane %v815_v25, %v16369_v17  ;;  %v16473_v54 = vrot.slane %v816_v26, %v16369_v17  ;;  %14986 = vmatprep.subr.bf16.mxu1 %v16407_v35  ;;  %v16486_v8 = vrot.slane %v817_v33, %v16369_v17  ;;  %v16489_v11 = vrot.slane %v818_v34, %v16369_v17  ;;  %v16498_v25 = vld [vmem:[%s16402_s27 + $0x70] sm:$0xff] }
  0x72   : > { %v886_v12 = vcombine.high %v868_v15, %v882_v28  ;;  %v16492_v13 = vrot.slane %v883_v46, %v16369_v17  ;;  %v16501_v26 = vrot.slane %v885_v59, %v16369_v17  ;;  %v16504_v36 = vrot.slane %v884_v47, %v16369_v17 }
  0x73   : > { %v920_v33 = vcombine.high %v16448_v4, %v16445_v3  ;;  %v929_v34 = vrot.slane %v919_v32, %v16369_v17  ;;  %14956 = vmatpush3.bf16.msra.mxu0 %v16409_v38  ;;  %v921_v28 = vcombine.low %v16476_v61, %v16465_v48  ;;  %v922_v46 = vcombine.high %v16476_v61, %v16465_v48 }
  0x74   : > { %23966 = vst [vmem:[#allocation46_spill] sm:$0xff] %v16501_v26  ;;  %v16511_v15 = vrot.slane %v886_v12, %v16369_v17  ;;  %v987_v47 = vcombine.low %v16482_v6, %v16479_v62  ;;  %14988 = vmatpush3.bf16.msra.mxu1 %v16411_v39  ;;  %14990 = vmatprep.subr.bf16.mxu0 %v16128_v51 }
  0x75   : > { %v936_v32 = vrot.slane %v920_v33, %v16369_v17  ;;  %v988_v59 = vcombine.high %v16482_v6, %v16479_v62  ;;  %v989_v12 = vcombine.low %v16498_v25, %v16495_v16  ;;  %15022 = vmatprep.subr.bf16.mxu1 %v16139_v55  ;;  %v943_v57 = vrot.slane %v921_v28, %v16369_v17 }
  0x76   : > { %23967 = vst [vmem:[#allocation47_spill] sm:$0xff] %v16511_v15  ;;  %v950_v38 = vrot.slane %v922_v46, %v16369_v17  ;;  %v997_v35 = vrot.slane %v987_v47, %v16369_v17  ;;  %v990_v39 = vcombine.high %v16498_v25, %v16495_v16  ;;  %1232 = vmatmul.mubr.f32.vlgmr.msra.gmra.mrb[0].mxu0 %v16414_v42 }
  0x77   : > { %v1004_v33 = vrot.slane %v988_v59, %v16369_v17  ;;  %v1011_v51 = vrot.slane %v989_v12, %v16369_v17  ;;  %v16537_v31 = vcombine.high %v16470_v49, %v16470_v49  ;;  %v16541_v28 = vcombine.high %v16486_v8, %v16486_v8  ;;  %1317 = vmatmul.mubr.f32.vlgmr.msra.gmra.mrb[0].mxu1 %v16417_v43 }
  0x78   : > { %14992 = vmatpush3.bf16.msra.mxu0 %v16141_v56  ;;  %v951_v46 = vcombine.low %v929_v34, %v943_v57  ;;  %v952_v47 = vcombine.high %v929_v34, %v943_v57  ;;  %v953_v55 = vcombine.low %v936_v32, %v950_v38  ;;  %15024 = vmatpush3.bf16.msra.mxu1 %v16153_v60 }
  0x79   : > { %14994 = vmatprep.subr.bf16.mxu0 %v16166_v0  ;;  %v954_v42 = vcombine.high %v936_v32, %v950_v38  ;;  %v1018_v59 = vrot.slane %v990_v39, %v16369_v17  ;;  %v1019_v12 = vcombine.low %v997_v35, %v1011_v51  ;;  %15026 = vmatprep.subr.bf16.mxu1 %v16168_v1 }
  0x7a   : > { %1236 = vmatprep.mubr.f32.mxu0 %v16420_v44  ;;  %v16551_v30 = vrot.slane %v951_v46, %v16369_v17  ;;  %v16554_v43 = vrot.slane %v953_v55, %v16369_v17  ;;  %v16557_v57 = vrot.slane %v952_v47, %v16369_v17  ;;  %1321 = vmatprep.mubr.f32.mxu1 %v16427_v50 }
  0x7b   : > { %1237 = vmatmul.mubr.f32.gmra.mrb[2].mxu0 %v16430_v52  ;;  %v16562_v38 = vrot.slane %v954_v42, %v16369_v17  ;;  %v1020_v39 = vcombine.high %v997_v35, %v1011_v51  ;;  %v1021_v34 = vcombine.low %v1004_v33, %v1018_v59  ;;  %1322 = vmatmul.mubr.f32.gmra.mrb[2].mxu1 %v16433_v53 }
  0x7c   : > { %14996 = vmatpush3.bf16.msra.mxu0 %v16180_v5  ;;  %v1022_v44 = vcombine.high %v1004_v33, %v1018_v59  ;;  %v16567_v55 = vrot.slane %v1019_v12, %v16369_v17  ;;  %v16571_v32 = vcombine.high %v16473_v54, %v16473_v54  ;;  %15028 = vmatpush3.bf16.msra.mxu1 %v16193_v9 }
  0x7d   : > { %14998 = vmatprep.subr.bf16.mxu0 %v16195_v10  ;;  %v16576_v50 = vrot.slane %v1021_v34, %v16369_v17  ;;  %v16579_v51 = vrot.slane %v1020_v39, %v16369_v17  ;;  %v16583_v35 = vcombine.high %v16489_v11, %v16489_v11  ;;  %15030 = vmatprep.subr.bf16.mxu1 %v16206_v14 }
  0x7e   : > { %23968 = vst [vmem:[#allocation48_spill] sm:$0xff] %v16567_v55  ;;  %1241 = vmatprep.mubr.f32.mxu0 %v16445_v3  ;;  %v16588_v52 = vrot.slane %v1022_v44, %v16369_v17  ;;  %v1103_v53 = vmul.f32 %v16470_v49, %v16470_v49  ;;  %v1104_v33 = vmul.f32 %v16473_v54, %v16473_v54 }
  0x7f   : > { %23969 = vst [vmem:[#allocation49_spill] sm:$0xff] %v16576_v50  ;;  %23970 = vst [vmem:[#allocation50_spill] sm:$0xff] %v16579_v51  ;;  %1326 = vmatprep.mubr.f32.mxu1 %v16465_v48  ;;  %1242 = vmatmul.mubr.f32.gmra.mrb[4].mxu0 %v16448_v4  ;;  %v1105_v46 = vmul.f32 %v16537_v31, %v16537_v31  ;;  %v1106_v47 = vmul.f32 %v16571_v32, %v16571_v32 }
  0x80   : > { %23971 = vst [vmem:[#allocation51_spill] sm:$0xff] %v16588_v52  ;;  %v1107_v3 = vmul.f32 %v16486_v8, %v16486_v8  ;;  %15000 = vmatpush3.bf16.msra.mxu0 %v16218_v18  ;;  %1327 = vmatmul.mubr.f32.gmra.mrb[4].mxu1 %v16476_v61  ;;  %v1108_v42 = vmul.f32 %v16489_v11, %v16489_v11 }
  0x81   : > { %v1109_v48 = vmul.f32 %v16541_v28, %v16541_v28  ;;  %v1110_v4 = vmul.f32 %v16583_v35, %v16583_v35  ;;  %15032 = vmatpush3.bf16.msra.mxu1 %v16231_v22  ;;  %15002 = vmatprep.subr.bf16.mxu0 %v16233_v23  ;;  %v1369_v59 = vcombine.low %v1103_v53, %v1104_v33  ;;  %v23976_v22 = vld [vmem:[#allocation45_spill] sm:$0xff] }
  0x82   : > { %v1370_v12 = vcombine.low %v1105_v46, %v1106_v47  ;;  %v16614_v39 = vcombine.high %v16492_v13, %v16492_v13  ;;  %15034 = vmatprep.subr.bf16.mxu1 %v16245_v27  ;;  %1246 = vmatprep.mubr.f32.mxu0 %v16479_v62  ;;  %v1371_v61 = vcombine.low %v1107_v3, %v1108_v42 }
  0x83   : > { %v1372_v34 = vcombine.low %v1109_v48, %v1110_v4  ;;  %v16620_v44 = vcombine.high %v16501_v26, %v16501_v26  ;;  %1331 = vmatprep.mubr.f32.mxu1 %v16495_v16  ;;  %1247 = vmatmul.mubr.f32.gmra.mrb[6].mxu0 %v16482_v6  ;;  %v1379_v53 = vrot.slane %v1369_v59, %v16369_v17 }
  0x84   : > { %v1386_v33 = vrot.slane %v1370_v12, %v16369_v17  ;;  %v16628_v46 = vcombine.high %v16504_v36, %v16504_v36  ;;  %15004 = vmatpush3.bf16.msra.mxu0 %v16266_v37  ;;  %1332 = vmatmul.mubr.f32.gmra.mrb[6].mxu1 %v16498_v25  ;;  %v1393_v62 = vrot.slane %v1371_v61, %v16369_v17 }
  0x85   : > { %v1400_v47 = vrot.slane %v1372_v34, %v16369_v17  ;;  %v16636_v16 = vcombine.high %v16511_v15, %v16511_v15  ;;  %15036 = vmatpush3.bf16.msra.mxu1 %v16279_v40  ;;  %15006 = vmatprep.subr.bf16.mxu0 %v16281_v41  ;;  %v1111_v42 = vmul.f32 %v16492_v13, %v16492_v13 }
  0x86   : > { %v1401_v6 = vcombine.low %v1379_v53, %v1386_v33  ;;  %v1402_v3 = vcombine.high %v1379_v53, %v1386_v33  ;;  %15038 = vmatprep.subr.bf16.mxu1 %v16293_v45  ;;  %v1112_v4 = vmul.f32 %v16504_v36, %v16504_v36  ;;  %v1113_v59 = vmul.f32 %v16614_v39, %v16614_v39 }
  0x87   : > { %v1403_v25 = vcombine.low %v1393_v62, %v1400_v47  ;;  %v1404_v48 = vcombine.high %v1393_v62, %v1400_v47  ;;  %v1114_v34 = vmul.f32 %v16628_v46, %v16628_v46  ;;  %v1115_v53 = vmul.f32 %v16501_v26, %v16501_v26 }
  0x88   : > { %v1418_v12 = vrot.slane %v1402_v3, %v16369_v17  ;;  %v16649_v61 = vrot.slane %v1401_v6, %v16369_v17  ;;  %15008 = vmatpush3.bf16.msra.mxu0 %v16321_v58  ;;  %v1116_v47 = vmul.f32 %v16511_v15, %v16511_v15  ;;  %v1117_v6 = vmul.f32 %v16620_v44, %v16620_v44 }
  0x89   : > { %v1432_v33 = vrot.slane %v1404_v48, %v16369_v17  ;;  %v16658_v62 = vrot.slane %v1403_v25, %v16369_v17  ;;  %15040 = vmatpush3.bf16.msra.mxu1 %v16334_v63  ;;  %15010 = vmatprep.subr.bf16.mxu0 %v16336_v2  ;;  %v1118_v3 = vmul.f32 %v16636_v16, %v16636_v16 }
  0x8a   : > { %v1437_v45 = vcombine.low %v1111_v42, %v1112_v4  ;;  %v1438_v58 = vcombine.low %v1113_v59, %v1114_v34  ;;  %15042 = vmatprep.subr.bf16.mxu1 %v16348_v7  ;;  %v1439_v37 = vcombine.low %v1115_v53, %v1116_v47  ;;  %v16678_v42 = vcombine.high %v16551_v30, %v16551_v30 }
  0x8b   : > { %v1435_v48 = vcombine.low %v1418_v12, %v1432_v33  ;;  %v1436_v25 = vcombine.high %v1418_v12, %v1432_v33  ;;  %v1433_v41 = vcombine.low %v16649_v61, %v16658_v62  ;;  %v1434_v40 = vcombine.high %v16649_v61, %v16658_v62 }
  0x8c   : > { %v1440_v27 = vcombine.low %v1117_v6, %v1118_v3  ;;  %v1447_v63 = vrot.slane %v1437_v45, %v16369_v17  ;;  %v1454_v2 = vrot.slane %v1438_v58, %v16369_v17  ;;  %15012 = vmatpush3.bf16.msra.mxu0 %v16372_v19  ;;  %v16682_v4 = vcombine.high %v16554_v43, %v16554_v43  ;;  %v23972_v3 = vld [vmem:[#allocation41_spill] sm:$0xff] }
  0x8d   : > { %1721 = vmatprep.mubr.f32.mxu0 %v1435_v48  ;;  %v16686_v59 = vcombine.high %v16557_v57, %v16557_v57  ;;  %15044 = vmatpush3.bf16.msra.mxu1 %v16374_v20  ;;  %v1461_v45 = vrot.slane %v1439_v37, %v16369_v17  ;;  %v16695_v34 = vcombine.high %v16562_v38, %v16562_v38  ;;  %v23973_v48 = vld [vmem:[#allocation42_spill] sm:$0xff] }
  0x8e   : > { %15014 = vmatprep.subr.bf16.mxu0 %v16376_v21  ;;  %v1468_v58 = vrot.slane %v1440_v27, %v16369_v17  ;;  %v1470_v12 = vcombine.high %v1447_v63, %v1454_v2  ;;  %15046 = vmatprep.subr.bf16.mxu1 %v16378_v24  ;;  %v1469_v61 = vcombine.low %v1447_v63, %v1454_v2 }
  0x8f   : > { %1806 = vmatprep.mubr.f32.mxu1 %v1436_v25  ;;  %v1119_v53 = vmul.f32 %v16551_v30, %v16551_v30  ;;  %v1120_v37 = vmul.f32 %v16557_v57, %v16557_v57  ;;  %v1121_v63 = vmul.f32 %v16678_v42, %v16678_v42  ;;  %v1122_v2 = vmul.f32 %v16686_v59, %v16686_v59 }
  0x90   : > { %v1472_v33 = vcombine.high %v1461_v45, %v1468_v58  ;;  %v1486_v62 = vrot.slane %v1470_v12, %v16369_v17  ;;  %v1471_v47 = vcombine.low %v1461_v45, %v1468_v58  ;;  %15016 = vmatpush3.bf16.msra.mxu0 %v16391_v29  ;;  %v1479_v27 = vrot.slane %v1469_v61, %v16369_v17  ;;  %v23974_v12 = vld [vmem:[#allocation43_spill] sm:$0xff] }
  0x91   : > { %v1123_v6 = vmul.f32 %v16554_v43, %v16554_v43  ;;  %15048 = vmatpush3.bf16.msra.mxu1 %v23972_v3  ;;  %15018 = vmatprep.subr.bf16.mxu0 %v23973_v48  ;;  %v1124_v58 = vmul.f32 %v16562_v38, %v16562_v38  ;;  %v1125_v61 = vmul.f32 %v16682_v4, %v16682_v4 }
  0x92   : > { %v1500_v25 = vrot.slane %v1472_v33, %v16369_v17  ;;  %v1493_v45 = vrot.slane %v1471_v47, %v16369_v17  ;;  %15050 = vmatprep.subr.bf16.mxu1 %v23974_v12  ;;  %v1126_v29 = vmul.f32 %v16695_v34, %v16695_v34  ;;  %v1505_v24 = vcombine.low %v1119_v53, %v1120_v37  ;;  %v23975_v33 = vld [vmem:[#allocation44_spill] sm:$0xff] }
  0x93   : > { %v1506_v21 = vcombine.low %v1121_v63, %v1122_v2  ;;  %v1507_v47 = vcombine.low %v1123_v6, %v1124_v58  ;;  %v16727_v18 = vcombine.high %v16567_v55, %v16567_v55  ;;  %v16731_v53 = vcombine.high %v16576_v50, %v16576_v50 }
  0x94   : > { %v1503_v3 = vcombine.low %v1486_v62, %v1500_v25  ;;  %v1504_v20 = vcombine.high %v1486_v62, %v1500_v25  ;;  %v1501_v48 = vcombine.low %v1479_v27, %v1493_v45  ;;  %v1502_v19 = vcombine.high %v1479_v27, %v1493_v45  ;;  %15020 = vmatpush3.bf16.msra.mxu0 %v23975_v33 }
  0x95   : > { %v1508_v7 = vcombine.low %v1125_v61, %v1126_v29  ;;  %v1515_v23 = vrot.slane %v1505_v24, %v16369_v17  ;;  %v1522_v12 = vrot.slane %v1506_v21, %v16369_v17  ;;  %15052 = vmatpush3.bf16.msra.mxu1 %v23976_v22  ;;  %23977 = vst [vmem:[#allocation52_spill] sm:$0xff] %v16727_v18  ;;  %23978 = vst [vmem:[#allocation53_spill] sm:$0xff] %v16731_v53 }
  0x96   : > { %v16735_v62 = vcombine.high %v16579_v51, %v16579_v51  ;;  %v16739_v29 = vcombine.high %v16588_v52, %v16588_v52  ;;  %v1529_v21 = vrot.slane %v1507_v47, %v16369_v17  ;;  %v1127_v63 = vmul.f32 %v16567_v55, %v16567_v55 }
  0x97   : > { %v1536_v24 = vrot.slane %v1508_v7, %v16369_v17  ;;  %v1538_v37 = vcombine.high %v1515_v23, %v1522_v12  ;;  %v1537_v27 = vcombine.low %v1515_v23, %v1522_v12  ;;  %1722 = vmatmul.mubr.f32.vlgmr.msra.gmra.mrb[8].mxu0 %v1433_v41  ;;  %v1128_v2 = vmul.f32 %v16579_v51, %v16579_v51 }
  0x98   : > { %23979 = vst [vmem:[#allocation54_spill] sm:$0xff] %v16735_v62  ;;  %23980 = vst [vmem:[#allocation55_spill] sm:$0xff] %v16739_v29  ;;  %v1129_v6 = vmul.f32 %v16727_v18, %v16727_v18  ;;  %v1130_v25 = vmul.f32 %v16735_v62, %v16735_v62  ;;  %1807 = vmatmul.mubr.f32.vlgmr.msra.gmra.mrb[8].mxu1 %v1434_v40  ;;  %1726 = vmatprep.mubr.f32.mxu0 %v1503_v3 }
  0x99   : > { %v1540_v45 = vcombine.high %v1529_v21, %v1536_v24  ;;  %v1554_v7 = vrot.slane %v1538_v37, %v16369_v17  ;;  %v1539_v58 = vcombine.low %v1529_v21, %v1536_v24  ;;  %1811 = vmatprep.mubr.f32.mxu1 %v1504_v20  ;;  %v1547_v23 = vrot.slane %v1537_v27, %v16369_v17 }
  0x9a   : > { %v1131_v41 = vmul.f32 %v16576_v50, %v16576_v50  ;;  %v1132_v12 = vmul.f32 %v16588_v52, %v16588_v52  ;;  %v1133_v61 = vmul.f32 %v16731_v53, %v16731_v53  ;;  %v1134_v3 = vmul.f32 %v16739_v29, %v16739_v29 }
  0x9b   : > { %v1568_v47 = vrot.slane %v1540_v45, %v16369_v17  ;;  %v1561_v40 = vrot.slane %v1539_v58, %v16369_v17  ;;  %v1573_v21 = vcombine.low %v1127_v63, %v1128_v2  ;;  %1727 = vmatmul.mubr.f32.gmra.mrb[10].mxu0 %v1501_v48  ;;  %v1574_v20 = vcombine.low %v1129_v6, %v1130_v25 }
  0x9c   : > { %v1575_v24 = vcombine.low %v1131_v41, %v1132_v12  ;;  %1812 = vmatmul.mubr.f32.gmra.mrb[10].mxu1 %v1502_v19  ;;  %v1576_v14 = vcombine.low %v1133_v61, %v1134_v3  ;;  %v763_v3 = vld [vmem:[%s23417_s3] sm:$0xff] }
  0x9d   : > { %v1571_v37 = vcombine.low %v1554_v7, %v1568_v47  ;;  %v1572_v27 = vcombine.high %v1554_v7, %v1568_v47  ;;  %v1569_v22 = vcombine.low %v1547_v23, %v1561_v40  ;;  %v1570_v33 = vcombine.high %v1547_v23, %v1561_v40  ;;  %v759_v40 = vld [vmem:[%s23416_s2] sm:$0xff] }
  0x9e   : > { %v1583_v10 = vrot.slane %v1573_v21, %v16369_v17  ;;  %v1590_v9 = vrot.slane %v1574_v20, %v16369_v17  ;;  %v1597_v45 = vrot.slane %v1575_v24, %v16369_v17  ;;  %v1604_v63 = vrot.slane %v1576_v14, %v16369_v17  ;;  %v760_v20 = vld [vmem:[%s23416_s2 + $0x8] sm:$0xff] }
  0x9f   : > { %1731 = vmatprep.mubr.f32.mxu0 %v1571_v37  ;;  %1816 = vmatprep.mubr.f32.mxu1 %v1572_v27  ;;  %v15867_v21 = vmov 0   ;;  %v764_v24 = vld [vmem:[%s23417_s3 + $0x8] sm:$0xff]  ;;  %v761_v37 = vld [vmem:[%s23416_s2 + $0x10] sm:$0xff]  ;;  %v762_v27 = vld [vmem:[%s23416_s2 + $0x18] sm:$0xff] }
  0xa0   : > { %1732 = vmatmul.mubr.f32.gmra.mrb[12].mxu0 %v1569_v22  ;;  %v1606_v48 = vcombine.high %v1583_v10, %v1590_v9  ;;  %v1605_v2 = vcombine.low %v1583_v10, %v1590_v9  ;;  %1817 = vmatmul.mubr.f32.gmra.mrb[12].mxu1 %v1570_v33  ;;  %v1608_v19 = vcombine.high %v1597_v45, %v1604_v63  ;;  %v755_v9 = vld [vmem:[%s23427_s13] sm:$0xff]  ;;  %v756_v10 = vld [vmem:[%s23427_s13 + $0x8] sm:$0xff]  ;;  %v23494_v33 = vmov 0.0  }
  0xa1   : > { %v1607_v25 = vcombine.low %v1597_v45, %v1604_v63  ;;  %v16777_v14 = vcombine.high %v755_v9, %v755_v9  ;;  %v16779_v22 = vcombine.high %v756_v10, %v756_v10  ;;  %15489 = vset.pattern.permute.xlu0 %v15867_v21  ;;  %15490 = vset.pattern.permute.xlu1 %v15867_v21  ;;  %v765_v45 = vld [vmem:[%s23417_s3 + $0x10] sm:$0xff]  ;;  %v766_v63 = vld [vmem:[%s23417_s3 + $0x18] sm:$0xff] }
  0xa2   : > { %v1622_v6 = vrot.slane %v1606_v48, %v16369_v17  ;;  %v1615_v7 = vrot.slane %v1605_v2, %v16369_v17  ;;  %v1636_v58 = vrot.slane %v1608_v19, %v16369_v17  ;;  %2951 = vperm.xlu0 %15489, %v759_v40   ;;  %3159 = vperm.xlu1 %15490, %v763_v3  }
  0xa3   : > { %v1629_v23 = vrot.slane %v1607_v25, %v16369_v17  ;;  %23981 = vst [vmem:[#allocation56_spill] sm:$0xff] %v16777_v14  ;;  %23982 = vst [vmem:[#allocation57_spill] sm:$0xff] %v16779_v22  ;;  %14373 = vmatprep.subr.msk.mxu0 %vm1868_vm0, %v16777_v14  ;;  %14379 = vmatprep.subr.msk.mxu1 %vm1868_vm0, %v16779_v22 }
  0xa4   : > { %v1639_v41 = vcombine.low %v1622_v6, %v1636_v58  ;;  %v1640_v12 = vcombine.high %v1622_v6, %v1636_v58  ;;  %14374 = vmatpush1.msk.msra.mxu0 %vm1868_vm0, %v755_v9  ;;  %14380 = vmatpush1.msk.msra.mxu1 %vm1868_vm0, %v756_v10 }
  0xa5   : > { %v1637_v61 = vcombine.low %v1615_v7, %v1629_v23  ;;  %v1638_v47 = vcombine.high %v1615_v7, %v1629_v23  ;;  %14385 = vmatprep.subr.msk.mxu0 %vm1868_vm0, %v16777_v14  ;;  %14391 = vmatprep.subr.msk.mxu1 %vm1868_vm0, %v16779_v22 }
  0xa6   : > { %1736 = vmatprep.mubr.f32.mxu0 %v1639_v41  ;;  %1821 = vmatprep.mubr.f32.mxu1 %v1640_v12 }
  0xa7   : > { %1737 = vmatmul.mubr.f32.gmra.mrb[14].mxu0 %v1637_v61  ;;  %1822 = vmatmul.mubr.f32.gmra.mrb[14].mxu1 %v1638_v47 }
  0xa8   : > { %1941 = vmatprep.mubr.f32.mxu0 %v23494_v33  ;;  %2030 = vmatprep.mubr.f32.mxu1 %v23494_v33 }
  0xa9   : > { %2955 = vperm.xlu0 %15489, %v760_v20   ;;  %3163 = vperm.xlu1 %15490, %v764_v24  }
  0xad   : > { %2959 = vperm.xlu0 %15489, %v761_v37   ;;  %2963 = vperm.xlu1 %15490, %v762_v27  }
  0xb1   : > { %3167 = vperm.xlu0 %15489, %v765_v45   ;;  %3171 = vperm.xlu1 %15490, %v766_v63  }
 0x149   : > { %v14605_v48 = vpop.f32.mrb[0].mxu0 }
 0x14a   : > { %v14649_v2 = vpop.f32.mrb[0].mxu1  ;;  %v14606_v19 = vpop.f32.mrb[1].mxu0 }
 0x14b   : > { %v14607_v6 = vadd.f32 %v14606_v19, %v14605_v48  ;;  %v14650_v25 = vpop.f32.mrb[1].mxu1 }
 0x14c   : > { %v14651_v7 = vadd.f32 %v14650_v25, %v14649_v2 }
 0x14e   : > { %v14608_v58 = vpop.f32.mrb[2].mxu0  ;;  %v1319_v23 = vadd.f32 %v14651_v7, %v14607_v6  ;;  %v14652_v41 = vpop.f32.mrb[2].mxu1 }
 0x14f   : > { %v14609_v12 = vpop.f32.mrb[3].mxu0  ;;  %v14653_v47 = vpop.f32.mrb[3].mxu1 }
 0x150   : > { %v14610_v61 = vadd.f32 %v14609_v12, %v14608_v58  ;;  %v1827_v40 = vmul.f32 0.0078125, %v1319_v23  ;;  %v14654_v3 = vadd.f32 %v14653_v47, %v14652_v41 }
 0x152   : > { %v14611_v21 = vpop.f32.mrb[4].mxu0  ;;  %14375 = vmatmul.mubr.msk.f32.vlgmr.msra.gmra.mrb[16].mxu0 %vm1855_vm1, %v1827_v40  ;;  %14381 = vmatmul.mubr.msk.f32.vlgmr.msra.gmra.mrb[16].mxu1 %vm1855_vm1, %v1827_v40  ;;  %v1324_v20 = vadd.f32 %v14654_v3, %v14610_v61 }
 0x153   : > { %v14655_v24 = vpop.f32.mrb[4].mxu1  ;;  %v14612_v37 = vpop.f32.mrb[5].mxu0  ;;  %1947 = vmatprep.mubr.f32.mxu0 %v23494_v33  ;;  %2036 = vmatprep.mubr.f32.mxu1 %v23494_v33 }
 0x154   : > { %v14613_v27 = vadd.f32 %v14612_v37, %v14611_v21  ;;  %v14656_v45 = vpop.f32.mrb[5].mxu1  ;;  %v1828_v63 = vmul.f32 0.0078125, %v1324_v20  ;;  %14386 = vmatpush1.msk.msra.mxu0 %vm1868_vm0, %v755_v9  ;;  %14392 = vmatpush1.msk.msra.mxu1 %vm1868_vm0, %v756_v10 }
 0x155   : > { %v14657_v48 = vadd.f32 %v14656_v45, %v14655_v24 }
 0x156   : > { %v14614_v2 = vpop.f32.mrb[6].mxu0  ;;  %14376 = vmatmul.mubr.msk.f32.gmra.mrb[18].mxu0 %vm1855_vm1, %v1828_v63  ;;  %14382 = vmatmul.mubr.msk.f32.gmra.mrb[18].mxu1 %vm1855_vm1, %v1828_v63 }
 0x157   : > { %v1329_v19 = vadd.f32 %v14657_v48, %v14613_v27  ;;  %v14658_v6 = vpop.f32.mrb[6].mxu1  ;;  %v14615_v25 = vpop.f32.mrb[7].mxu0  ;;  %1953 = vmatprep.mubr.f32.mxu0 %v23494_v33  ;;  %2042 = vmatprep.mubr.f32.mxu1 %v23494_v33 }
 0x158   : > { %v14616_v7 = vadd.f32 %v14615_v25, %v14614_v2  ;;  %v14659_v58 = vpop.f32.mrb[7].mxu1 }
 0x159   : > { %v1829_v23 = vmul.f32 0.0078125, %v1329_v19  ;;  %v14660_v41 = vadd.f32 %v14659_v58, %v14658_v6  ;;  %v1835_v6 = vmul.f32 %v1827_v40, %v1827_v40 }
 0x15b   : > { %v1334_v12 = vadd.f32 %v14660_v41, %v14616_v7  ;;  %14377 = vmatmul.mubr.msk.f32.gmra.mrb[20].mxu0 %vm1855_vm1, %v1829_v23  ;;  %14383 = vmatmul.mubr.msk.f32.gmra.mrb[20].mxu1 %vm1855_vm1, %v1829_v23 }
 0x15c   : > { %1959 = vmatprep.mubr.f32.mxu0 %v23494_v33  ;;  %2048 = vmatprep.mubr.f32.mxu1 %v23494_v33 }
 0x15d   : > { %v1830_v9 = vmul.f32 0.0078125, %v1334_v12 }
 0x15f   : > { %14378 = vmatmul.mubr.msk.f32.gmra.mrb[22].mxu0 %vm1855_vm1, %v1830_v9  ;;  %14384 = vmatmul.mubr.msk.f32.gmra.mrb[22].mxu1 %vm1855_vm1, %v1830_v9 }
 0x160   : > { %2131 = vmatprep.mubr.f32.mxu0 %v23494_v33  ;;  %2220 = vmatprep.mubr.f32.mxu1 %v23494_v33 }
 0x16a   : > { %v14693_v10 = vpop.f32.mrb[8].mxu0 }
 0x16b   : > { %v14737_v61 = vpop.f32.mrb[8].mxu1  ;;  %v14694_v47 = vpop.f32.mrb[9].mxu0 }
 0x16c   : > { %v14695_v3 = vadd.f32 %v14694_v47, %v14693_v10  ;;  %v14738_v21 = vpop.f32.mrb[9].mxu1  ;;  %v1836_v47 = vmul.f32 %v1828_v63, %v1828_v63 }
 0x16d   : > { %v14739_v20 = vadd.f32 %v14738_v21, %v14737_v61 }
 0x16e   : > { %v14696_v24 = vpop.f32.mrb[10].mxu0 }
 0x16f   : > { %v1809_v37 = vadd.f32 %v14739_v20, %v14695_v3  ;;  %v14740_v27 = vpop.f32.mrb[10].mxu1  ;;  %v14697_v45 = vpop.f32.mrb[11].mxu0 }
 0x170   : > { %v14698_v48 = vadd.f32 %v14697_v45, %v14696_v24  ;;  %v14741_v2 = vpop.f32.mrb[11].mxu1  ;;  %v1837_v45 = vmul.f32 %v1829_v23, %v1829_v23 }
 0x171   : > { %v1831_v19 = vmul.f32 0.0078125, %v1809_v37  ;;  %v14742_v25 = vadd.f32 %v14741_v2, %v14740_v27 }
 0x173   : > { %v14699_v7 = vpop.f32.mrb[12].mxu0  ;;  %v1839_v58 = vsub.f32 %v1831_v19, %v1835_v6  ;;  %v1814_v41 = vadd.f32 %v14742_v25, %v14698_v48  ;;  %v14743_v12 = vpop.f32.mrb[12].mxu1 }
 0x174   : > { %v14700_v33 = vpop.f32.mrb[13].mxu0  ;;  %v14744_v14 = vpop.f32.mrb[13].mxu1 }
 0x175   : > { %v14701_v22 = vadd.f32 %v14700_v33, %v14699_v7  ;;  %v1843_v5 = vadd.f32 1e-05, %v1839_v58  ;;  %v1832_v10 = vmul.f32 0.0078125, %v1814_v41  ;;  %v14745_v61 = vadd.f32 %v14744_v14, %v14743_v12 }
 0x176   : > { %v1838_v14 = vmul.f32 %v1830_v9, %v1830_v9 }
 0x177   : > { %15509 = vrsqrt.f32 %v1843_v5  ;;  %v1840_v3 = vsub.f32 %v1832_v10, %v1836_v47  ;;  %v1819_v21 = vadd.f32 %v14745_v61, %v14701_v22  ;;  %v23983_v22 = vmov 0.0  }
 0x179   : > { %v1844_v20 = vadd.f32 1e-05, %v1840_v3  ;;  %v1833_v24 = vmul.f32 0.0078125, %v1819_v21 }
 0x17a   : > { %v14702_v37 = vpop.f32.mrb[14].mxu0  ;;  %v14746_v27 = vpop.f32.mrb[14].mxu1 }
 0x17b   : > { %15511 = vrsqrt.f32 %v1844_v20  ;;  %v1841_v40 = vsub.f32 %v1833_v24, %v1837_v45  ;;  %v14703_v2 = vpop.f32.mrb[15].mxu0  ;;  %v14747_v48 = vpop.f32.mrb[15].mxu1 }
 0x17c   : > { %v14704_v6 = vadd.f32 %v14703_v2, %v14702_v37  ;;  %v14748_v33 = vadd.f32 %v14747_v48, %v14746_v27 }
 0x17d   : > { %v1845_v19 = vadd.f32 1e-05, %v1841_v40 }
 0x17e   : > { %v1824_v25 = vadd.f32 %v14748_v33, %v14704_v6 }
 0x17f   : > { %15513 = vrsqrt.f32 %v1845_v19 }
 0x180   : > { %v1834_v63 = vmul.f32 0.0078125, %v1824_v25 }
 0x181   : > { %v15510_v7 = vpop.eup %15509 }
 0x182   : > { %14387 = vmatmul.mubr.msk.f32.vlgmr.msra.gmra.mrb[24].mxu0 %vm1855_vm1, %v15510_v7  ;;  %14393 = vmatmul.mubr.msk.f32.vlgmr.msra.gmra.mrb[24].mxu1 %vm1855_vm1, %v15510_v7  ;;  %v1842_v5 = vsub.f32 %v1834_v63, %v1838_v14 }
 0x183   : > { %2137 = vmatprep.mubr.f32.mxu0 %v23983_v22  ;;  %2226 = vmatprep.mubr.f32.mxu1 %v23983_v22 }
 0x184   : > { %v1846_v58 = vadd.f32 1e-05, %v1842_v5 }
 0x185   : > { %v15512_v23 = vpop.eup %15511 }
 0x186   : > { %14388 = vmatmul.mubr.msk.f32.gmra.mrb[26].mxu0 %vm1855_vm1, %v15512_v23  ;;  %14394 = vmatmul.mubr.msk.f32.gmra.mrb[26].mxu1 %vm1855_vm1, %v15512_v23  ;;  %15515 = vrsqrt.f32 %v1846_v58 }
 0x187   : > { %2143 = vmatprep.mubr.f32.mxu0 %v23983_v22  ;;  %2232 = vmatprep.mubr.f32.mxu1 %v23983_v22 }
 0x189   : > { %v15514_v9 = vpop.eup %15513 }
 0x18a   : > { %14389 = vmatmul.mubr.msk.f32.gmra.mrb[28].mxu0 %vm1855_vm1, %v15514_v9  ;;  %14395 = vmatmul.mubr.msk.f32.gmra.mrb[28].mxu1 %vm1855_vm1, %v15514_v9 }
 0x18b   : > { %2149 = vmatprep.mubr.f32.mxu0 %v23983_v22  ;;  %2238 = vmatprep.mubr.f32.mxu1 %v23983_v22 }
 0x190   : > { %v15516_v41 = vpop.eup %15515 }
 0x191   : > { %14390 = vmatmul.mubr.msk.f32.gmra.mrb[30].mxu0 %vm1855_vm1, %v15516_v41  ;;  %14396 = vmatmul.mubr.msk.f32.gmra.mrb[30].mxu1 %vm1855_vm1, %v15516_v41 }
 0x192   : > { %4228 = vmatprep.mubr.f32.mxu0 %v23983_v22  ;;  %4341 = vmatprep.mubr.f32.mxu1 %v23983_v22 }
 0x225   : > { %v1943_v12 = vpop.f32.mrb[16].mxu0  ;;  %v2032_v10 = vpop.f32.mrb[16].mxu1 }
 0x226   : > { %v1945_v47 = vpop.f32.mrb[17].mxu0  ;;  %v2034_v61 = vpop.f32.mrb[17].mxu1 }
 0x227   : > { %v2261_v3 = vcombine.low %v1943_v12, %v1945_v47  ;;  %v2262_v21 = vcombine.high %v1943_v12, %v1945_v47  ;;  %v2263_v20 = vcombine.low %v2032_v10, %v2034_v61  ;;  %v2264_v24 = vcombine.high %v2032_v10, %v2034_v61  ;;  %v23984_v12 = vld [vmem:[#allocation30_spill] sm:$0xff] }
 0x228   : > { %v16872_v10 = vsub.s32 0, %v23984_v12  ;;  %v16875_v47 = vsub.s32 1, %v23984_v12  ;;  %v16878_v61 = vsub.s32 2, %v23984_v12  ;;  %v16897_v63 = vsub.s32 3, %v23984_v12 }
 0x229   : > { %v16852_v45 = vrot.slane %v2261_v3, %v16369_v17  ;;  %v16855_v40 = vrot.slane %v2262_v21, %v16369_v17  ;;  %v16858_v37 = vrot.slane %v2263_v20, %v16369_v17  ;;  %v16861_v27 = vrot.slane %v2264_v24, %v16369_v17  ;;  %v1949_v2 = vpop.f32.mrb[18].mxu0  ;;  %v2038_v48 = vpop.f32.mrb[18].mxu1 }
 0x22a   : > { %v1951_v19 = vpop.f32.mrb[19].mxu0  ;;  %v2040_v6 = vpop.f32.mrb[19].mxu1  ;;  %23985 = vst [vmem:[#allocation58_spill] sm:$0xff] %v16872_v10  ;;  %23986 = vst [vmem:[#allocation59_spill] sm:$0xff] %v16875_v47  ;;  %v16915_v0 = vsub.s32 7, %v23984_v12 }
 0x22b   : > { %v2329_v14 = vcombine.low %v1949_v2, %v1951_v19  ;;  %v2330_v5 = vcombine.high %v1949_v2, %v1951_v19  ;;  %v2331_v23 = vcombine.low %v2038_v48, %v2040_v6  ;;  %v2332_v58 = vcombine.high %v2038_v48, %v2040_v6  ;;  %23987 = vst [vmem:[#allocation60_spill] sm:$0xff] %v16878_v61  ;;  %v16892_v19 = vpop.permute.xlu1 %3159  ;;  %v16894_v6 = vpop.permute.xlu0 %2951 }
 0x22c   : > { %23988 = vst [vmem:[#allocation61_spill] sm:$0xff] %v16892_v19  ;;  %23989 = vst [vmem:[#allocation62_spill] sm:$0xff] %v16894_v6 }
 0x22d   : > { %v16881_v3 = vrot.slane %v2329_v14, %v16369_v17  ;;  %v16884_v21 = vrot.slane %v2330_v5, %v16369_v17  ;;  %v16887_v20 = vrot.slane %v2331_v23, %v16369_v17  ;;  %v16890_v24 = vrot.slane %v2332_v58, %v16369_v17  ;;  %23990 = vst [vmem:[#allocation63_spill] sm:$0xff] %v16897_v63 }
 0x22e   : > { %v1955_v9 = vpop.f32.mrb[20].mxu0  ;;  %v2044_v41 = vpop.f32.mrb[20].mxu1  ;;  %v16900_v14 = vsub.s32 4, %v23984_v12  ;;  %v16903_v5 = vsub.s32 5, %v23984_v12  ;;  %v16906_v23 = vsub.s32 6, %v23984_v12  ;;  %23992 = vst [vmem:[#allocation65_spill] sm:$0xff] %v16915_v0 }
 0x22f   : > { %v1957_v2 = vpop.f32.mrb[21].mxu0  ;;  %v2046_v48 = vpop.f32.mrb[21].mxu1 }
 0x230   : > { %23991 = vst [vmem:[#allocation64_spill] sm:$0xff] %v16906_v23  ;;  %v2397_v53 = vcombine.low %v1955_v9, %v1957_v2  ;;  %v2398_v62 = vcombine.high %v1955_v9, %v1957_v2  ;;  %v2399_v1 = vcombine.low %v2044_v41, %v2046_v48  ;;  %v2400_v18 = vcombine.high %v2044_v41, %v2046_v48  ;;  %v16945_v2 = vpop.permute.xlu1 %3163  ;;  %v16963_v56 = vpop.permute.xlu0 %2955 }
 0x231   : > { %23993 = vst [vmem:[#allocation66_spill] sm:$0xff] %v16945_v2  ;;  %23994 = vst [vmem:[#allocation67_spill] sm:$0xff] %v16963_v56  ;;  %v23999_v48 = vcombine.low %v16852_v45, %v16858_v37 }
 0x232   : > { %v1961_v58 = vpop.f32.mrb[22].mxu0  ;;  %v2050_v25 = vpop.f32.mrb[22].mxu1  ;;  %v16934_v7 = vrot.slane %v2397_v53, %v16369_v17  ;;  %v16937_v52 = vrot.slane %v2398_v62, %v16369_v17  ;;  %v16940_v9 = vrot.slane %v2399_v1, %v16369_v17  ;;  %v16943_v41 = vrot.slane %v2400_v18, %v16369_v17 }
 0x233   : > { %v1963_v29 = vpop.f32.mrb[23].mxu0  ;;  %v2052_v33 = vpop.f32.mrb[23].mxu1  ;;  %v17077_v12 = vrot.slane %v23999_v48, %v16369_v17  ;;  %v24002_v1 = vcombine.high %v16855_v40, %v16861_v27  ;;  %v24006_v48 = vcombine.high %v16881_v3, %v16887_v20 }
 0x234   : > { %v2465_v60 = vcombine.low %v1961_v58, %v1963_v29  ;;  %v2466_v62 = vcombine.high %v1961_v58, %v1963_v29  ;;  %v2467_v19 = vcombine.low %v2050_v25, %v2052_v33  ;;  %v2468_v6 = vcombine.high %v2050_v25, %v2052_v33  ;;  %v16989_v22 = vpop.permute.xlu1 %2963  ;;  %v17019_v18 = vpop.permute.xlu0 %2959 }
 0x235   : > { %23995 = vst [vmem:[#allocation68_spill] sm:$0xff] %v16989_v22  ;;  %23996 = vst [vmem:[#allocation69_spill] sm:$0xff] %v17019_v18  ;;  %v24000_v58 = vcombine.low %v16855_v40, %v16861_v27  ;;  %v17095_v22 = vrot.slane %v24002_v1, %v16369_v17  ;;  %v2325_v40 = vcombine.high %v17077_v12, %v17077_v12 }
 0x236   : > { %v16992_v53 = vrot.slane %v2465_v60, %v16369_v17  ;;  %v16995_v29 = vrot.slane %v2466_v62, %v16369_v17  ;;  %v16998_v33 = vrot.slane %v2467_v19, %v16369_v17  ;;  %v17001_v25 = vrot.slane %v2468_v6, %v16369_v17 }
 0x237   : > { %v17083_v60 = vrot.slane %v24000_v58, %v16369_v17  ;;  %v24001_v62 = vcombine.high %v16852_v45, %v16858_v37  ;;  %v24003_v58 = vcombine.low %v16881_v3, %v16887_v20  ;;  %v24004_v37 = vcombine.low %v16884_v21, %v16890_v24 }
 0x238   : > { %v17045_v6 = vpop.permute.xlu1 %3171  ;;  %v17063_v18 = vpop.permute.xlu0 %3167  ;;  %v24009_v20 = vcombine.low %v16934_v7, %v16940_v9  ;;  %v24012_v3 = vcombine.high %v16937_v52, %v16943_v41 }
 0x239   : > { %23997 = vst [vmem:[#allocation70_spill] sm:$0xff] %v17045_v6  ;;  %23998 = vst [vmem:[#allocation71_spill] sm:$0xff] %v17063_v18  ;;  %v17089_v19 = vrot.slane %v24001_v62, %v16369_v17  ;;  %v2326_v27 = vcombine.high %v17083_v60, %v17083_v60  ;;  %v2328_v62 = vcombine.high %v17095_v22, %v17095_v22 }
 0x23a   : > { %v17133_v45 = vrot.slane %v24003_v58, %v16369_v17  ;;  %v17139_v2 = vrot.slane %v24004_v37, %v16369_v17  ;;  %v17145_v18 = vrot.slane %v24006_v48, %v16369_v17  ;;  %v24007_v6 = vcombine.high %v16884_v21, %v16890_v24 }
 0x23b   : > { %v2327_v1 = vcombine.high %v17089_v19, %v17089_v19  ;;  %v17165_v48 = vrot.slane %v24009_v20, %v16369_v17  ;;  %v24010_v21 = vcombine.low %v16937_v52, %v16943_v41  ;;  %v17183_v0 = vrot.slane %v24012_v3, %v16369_v17 }
 0x23c   : > { %24005 = vst [vmem:[#allocation72_spill] sm:$0xff] %v17139_v2  ;;  %v17151_v56 = vrot.slane %v24007_v6, %v16369_v17  ;;  %v24011_v6 = vcombine.high %v16934_v7, %v16940_v9  ;;  %v17186_v20 = vsub.f32 %v16537_v31, %v2325_v40  ;;  %v17195_v23 = vsub.f32 %v16583_v35, %v2328_v62 }
 0x23d   : > { %v17171_v24 = vrot.slane %v24010_v21, %v16369_v17  ;;  %v17189_v58 = vsub.f32 %v16571_v32, %v2327_v1  ;;  %v17192_v21 = vsub.f32 %v16541_v28, %v2326_v27  ;;  %v2393_v7 = vcombine.high %v17133_v45, %v17133_v45 }
 0x23e   : > { %24008 = vst [vmem:[#allocation73_spill] sm:$0xff] %v17151_v56  ;;  %v17177_v37 = vrot.slane %v24011_v6, %v16369_v17  ;;  %v2394_v52 = vcombine.high %v17139_v2, %v17139_v2  ;;  %v2395_v9 = vcombine.high %v17145_v18, %v17145_v18  ;;  %v2396_v31 = vcombine.high %v17151_v56, %v17151_v56 }
 0x23f   : > { %v2461_v40 = vcombine.high %v17165_v48, %v17165_v48  ;;  %v2462_v27 = vcombine.high %v17171_v24, %v17171_v24  ;;  %v2464_v62 = vcombine.high %v17183_v0, %v17183_v0  ;;  %v24013_v3 = vcombine.low %v16992_v53, %v16998_v33 }
 0x240   : > { %v2463_v1 = vcombine.high %v17177_v37, %v17177_v37  ;;  %v24015_v41 = vcombine.low %v16995_v29, %v17001_v25  ;;  %v24017_v28 = vcombine.high %v16992_v53, %v16998_v33  ;;  %v24019_v56 = vcombine.high %v16995_v29, %v17001_v25  ;;  %v24030_v29 = vld [vmem:[#allocation55_spill] sm:$0xff] }
 0x241   : > { %v17225_v6 = vrot.slane %v24013_v3, %v16369_v17  ;;  %v17246_v3 = vsub.f32 %v16614_v39, %v2393_v7  ;;  %v17249_v2 = vsub.f32 %v16628_v46, %v2395_v9  ;;  %v17255_v26 = vsub.f32 %v16636_v16, %v2396_v31  ;;  %v24028_v39 = vld [vmem:[#allocation53_spill] sm:$0xff] }
 0x242   : > { %v17231_v35 = vrot.slane %v24015_v41, %v16369_v17  ;;  %v17237_v32 = vrot.slane %v24017_v28, %v16369_v17  ;;  %v17243_v15 = vrot.slane %v24019_v56, %v16369_v17  ;;  %v17252_v41 = vsub.f32 %v16620_v44, %v2394_v52 }
 0x243   : > { %24014 = vst [vmem:[#allocation74_spill] sm:$0xff] %v17225_v6  ;;  %v17266_v46 = vsub.f32 %v16678_v42, %v2461_v40  ;;  %v17269_v44 = vsub.f32 %v16686_v59, %v2463_v1  ;;  %v17272_v16 = vsub.f32 %v16682_v4, %v2462_v27  ;;  %v17275_v33 = vsub.f32 %v16695_v34, %v2464_v62  ;;  %v24024_v1 = vld [vmem:[#allocation52_spill] sm:$0xff]  ;;  %v24026_v62 = vld [vmem:[#allocation54_spill] sm:$0xff] }
 0x244   : > { %24016 = vst [vmem:[#allocation75_spill] sm:$0xff] %v17231_v35  ;;  %24018 = vst [vmem:[#allocation76_spill] sm:$0xff] %v17237_v32  ;;  %v2529_v52 = vcombine.high %v17225_v6, %v17225_v6  ;;  %v2530_v9 = vcombine.high %v17231_v35, %v17231_v35  ;;  %v2531_v42 = vcombine.high %v17237_v32, %v17237_v32 }
 0x245   : > { %24020 = vst [vmem:[#allocation77_spill] sm:$0xff] %v17243_v15  ;;  %24021 = vst [vmem:[#allocation78_spill] sm:$0xff] %v17272_v16  ;;  %v2532_v59 = vcombine.high %v17243_v15, %v17243_v15 }
 0x246   : > { %24022 = vst [vmem:[#allocation79_spill] sm:$0xff] %v17275_v33  ;;  %v17298_v6 = vsub.f32 %v24024_v1, %v2529_v52  ;;  %v17301_v32 = vsub.f32 %v24026_v62, %v2531_v42  ;;  %v17304_v35 = vsub.f32 %v24028_v39, %v2530_v9 }
 0x247   : > { %v17307_v15 = vsub.f32 %v24030_v29, %v2532_v59 }
 0x248   : > { %24025 = vst [vmem:[#allocation52_spill] sm:$0xff] %v17298_v6  ;;  %24027 = vst [vmem:[#allocation54_spill] sm:$0xff] %v17301_v32 }
 0x249   : > { %24029 = vst [vmem:[#allocation53_spill] sm:$0xff] %v17304_v35  ;;  %24031 = vst [vmem:[#allocation55_spill] sm:$0xff] %v17307_v15 }
 0x255   : > { %v2133_v25 = vpop.f32.mrb[24].mxu0  ;;  %v2222_v7 = vpop.f32.mrb[24].mxu1 }
 0x256   : > { %v2135_v31 = vpop.f32.mrb[25].mxu0  ;;  %v2224_v4 = vpop.f32.mrb[25].mxu1 }
 0x257   : > { %v2613_v28 = vcombine.low %v2133_v25, %v2135_v31  ;;  %v2614_v40 = vcombine.high %v2133_v25, %v2135_v31  ;;  %v2615_v34 = vcombine.low %v2222_v7, %v2224_v4  ;;  %v2616_v27 = vcombine.high %v2222_v7, %v2224_v4 }
 0x259   : > { %v2623_v53 = vrot.slane %v2613_v28, %v16369_v17  ;;  %v2630_v33 = vrot.slane %v2614_v40, %v16369_v17  ;;  %v2637_v25 = vrot.slane %v2615_v34, %v16369_v17  ;;  %v2644_v7 = vrot.slane %v2616_v27, %v16369_v17  ;;  %v2139_v31 = vpop.f32.mrb[26].mxu0  ;;  %v2228_v4 = vpop.f32.mrb[26].mxu1 }
 0x25a   : > { %v2141_v28 = vpop.f32.mrb[27].mxu0  ;;  %v2230_v40 = vpop.f32.mrb[27].mxu1 }
 0x25b   : > { %v2645_v56 = vcombine.low %v2623_v53, %v2637_v25  ;;  %v2646_v34 = vcombine.high %v2623_v53, %v2637_v25  ;;  %v2647_v50 = vcombine.low %v2630_v33, %v2644_v7  ;;  %v2648_v27 = vcombine.high %v2630_v33, %v2644_v7 }
 0x25c   : > { %v2681_v51 = vcombine.low %v2139_v31, %v2141_v28  ;;  %v2682_v55 = vcombine.high %v2139_v31, %v2141_v28  ;;  %v2683_v16 = vcombine.low %v2228_v4, %v2230_v40  ;;  %v2684_v52 = vcombine.high %v2228_v4, %v2230_v40 }
 0x25d   : > { %v2655_v1 = vrot.slane %v2645_v56, %v16369_v17  ;;  %v2662_v42 = vrot.slane %v2647_v50, %v16369_v17  ;;  %v2669_v39 = vrot.slane %v2646_v34, %v16369_v17  ;;  %v2676_v9 = vrot.slane %v2648_v27, %v16369_v17  ;;  %v17313_v29 = vpop.f32.mrb[28].mxu0  ;;  %v17315_v59 = vpop.f32.mrb[28].mxu1 }
 0x25e   : > { %v2691_v53 = vrot.slane %v2681_v51, %v16369_v17  ;;  %v2698_v33 = vrot.slane %v2682_v55, %v16369_v17  ;;  %v2705_v62 = vrot.slane %v2683_v16, %v16369_v17  ;;  %v2712_v25 = vrot.slane %v2684_v52, %v16369_v17  ;;  %v17321_v7 = vpop.f32.mrb[29].mxu0  ;;  %v17323_v56 = vpop.f32.mrb[29].mxu1 }
 0x25f   : > { %v2677_v50 = vcombine.high %v2655_v1, %v2655_v1  ;;  %v2678_v31 = vcombine.high %v2662_v42, %v2662_v42  ;;  %v2679_v4 = vcombine.high %v2669_v39, %v2669_v39  ;;  %v2680_v28 = vcombine.high %v2676_v9, %v2676_v9 }
 0x260   : > { %v24032_v40 = vsub.f32 %v16470_v49, %v17077_v12  ;;  %v24033_v51 = vsub.f32 %v16473_v54, %v17089_v19  ;;  %v24034_v16 = vsub.f32 %v16486_v8, %v17083_v60  ;;  %v24035_v52 = vsub.f32 %v16489_v11, %v17095_v22  ;;  %v24036_v12 = vld [vmem:[#allocation62_spill] sm:$0xff] }
 0x261   : > { %v2919_v35 = vmul.f32 %v2677_v50, %v17186_v20  ;;  %v2920_v32 = vmul.f32 %v2679_v4, %v17189_v58  ;;  %v2923_v6 = vmul.f32 %v2678_v31, %v17192_v21  ;;  %v2924_v49 = vmul.f32 %v2680_v28, %v17195_v23  ;;  %v24045_v31 = vld [vmem:[#allocation65_spill] sm:$0xff] }
 0x262   : > { %v2917_v34 = vmul.f32 %v2655_v1, %v24032_v40  ;;  %v2918_v55 = vmul.f32 %v2669_v39, %v24033_v51  ;;  %v2921_v27 = vmul.f32 %v2662_v42, %v24034_v16  ;;  %v2922_v15 = vmul.f32 %v2676_v9, %v24035_v52  ;;  %v24043_v39 = vld [vmem:[#allocation64_spill] sm:$0xff]  ;;  %v24047_v40 = vld [vmem:[#allocation61_spill] sm:$0xff] }
 0x263   : > { %v24037_v54 = vrot.slane %v24036_v12, %v16872_v10  ;;  %v24038_v8 = vrot.slane %v24036_v12, %v16875_v47  ;;  %v24039_v11 = vrot.slane %v24036_v12, %v16900_v14  ;;  %v24040_v20 = vrot.slane %v24036_v12, %v16903_v5 }
 0x264   : > { %v24041_v21 = vrot.slane %v24036_v12, %v16878_v61  ;;  %v24042_v1 = vrot.slane %v24036_v12, %v16897_v63  ;;  %v24044_v9 = vrot.slane %v24036_v12, %v24043_v39  ;;  %v24046_v4 = vrot.slane %v24036_v12, %v24045_v31 }
 0x265   : > { %v3125_v19 = vmul.f32 %v24037_v54, %v2917_v34  ;;  %v3126_v60 = vmul.f32 %v24038_v8, %v2918_v55  ;;  %v3129_v22 = vmul.f32 %v24039_v11, %v2921_v27  ;;  %v3130_v58 = vmul.f32 %v24040_v20, %v2922_v15  ;;  %v17405_v11 = vpop.f32.mrb[30].mxu0 }
 0x266   : > { %v3127_v23 = vmul.f32 %v24041_v21, %v2919_v35  ;;  %v3128_v42 = vmul.f32 %v24042_v1, %v2920_v32  ;;  %v3131_v50 = vmul.f32 %v24044_v9, %v2923_v6  ;;  %v3132_v28 = vmul.f32 %v24046_v4, %v2924_v49 }
 0x267   : > { %v24048_v34 = vrot.slane %v24047_v40, %v16872_v10  ;;  %v24049_v35 = vrot.slane %v24047_v40, %v16875_v47  ;;  %v24050_v32 = vrot.slane %v24047_v40, %v16900_v14  ;;  %v24051_v6 = vrot.slane %v24047_v40, %v16903_v5 }
 0x268   : > { %v24053_v27 = vrot.slane %v24047_v40, %v16878_v61  ;;  %v24054_v49 = vrot.slane %v24047_v40, %v16897_v63  ;;  %v24055_v54 = vrot.slane %v24047_v40, %v24043_v39  ;;  %v24057_v8 = vrot.slane %v24047_v40, %v24045_v31 }
 0x269   : > { %v17368_v15 = vadd.f32 %v24048_v34, %v3125_v19  ;;  %v17373_v51 = vadd.f32 %v24049_v35, %v3126_v60  ;;  %v17378_v55 = vadd.f32 %v24050_v32, %v3129_v22  ;;  %v17383_v16 = vadd.f32 %v24051_v6, %v3130_v58  ;;  %v17407_v22 = vpop.f32.mrb[30].mxu1  ;;  %v17417_v34 = vpop.f32.mrb[31].mxu0 }
 0x26a   : > { %v17388_v52 = vadd.f32 %v24053_v27, %v3127_v23  ;;  %v17393_v12 = vadd.f32 %v24054_v49, %v3128_v42  ;;  %v17398_v19 = vadd.f32 %v24055_v54, %v3131_v50  ;;  %v17403_v60 = vadd.f32 %v24057_v8, %v3132_v28  ;;  %v17419_v35 = vpop.f32.mrb[31].mxu1 }
 0x26b   : > { %24052 = vst [vmem:[#allocation62_spill] sm:$0xff] %v17383_v16  ;;  %v14397_v20 = vmul.f32 -1.442695, %v17368_v15  ;;  %v14398_v58 = vmul.f32 -1.442695, %v17373_v51  ;;  %v2713_v23 = vcombine.low %v2691_v53, %v2705_v62  ;;  %v2714_v50 = vcombine.high %v2691_v53, %v2705_v62 }
 0x26c   : > { %24056 = vst [vmem:[#allocation64_spill] sm:$0xff] %v17398_v19  ;;  %24058 = vst [vmem:[#allocation65_spill] sm:$0xff] %v17403_v60  ;;  %v14401_v21 = vmul.f32 -1.442695, %v17378_v55  ;;  %v14399_v1 = vmul.f32 -1.442695, %v17388_v52  ;;  %v2715_v40 = vcombine.low %v2698_v33, %v2712_v25  ;;  %v2716_v32 = vcombine.high %v2698_v33, %v2712_v25 }
 0x26d   : > { %v14400_v42 = vmul.f32 -1.442695, %v17393_v12  ;;  %v14402_v9 = vmul.f32 -1.442695, %v17383_v16  ;;  %15517 = vpow2.f32 %v14397_v20  ;;  %v14403_v4 = vmul.f32 -1.442695, %v17398_v19 }
 0x26e   : > { %v14404_v28 = vmul.f32 -1.442695, %v17403_v60  ;;  %15519 = vpow2.f32 %v14398_v58  ;;  %v2723_v6 = vrot.slane %v2713_v23, %v16369_v17  ;;  %v2737_v27 = vrot.slane %v2714_v50, %v16369_v17  ;;  %v24064_v60 = vld [vmem:[#allocation47_spill] sm:$0xff]  ;;  %v24065_v19 = vld [vmem:[#allocation73_spill] sm:$0xff] }
 0x26f   : > { %15521 = vpow2.f32 %v14399_v1  ;;  %v2730_v49 = vrot.slane %v2715_v40, %v16369_v17  ;;  %v2749_v53 = vcombine.low %v17313_v29, %v17321_v7  ;;  %v2750_v62 = vcombine.high %v17313_v29, %v17321_v7  ;;  %v24061_v7 = vld [vmem:[#allocation46_spill] sm:$0xff] }
 0x270   : > { %15523 = vpow2.f32 %v14400_v42  ;;  %v2744_v54 = vrot.slane %v2716_v32, %v16369_v17  ;;  %v2745_v8 = vcombine.high %v2723_v6, %v2723_v6  ;;  %v2747_v20 = vcombine.high %v2737_v27, %v2737_v27  ;;  %v24062_v42 = vld [vmem:[#allocation72_spill] sm:$0xff] }
 0x271   : > { %15525 = vpow2.f32 %v14401_v21  ;;  %v2746_v33 = vcombine.high %v2730_v49, %v2730_v49  ;;  %v24059_v25 = vsub.f32 %v16492_v13, %v17133_v45  ;;  %v24060_v23 = vsub.f32 %v16504_v36, %v17145_v18  ;;  %v24067_v18 = vld [vmem:[#allocation67_spill] sm:$0xff] }
 0x272   : > { %15527 = vpow2.f32 %v14402_v9  ;;  %v2748_v50 = vcombine.high %v2744_v54, %v2744_v54  ;;  %v2927_v40 = vmul.f32 %v2745_v8, %v17246_v3  ;;  %v2928_v29 = vmul.f32 %v2747_v20, %v17249_v2 }
 0x273   : > { %v2925_v58 = vmul.f32 %v2723_v6, %v24059_v25  ;;  %v2926_v1 = vmul.f32 %v2737_v27, %v24060_v23  ;;  %15529 = vpow2.f32 %v14403_v4  ;;  %v24063_v32 = vsub.f32 %v24061_v7, %v24062_v42 }
 0x274   : > { %v24066_v16 = vsub.f32 %v24064_v60, %v24065_v19  ;;  %v2931_v45 = vmul.f32 %v2746_v33, %v17252_v41  ;;  %15531 = vpow2.f32 %v14404_v28  ;;  %v2932_v36 = vmul.f32 %v2748_v50, %v17255_v26  ;;  %v24076_v33 = vld [vmem:[#allocation66_spill] sm:$0xff] }
 0x275   : > { %v2929_v21 = vmul.f32 %v2730_v49, %v24063_v32  ;;  %v24068_v9 = vrot.slane %v24067_v18, %v16872_v10  ;;  %v24069_v2 = vrot.slane %v24067_v18, %v16875_v47  ;;  %v24070_v6 = vrot.slane %v24067_v18, %v16878_v61 }
 0x276   : > { %v2930_v13 = vmul.f32 %v2744_v54, %v24066_v16  ;;  %v24071_v16 = vrot.slane %v24067_v18, %v16897_v63  ;;  %v24072_v41 = vrot.slane %v24067_v18, %v16900_v14  ;;  %v24073_v60 = vrot.slane %v24067_v18, %v16903_v5 }
 0x277   : > { %v3133_v3 = vmul.f32 %v24068_v9, %v2925_v58  ;;  %v3134_v4 = vmul.f32 %v24069_v2, %v2926_v1  ;;  %v3135_v27 = vmul.f32 %v24070_v6, %v2927_v40  ;;  %v24074_v49 = vrot.slane %v24067_v18, %v24043_v39  ;;  %v15518_v50 = vpop.eup %15517 }
 0x278   : > { %v3136_v19 = vmul.f32 %v24071_v16, %v2928_v29  ;;  %v3137_v26 = vmul.f32 %v24072_v41, %v2929_v21  ;;  %v3138_v28 = vmul.f32 %v24073_v60, %v2930_v13  ;;  %v24075_v8 = vrot.slane %v24067_v18, %v24045_v31 }
 0x279   : > { %v3139_v54 = vmul.f32 %v24074_v49, %v2931_v45  ;;  %v24077_v25 = vrot.slane %v24076_v33, %v16872_v10  ;;  %v24078_v23 = vrot.slane %v24076_v33, %v16875_v47  ;;  %v24079_v40 = vrot.slane %v24076_v33, %v16878_v61 }
 0x27a   : > { %v3140_v20 = vmul.f32 %v24075_v8, %v2932_v36  ;;  %v24080_v7 = vrot.slane %v24076_v33, %v16897_v63  ;;  %v24081_v32 = vrot.slane %v24076_v33, %v16900_v14  ;;  %v24082_v13 = vrot.slane %v24076_v33, %v16903_v5  ;;  %v15520_v36 = vpop.eup %15519 }
 0x27b   : > { %v17472_v58 = vadd.f32 %v24077_v25, %v3133_v3  ;;  %v17477_v1 = vadd.f32 %v24078_v23, %v3134_v4  ;;  %v17482_v29 = vadd.f32 %v24079_v40, %v3135_v27  ;;  %v3461_v18 = vadd.f32 1.0, %v15518_v50  ;;  %v15522_v27 = vpop.eup %15521 }
 0x27c   : > { %v17487_v42 = vadd.f32 %v24080_v7, %v3136_v19  ;;  %v17492_v21 = vadd.f32 %v24081_v32, %v3137_v26  ;;  %v17497_v45 = vadd.f32 %v24082_v13, %v3138_v28  ;;  %v24083_v9 = vrot.slane %v24076_v33, %v24043_v39  ;;  %v15524_v60 = vpop.eup %15523 }
 0x27d   : > { %v24084_v2 = vrot.slane %v24076_v33, %v24045_v31  ;;  %v14405_v6 = vmul.f32 -1.442695, %v17472_v58  ;;  %v3462_v16 = vadd.f32 1.0, %v15520_v36  ;;  %v14406_v19 = vmul.f32 -1.442695, %v17477_v1  ;;  %v15526_v8 = vpop.eup %15525 }
 0x27e   : > { %v17502_v3 = vadd.f32 %v24083_v9, %v3139_v54  ;;  %v14407_v41 = vmul.f32 -1.442695, %v17482_v29  ;;  %v2759_v26 = vrot.slane %v2749_v53, %v16369_v17  ;;  %v3463_v28 = vadd.f32 1.0, %v15522_v27  ;;  %v15528_v23 = vpop.eup %15527 }
 0x27f   : > { %v17507_v4 = vadd.f32 %v24084_v2, %v3140_v20  ;;  %15533 = vrcp.f32 %v3461_v18  ;;  %v14408_v49 = vmul.f32 -1.442695, %v17487_v42  ;;  %v14409_v54 = vmul.f32 -1.442695, %v17492_v21  ;;  %v15530_v7 = vpop.eup %15529 }
 0x280   : > { %v3464_v20 = vadd.f32 1.0, %v15524_v60  ;;  %15535 = vrcp.f32 %v3462_v16  ;;  %v14410_v33 = vmul.f32 -1.442695, %v17497_v45  ;;  %v14411_v25 = vmul.f32 -1.442695, %v17502_v3  ;;  %v15532_v18 = vpop.eup %15531 }
 0x281   : > { %v3465_v50 = vadd.f32 1.0, %v15526_v8  ;;  %15537 = vrcp.f32 %v3463_v28  ;;  %v14412_v40 = vmul.f32 -1.442695, %v17507_v4  ;;  %v2766_v53 = vrot.slane %v2750_v62, %v16369_v17 }
 0x282   : > { %v3466_v32 = vadd.f32 1.0, %v15528_v23  ;;  %15539 = vrcp.f32 %v3464_v20  ;;  %v2751_v13 = vcombine.low %v17315_v59, %v17323_v56  ;;  %v2752_v36 = vcombine.high %v17315_v59, %v17323_v56 }
 0x283   : > { %v3467_v9 = vadd.f32 1.0, %v15530_v7  ;;  %15541 = vrcp.f32 %v3465_v50  ;;  %v2817_v2 = vcombine.low %v17405_v11, %v17417_v34  ;;  %v2818_v27 = vcombine.high %v17405_v11, %v17417_v34 }
 0x284   : > { %v3468_v16 = vadd.f32 1.0, %v15532_v18  ;;  %15543 = vrcp.f32 %v3466_v32  ;;  %v2773_v62 = vrot.slane %v2751_v13, %v16369_v17  ;;  %v2780_v60 = vrot.slane %v2752_v36, %v16369_v17 }
 0x285   : > { %15545 = vrcp.f32 %v3467_v9  ;;  %v17530_v28 = vrot.slane %v2817_v2, %v16369_v17  ;;  %v17533_v59 = vrot.slane %v2818_v27, %v16369_v17  ;;  %v2819_v56 = vcombine.low %v17407_v22, %v17419_v35 }
 0x286   : > { %15547 = vrcp.f32 %v3468_v16  ;;  %v2781_v8 = vcombine.low %v2759_v26, %v2773_v62  ;;  %v2782_v20 = vcombine.high %v2759_v26, %v2773_v62  ;;  %v2783_v11 = vcombine.low %v2766_v53, %v2780_v60 }
 0x287   : > { %15549 = vpow2.f32 %v14405_v6  ;;  %v2784_v34 = vcombine.high %v2766_v53, %v2780_v60  ;;  %v2820_v23 = vcombine.high %v17407_v22, %v17419_v35  ;;  %v2841_v50 = vrot.slane %v2819_v56, %v16369_v17 }
 0x288   : > { %15551 = vpow2.f32 %v14406_v19  ;;  %v2791_v7 = vrot.slane %v2781_v8, %v16369_v17  ;;  %v2798_v32 = vrot.slane %v2783_v11, %v16369_v17  ;;  %v2805_v13 = vrot.slane %v2782_v20, %v16369_v17  ;;  %v24089_v11 = vld [vmem:[#allocation78_spill] sm:$0xff] }
 0x289   : > { %v15534_v36 = vpop.eup %15533  ;;  %15553 = vpow2.f32 %v14407_v41  ;;  %v2812_v18 = vrot.slane %v2784_v34, %v16369_v17  ;;  %v2848_v26 = vrot.slane %v2820_v23, %v16369_v17  ;;  %v2849_v6 = vcombine.low %v17530_v28, %v2841_v50 }
 0x28a   : > { %v15536_v53 = vpop.eup %15535  ;;  %15555 = vpow2.f32 %v14408_v49  ;;  %v2813_v22 = vcombine.high %v2791_v7, %v2791_v7  ;;  %v2814_v35 = vcombine.high %v2798_v32, %v2798_v32  ;;  %v2815_v9 = vcombine.high %v2805_v13, %v2805_v13 }
 0x28b   : > { %v15538_v19 = vpop.eup %15537  ;;  %15557 = vpow2.f32 %v14409_v54  ;;  %v2816_v2 = vcombine.high %v2812_v18, %v2812_v18  ;;  %v24085_v27 = vsub.f32 %v16551_v30, %v17165_v48  ;;  %v24086_v41 = vsub.f32 %v16557_v57, %v17177_v37  ;;  %v24090_v37 = vld [vmem:[#allocation79_spill] sm:$0xff] }
 0x28c   : > { %v15540_v60 = vpop.eup %15539  ;;  %15559 = vpow2.f32 %v14410_v33  ;;  %v2935_v56 = vmul.f32 %v2813_v22, %v17266_v46  ;;  %v2936_v49 = vmul.f32 %v2815_v9, %v17269_v44  ;;  %v24087_v8 = vsub.f32 %v16554_v43, %v17171_v24  ;;  %v24091_v46 = vld [vmem:[#allocation69_spill] sm:$0xff] }
 0x28d   : > { %v2933_v16 = vmul.f32 %v2791_v7, %v24085_v27  ;;  %v2934_v62 = vmul.f32 %v2805_v13, %v24086_v41  ;;  %v17557_v54 = vpop.eup %15541  ;;  %15561 = vpow2.f32 %v14411_v25  ;;  %v24088_v30 = vsub.f32 %v16562_v38, %v17183_v0 }
 0x28e   : > { %v2937_v20 = vmul.f32 %v2798_v32, %v24087_v8  ;;  %v2939_v57 = vmul.f32 %v2814_v35, %v24089_v11  ;;  %v2940_v34 = vmul.f32 %v2816_v2, %v24090_v37  ;;  %v17564_v33 = vpop.eup %15543  ;;  %15563 = vpow2.f32 %v14412_v40 }
 0x28f   : > { %v2938_v48 = vmul.f32 %v2812_v18, %v24088_v30  ;;  %v24092_v44 = vrot.slane %v24091_v46, %v16872_v10  ;;  %v24093_v43 = vrot.slane %v24091_v46, %v16875_v47  ;;  %v24094_v0 = vrot.slane %v24091_v46, %v16878_v61  ;;  %v17581_v25 = vpop.eup %15545 }
 0x290   : > { %v24095_v40 = vrot.slane %v24091_v46, %v16897_v63  ;;  %v24096_v32 = vrot.slane %v24091_v46, %v16900_v14  ;;  %v24097_v18 = vrot.slane %v24091_v46, %v16903_v5  ;;  %v24098_v35 = vrot.slane %v24091_v46, %v24043_v39  ;;  %v17603_v2 = vpop.eup %15547 }
 0x291   : > { %v17569_v23 = vmul.f32 %v24092_v44, %v2933_v16  ;;  %v17574_v24 = vmul.f32 %v24093_v43, %v2934_v62  ;;  %v17579_v38 = vmul.f32 %v24094_v0, %v2935_v56  ;;  %v24099_v27 = vrot.slane %v24091_v46, %v24045_v31 }
 0x292   : > { %v17586_v7 = vmul.f32 %v24095_v40, %v2936_v49  ;;  %v17591_v13 = vmul.f32 %v24096_v32, %v2937_v20  ;;  %v17596_v22 = vmul.f32 %v24097_v18, %v2938_v48  ;;  %v17601_v9 = vmul.f32 %v24098_v35, %v2939_v57  ;;  %v15550_v49 = vpop.eup %15549  ;;  %v24104_v32 = vld [vmem:[#allocation50_spill] sm:$0xff]  ;;  %v24105_v18 = vld [vmem:[#allocation76_spill] sm:$0xff] }
 0x293   : > { %v17608_v16 = vmul.f32 %v24099_v27, %v2940_v34  ;;  %v2850_v41 = vcombine.high %v17530_v28, %v2841_v50  ;;  %v2851_v62 = vcombine.low %v17533_v59, %v2848_v26  ;;  %v2852_v56 = vcombine.high %v17533_v59, %v2848_v26  ;;  %v15552_v11 = vpop.eup %15551  ;;  %v24101_v34 = vld [vmem:[#allocation48_spill] sm:$0xff] }
 0x294   : > { %v2859_v8 = vrot.slane %v2849_v6, %v16369_v17  ;;  %v17615_v20 = vmul.f32 %v15534_v36, %v17368_v15  ;;  %v17618_v30 = vmul.f32 %v15536_v53, %v17373_v51  ;;  %v17621_v48 = vmul.f32 %v15538_v19, %v17388_v52  ;;  %v15554_v26 = vpop.eup %15553  ;;  %v24102_v15 = vld [vmem:[#allocation74_spill] sm:$0xff] }
 0x295   : > { %24100 = vst [vmem:[#allocation61_spill] sm:$0xff] %v17608_v16  ;;  %v3469_v57 = vadd.f32 1.0, %v15550_v49  ;;  %v2866_v28 = vrot.slane %v2851_v62, %v16369_v17  ;;  %v2873_v50 = vrot.slane %v2850_v41, %v16369_v17  ;;  %v2880_v59 = vrot.slane %v2852_v56, %v16369_v17  ;;  %v15556_v52 = vpop.eup %15555  ;;  %v24107_v56 = vld [vmem:[#allocation52_spill] sm:$0xff] }
 0x296   : > { %v3470_v37 = vadd.f32 1.0, %v15552_v11  ;;  %v2881_v6 = vcombine.high %v2859_v8, %v2859_v8  ;;  %v24103_v36 = vsub.f32 %v24101_v34, %v24102_v15  ;;  %v17630_v51 = vmul.f32 %v15540_v60, %v17393_v12  ;;  %v15558_v43 = vpop.eup %15557  ;;  %v24108_v12 = vld [vmem:[#allocation54_spill] sm:$0xff] }
 0x297   : > { %v3471_v53 = vadd.f32 1.0, %v15554_v26  ;;  %15565 = vrcp.f32 %v3469_v57  ;;  %v2882_v19 = vcombine.high %v2866_v28, %v2866_v28  ;;  %v2883_v44 = vcombine.high %v2873_v50, %v2873_v50  ;;  %v15560_v41 = vpop.eup %15559  ;;  %v24109_v57 = vld [vmem:[#allocation49_spill] sm:$0xff]  ;;  %v24110_v26 = vld [vmem:[#allocation75_spill] sm:$0xff] }
 0x298   : > { %v2941_v46 = vmul.f32 %v2859_v8, %v24103_v36  ;;  %v3472_v0 = vadd.f32 1.0, %v15556_v52  ;;  %15567 = vrcp.f32 %v3470_v37  ;;  %v2884_v40 = vcombine.high %v2880_v59, %v2880_v59  ;;  %v15562_v8 = vpop.eup %15561  ;;  %v24112_v37 = vld [vmem:[#allocation51_spill] sm:$0xff]  ;;  %v24113_v36 = vld [vmem:[#allocation77_spill] sm:$0xff] }
 0x299   : > { %v24106_v35 = vsub.f32 %v24104_v32, %v24105_v18  ;;  %v3473_v62 = vadd.f32 1.0, %v15558_v43  ;;  %15569 = vrcp.f32 %v3471_v53  ;;  %v2943_v49 = vmul.f32 %v2881_v6, %v24107_v56  ;;  %v15564_v32 = vpop.eup %15563  ;;  %v24115_v43 = vld [vmem:[#allocation53_spill] sm:$0xff]  ;;  %v24116_v18 = vld [vmem:[#allocation55_spill] sm:$0xff] }
 0x29a   : > { %v2944_v60 = vmul.f32 %v2883_v44, %v24108_v12  ;;  %v3474_v11 = vadd.f32 1.0, %v15560_v41  ;;  %15571 = vrcp.f32 %v3472_v0  ;;  %v24111_v34 = vsub.f32 %v24109_v57, %v24110_v26  ;;  %v24117_v44 = vld [vmem:[#allocation68_spill] sm:$0xff] }
 0x29b   : > { %v2942_v27 = vmul.f32 %v2873_v50, %v24106_v35  ;;  %v24114_v52 = vsub.f32 %v24112_v37, %v24113_v36  ;;  %v3475_v50 = vadd.f32 1.0, %v15562_v8  ;;  %15573 = vrcp.f32 %v3473_v62 }
 0x29c   : > { %v2945_v15 = vmul.f32 %v2866_v28, %v24111_v34  ;;  %v2947_v53 = vmul.f32 %v2882_v19, %v24115_v43  ;;  %v2948_v6 = vmul.f32 %v2884_v40, %v24116_v18  ;;  %v3476_v35 = vadd.f32 1.0, %v15564_v32  ;;  %v24126_v34 = vld [vmem:[#allocation70_spill] sm:$0xff] }
 0x29d   : > { %v2946_v16 = vmul.f32 %v2880_v59, %v24114_v52  ;;  %15575 = vrcp.f32 %v3474_v11  ;;  %v24118_v0 = vrot.slane %v24117_v44, %v16872_v10  ;;  %v24119_v28 = vrot.slane %v24117_v44, %v16875_v47 }
 0x29e   : > { %15577 = vrcp.f32 %v3475_v50  ;;  %v24120_v59 = vrot.slane %v24117_v44, %v16878_v61  ;;  %v24121_v19 = vrot.slane %v24117_v44, %v16897_v63  ;;  %v24122_v40 = vrot.slane %v24117_v44, %v16900_v14 }
 0x29f   : > { %v3149_v41 = vmul.f32 %v24118_v0, %v2941_v46  ;;  %v3150_v56 = vmul.f32 %v24119_v28, %v2942_v27  ;;  %15579 = vrcp.f32 %v3476_v35  ;;  %v24123_v46 = vrot.slane %v24117_v44, %v16903_v5 }
 0x2a0   : > { %v3151_v12 = vmul.f32 %v24120_v59, %v2943_v49  ;;  %v3152_v62 = vmul.f32 %v24121_v19, %v2944_v60  ;;  %v3153_v8 = vmul.f32 %v24122_v40, %v2945_v15  ;;  %v24124_v27 = vrot.slane %v24117_v44, %v24043_v39 }
 0x2a1   : > { %v3154_v11 = vmul.f32 %v24123_v46, %v2946_v16  ;;  %v24125_v49 = vrot.slane %v24117_v44, %v24045_v31  ;;  %v24127_v60 = vrot.slane %v24126_v34, %v16872_v10  ;;  %v24128_v15 = vrot.slane %v24126_v34, %v16875_v47  ;;  %v15566_v28 = vpop.eup %15565 }
 0x2a2   : > { %v3155_v57 = vmul.f32 %v24124_v27, %v2947_v53  ;;  %v24129_v16 = vrot.slane %v24126_v34, %v16878_v61  ;;  %v24130_v32 = vrot.slane %v24126_v34, %v16897_v63  ;;  %v24131_v43 = vrot.slane %v24126_v34, %v16900_v14 }
 0x2a3   : > { %v3156_v26 = vmul.f32 %v24125_v49, %v2948_v6  ;;  %v17672_v37 = vadd.f32 %v24127_v60, %v3149_v41  ;;  %v17677_v36 = vadd.f32 %v24128_v15, %v3150_v56  ;;  %v24132_v18 = vrot.slane %v24126_v34, %v16903_v5 }
 0x2a4   : > { %v17682_v52 = vadd.f32 %v24129_v16, %v3151_v12  ;;  %v17687_v50 = vadd.f32 %v24130_v32, %v3152_v62  ;;  %v17692_v53 = vadd.f32 %v24131_v43, %v3153_v8  ;;  %v24133_v35 = vrot.slane %v24126_v34, %v24043_v39  ;;  %v15568_v62 = vpop.eup %15567 }
 0x2a5   : > { %v17697_v6 = vadd.f32 %v24132_v18, %v3154_v11  ;;  %v24134_v0 = vrot.slane %v24126_v34, %v24045_v31  ;;  %v14421_v56 = vmul.f32 -1.442695, %v17672_v37  ;;  %v14422_v59 = vmul.f32 -1.442695, %v17677_v36  ;;  %v24135_v11 = vld [vmem:[#allocation62_spill] sm:$0xff]  ;;  %v24136_v34 = vld [vmem:[#allocation64_spill] sm:$0xff] }
 0x2a6   : > { %v17702_v44 = vadd.f32 %v24133_v35, %v3155_v57  ;;  %v14423_v12 = vmul.f32 -1.442695, %v17682_v52  ;;  %v3561_v19 = vmul.f32 %v17557_v54, %v17378_v55  ;;  %v14424_v40 = vmul.f32 -1.442695, %v17687_v50  ;;  %v15570_v57 = vpop.eup %15569  ;;  %v24137_v54 = vld [vmem:[#allocation65_spill] sm:$0xff] }
 0x2a7   : > { %v17707_v41 = vadd.f32 %v24134_v0, %v3156_v26  ;;  %v14425_v8 = vmul.f32 -1.442695, %v17692_v53  ;;  %v14426_v46 = vmul.f32 -1.442695, %v17697_v6  ;;  %v3562_v27 = vmul.f32 %v17564_v33, %v24135_v11  ;;  %v15572_v55 = vpop.eup %15571 }
 0x2a8   : > { %15581 = vpow2.f32 %v14421_v56  ;;  %v14427_v49 = vmul.f32 -1.442695, %v17702_v44  ;;  %v3563_v60 = vmul.f32 %v17581_v25, %v24136_v34  ;;  %v3564_v15 = vmul.f32 %v17603_v2, %v24137_v54  ;;  %v15574_v32 = vpop.eup %15573 }
 0x2a9   : > { %v14428_v26 = vmul.f32 -1.442695, %v17707_v41  ;;  %15583 = vpow2.f32 %v14422_v59  ;;  %v3637_v16 = vcombine.low %v17615_v20, %v17618_v30  ;;  %v3638_v33 = vcombine.low %v17621_v48, %v17630_v51  ;;  %v15576_v0 = vpop.eup %15575 }
 0x2aa   : > { %15585 = vpow2.f32 %v14423_v12  ;;  %v3639_v43 = vcombine.low %v3561_v19, %v3562_v27  ;;  %v3565_v18 = vmul.f32 %v15566_v28, %v17472_v58  ;;  %v3566_v35 = vmul.f32 %v15568_v62, %v17477_v1  ;;  %v15578_v59 = vpop.eup %15577 }
 0x2ab   : > { %15587 = vpow2.f32 %v14424_v40  ;;  %v3640_v25 = vcombine.low %v3563_v60, %v3564_v15  ;;  %v3647_v56 = vrot.slane %v3637_v16, %v16369_v17  ;;  %v3654_v2 = vrot.slane %v3638_v33, %v16369_v17  ;;  %v15580_v51 = vpop.eup %15579 }
 0x2ac   : > { %15589 = vpow2.f32 %v14425_v8  ;;  %v3661_v20 = vrot.slane %v3639_v43, %v16369_v17  ;;  %v3567_v30 = vmul.f32 %v15570_v57, %v17482_v29  ;;  %v3568_v48 = vmul.f32 %v15572_v55, %v17487_v42 }
 0x2ad   : > { %15591 = vpow2.f32 %v14426_v46  ;;  %v3668_v58 = vrot.slane %v3640_v25, %v16369_v17  ;;  %v3669_v1 = vcombine.low %v3647_v56, %v3654_v2  ;;  %v3670_v28 = vcombine.high %v3647_v56, %v3654_v2 }
 0x2ae   : > { %15593 = vpow2.f32 %v14427_v49  ;;  %v3569_v12 = vmul.f32 %v15574_v32, %v17492_v21  ;;  %v3570_v19 = vmul.f32 %v15576_v0, %v17497_v45  ;;  %v3571_v62 = vmul.f32 %v15578_v59, %v17502_v3  ;;  %v24138_v45 = vld [vmem:[#allocation71_spill] sm:$0xff] }
 0x2af   : > { %15595 = vpow2.f32 %v14428_v26  ;;  %v3671_v40 = vcombine.low %v3661_v20, %v3668_v58  ;;  %v3679_v8 = vrot.slane %v3669_v1, %v16369_v17  ;;  %v3672_v29 = vcombine.high %v3661_v20, %v3668_v58 }
 0x2b0   : > { %v3686_v42 = vrot.slane %v3670_v28, %v16369_v17  ;;  %v3572_v46 = vmul.f32 %v15580_v51, %v17507_v4  ;;  %v3705_v11 = vcombine.low %v3565_v18, %v3566_v35  ;;  %v3706_v27 = vcombine.low %v3567_v30, %v3568_v48 }
 0x2b1   : > { %v3693_v57 = vrot.slane %v3671_v40, %v16369_v17  ;;  %v3700_v49 = vrot.slane %v3672_v29, %v16369_v17  ;;  %v3707_v21 = vcombine.low %v3569_v12, %v3570_v19  ;;  %v24139_v3 = vrot.slane %v24138_v45, %v16872_v10 }
 0x2b2   : > { %v15582_v34 = vpop.eup %15581  ;;  %v3708_v60 = vcombine.low %v3571_v62, %v3572_v46  ;;  %v3715_v55 = vrot.slane %v3705_v11, %v16369_v17  ;;  %v3722_v54 = vrot.slane %v3706_v27, %v16369_v17  ;;  %v24140_v4 = vrot.slane %v24138_v45, %v16875_v47 }
 0x2b3   : > { %v17749_v26 = vadd.f32 %v24139_v3, %v17569_v23  ;;  %v15584_v16 = vpop.eup %15583  ;;  %v3485_v33 = vadd.f32 1.0, %v15582_v34  ;;  %v17759_v32 = vcombine.low %v3679_v8, %v3693_v57  ;;  %v17761_v43 = vcombine.low %v3686_v42, %v3700_v49 }
 0x2b4   : > { %v17757_v15 = vadd.f32 %v24140_v4, %v17574_v24  ;;  %v3729_v23 = vrot.slane %v3707_v21, %v16369_v17  ;;  %v15586_v18 = vpop.eup %15585  ;;  %v3486_v35 = vadd.f32 1.0, %v15584_v16  ;;  %v3736_v0 = vrot.slane %v3708_v60, %v16369_v17 }
 0x2b5   : > { %v3737_v25 = vcombine.low %v3715_v55, %v3722_v54  ;;  %v17765_v56 = vcombine.high %v3679_v8, %v3693_v57  ;;  %v15588_v2 = vpop.eup %15587  ;;  %v3487_v59 = vadd.f32 1.0, %v15586_v18  ;;  %15597 = vrcp.f32 %v3485_v33  ;;  %3925 = vrot.lane.b32.xlu0 %v17759_v32, %s15868_s26  ;;  %v24146_v18 = vld [vmem:[#allocation61_spill] sm:$0xff] }
 0x2b6   : > { %v3738_v24 = vcombine.high %v3715_v55, %v3722_v54  ;;  %v17769_v20 = vcombine.high %v3686_v42, %v3700_v49  ;;  %v15590_v30 = vpop.eup %15589  ;;  %v3488_v48 = vadd.f32 1.0, %v15588_v2  ;;  %15599 = vrcp.f32 %v3486_v35 }
 0x2b7   : > { %v3739_v51 = vcombine.low %v3729_v23, %v3736_v0  ;;  %v3747_v58 = vrot.slane %v3737_v25, %v16369_v17  ;;  %v15592_v1 = vpop.eup %15591  ;;  %v3489_v28 = vadd.f32 1.0, %v15590_v30  ;;  %15601 = vrcp.f32 %v3487_v59 }
 0x2b8   : > { %v3740_v12 = vcombine.high %v3729_v23, %v3736_v0  ;;  %v3754_v19 = vrot.slane %v3738_v24, %v16369_v17  ;;  %v15594_v62 = vpop.eup %15593  ;;  %v3490_v40 = vadd.f32 1.0, %v15592_v1  ;;  %15603 = vrcp.f32 %v3488_v48 }
 0x2b9   : > { %v3761_v8 = vrot.slane %v3739_v51, %v16369_v17  ;;  %v24141_v29 = vrot.slane %v24138_v45, %v16878_v61  ;;  %v15596_v46 = vpop.eup %15595  ;;  %v3491_v11 = vadd.f32 1.0, %v15594_v62  ;;  %15605 = vrcp.f32 %v3489_v28  ;;  %3933 = vrot.lane.b32.xlu0 %v17761_v43, %s15868_s26 }
 0x2ba   : > { %v3768_v27 = vrot.slane %v3740_v12, %v16369_v17  ;;  %v24142_v57 = vrot.slane %v24138_v45, %v16897_v63  ;;  %v3492_v21 = vadd.f32 1.0, %v15596_v46  ;;  %15607 = vrcp.f32 %v3490_v40 }
 0x2bb   : > { %v17778_v42 = vadd.f32 %v24141_v29, %v17579_v38  ;;  %v17789_v3 = vcombine.low %v3747_v58, %v3761_v8  ;;  %v17791_v38 = vcombine.high %v3747_v58, %v3761_v8  ;;  %15609 = vrcp.f32 %v3491_v11 }
 0x2bc   : > { %v17787_v49 = vadd.f32 %v24142_v57, %v17586_v7  ;;  %v17793_v34 = vcombine.low %v3754_v19, %v3768_v27  ;;  %v17795_v60 = vcombine.high %v3754_v19, %v3768_v27  ;;  %v24143_v55 = vrot.slane %v24138_v45, %v16900_v14 }
 0x2bd   : > { %15611 = vrcp.f32 %v3492_v21  ;;  %3927 = vrot.lane.b32.xlu1 %v17789_v3, %s15868_s26  ;;  %v3268_v7 = vrot.slane %v24138_v45, %v24045_v31  ;;  %v24144_v4 = vrot.slane %v24138_v45, %v16903_v5  ;;  %3941 = vrot.lane.b32.xlu0 %v17765_v56, %s15868_s26  ;;  %v24145_v14 = vrot.slane %v24138_v45, %v24043_v39 }
 0x2be   : > { %v17801_v54 = vadd.f32 %v24143_v55, %v17591_v13  ;;  %v14413_v33 = vmul.f32 -1.442695, %v17749_v26  ;;  %v14414_v23 = vmul.f32 -1.442695, %v17757_v15  ;;  %v14415_v31 = vmul.f32 -1.442695, %v17778_v42 }
 0x2bf   : > { %v17811_v16 = vadd.f32 %v24144_v4, %v17596_v22  ;;  %v17819_v13 = vadd.f32 %v24145_v14, %v17601_v9  ;;  %v17825_v35 = vadd.f32 %v3268_v7, %v24146_v18  ;;  %v14416_v5 = vmul.f32 -1.442695, %v17787_v49  ;;  %v15598_v22 = vpop.eup %15597 }
 0x2c0   : > { %15613 = vpow2.f32 %v14413_v33  ;;  %v14417_v0 = vmul.f32 -1.442695, %v17801_v54  ;;  %v15600_v25 = vpop.eup %15599  ;;  %v3581_v9 = vmul.f32 %v15598_v22, %v17672_v37  ;;  %v15061_v1 = vpack.c.bf16 %v17793_v34, %v17761_v43 }
 0x2c1   : > { %3935 = vrot.lane.b32.xlu1 %v17793_v34, %s15868_s26  ;;  %15615 = vpow2.f32 %v14414_v23  ;;  %v14418_v39 = vmul.f32 -1.442695, %v17811_v16  ;;  %v15602_v45 = vpop.eup %15601  ;;  %3949 = vrot.lane.b32.xlu0 %v17769_v20, %s15868_s26  ;;  %v14419_v2 = vmul.f32 -1.442695, %v17819_v13  ;;  %v3582_v59 = vmul.f32 %v15600_v25, %v17677_v36 }
 0x2c2   : > { %15617 = vpow2.f32 %v14415_v31  ;;  %v15604_v24 = vpop.eup %15603  ;;  %v14420_v30 = vmul.f32 -1.442695, %v17825_v35  ;;  %v3583_v48 = vmul.f32 %v15602_v45, %v17682_v52  ;;  %v15085_v12 = vpack.c.bf16 %v17795_v60, %v17769_v20 }
 0x2c3   : > { %15619 = vpow2.f32 %v14416_v5  ;;  %v15606_v51 = vpop.eup %15605  ;;  %v3584_v58 = vmul.f32 %v15604_v24, %v17687_v50  ;;  %v3841_v37 = vcombine.low %v3581_v9, %v3582_v59  ;;  %v15063_v52 = vpack.c.bf16 %v17789_v3, %v17759_v32 }
 0x2c4   : > { %15621 = vpow2.f32 %v14417_v0  ;;  %v15608_v28 = vpop.eup %15607  ;;  %v3585_v36 = vmul.f32 %v15606_v51, %v17692_v53  ;;  %v15087_v27 = vpack.c.bf16 %v17791_v38, %v17765_v56 }
 0x2c5   : > { %3943 = vrot.lane.b32.xlu1 %v17791_v38, %s15868_s26  ;;  %15623 = vpow2.f32 %v14418_v39  ;;  %v15610_v19 = vpop.eup %15609  ;;  %4013 = vrot.lane.b32.xlu0 %v17759_v32, %s23552_s1  ;;  %v3586_v50 = vmul.f32 %v15608_v28, %v17697_v6  ;;  %v3842_v62 = vcombine.low %v3583_v48, %v3584_v58  ;;  %v3851_v53 = vrot.slane %v3841_v37, %v16369_v17 }
 0x2c6   : > { %15625 = vpow2.f32 %v14419_v2  ;;  %v3587_v8 = vmul.f32 %v15610_v19, %v17702_v44 }
 0x2c7   : > { %v15612_v40 = vpop.eup %15611  ;;  %15627 = vpow2.f32 %v14420_v30  ;;  %v3843_v46 = vcombine.low %v3585_v36, %v3586_v50  ;;  %v3858_v11 = vrot.slane %v3842_v62, %v16369_v17 }
 0x2c8   : > { %v3588_v29 = vmul.f32 %v15612_v40, %v17707_v41 }
 0x2c9   : > { %3951 = vrot.lane.b32.xlu1 %v17795_v60, %s15868_s26  ;;  %4021 = vrot.lane.b32.xlu0 %v17761_v43, %s23552_s1  ;;  %v3873_v21 = vcombine.low %v3851_v53, %v3858_v11  ;;  %v3874_v44 = vcombine.high %v3851_v53, %v3858_v11  ;;  %v3865_v14 = vrot.slane %v3843_v46, %v16369_v17 }
 0x2ca   : > { %v15614_v57 = vpop.eup %15613  ;;  %v3844_v6 = vcombine.low %v3587_v8, %v3588_v29 }
 0x2cb   : > { %v15616_v55 = vpop.eup %15615  ;;  %v3477_v7 = vadd.f32 1.0, %v15614_v57  ;;  %v3883_v18 = vrot.slane %v3873_v21, %v16369_v17  ;;  %v3890_v5 = vrot.slane %v3874_v44, %v16369_v17 }
 0x2cc   : > { %v15618_v4 = vpop.eup %15617  ;;  %v3478_v41 = vadd.f32 1.0, %v15616_v55  ;;  %v3872_v33 = vrot.slane %v3844_v6, %v16369_v17 }
 0x2cd   : > { %v15620_v23 = vpop.eup %15619  ;;  %4015 = vrot.lane.b32.xlu1 %v17789_v3, %s23552_s1  ;;  %v3479_v31 = vadd.f32 1.0, %v15618_v4  ;;  %15629 = vrcp.f32 %v3477_v7  ;;  %4029 = vrot.lane.b32.xlu0 %v17765_v56, %s23552_s1 }
 0x2ce   : > { %v15622_v22 = vpop.eup %15621  ;;  %v3480_v0 = vadd.f32 1.0, %v15620_v23  ;;  %15631 = vrcp.f32 %v3478_v41  ;;  %v3875_v25 = vcombine.low %v3865_v14, %v3872_v33  ;;  %v3876_v39 = vcombine.high %v3865_v14, %v3872_v33 }
 0x2cf   : > { %v15624_v9 = vpop.eup %15623  ;;  %v3481_v45 = vadd.f32 1.0, %v15622_v22  ;;  %15633 = vrcp.f32 %v3479_v31 }
 0x2d0   : > { %v15626_v2 = vpop.eup %15625  ;;  %v3482_v59 = vadd.f32 1.0, %v15624_v9  ;;  %15635 = vrcp.f32 %v3480_v0  ;;  %v3897_v24 = vrot.slane %v3875_v25, %v16369_v17  ;;  %v3904_v30 = vrot.slane %v3876_v39, %v16369_v17 }
 0x2d1   : > { %v15628_v48 = vpop.eup %15627  ;;  %4023 = vrot.lane.b32.xlu1 %v17793_v34, %s23552_s1  ;;  %v3483_v51 = vadd.f32 1.0, %v15626_v2  ;;  %15637 = vrcp.f32 %v3481_v45  ;;  %4037 = vrot.lane.b32.xlu0 %v17769_v20, %s23552_s1 }
 0x2d2   : > { %v3484_v58 = vadd.f32 1.0, %v15628_v48  ;;  %15639 = vrcp.f32 %v3482_v59  ;;  %v17876_v37 = vcombine.low %v3883_v18, %v3897_v24  ;;  %v17878_v28 = vcombine.low %v3890_v5, %v3904_v30  ;;  %v3598_v48 = vld [vmem:[%s23419_s5 + $0x8] sm:$0xff] }
 0x2d3   : > { %15641 = vrcp.f32 %v3483_v51  ;;  %v17880_v36 = vcombine.high %v3883_v18, %v3897_v24  ;;  %v17882_v19 = vcombine.high %v3890_v5, %v3904_v30  ;;  %v3600_v51 = vld [vmem:[%s23419_s5 + $0x18] sm:$0xff] }
 0x2d4   : > { %15643 = vrcp.f32 %v3484_v58  ;;  %v3602_v58 = vld [vmem:[%s23419_s5 + $0x28] sm:$0xff] }
 0x2d5   : > { %4031 = vrot.lane.b32.xlu1 %v17791_v38, %s23552_s1 }
 0x2d7   : > { %v15630_v50 = vpop.eup %15629 }
 0x2d8   : > { %v15632_v62 = vpop.eup %15631  ;;  %v3573_v40 = vmul.f32 %v15630_v50, %v17749_v26  ;;  %v3604_v50 = vld [vmem:[%s23419_s5 + $0x38] sm:$0xff] }
 0x2d9   : > { %v15634_v8 = vpop.eup %15633  ;;  %4039 = vrot.lane.b32.xlu1 %v17795_v60, %s23552_s1  ;;  %v3574_v53 = vmul.f32 %v15632_v62, %v17757_v15  ;;  %v3597_v62 = vld [vmem:[%s23419_s5] sm:$0xff] }
 0x2da   : > { %v15636_v29 = vpop.eup %15635  ;;  %v3575_v46 = vmul.f32 %v15634_v8, %v17778_v42  ;;  %v3599_v8 = vld [vmem:[%s23419_s5 + $0x10] sm:$0xff] }
 0x2db   : > { %v15638_v11 = vpop.eup %15637  ;;  %v3576_v57 = vmul.f32 %v15636_v29, %v17787_v49  ;;  %v3773_v6 = vcombine.low %v3573_v40, %v3574_v53  ;;  %v4455_v40 = vld [vmem:[%s23420_s6 + $0x8] sm:$0xff]  ;;  %v3601_v29 = vld [vmem:[%s23419_s5 + $0x20] sm:$0xff] }
 0x2dc   : > { %v15640_v21 = vpop.eup %15639  ;;  %v3577_v44 = vmul.f32 %v15638_v11, %v17801_v54  ;;  %v4463_v53 = vld [vmem:[%s23421_s7 + $0x8] sm:$0xff]  ;;  %v3603_v11 = vld [vmem:[%s23419_s5 + $0x30] sm:$0xff] }
 0x2dd   : > { %v15642_v55 = vpop.eup %15641  ;;  %v3578_v7 = vmul.f32 %v15640_v21, %v17811_v16  ;;  %v3774_v26 = vcombine.low %v3575_v46, %v3576_v57  ;;  %3931 = vrot.lane.b32.xlu1 %v17876_v37, %s15868_s26  ;;  %v3783_v14 = vrot.slane %v3773_v6, %v16369_v17  ;;  %v4457_v46 = vld [vmem:[%s23420_s6 + $0x18] sm:$0xff]  ;;  %v4454_v6 = vld [vmem:[%s23420_s6] sm:$0xff]  ;;  %v4459_v21 = vld [vmem:[%s23420_s6 + $0x28] sm:$0xff] }
 0x2de   : > { %v15644_v4 = vpop.eup %15643  ;;  %v3579_v15 = vmul.f32 %v15642_v55, %v17819_v13  ;;  %v4465_v57 = vld [vmem:[%s23421_s7 + $0x18] sm:$0xff]  ;;  %v4467_v55 = vld [vmem:[%s23421_s7 + $0x28] sm:$0xff] }
 0x2df   : > { %v3580_v41 = vmul.f32 %v15644_v4, %v17825_v35  ;;  %v3775_v42 = vcombine.low %v3577_v44, %v3578_v7  ;;  %v3790_v49 = vrot.slane %v3774_v26, %v16369_v17  ;;  %v4462_v44 = vld [vmem:[%s23421_s7] sm:$0xff]  ;;  %v4456_v7 = vld [vmem:[%s23420_s6 + $0x10] sm:$0xff]  ;;  %v4461_v26 = vld [vmem:[%s23420_s6 + $0x38] sm:$0xff] }
 0x2e0   : > { %v4464_v4 = vld [vmem:[%s23421_s7 + $0x10] sm:$0xff] }
 0x2e1   : > { %v3776_v33 = vcombine.low %v3579_v15, %v3580_v41  ;;  %v3805_v23 = vcombine.low %v3783_v14, %v3790_v49  ;;  %v3806_v54 = vcombine.high %v3783_v14, %v3790_v49  ;;  %3939 = vrot.lane.b32.xlu1 %v17878_v28, %s15868_s26  ;;  %v3797_v16 = vrot.slane %v3775_v42, %v16369_v17  ;;  %v4469_v15 = vld [vmem:[%s23421_s7 + $0x38] sm:$0xff]  ;;  %v4458_v41 = vld [vmem:[%s23420_s6 + $0x20] sm:$0xff] }
 0x2e2   : > { %v24147_v14 = vlaneseq }
 0x2e3   : > { %v3804_v31 = vrot.slane %v3776_v33, %v16369_v17  ;;  %v3815_v13 = vrot.slane %v3805_v23, %v16369_v17  ;;  %v3822_v35 = vrot.slane %v3806_v54, %v16369_v17  ;;  %v4466_v33 = vld [vmem:[%s23421_s7 + $0x20] sm:$0xff] }
 0x2e4   : > { %v18016_v49 = vand.u32 127, %v24147_v14  ;;  %v757_v54 = vld [vmem:[%s23428_s14] sm:$0xf] }
 0x2e5   : > { %v3807_v18 = vcombine.low %v3797_v16, %v3804_v31  ;;  %v3808_v5 = vcombine.high %v3797_v16, %v3804_v31  ;;  %3947 = vrot.lane.b32.xlu1 %v17880_v36, %s15868_s26  ;;  %v4460_v31 = vld [vmem:[%s23420_s6 + $0x30] sm:$0xff] }
 0x2e6   : > { %24148 = vst [vmem:[#allocation46_spill] sm:$0xff] %v18016_v49  ;;  %vm3959_vm2 = vcmp.lt.s32.totalorder %v18016_v49, 1  ;;  %vm4045_vm3 = vcmp.lt.s32.totalorder %v18016_v49, 127 }
 0x2e7   : > { %v3829_v22 = vrot.slane %v3807_v18, %v16369_v17  ;;  %v3836_v0 = vrot.slane %v3808_v5, %v16369_v17  ;;  %v18029_v18 = vrot.slane %v757_v54, %v16875_v47 }
 0x2e9   : > { %v17910_v25 = vcombine.low %v3815_v13, %v3829_v22  ;;  %v17912_v39 = vcombine.low %v3822_v35, %v3836_v0  ;;  %v17914_v9 = vcombine.high %v3815_v13, %v3829_v22  ;;  %v17916_v45 = vcombine.high %v3822_v35, %v3836_v0  ;;  %3955 = vrot.lane.b32.xlu1 %v17882_v19, %s15868_s26  ;;  %v4468_v22 = vld [vmem:[%s23421_s7 + $0x30] sm:$0xff] }
 0x2ea   : > { %24149 = vst [vmem:[#allocation72_spill] sm:$0xff] %v18029_v18 }
 0x2eb   : > { %3929 = vrot.lane.b32.xlu0 %v17910_v25, %s15868_s26  ;;  %v15065_v2 = vpack.c.bf16 %v17878_v28, %v17912_v39  ;;  %v15089_v59 = vpack.c.bf16 %v17882_v19, %v17916_v45  ;;  %v15067_v24 = vpack.c.bf16 %v17876_v37, %v17910_v25  ;;  %v15091_v30 = vpack.c.bf16 %v17880_v36, %v17914_v9 }
 0x2ed   : > { %4019 = vrot.lane.b32.xlu1 %v17876_v37, %s23552_s1 }
 0x2ef   : > { %3937 = vrot.lane.b32.xlu0 %v17912_v39, %s15868_s26 }
 0x2f1   : > { %4027 = vrot.lane.b32.xlu1 %v17878_v28, %s23552_s1 }
 0x2f3   : > { %3945 = vrot.lane.b32.xlu0 %v17914_v9, %s15868_s26 }
 0x2f5   : > { %4035 = vrot.lane.b32.xlu1 %v17880_v36, %s23552_s1 }
 0x2f7   : > { %3953 = vrot.lane.b32.xlu0 %v17916_v45, %s15868_s26 }
 0x2f9   : > { %4043 = vrot.lane.b32.xlu1 %v17882_v19, %s23552_s1 }
 0x2fb   : > { %4017 = vrot.lane.b32.xlu0 %v17910_v25, %s23552_s1 }
 0x2fd   : > { %4106 = vperm.xlu1 %15490, %v3598_v48  }
 0x2ff   : > { %4025 = vrot.lane.b32.xlu0 %v17912_v39, %s23552_s1 }
 0x301   : > { %4116 = vperm.xlu1 %15490, %v3600_v51  }
 0x303   : > { %4033 = vrot.lane.b32.xlu0 %v17914_v9, %s23552_s1 }
 0x305   : > { %4126 = vperm.xlu1 %15490, %v3602_v58  }
 0x307   : > { %4041 = vrot.lane.b32.xlu0 %v17916_v45, %s23552_s1 }
 0x309   : > { %4136 = vperm.xlu1 %15490, %v3604_v50  }
 0x30b   : > { %4101 = vperm.xlu0 %15489, %v3597_v62  }
 0x30d   : > { %12108 = vperm.xlu1 %15490, %v4455_v40   ;;  %v18041_v40 = vrot.slane %v757_v54, %v16872_v10 }
 0x30f   : > { %4111 = vperm.xlu0 %15489, %v3599_v8   ;;  %24150 = vst [vmem:[#allocation47_spill] sm:$0xff] %v18041_v40  ;;  %v18044_v8 = vrot.slane %v757_v54, %v16897_v63 }
 0x311   : > { %12428 = vperm.xlu1 %15490, %v4463_v53   ;;  %24151 = vst [vmem:[#allocation73_spill] sm:$0xff] %v18044_v8 }
 0x313   : > { %4121 = vperm.xlu0 %15489, %v3601_v29   ;;  %v18049_v29 = vrot.slane %v757_v54, %v16878_v61 }
 0x315   : > { %12116 = vperm.xlu1 %15490, %v4457_v46   ;;  %24152 = vst [vmem:[#allocation67_spill] sm:$0xff] %v18049_v29 }
 0x317   : > { %4131 = vperm.xlu0 %15489, %v3603_v11  }
 0x319   : > { %12436 = vperm.xlu1 %15490, %v4465_v57  }
 0x31b   : > { %12104 = vperm.xlu0 %15489, %v4454_v6  }
 0x31d   : > { %12124 = vperm.xlu1 %15490, %v4459_v21  }
 0x31f   : > { %12424 = vperm.xlu0 %15489, %v4462_v44  }
 0x321   : > { %12444 = vperm.xlu1 %15490, %v4467_v55  }
 0x323   : > { %12112 = vperm.xlu0 %15489, %v4456_v7  }
 0x325   : > { %12132 = vperm.xlu1 %15490, %v4461_v26  }
 0x327   : > { %12432 = vperm.xlu0 %15489, %v4464_v4   ;;  %v3926_v42 = vpop.permute.xlu0 %3925 }
 0x329   : > { %12452 = vperm.xlu1 %15490, %v4469_v15  }
 0x32b   : > { %12120 = vperm.xlu0 %15489, %v4458_v41   ;;  %v3934_v23 = vpop.permute.xlu0 %3933 }
 0x32c   : > { %v3968_v5 = vsel %vm3959_vm2, %v3926_v42, %v3934_v23 }
 0x32d   : > { %v3998_v48 = vmul.f32 %v18029_v18, %v3968_v5 }
 0x32f   : > { %12440 = vperm.xlu0 %15489, %v4466_v33   ;;  %v3928_v16 = vpop.permute.xlu1 %3927  ;;  %v3942_v13 = vpop.permute.xlu0 %3941 }
 0x330   : > { %v3964_v57 = vsel %vm3959_vm2, %v3934_v23, %v3942_v13 }
 0x331   : > { %v3999_v41 = vmul.f32 %v18049_v29, %v3964_v57 }
 0x333   : > { %12128 = vperm.xlu0 %15489, %v4460_v31   ;;  %v3936_v35 = vpop.permute.xlu1 %3935  ;;  %v3950_v58 = vpop.permute.xlu0 %3949 }
 0x334   : > { %v3969_v0 = vsel %vm3959_vm2, %v3928_v16, %v3936_v35  ;;  %v3960_v46 = vsel %vm3959_vm2, %v3942_v13, %v3950_v58  ;;  %v3972_v11 = vsel %vm3959_vm2, %v3950_v58, %v3926_v42 }
 0x335   : > { %v4002_v51 = vmul.f32 %v18029_v18, %v3969_v0  ;;  %v3997_v7 = vmul.f32 %v18041_v40, %v3972_v11  ;;  %v4000_v26 = vmul.f32 %v18044_v8, %v3960_v46 }
 0x337   : > { %12448 = vperm.xlu0 %15489, %v4468_v22   ;;  %v3944_v50 = vpop.permute.xlu1 %3943  ;;  %v15053_v62 = vpack.c.bf16 %v4002_v51, %v3998_v48  ;;  %v4014_v31 = vpop.permute.xlu0 %4013 }
 0x338   : > { %v3965_v53 = vsel %vm3959_vm2, %v3936_v35, %v3944_v50 }
 0x339   : > { %15054 = vmatprep.subr.bf16.mxu0 %v15053_v62  ;;  %v4003_v21 = vmul.f32 %v18049_v29, %v3965_v53 }
 0x33b   : > { %v3952_v6 = vpop.permute.xlu1 %3951  ;;  %v15079_v23 = vpack.c.bf16 %v4003_v21, %v3999_v41  ;;  %v4022_v13 = vpop.permute.xlu0 %4021 }
 0x33c   : > { %v3961_v44 = vsel %vm3959_vm2, %v3944_v50, %v3952_v6  ;;  %v3973_v55 = vsel %vm3959_vm2, %v3952_v6, %v3928_v16 }
 0x33d   : > { %v4001_v4 = vmul.f32 %v18041_v40, %v3973_v55  ;;  %v4004_v15 = vmul.f32 %v18044_v8, %v3961_v44 }
 0x33f   : > { %v15055_v42 = vpack.c.bf16 %v4001_v4, %v3997_v7  ;;  %v4016_v14 = vpop.permute.xlu1 %4015  ;;  %v15077_v33 = vpack.c.bf16 %v4004_v15, %v4000_v26  ;;  %v4030_v22 = vpop.permute.xlu0 %4029 }
 0x341   : > { %15056 = vmatpush1.bf16.msra.mxu0 %v15055_v42  ;;  %15078 = vmatprep.subr.bf16.mxu1 %v15077_v33 }
 0x342   : > { %15080 = vmatpush1.bf16.msra.mxu1 %v15079_v23 }
 0x343   : > { %v4024_v54 = vpop.permute.xlu1 %4023  ;;  %v4038_v48 = vpop.permute.xlu0 %4037 }
 0x344   : > { %v4058_v43 = vsel %vm4045_vm3, %v4038_v48, %v4014_v31 }
 0x347   : > { %v4032_v16 = vpop.permute.xlu1 %4031 }
 0x34b   : > { %v4040_v5 = vpop.permute.xlu1 %4039 }
 0x34c   : > { %v4047_v34 = vsel %vm4045_vm3, %v4032_v16, %v4040_v5 }
 0x34f   : > { %v3932_v35 = vpop.permute.xlu1 %3931 }
 0x353   : > { %v3940_v0 = vpop.permute.xlu1 %3939 }
 0x354   : > { %v3971_v62 = vsel %vm3959_vm2, %v3932_v35, %v3940_v0 }
 0x355   : > { %v4010_v46 = vmul.f32 %v18029_v18, %v3971_v62 }
 0x357   : > { %v3948_v51 = vpop.permute.xlu1 %3947 }
 0x358   : > { %v3967_v26 = vsel %vm3959_vm2, %v3940_v0, %v3948_v51 }
 0x35b   : > { %v3956_v58 = vpop.permute.xlu1 %3955 }
 0x35c   : > { %v3963_v55 = vsel %vm3959_vm2, %v3948_v51, %v3956_v58  ;;  %v3975_v7 = vsel %vm3959_vm2, %v3956_v58, %v3932_v35  ;;  %v4011_v35 = vmul.f32 %v18049_v29, %v3967_v26  ;;  %v4050_v26 = vsel %vm4045_vm3, %v4022_v13, %v4030_v22 }
 0x35d   : > { %v3930_v50 = vpop.permute.xlu0 %3929  ;;  %v4009_v42 = vmul.f32 %v18041_v40, %v3975_v7  ;;  %v4012_v33 = vmul.f32 %v18044_v8, %v3963_v55 }
 0x35f   : > { %v18070_v11 = vpop.permute.xlu1 %4019 }
 0x361   : > { %v3938_v53 = vpop.permute.xlu0 %3937 }
 0x362   : > { %v3970_v57 = vsel %vm3959_vm2, %v3930_v50, %v3938_v53 }
 0x363   : > { %v4006_v6 = vmul.f32 %v18029_v18, %v3970_v57  ;;  %v4028_v4 = vpop.permute.xlu1 %4027 }
 0x364   : > { %v4057_v56 = vsel %vm4045_vm3, %v18070_v11, %v4028_v4 }
 0x365   : > { %v3946_v21 = vpop.permute.xlu0 %3945  ;;  %v15057_v44 = vpack.c.bf16 %v4010_v46, %v4006_v6 }
 0x366   : > { %v3966_v15 = vsel %vm3959_vm2, %v3938_v53, %v3946_v21  ;;  %v758_v53 = vld [vmem:[%s23429_s15] sm:$0xf] }
 0x367   : > { %15058 = vmatprep.subr.bf16.mxu0 %v15057_v44  ;;  %v4007_v58 = vmul.f32 %v18049_v29, %v3966_v15  ;;  %v18100_v55 = vrot.slane %v758_v53, %v16875_v47  ;;  %v18103_v7 = vrot.slane %v758_v53, %v16872_v10  ;;  %v4059_v15 = vsel %vm4045_vm3, %v4040_v5, %v4016_v14 }
 0x369   : > { %v3954_v41 = vpop.permute.xlu0 %3953  ;;  %v15083_v44 = vpack.c.bf16 %v4011_v35, %v4007_v58  ;;  %24153 = vst [vmem:[#allocation66_spill] sm:$0xff] %v18100_v55  ;;  %24154 = vst [vmem:[#allocation78_spill] sm:$0xff] %v18103_v7 }
 0x36a   : > { %v3962_v23 = vsel %vm3959_vm2, %v3946_v21, %v3954_v41  ;;  %v3974_v62 = vsel %vm3959_vm2, %v3954_v41, %v3930_v50  ;;  %v4036_v21 = vpop.permute.xlu1 %4035  ;;  %v4051_v50 = vsel %vm4045_vm3, %v4024_v54, %v4032_v16  ;;  %v4054_v41 = vsel %vm4045_vm3, %v4014_v31, %v4022_v13 }
 0x36b   : > { %v4005_v0 = vmul.f32 %v18041_v40, %v3974_v62  ;;  %v4008_v51 = vmul.f32 %v18044_v8, %v3962_v23  ;;  %v4088_v23 = vmul.f32 %v18100_v55, %v4051_v50  ;;  %v4083_v60 = vmul.f32 %v18103_v7, %v4054_v41  ;;  %v24160_v50 = vld [vmem:[#allocation14_spill] sm:$0xff]  ;;  %v4395_v40 = vld [vmem:[%s18274_s30 + $0x28] sm:$0xff] }
 0x36c   : > { %v4046_v31 = vsel %vm4045_vm3, %v4030_v22, %v4038_v48  ;;  %v4095_v22 = vmul.f32 %v18103_v7, %v4057_v56  ;;  %v3591_v41 = vld [vmem:[%s23418_s4 + $0x10] sm:$0xff]  ;;  %v24178_v56 = vld [vmem:[#allocation33_spill] sm:$0xff] }
 0x36d   : > { %v4018_v46 = vpop.permute.xlu0 %4017  ;;  %v15059_v57 = vpack.c.bf16 %v4009_v42, %v4005_v0  ;;  %v15081_v6 = vpack.c.bf16 %v4012_v33, %v4008_v51  ;;  %v4055_v42 = vsel %vm4045_vm3, %v4016_v14, %v4024_v54  ;;  %v18117_v33 = vrot.slane %v758_v53, %v16897_v63 }
 0x36e   : > { %v4084_v14 = vmul.f32 %v18100_v55, %v4050_v26  ;;  %v18131_v54 = vrot.slane %v758_v53, %v16878_v61  ;;  %v4044_v20 = vpop.permute.xlu1 %4043  ;;  %v3589_v53 = vld [vmem:[%s23418_s4] sm:$0xff] }
 0x36f   : > { %15060 = vmatpush1.bf16.msra.mxu0 %v15059_v57  ;;  %15082 = vmatprep.subr.bf16.mxu1 %v15081_v6  ;;  %24155 = vst [vmem:[#allocation79_spill] sm:$0xff] %v18117_v33  ;;  %v4090_v13 = vmul.f32 %v18117_v33, %v4059_v15  ;;  %v4086_v16 = vmul.f32 %v18117_v33, %v4058_v43  ;;  %v24158_v57 = vld [vmem:[#allocation13_spill] sm:$0xff]  ;;  %v24159_v6 = vmov 0.0   ;;  %v24162_v26 = vld [vmem:[#allocation16_spill] sm:$0xff] }
 0x370   : > { %15062 = vmatprep.subr.bf16.mxu0 %v15061_v1  ;;  %15084 = vmatpush1.bf16.msra.mxu1 %v15083_v44  ;;  %v4053_v1 = vsel %vm4045_vm3, %v4028_v4, %v4036_v21  ;;  %24156 = vst [vmem:[#allocation69_spill] sm:$0xff] %v18131_v54  ;;  %v4089_v32 = vmul.f32 %v18131_v54, %v4047_v34  ;;  %v24161_v44 = vld [vmem:[#allocation15_spill] sm:$0xff]  ;;  %v24163_v15 = vld [vmem:[#allocation17_spill] sm:$0xff] }
 0x371   : > { %v4026_v62 = vpop.permute.xlu0 %4025  ;;  %15086 = vmatprep.subr.bf16.mxu1 %v15085_v12  ;;  %v4087_v12 = vmul.f32 %v18103_v7, %v4055_v42  ;;  %v15069_v5 = vpack.c.bf16 %v4088_v23, %v4084_v14  ;;  %v4049_v38 = vsel %vm4045_vm3, %v4036_v21, %v4044_v20  ;;  %v15093_v39 = vpack.c.bf16 %v4090_v13, %v4086_v16  ;;  %v3590_v21 = vld [vmem:[%s23418_s4 + $0x8] sm:$0xff]  ;;  %v24164_v42 = vld [vmem:[#allocation18_spill] sm:$0xff]  ;;  %v24165_v23 = vld [vmem:[#allocation19_spill] sm:$0xff] }
 0x372   : > { %v24167_v43 = vld [vmem:[#allocation21_spill] sm:$0xff]  ;;  %v3592_v34 = vld [vmem:[%s23418_s4 + $0x18] sm:$0xff]  ;;  %v24170_v13 = vld [vmem:[#allocation24_spill] sm:$0xff] }
 0x373   : > { %15064 = vmatpush1.bf16.msra.mxu0 %v15063_v52  ;;  %v4096_v52 = vmul.f32 %v18100_v55, %v4053_v1  ;;  %v15071_v45 = vpack.c.bf16 %v4087_v12, %v4083_v60  ;;  %v24168_v1 = vld [vmem:[#allocation22_spill] sm:$0xff]  ;;  %v24169_v14 = vld [vmem:[#allocation23_spill] sm:$0xff]  ;;  %v24171_v60 = vld [vmem:[#allocation25_spill] sm:$0xff] }
 0x374   : > { %15066 = vmatprep.subr.bf16.mxu0 %v15065_v2  ;;  %15088 = vmatpush1.bf16.msra.mxu1 %v15087_v27  ;;  %v4061_v27 = vsel %vm4045_vm3, %v4044_v20, %v18070_v11  ;;  %v4085_v2 = vmul.f32 %v18131_v54, %v4046_v31  ;;  %v4097_v11 = vmul.f32 %v18131_v54, %v4049_v38  ;;  %v3593_v20 = vld [vmem:[%s23418_s4 + $0x20] sm:$0xff]  ;;  %v24172_v12 = vld [vmem:[#allocation26_spill] sm:$0xff]  ;;  %v24173_v31 = vld [vmem:[#allocation27_spill] sm:$0xff] }
 0x375   : > { %v4034_v3 = vpop.permute.xlu0 %4033  ;;  %15090 = vmatprep.subr.bf16.mxu1 %v15089_v59  ;;  %v4056_v59 = vsel %vm4045_vm3, %v4018_v46, %v4026_v62  ;;  %v4098_v37 = vmul.f32 %v18117_v33, %v4061_v27  ;;  %v3594_v16 = vld [vmem:[%s23418_s4 + $0x28] sm:$0xff]  ;;  %v24179_v38 = vld [vmem:[#allocation34_spill] sm:$0xff]  ;;  %v3596_v27 = vld [vmem:[%s23418_s4 + $0x38] sm:$0xff] }
 0x376   : > { %v4052_v28 = vsel %vm4045_vm3, %v4026_v62, %v4034_v3  ;;  %v4091_v0 = vmul.f32 %v18103_v7, %v4056_v59  ;;  %v24166_v62 = vld [vmem:[#allocation20_spill] sm:$0xff] }
 0x377   : > { %v4092_v19 = vmul.f32 %v18100_v55, %v4052_v28  ;;  %15068 = vmatpush1.bf16.msra.mxu0 %v15067_v24  ;;  %v15095_v24 = vpack.c.bf16 %v4089_v32, %v4085_v2  ;;  %v24174_v32 = vld [vmem:[#allocation28_spill] sm:$0xff]  ;;  %v24177_v28 = vld [vmem:[#allocation31_spill] sm:$0xff] }
 0x378   : > { %15070 = vmatprep.subr.bf16.mxu0 %v15069_v5  ;;  %15092 = vmatpush1.bf16.msra.mxu1 %v15091_v30  ;;  %v15075_v30 = vpack.c.bf16 %v4095_v22, %v4091_v0  ;;  %v3595_v5 = vld [vmem:[%s23418_s4 + $0x30] sm:$0xff]  ;;  %v24183_v2 = vld [vmem:[#allocation39_spill] sm:$0xff]  ;;  %v24184_v59 = vld [vmem:[#allocation40_spill] sm:$0xff] }
 0x379   : > { %v4042_v48 = vpop.permute.xlu0 %4041  ;;  %15094 = vmatprep.subr.bf16.mxu1 %v15093_v39  ;;  %v15073_v25 = vpack.c.bf16 %v4096_v52, %v4092_v19  ;;  %v24176_v52 = vld [vmem:[#allocation32_spill] sm:$0xff]  ;;  %v24181_v39 = vld [vmem:[#allocation37_spill] sm:$0xff] }
 0x37a   : > { %v4048_v4 = vsel %vm4045_vm3, %v4034_v3, %v4042_v48  ;;  %v4060_v35 = vsel %vm4045_vm3, %v4042_v48, %v4018_v46  ;;  %v24157_v46 = vld [vmem:[#allocation12_spill] sm:$0xff]  ;;  %v24175_v3 = vld [vmem:[#allocation29_spill] sm:$0xff]  ;;  %v24186_v48 = vld [vmem:[#allocation42_spill] sm:$0xff] }
 0x37b   : > { %v4093_v36 = vmul.f32 %v18131_v54, %v4048_v4  ;;  %v4094_v9 = vmul.f32 %v18117_v33, %v4060_v35  ;;  %15072 = vmatpush1.bf16.msra.mxu0 %v15071_v45  ;;  %v24180_v19 = vld [vmem:[#allocation36_spill] sm:$0xff]  ;;  %v24182_v45 = vld [vmem:[#allocation38_spill] sm:$0xff]  ;;  %v24185_v22 = vld [vmem:[#allocation41_spill] sm:$0xff] }
 0x37c   : > { %15074 = vmatprep.subr.bf16.mxu0 %v15073_v25  ;;  %15096 = vmatpush1.bf16.msra.mxu1 %v15095_v24  ;;  %v24189_v25 = vld [vmem:[#allocation45_spill] sm:$0xff]  ;;  %v15870_v24 = vmov 1983009808   ;;  %v4394_v55 = vld [vmem:[%s18274_s30 + $0x20] sm:$0xff] }
 0x37d   : > { %v15099_v51 = vpack.c.bf16 %v4097_v11, %v4093_v36  ;;  %v15097_v58 = vpack.c.bf16 %v4098_v37, %v4094_v9  ;;  %v24187_v11 = vld [vmem:[#allocation43_spill] sm:$0xff]  ;;  %v24188_v37 = vld [vmem:[#allocation44_spill] sm:$0xff]  ;;  %v4507_v4 = vunpack.c.l.s4 %v15870_v24  ;;  %v24190_v24 = vld [vmem:[#allocation30_spill] sm:$0xff] }
 0x37e   : > { %v4390_v36 = vld [vmem:[%s18274_s30] sm:$0xff] }
 0x37f   : > { %15076 = vmatpush1.bf16.msra.mxu0 %v15075_v30  ;;  %15098 = vmatprep.subr.bf16.mxu1 %v15097_v58  ;;  %v4508_v9 = vunpack.c.0.s8 %v4507_v4  ;;  %v4391_v58 = vld [vmem:[%s18274_s30 + $0x8] sm:$0xff] }
 0x380   : > { %15100 = vmatpush1.bf16.msra.mxu1 %v15099_v51  ;;  %15102 = vmatprep.subr.bf16.mxu0 %v24157_v46 }
 0x381   : > { %15134 = vmatprep.subr.bf16.mxu1 %v24158_v57  ;;  %v18281_v33 = vsub.s32 %v4508_v9, %v24190_v24 }
 0x382   : > { %14429 = vmatmul.mubr.msk.f32.vlgmr.msra.gmra.mrb[32].mxu0 %vm4139_vm4, %v3589_v53 }
 0x383   : > { %14437 = vmatmul.mubr.msk.f32.vlgmr.msra.gmra.mrb[32].mxu1 %vm4139_vm4, %v3589_v53  ;;  %4234 = vmatprep.mubr.f32.mxu0 %v24159_v6  ;;  %24191 = vst [vmem:[#allocation48_spill] sm:$0xff] %v18281_v33 }
 0x384   : > { %4347 = vmatprep.mubr.f32.mxu1 %v24159_v6  ;;  %15104 = vmatpush3.bf16.msra.mxu0 %v24160_v50 }
 0x385   : > { %15136 = vmatpush3.bf16.msra.mxu1 %v24161_v44  ;;  %15106 = vmatprep.subr.bf16.mxu0 %v24162_v26 }
 0x386   : > { %14430 = vmatmul.mubr.msk.f32.gmra.mrb[34].mxu0 %vm4139_vm4, %v3590_v21  ;;  %15138 = vmatprep.subr.bf16.mxu1 %v24163_v15 }
 0x387   : > { %14438 = vmatmul.mubr.msk.f32.gmra.mrb[34].mxu1 %vm4139_vm4, %v3590_v21  ;;  %4240 = vmatprep.mubr.f32.mxu0 %v24159_v6 }
 0x388   : > { %4353 = vmatprep.mubr.f32.mxu1 %v24159_v6  ;;  %15108 = vmatpush3.bf16.msra.mxu0 %v24164_v42 }
 0x389   : > { %15140 = vmatpush3.bf16.msra.mxu1 %v24165_v23  ;;  %15110 = vmatprep.subr.bf16.mxu0 %v24166_v62 }
 0x38a   : > { %14431 = vmatmul.mubr.msk.f32.gmra.mrb[36].mxu0 %vm4139_vm4, %v3591_v41  ;;  %15142 = vmatprep.subr.bf16.mxu1 %v24167_v43  ;;  %v4102_v35 = vpop.permute.xlu0 %4101 }
 0x38b   : > { %14439 = vmatmul.mubr.msk.f32.gmra.mrb[36].mxu1 %vm4139_vm4, %v3591_v41  ;;  %4246 = vmatprep.mubr.f32.mxu0 %v24159_v6 }
 0x38c   : > { %4359 = vmatprep.mubr.f32.mxu1 %v24159_v6  ;;  %15112 = vmatpush3.bf16.msra.mxu0 %v24168_v1 }
 0x38d   : > { %15144 = vmatpush3.bf16.msra.mxu1 %v24169_v14  ;;  %15114 = vmatprep.subr.bf16.mxu0 %v24170_v13 }
 0x38e   : > { %14432 = vmatmul.mubr.msk.f32.gmra.mrb[38].mxu0 %vm4139_vm4, %v3592_v34  ;;  %15146 = vmatprep.subr.bf16.mxu1 %v24171_v60 }
 0x38f   : > { %14440 = vmatmul.mubr.msk.f32.gmra.mrb[38].mxu1 %vm4139_vm4, %v3592_v34  ;;  %4252 = vmatprep.mubr.f32.mxu0 %v24159_v6  ;;  %v4393_v34 = vld [vmem:[%s18274_s30 + $0x18] sm:$0xff] }
 0x390   : > { %4365 = vmatprep.mubr.f32.mxu1 %v24159_v6  ;;  %15116 = vmatpush3.bf16.msra.mxu0 %v24172_v12 }
 0x391   : > { %15148 = vmatpush3.bf16.msra.mxu1 %v24173_v31  ;;  %15118 = vmatprep.subr.bf16.mxu0 %v24174_v32 }
 0x392   : > { %14433 = vmatmul.mubr.msk.f32.gmra.mrb[40].mxu0 %vm4139_vm4, %v3593_v20  ;;  %15150 = vmatprep.subr.bf16.mxu1 %v24175_v3 }
 0x393   : > { %14441 = vmatmul.mubr.msk.f32.gmra.mrb[40].mxu1 %vm4139_vm4, %v3593_v20  ;;  %4258 = vmatprep.mubr.f32.mxu0 %v24159_v6 }
 0x394   : > { %4371 = vmatprep.mubr.f32.mxu1 %v24159_v6  ;;  %15120 = vmatpush3.bf16.msra.mxu0 %v24177_v28 }
 0x395   : > { %15152 = vmatpush3.bf16.msra.mxu1 %v24176_v52  ;;  %15122 = vmatprep.subr.bf16.mxu0 %v24178_v56 }
 0x396   : > { %14434 = vmatmul.mubr.msk.f32.gmra.mrb[42].mxu0 %vm4139_vm4, %v3594_v16  ;;  %15154 = vmatprep.subr.bf16.mxu1 %v24179_v38 }
 0x397   : > { %14442 = vmatmul.mubr.msk.f32.gmra.mrb[42].mxu1 %vm4139_vm4, %v3594_v16  ;;  %4264 = vmatprep.mubr.f32.mxu0 %v24159_v6 }
 0x398   : > { %4377 = vmatprep.mubr.f32.mxu1 %v24159_v6  ;;  %15124 = vmatpush3.bf16.msra.mxu0 %v24180_v19 }
 0x399   : > { %15156 = vmatpush3.bf16.msra.mxu1 %v24181_v39  ;;  %15126 = vmatprep.subr.bf16.mxu0 %v24182_v45 }
 0x39a   : > { %14435 = vmatmul.mubr.msk.f32.gmra.mrb[44].mxu0 %vm4139_vm4, %v3595_v5  ;;  %15158 = vmatprep.subr.bf16.mxu1 %v24183_v2 }
 0x39b   : > { %14443 = vmatmul.mubr.msk.f32.gmra.mrb[44].mxu1 %vm4139_vm4, %v3595_v5  ;;  %4270 = vmatprep.mubr.f32.mxu0 %v24159_v6  ;;  %v4107_v5 = vpop.permute.xlu1 %4106 }
 0x39c   : > { %4383 = vmatprep.mubr.f32.mxu1 %v24159_v6  ;;  %15128 = vmatpush3.bf16.msra.mxu0 %v24184_v59 }
 0x39d   : > { %15160 = vmatpush3.bf16.msra.mxu1 %v24185_v22  ;;  %15130 = vmatprep.subr.bf16.mxu0 %v24186_v48 }
 0x39e   : > { %14436 = vmatmul.mubr.msk.f32.gmra.mrb[46].mxu0 %vm4139_vm4, %v3596_v27  ;;  %15162 = vmatprep.subr.bf16.mxu1 %v24187_v11 }
 0x39f   : > { %14444 = vmatmul.mubr.msk.f32.gmra.mrb[46].mxu1 %vm4139_vm4, %v3596_v27 }
 0x3a0   : > { %15132 = vmatpush3.bf16.msra.mxu0 %v24188_v37 }
 0x3a1   : > { %15164 = vmatpush3.bf16.msra.mxu1 %v24189_v25  ;;  %15166 = vmatprep.subr.bf16.mxu0 %v24157_v46  ;;  %v4392_v46 = vld [vmem:[%s18274_s30 + $0x10] sm:$0xff] }
 0x3a2   : > { %15198 = vmatprep.subr.bf16.mxu1 %v24158_v57 }
 0x455   : > { %v4230_v0 = vpop.f32.mrb[32].mxu0 }
 0x456   : > { %v4231_v30 = vadd.f32 %v4230_v0, %v4102_v35  ;;  %v4232_v51 = vpop.f32.mrb[33].mxu0  ;;  %v4343_v53 = vpop.f32.mrb[32].mxu1 }
 0x457   : > { %v4233_v57 = vadd.f32 %v4232_v51, %v4102_v35  ;;  %v4344_v21 = vadd.f32 %v4343_v53, %v4102_v35  ;;  %v4345_v41 = vpop.f32.mrb[33].mxu1  ;;  %v4396_v53 = vld [vmem:[%s18274_s30 + $0x30] sm:$0xff] }
 0x458   : > { %v4422_v20 = vadd.f32 %v4390_v36, %v4231_v30  ;;  %v4346_v16 = vadd.f32 %v4345_v41, %v4102_v35 }
 0x459   : > { %v4423_v27 = vadd.f32 %v4391_v58, %v4233_v57  ;;  %v4424_v4 = vadd.f32 %v4392_v46, %v4344_v21  ;;  %v4236_v0 = vpop.f32.mrb[34].mxu0  ;;  %v4397_v58 = vld [vmem:[%s18274_s30 + $0x38] sm:$0xff]  ;;  %v18289_v21 = vpop.permute.xlu0 %4111 }
 0x45a   : > { %v4425_v54 = vadd.f32 %v4393_v34, %v4346_v16  ;;  %v4237_v7 = vadd.f32 %v4236_v0, %v4107_v5  ;;  %v4238_v8 = vpop.f32.mrb[35].mxu0  ;;  %v4349_v51 = vpop.f32.mrb[34].mxu1 }
 0x45b   : > { %v4502_v29 = vcombine.low %v4422_v20, %v4423_v27  ;;  %v4503_v18 = vcombine.high %v4422_v20, %v4423_v27  ;;  %v4239_v36 = vadd.f32 %v4238_v8, %v4107_v5  ;;  %v4350_v35 = vadd.f32 %v4349_v51, %v4107_v5  ;;  %v4351_v30 = vpop.f32.mrb[35].mxu1 }
 0x45c   : > { %v4504_v57 = vcombine.low %v4424_v4, %v4425_v54  ;;  %v4505_v9 = vcombine.high %v4424_v4, %v4425_v54  ;;  %v18287_v41 = vadd.f32 %v4394_v55, %v4237_v7  ;;  %v4352_v46 = vadd.f32 %v4351_v30, %v4107_v5 }
 0x45d   : > { %v4512_v34 = vrot.slane %v4502_v29, %v18281_v33  ;;  %v4519_v16 = vrot.slane %v4503_v18, %v18281_v33  ;;  %v18293_v0 = vadd.f32 %v4395_v40, %v4239_v36  ;;  %v18295_v49 = vadd.f32 %v4396_v53, %v4350_v35  ;;  %v4242_v20 = vpop.f32.mrb[36].mxu0 }
 0x45e   : > { %v4526_v8 = vrot.slane %v4504_v57, %v18281_v33  ;;  %v4533_v27 = vrot.slane %v4505_v9, %v18281_v33  ;;  %v18299_v51 = vadd.f32 %v4397_v58, %v4352_v46  ;;  %v18302_v55 = vadd.f32 %v4242_v20, %v18289_v21  ;;  %v4244_v7 = vpop.f32.mrb[37].mxu0  ;;  %v4355_v54 = vpop.f32.mrb[36].mxu1 }
 0x45f   : > { %v18309_v40 = vadd.f32 %v4244_v7, %v18289_v21  ;;  %v18312_v5 = vadd.f32 %v4355_v54, %v18289_v21  ;;  %v18314_v4 = vpop.f32.mrb[37].mxu1 }
 0x460   : > { %v18316_v53 = vcombine.low %v4512_v34, %v4526_v8  ;;  %v18318_v36 = vcombine.high %v4512_v34, %v4526_v8  ;;  %v18320_v35 = vcombine.low %v4519_v16, %v4533_v27  ;;  %v18322_v30 = vcombine.high %v4519_v16, %v4533_v27 }
 0x461   : > { %v14445_v58 = vcombine.low %v4526_v8, %v4526_v8  ;;  %v14446_v57 = vcombine.high %v4526_v8, %v4526_v8  ;;  %v14447_v9 = vcombine.low %v4533_v27, %v4533_v27  ;;  %v14448_v46 = vcombine.high %v4533_v27, %v4533_v27  ;;  %v18324_v20 = vpop.f32.mrb[38].mxu0 }
 0x462   : > { %24192 = vst [vmem:[#allocation74_spill] sm:$0xff] %v18316_v53  ;;  %24193 = vst [vmem:[#allocation50_spill] sm:$0xff] %v18318_v36  ;;  %v4829_v7 = vrot.slane %v18316_v53, %v18281_v33  ;;  %v4846_v54 = vrot.slane %v18318_v36, %v18281_v33  ;;  %v18332_v34 = vrot.slane %v18320_v35, %v18281_v33  ;;  %v18338_v18 = vpop.f32.mrb[39].mxu0  ;;  %v18340_v8 = vpop.f32.mrb[38].mxu1 }
 0x463   : > { %24194 = vst [vmem:[#allocation76_spill] sm:$0xff] %v18320_v35  ;;  %24195 = vst [vmem:[#allocation52_spill] sm:$0xff] %v18322_v30  ;;  %v18336_v16 = vrot.slane %v18322_v30, %v18281_v33  ;;  %v4836_v27 = vrot.slane %v14445_v58, %v18281_v33  ;;  %v4853_v29 = vrot.slane %v14446_v57, %v18281_v33  ;;  %v18348_v47 = vpop.f32.mrb[39].mxu1 }
 0x464   : > { %v4870_v63 = vrot.slane %v14447_v9, %v18281_v33  ;;  %v18346_v61 = vrot.slane %v14448_v46, %v18281_v33  ;;  %v4837_v10 = vcombine.high %v4829_v7, %v4829_v7  ;;  %v4854_v24 = vcombine.high %v4846_v54, %v4846_v54 }
 0x465   : > { %v4838_v25 = vcombine.high %v4836_v27, %v4836_v27  ;;  %v4855_v11 = vcombine.high %v4853_v29, %v4853_v29  ;;  %v18356_v9 = vpop.f32.mrb[40].mxu0  ;;  %v5495_v46 = vsel %vm5494_vm5, %v4829_v7, 0.0  ;;  %v5509_v2 = vsel %vm5494_vm5, %v4836_v27, 0.0 }
 0x466   : > { %24196 = vst [vmem:[#allocation54_spill] sm:$0xff] %v18346_v61  ;;  %v4872_v58 = vcombine.high %v4870_v63, %v4870_v63  ;;  %v18360_v22 = vsel %vm5494_vm5, %v4837_v10, 0.0  ;;  %v5523_v17 = vsel %vm5494_vm5, %v4846_v54, 0.0  ;;  %v18364_v37 = vpop.f32.mrb[41].mxu0  ;;  %v18366_v6 = vpop.f32.mrb[40].mxu1  ;;  %v5496_v39 = vrot.slane %v5495_v46, 4 }
 0x467   : > { %v5510_v38 = vrot.slane %v5509_v2, 4  ;;  %v5516_v57 = vsel %vm5494_vm5, %v4838_v25, 0.0  ;;  %v18370_v59 = vpop.f32.mrb[41].mxu1  ;;  %v5524_v52 = vrot.slane %v5523_v17, 4  ;;  %v18373_v10 = vsel %vm5494_vm5, %v4854_v24, 0.0 }
 0x468   : > { %v5517_v7 = vrot.slane %v5516_v57, 4  ;;  %v5537_v27 = vsel %vm5494_vm5, %v4853_v29, 0.0  ;;  %v5497_v54 = vadd.f32 %v5496_v39, %v5495_v46  ;;  %v5544_v25 = vsel %vm5494_vm5, %v4855_v11, 0.0 }
 0x469   : > { %v5511_v45 = vadd.f32 %v5510_v38, %v5509_v2  ;;  %v5538_v19 = vrot.slane %v5537_v27, 4  ;;  %v18377_v31 = vpop.f32.mrb[42].mxu0  ;;  %v5525_v56 = vadd.f32 %v5524_v52, %v5523_v17  ;;  %v5551_v60 = vsel %vm5494_vm5, %v18332_v34, 0.0 }
 0x46a   : > { %v18379_v48 = vadd.f32 %v5517_v7, %v5516_v57  ;;  %v18384_v28 = vpop.f32.mrb[43].mxu0  ;;  %v18386_v24 = vpop.f32.mrb[42].mxu1  ;;  %v5498_v29 = vrot.slane %v5497_v54, 2  ;;  %v5545_v2 = vrot.slane %v5544_v25, 4  ;;  %v5552_v7 = vrot.slane %v5551_v60, 4 }
 0x46b   : > { %v5512_v39 = vrot.slane %v5511_v45, 2  ;;  %v5539_v38 = vadd.f32 %v5538_v19, %v5537_v27  ;;  %v18388_v46 = vpop.f32.mrb[43].mxu1  ;;  %v5526_v57 = vrot.slane %v5525_v56, 2  ;;  %v5565_v17 = vsel %vm5494_vm5, %v4870_v63, 0.0 }
 0x46c   : > { %24197 = vst [vmem:[#allocation49_spill] sm:$0xff] %v18379_v48  ;;  %v18392_v52 = vadd.f32 %v5498_v29, %v5497_v54  ;;  %v18394_v32 = vadd.f32 %v5545_v2, %v5544_v25  ;;  %v18400_v19 = vadd.f32 %v5552_v7, %v5551_v60  ;;  %v5566_v27 = vrot.slane %v5565_v17, 4 }
 0x46d   : > { %v5513_v11 = vadd.f32 %v5512_v39, %v5511_v45  ;;  %v5540_v14 = vrot.slane %v5539_v38, 2  ;;  %v18396_v43 = vpop.f32.mrb[44].mxu0  ;;  %v18398_v12 = vadd.f32 %v5526_v57, %v5525_v56  ;;  %v18403_v23 = vsel %vm5494_vm5, %v4872_v58, 0.0 }
 0x46e   : > { %24198 = vst [vmem:[#allocation75_spill] sm:$0xff] %v18392_v52  ;;  %24199 = vst [vmem:[#allocation51_spill] sm:$0xff] %v18394_v32  ;;  %v18405_v3 = vpop.f32.mrb[45].mxu0  ;;  %v18407_v13 = vpop.f32.mrb[44].mxu1  ;;  %v5567_v60 = vadd.f32 %v5566_v27, %v5565_v17  ;;  %v5579_v39 = vsel %vm5494_vm5, %v18336_v16, 0.0  ;;  %v5593_v58 = vsel %vm5494_vm5, %v18346_v61, 0.0  ;;  %v6391_v25 = vmul.f32 %v18316_v53, %v18316_v53 }
 0x46f   : > { %24200 = vst [vmem:[#allocation77_spill] sm:$0xff] %v18398_v12  ;;  %24201 = vst [vmem:[#allocation53_spill] sm:$0xff] %v18400_v19  ;;  %v5514_v63 = vrot.slane %v5513_v11, 1  ;;  %v5541_v54 = vadd.f32 %v5540_v14, %v5539_v38  ;;  %v18411_v29 = vpop.f32.mrb[45].mxu1  ;;  %v5580_v7 = vrot.slane %v5579_v39, 4  ;;  %v5594_v14 = vrot.slane %v5593_v58, 4 }
 0x470   : > { %24202 = vst [vmem:[#allocation55_spill] sm:$0xff] %v18403_v23  ;;  %v5568_v45 = vrot.slane %v5567_v60, 2  ;;  %v6392_v17 = vmul.f32 %v18318_v36, %v18318_v36  ;;  %v6393_v27 = vmul.f32 %v18320_v35, %v18320_v35  ;;  %v6394_v44 = vmul.f32 %v18322_v30, %v18322_v30 }
 0x471   : > { %v18418_v2 = vadd.f32 %v5514_v63, %v5513_v11  ;;  %v5542_v57 = vrot.slane %v5541_v54, 1  ;;  %v18420_v38 = vpop.f32.mrb[46].mxu0  ;;  %v18434_v63 = vadd.f32 %v5580_v7, %v5579_v39  ;;  %v18436_v1 = vadd.f32 %v5594_v14, %v5593_v58 }
 0x472   : > { %v18428_v56 = vpop.f32.mrb[47].mxu0  ;;  %v18430_v15 = vpop.f32.mrb[46].mxu1  ;;  %v18442_v62 = vadd.f32 %v5568_v45, %v5567_v60  ;;  %v6455_v36 = vcombine.high %v6391_v25, %v6391_v25  ;;  %v18445_v35 = vrot.slane %v6391_v25, %v18281_v33  ;;  %v6472_v42 = vcombine.high %v6392_v17, %v6392_v17 }
 0x473   : > { %24203 = vst [vmem:[#allocation68_spill] sm:$0xff] %v18418_v2  ;;  %v18432_v11 = vadd.f32 %v5542_v57, %v5541_v54  ;;  %24205 = vst [vmem:[#allocation62_spill] sm:$0xff] %v18434_v63  ;;  %v18440_v53 = vpop.f32.mrb[47].mxu1  ;;  %v18449_v54 = vrot.slane %v6392_v17, %v18281_v33  ;;  %v6489_v39 = vcombine.high %v6393_v27, %v6393_v27  ;;  %v4400_v2 = vld [vmem:[%s18274_s30 + $0x50] sm:$0xff] }
 0x474   : > { %24206 = vst [vmem:[#allocation64_spill] sm:$0xff] %v18436_v1  ;;  %24207 = vst [vmem:[#allocation65_spill] sm:$0xff] %v18442_v62  ;;  %v18452_v58 = vrot.slane %v6393_v27, %v18281_v33  ;;  %v18455_v57 = vrot.slane %v6455_v36, %v18281_v33  ;;  %v18460_v60 = vrot.slane %v6472_v42, %v18281_v33  ;;  %v7127_v7 = vsel %vm5494_vm5, %v18445_v35, 0.0 }
 0x475   : > { %24204 = vst [vmem:[#allocation70_spill] sm:$0xff] %v18432_v11  ;;  %24208 = vst [vmem:[#allocation71_spill] sm:$0xff] %v18445_v35  ;;  %v6506_v25 = vcombine.high %v6394_v44, %v6394_v44  ;;  %v18465_v14 = vrot.slane %v6489_v39, %v18281_v33  ;;  %v18470_v27 = vrot.slane %v6394_v44, %v18281_v33  ;;  %v7128_v39 = vrot.slane %v7127_v7, 4 }
 0x476   : > { %24209 = vst [vmem:[#allocation61_spill] sm:$0xff] %v18449_v54  ;;  %24210 = vst [vmem:[#allocation12_spill] sm:$0xff] %v18452_v58  ;;  %v7141_v17 = vsel %vm5494_vm5, %v18455_v57, 0.0  ;;  %v7155_v44 = vsel %vm5494_vm5, %v18449_v54, 0.0  ;;  %v7169_v36 = vsel %vm5494_vm5, %v18460_v60, 0.0  ;;  %v7183_v30 = vsel %vm5494_vm5, %v18452_v58, 0.0  ;;  %v4117_v58 = vpop.permute.xlu1 %4116 }
 0x477   : > { %24211 = vst [vmem:[#allocation13_spill] sm:$0xff] %v18455_v57  ;;  %24212 = vst [vmem:[#allocation80_spill] sm:$0xff] %v18460_v60  ;;  %v18477_v45 = vrot.slane %v6506_v25, %v18281_v33  ;;  %v7142_v42 = vrot.slane %v7141_v17, 4  ;;  %v7156_v26 = vrot.slane %v7155_v44, 4  ;;  %v7170_v25 = vrot.slane %v7169_v36, 4 }
 0x478   : > { %24213 = vst [vmem:[#allocation81_spill] sm:$0xff] %v18465_v14  ;;  %24214 = vst [vmem:[#allocation82_spill] sm:$0xff] %v18470_v27  ;;  %v7184_v35 = vrot.slane %v7183_v30, 4  ;;  %v18493_v57 = vsel %vm5494_vm5, %v18465_v14, 0.0  ;;  %v18497_v54 = vsel %vm5494_vm5, %v18470_v27, 0.0 }
 0x479   : > { %24215 = vst [vmem:[#allocation83_spill] sm:$0xff] %v18477_v45  ;;  %v18489_v45 = vadd.f32 %v7128_v39, %v7127_v7  ;;  %24217 = vst [vmem:[#allocation85_spill] sm:$0xff] %v18493_v57  ;;  %v18499_v50 = vadd.f32 %v7142_v42, %v7141_v17  ;;  %v18501_v60 = vadd.f32 %v7156_v26, %v7155_v44  ;;  %v4398_v7 = vld [vmem:[%s18274_s30 + $0x40] sm:$0xff]  ;;  %v4399_v39 = vld [vmem:[%s18274_s30 + $0x48] sm:$0xff] }
 0x47a   : > { %24218 = vst [vmem:[#allocation86_spill] sm:$0xff] %v18497_v54  ;;  %v18503_v11 = vadd.f32 %v7170_v25, %v7169_v36  ;;  %v18510_v14 = vadd.f32 %v7184_v35, %v7183_v30  ;;  %v24223_v17 = vcombine.low %v18287_v41, %v18293_v0  ;;  %v24224_v36 = vcombine.high %v18287_v41, %v18293_v0  ;;  %v4401_v30 = vld [vmem:[%s18274_s30 + $0x58] sm:$0xff] }
 0x47b   : > { %24216 = vst [vmem:[#allocation84_spill] sm:$0xff] %v18489_v45  ;;  %24219 = vst [vmem:[#allocation87_spill] sm:$0xff] %v18499_v50  ;;  %v4540_v25 = vcombine.low %v18295_v49, %v18299_v51  ;;  %v4541_v35 = vcombine.high %v18295_v49, %v18299_v51  ;;  %v4430_v62 = vadd.f32 %v4398_v7, %v18302_v55  ;;  %v4404_v50 = vld [vmem:[%s18274_s30 + $0x70] sm:$0xff]  ;;  %v18609_v45 = vpop.permute.xlu0 %4121 }
 0x47c   : > { %24220 = vst [vmem:[#allocation88_spill] sm:$0xff] %v18501_v60  ;;  %24221 = vst [vmem:[#allocation89_spill] sm:$0xff] %v18503_v11  ;;  %v4548_v42 = vrot.slane %v24223_v17, %v18281_v33  ;;  %v4555_v44 = vrot.slane %v24224_v36, %v18281_v33  ;;  %v4431_v1 = vadd.f32 %v4399_v39, %v18309_v40 }
 0x47d   : > { %24222 = vst [vmem:[#allocation90_spill] sm:$0xff] %v18510_v14  ;;  %v4432_v17 = vadd.f32 %v4400_v2, %v18312_v5  ;;  %v4358_v26 = vadd.f32 %v18314_v4, %v18289_v21  ;;  %v4562_v41 = vrot.slane %v4540_v25, %v18281_v33  ;;  %v18534_v0 = vrot.slane %v4541_v35, %v18281_v33 }
 0x47e   : > { %v4249_v36 = vadd.f32 %v18324_v20, %v4117_v58  ;;  %v4251_v49 = vadd.f32 %v18338_v18, %v4117_v58  ;;  %v4574_v51 = vcombine.low %v4430_v62, %v4431_v1  ;;  %v4575_v57 = vcombine.high %v4430_v62, %v4431_v1 }
 0x47f   : > { %v4433_v11 = vadd.f32 %v4401_v30, %v4358_v26  ;;  %v4362_v55 = vadd.f32 %v18340_v8, %v4117_v58  ;;  %v18539_v40 = vcombine.low %v4548_v42, %v4562_v41  ;;  %v18541_v5 = vcombine.high %v4548_v42, %v4562_v41 }
 0x480   : > { %v18544_v21 = vcombine.low %v4555_v44, %v18534_v0  ;;  %v18547_v4 = vcombine.high %v4555_v44, %v18534_v0  ;;  %v14449_v2 = vcombine.low %v4562_v41, %v4562_v41  ;;  %v14450_v20 = vcombine.high %v4562_v41, %v4562_v41 }
 0x481   : > { %24225 = vst [vmem:[#allocation91_spill] sm:$0xff] %v18539_v40  ;;  %24226 = vst [vmem:[#allocation92_spill] sm:$0xff] %v18541_v5  ;;  %v14451_v62 = vcombine.low %v18534_v0, %v18534_v0  ;;  %v18555_v18 = vrot.slane %v18539_v40, %v18281_v33  ;;  %v18559_v8 = vrot.slane %v18541_v5, %v18281_v33 }
 0x482   : > { %24227 = vst [vmem:[#allocation93_spill] sm:$0xff] %v18544_v21  ;;  %24228 = vst [vmem:[#allocation94_spill] sm:$0xff] %v18547_v4  ;;  %v18563_v7 = vmul.f32 %v18539_v40, %v18539_v40  ;;  %v18567_v39 = vmul.f32 %v18541_v5, %v18541_v5  ;;  %v18570_v42 = vrot.slane %v14449_v2, %v18281_v33 }
 0x483   : > { %v18573_v26 = vrot.slane %v14450_v20, %v18281_v33  ;;  %v18576_v44 = vrot.slane %v14451_v62, %v18281_v33  ;;  %v18580_v25 = vmul.f32 %v18544_v21, %v18544_v21  ;;  %v18584_v35 = vsel %vm5494_vm5, %v18555_v18, 0.0  ;;  %v4402_v20 = vld [vmem:[%s18274_s30 + $0x60] sm:$0xff]  ;;  %v4403_v62 = vld [vmem:[%s18274_s30 + $0x68] sm:$0xff] }
 0x484   : > { %24229 = vst [vmem:[#allocation95_spill] sm:$0xff] %v18563_v7  ;;  %24230 = vst [vmem:[#allocation96_spill] sm:$0xff] %v18567_v39  ;;  %v18590_v41 = vrot.slane %v18563_v7, %v18281_v33  ;;  %v5621_v40 = vsel %vm5494_vm5, %v18570_v42, 0.0  ;;  %v4584_v14 = vrot.slane %v4574_v51, %v18281_v33  ;;  %v4591_v60 = vrot.slane %v4575_v57, %v18281_v33  ;;  %v4405_v39 = vld [vmem:[%s18274_s30 + $0x78] sm:$0xff] }
 0x485   : > { %24231 = vst [vmem:[#allocation97_spill] sm:$0xff] %v18570_v42  ;;  %24232 = vst [vmem:[#allocation98_spill] sm:$0xff] %v18580_v25  ;;  %v18603_v30 = vsel %vm5494_vm5, %v18573_v26, 0.0  ;;  %v5622_v54 = vrot.slane %v5621_v40, 4  ;;  %v4576_v1 = vcombine.low %v4432_v17, %v4433_v11  ;;  %v4577_v7 = vcombine.high %v4432_v17, %v4433_v11 }
 0x486   : > { %24233 = vst [vmem:[#allocation99_spill] sm:$0xff] %v18584_v35  ;;  %24234 = vst [vmem:[#allocation100_spill] sm:$0xff] %v18590_v41  ;;  %v18611_v5 = vadd.f32 %v4402_v20, %v4249_v36  ;;  %v18613_v25 = vadd.f32 %v4403_v62, %v4251_v49  ;;  %v4406_v41 = vld [vmem:[%s18274_s30 + $0x80] sm:$0xff]  ;;  %v18619_v35 = vadd.f32 %v4404_v50, %v4362_v55 }
 0x487   : > { %24235 = vst [vmem:[#allocation101_spill] sm:$0xff] %v18603_v30  ;;  %v18617_v27 = vadd.f32 %v5622_v54, %v5621_v40  ;;  %v4364_v2 = vadd.f32 %v18348_v47, %v4117_v58  ;;  %v4255_v51 = vadd.f32 %v18356_v9, %v18609_v45  ;;  %v4598_v57 = vrot.slane %v4576_v1, %v18281_v33 }
 0x488   : > { %v4605_v30 = vrot.slane %v4577_v7, %v18281_v33  ;;  %v18636_v47 = vadd.f32 %v18364_v37, %v18609_v45  ;;  %v18640_v50 = vadd.f32 %v18366_v6, %v18609_v45 }
 0x489   : > { %24236 = vst [vmem:[#allocation102_spill] sm:$0xff] %v18617_v27  ;;  %v18630_v36 = vadd.f32 %v4405_v39, %v4364_v2  ;;  %v18632_v54 = vadd.f32 %v4406_v41, %v4255_v51  ;;  %v18642_v9 = vcombine.low %v4584_v14, %v4598_v57  ;;  %v18644_v58 = vcombine.high %v4584_v14, %v4598_v57 }
 0x48a   : > { %v18646_v49 = vcombine.low %v4591_v60, %v4605_v30  ;;  %v18648_v55 = vcombine.high %v4591_v60, %v4605_v30  ;;  %v14453_v40 = vcombine.low %v4598_v57, %v4598_v57  ;;  %v14454_v1 = vcombine.high %v4598_v57, %v4598_v57 }
 0x48b   : > { %24237 = vst [vmem:[#allocation103_spill] sm:$0xff] %v18642_v9  ;;  %24238 = vst [vmem:[#allocation104_spill] sm:$0xff] %v18644_v58  ;;  %v14455_v7 = vcombine.low %v4605_v30, %v4605_v30  ;;  %v14456_v39 = vcombine.high %v4605_v30, %v4605_v30  ;;  %v4965_v37 = vrot.slane %v18642_v9, %v18281_v33 }
 0x48c   : > { %24239 = vst [vmem:[#allocation105_spill] sm:$0xff] %v18646_v49  ;;  %24240 = vst [vmem:[#allocation106_spill] sm:$0xff] %v18648_v55  ;;  %v4982_v41 = vrot.slane %v18644_v58, %v18281_v33  ;;  %v18656_v6 = vrot.slane %v18646_v49, %v18281_v33  ;;  %v18660_v14 = vrot.slane %v18648_v55, %v18281_v33 }
 0x48d   : > { %v4972_v60 = vrot.slane %v14453_v40, %v18281_v33  ;;  %v4989_v2 = vrot.slane %v14454_v1, %v18281_v33  ;;  %v5006_v30 = vrot.slane %v14455_v7, %v18281_v33  ;;  %v18666_v20 = vrot.slane %v14456_v39, %v18281_v33 }
 0x48e   : > { %24241 = vst [vmem:[#allocation107_spill] sm:$0xff] %v18660_v14  ;;  %v4973_v62 = vcombine.high %v4965_v37, %v4965_v37  ;;  %v4990_v51 = vcombine.high %v4982_v41, %v4982_v41  ;;  %v5719_v1 = vsel %vm5494_vm5, %v4965_v37, 0.0  ;;  %v5747_v19 = vsel %vm5494_vm5, %v4982_v41, 0.0 }
 0x48f   : > { %24242 = vst [vmem:[#allocation108_spill] sm:$0xff] %v18666_v20  ;;  %v4974_v11 = vcombine.high %v4972_v60, %v4972_v60  ;;  %v4991_v27 = vcombine.high %v4989_v2, %v4989_v2  ;;  %v5008_v63 = vcombine.high %v5006_v30, %v5006_v30  ;;  %v5733_v39 = vsel %vm5494_vm5, %v4972_v60, 0.0 }
 0x490   : > { %v18676_v7 = vsel %vm5494_vm5, %v4973_v62, 0.0  ;;  %v5720_v12 = vrot.slane %v5719_v1, 4  ;;  %v5734_v52 = vrot.slane %v5733_v39, 4  ;;  %v5748_v42 = vrot.slane %v5747_v19, 4 }
 0x491   : > { %24243 = vst [vmem:[#allocation109_spill] sm:$0xff] %v18676_v7  ;;  %v5740_v17 = vsel %vm5494_vm5, %v4974_v11, 0.0  ;;  %v18683_v61 = vsel %vm5494_vm5, %v4990_v51, 0.0  ;;  %v5761_v37 = vsel %vm5494_vm5, %v4989_v2, 0.0  ;;  %v5768_v57 = vsel %vm5494_vm5, %v4991_v27, 0.0 }
 0x492   : > { %v5741_v14 = vrot.slane %v5740_v17, 4  ;;  %v18686_v40 = vadd.f32 %v5720_v12, %v5719_v1  ;;  %v5735_v62 = vadd.f32 %v5734_v52, %v5733_v39  ;;  %v5762_v23 = vrot.slane %v5761_v37, 4 }
 0x493   : > { %v18691_v32 = vadd.f32 %v5748_v42, %v5747_v19  ;;  %v18696_v11 = vsel %vm5494_vm5, %v18656_v6, 0.0  ;;  %v5769_v48 = vrot.slane %v5768_v57, 4  ;;  %v5789_v2 = vsel %vm5494_vm5, %v5006_v30, 0.0 }
 0x494   : > { %24244 = vst [vmem:[#allocation110_spill] sm:$0xff] %v18686_v40  ;;  %v18689_v41 = vadd.f32 %v5741_v14, %v5740_v17  ;;  %24247 = vst [vmem:[#allocation113_spill] sm:$0xff] %v18696_v11  ;;  %v5736_v51 = vrot.slane %v5735_v62, 2  ;;  %v5763_v7 = vadd.f32 %v5762_v23, %v5761_v37  ;;  %v18702_v17 = vsel %vm5494_vm5, %v5008_v63, 0.0 }
 0x495   : > { %24246 = vst [vmem:[#allocation112_spill] sm:$0xff] %v18691_v32  ;;  %24248 = vst [vmem:[#allocation114_spill] sm:$0xff] %v18702_v17  ;;  %v18706_v19 = vsel %vm5494_vm5, %v18666_v20, 0.0  ;;  %v18710_v14 = vadd.f32 %v5769_v48, %v5768_v57  ;;  %v5790_v23 = vrot.slane %v5789_v2, 4  ;;  %v6399_v30 = vmul.f32 %v18642_v9, %v18642_v9 }
 0x496   : > { %24245 = vst [vmem:[#allocation111_spill] sm:$0xff] %v18689_v41  ;;  %24249 = vst [vmem:[#allocation115_spill] sm:$0xff] %v18706_v19  ;;  %v18708_v27 = vadd.f32 %v5736_v51, %v5735_v62  ;;  %v5764_v42 = vrot.slane %v5763_v7, 2  ;;  %v6400_v63 = vmul.f32 %v18644_v58, %v18644_v58  ;;  %v6401_v48 = vmul.f32 %v18646_v49, %v18646_v49  ;;  %v4408_v58 = vld [vmem:[%s18274_s30 + $0x90] sm:$0xff]  ;;  %v4413_v19 = vld [vmem:[%s18274_s30 + $0xb8] sm:$0xff] }
 0x497   : > { %24251 = vst [vmem:[#allocation117_spill] sm:$0xff] %v18710_v14  ;;  %v18721_v62 = vadd.f32 %v5790_v23, %v5789_v2  ;;  %v6402_v57 = vmul.f32 %v18648_v55, %v18648_v55  ;;  %v6591_v51 = vcombine.high %v6399_v30, %v6399_v30  ;;  %v18728_v39 = vrot.slane %v6399_v30, %v18281_v33 }
 0x498   : > { %24250 = vst [vmem:[#allocation116_spill] sm:$0xff] %v18708_v27  ;;  %v18718_v37 = vadd.f32 %v5764_v42, %v5763_v7  ;;  %v6608_v1 = vcombine.high %v6400_v63, %v6400_v63  ;;  %v18731_v7 = vrot.slane %v6400_v63, %v18281_v33  ;;  %v6625_v42 = vcombine.high %v6401_v48, %v6401_v48 }
 0x499   : > { %24253 = vst [vmem:[#allocation119_spill] sm:$0xff] %v18721_v62  ;;  %24254 = vst [vmem:[#allocation120_spill] sm:$0xff] %v18728_v39  ;;  %v18734_v2 = vrot.slane %v6401_v48, %v18281_v33  ;;  %v24257_v23 = vcombine.low %v18611_v5, %v18613_v25  ;;  %v18741_v52 = vrot.slane %v6591_v51, %v18281_v33  ;;  %v4407_v51 = vld [vmem:[%s18274_s30 + $0x88] sm:$0xff] }
 0x49a   : > { %24252 = vst [vmem:[#allocation118_spill] sm:$0xff] %v18718_v37  ;;  %24255 = vst [vmem:[#allocation121_spill] sm:$0xff] %v18731_v7  ;;  %v18746_v60 = vrot.slane %v6608_v1, %v18281_v33  ;;  %v6642_v63 = vcombine.high %v6402_v57, %v6402_v57  ;;  %v18751_v48 = vrot.slane %v6625_v42, %v18281_v33  ;;  %v18769_v42 = vsel %vm5494_vm5, %v18728_v39, 0.0 }
 0x49b   : > { %24256 = vst [vmem:[#allocation122_spill] sm:$0xff] %v18734_v2  ;;  %v4620_v12 = vrot.slane %v24257_v23, %v18281_v33  ;;  %24258 = vst [vmem:[#allocation123_spill] sm:$0xff] %v18741_v52  ;;  %v18756_v23 = vrot.slane %v6402_v57, %v18281_v33  ;;  %v18774_v57 = vsel %vm5494_vm5, %v18731_v7, 0.0  ;;  %v24265_v30 = vcombine.high %v18611_v5, %v18613_v25 }
 0x49c   : > { %24259 = vst [vmem:[#allocation124_spill] sm:$0xff] %v18746_v60  ;;  %24260 = vst [vmem:[#allocation125_spill] sm:$0xff] %v18751_v48  ;;  %v18765_v9 = vrot.slane %v6642_v63, %v18281_v33  ;;  %v4612_v1 = vcombine.low %v18619_v35, %v18630_v36  ;;  %v4127_v63 = vpop.permute.xlu1 %4126  ;;  %v4613_v52 = vcombine.high %v18619_v35, %v18630_v36 }
 0x49d   : > { %24261 = vst [vmem:[#allocation126_spill] sm:$0xff] %v18756_v23  ;;  %24263 = vst [vmem:[#allocation128_spill] sm:$0xff] %v18769_v42  ;;  %v4627_v55 = vrot.slane %v24265_v30, %v18281_v33  ;;  %v4439_v49 = vadd.f32 %v4407_v51, %v18636_v47  ;;  %v4440_v42 = vadd.f32 %v4408_v58, %v18640_v50 }
 0x49e   : > { %24262 = vst [vmem:[#allocation127_spill] sm:$0xff] %v18765_v9  ;;  %24264 = vst [vmem:[#allocation129_spill] sm:$0xff] %v18774_v57  ;;  %v4634_v9 = vrot.slane %v4612_v1, %v18281_v33  ;;  %v4370_v5 = vadd.f32 %v18370_v59, %v18609_v45  ;;  %v4261_v25 = vadd.f32 %v18377_v31, %v4127_v63  ;;  %v4411_v57 = vld [vmem:[%s18274_s30 + $0xa8] sm:$0xff] }
 0x49f   : > { %v4263_v30 = vadd.f32 %v18384_v28, %v4127_v63  ;;  %v18793_v48 = vrot.slane %v4613_v52, %v18281_v33  ;;  %v4646_v60 = vcombine.low %v18632_v54, %v4439_v49  ;;  %v4647_v35 = vcombine.high %v18632_v54, %v4439_v49  ;;  %v4409_v54 = vld [vmem:[%s18274_s30 + $0x98] sm:$0xff]  ;;  %v4410_v52 = vld [vmem:[%s18274_s30 + $0xa0] sm:$0xff] }
 0x4a0   : > { %v4374_v36 = vadd.f32 %v18386_v24, %v4127_v63  ;;  %v18798_v47 = vcombine.low %v4620_v12, %v4634_v9  ;;  %v18800_v50 = vcombine.high %v4620_v12, %v4634_v9  ;;  %v14457_v58 = vcombine.low %v4634_v9, %v4634_v9 }
 0x4a1   : > { %24266 = vst [vmem:[#allocation130_spill] sm:$0xff] %v18793_v48  ;;  %v14458_v59 = vcombine.high %v4634_v9, %v4634_v9  ;;  %v18803_v31 = vcombine.low %v4627_v55, %v18793_v48  ;;  %v18806_v28 = vcombine.high %v4627_v55, %v18793_v48  ;;  %v14459_v45 = vcombine.low %v18793_v48, %v18793_v48 }
 0x4a2   : > { %24267 = vst [vmem:[#allocation131_spill] sm:$0xff] %v18798_v47  ;;  %24268 = vst [vmem:[#allocation132_spill] sm:$0xff] %v18800_v50  ;;  %v18815_v49 = vrot.slane %v18798_v47, %v18281_v33  ;;  %v18818_v9 = vrot.slane %v14457_v58, %v18281_v33  ;;  %v18822_v12 = vrot.slane %v18800_v50, %v18281_v33 }
 0x4a3   : > { %24269 = vst [vmem:[#allocation133_spill] sm:$0xff] %v18803_v31  ;;  %24270 = vst [vmem:[#allocation134_spill] sm:$0xff] %v18806_v28  ;;  %v18825_v55 = vrot.slane %v14458_v59, %v18281_v33  ;;  %v18829_v51 = vrot.slane %v14459_v45, %v18281_v33  ;;  %v18833_v1 = vmul.f32 %v18798_v47, %v18798_v47  ;;  %v4412_v59 = vld [vmem:[%s18274_s30 + $0xb0] sm:$0xff]  ;;  %v18860_v45 = vpop.permute.xlu0 %4131 }
 0x4a4   : > { %24271 = vst [vmem:[#allocation135_spill] sm:$0xff] %v18818_v9  ;;  %v18837_v58 = vmul.f32 %v18800_v50, %v18800_v50  ;;  %v18841_v24 = vmul.f32 %v18803_v31, %v18803_v31  ;;  %v4656_v2 = vrot.slane %v4646_v60, %v18281_v33  ;;  %v4663_v47 = vrot.slane %v4647_v35, %v18281_v33  ;;  %v4414_v35 = vld [vmem:[%s18274_s30 + $0xc0] sm:$0xff]  ;;  %v4416_v50 = vld [vmem:[%s18274_s30 + $0xd0] sm:$0xff] }
 0x4a5   : > { %24272 = vst [vmem:[#allocation136_spill] sm:$0xff] %v18833_v1  ;;  %v4441_v7 = vadd.f32 %v4409_v54, %v4370_v5  ;;  %v18853_v39 = vrot.slane %v18833_v1, %v18281_v33  ;;  %v18857_v23 = vadd.f32 %v4410_v52, %v4261_v25  ;;  %v18862_v37 = vadd.f32 %v4411_v57, %v4263_v30  ;;  %v4415_v54 = vld [vmem:[%s18274_s30 + $0xc8] sm:$0xff] }
 0x4a6   : > { %24273 = vst [vmem:[#allocation137_spill] sm:$0xff] %v18837_v58  ;;  %24274 = vst [vmem:[#allocation138_spill] sm:$0xff] %v18841_v24  ;;  %v18864_v5 = vadd.f32 %v4412_v59, %v4374_v36  ;;  %v4376_v1 = vadd.f32 %v18388_v46, %v4127_v63  ;;  %v4269_v25 = vadd.f32 %v18405_v3, %v18860_v45 }
 0x4a7   : > { %24275 = vst [vmem:[#allocation139_spill] sm:$0xff] %v18853_v39  ;;  %v4648_v62 = vcombine.low %v4440_v42, %v4441_v7  ;;  %v4649_v60 = vcombine.high %v4440_v42, %v4441_v7  ;;  %v4267_v39 = vadd.f32 %v18396_v43, %v18860_v45  ;;  %v4380_v52 = vadd.f32 %v18407_v13, %v18860_v45 }
 0x4a8   : > { %v18882_v46 = vadd.f32 %v4413_v19, %v4376_v1  ;;  %v18886_v43 = vadd.f32 %v4415_v54, %v4269_v25 }
 0x4a9   : > { %v4670_v7 = vrot.slane %v4648_v62, %v18281_v33  ;;  %v4677_v42 = vrot.slane %v4649_v60, %v18281_v33  ;;  %v18884_v63 = vadd.f32 %v4414_v35, %v4267_v39  ;;  %v18888_v3 = vadd.f32 %v4416_v50, %v4380_v52 }
 0x4ab   : > { %v18890_v36 = vcombine.low %v4656_v2, %v4670_v7  ;;  %v18892_v13 = vcombine.high %v4656_v2, %v4670_v7  ;;  %v18894_v62 = vcombine.low %v4663_v47, %v4677_v42  ;;  %v18896_v59 = vcombine.high %v4663_v47, %v4677_v42 }
 0x4ac   : > { %v14461_v60 = vcombine.low %v4670_v7, %v4670_v7  ;;  %v14462_v24 = vcombine.high %v4670_v7, %v4670_v7  ;;  %v14463_v57 = vcombine.low %v4677_v42, %v4677_v42  ;;  %v14464_v30 = vcombine.high %v4677_v42, %v4677_v42 }
 0x4ad   : > { %24276 = vst [vmem:[#allocation140_spill] sm:$0xff] %v18890_v36  ;;  %24277 = vst [vmem:[#allocation141_spill] sm:$0xff] %v18892_v13  ;;  %v5101_v19 = vrot.slane %v18890_v36, %v18281_v33  ;;  %v5118_v39 = vrot.slane %v18892_v13, %v18281_v33  ;;  %v18904_v50 = vrot.slane %v18894_v62, %v18281_v33 }
 0x4ae   : > { %24278 = vst [vmem:[#allocation142_spill] sm:$0xff] %v18894_v62  ;;  %24279 = vst [vmem:[#allocation143_spill] sm:$0xff] %v18896_v59  ;;  %v18908_v2 = vrot.slane %v18896_v59, %v18281_v33  ;;  %v5108_v47 = vrot.slane %v14461_v60, %v18281_v33  ;;  %v5125_v1 = vrot.slane %v14462_v24, %v18281_v33 }
 0x4af   : > { %v5142_v35 = vrot.slane %v14463_v57, %v18281_v33  ;;  %v18914_v54 = vrot.slane %v14464_v30, %v18281_v33  ;;  %v5109_v25 = vcombine.high %v5101_v19, %v5101_v19  ;;  %v5126_v52 = vcombine.high %v5118_v39, %v5118_v39 }
 0x4b0   : > { %24280 = vst [vmem:[#allocation144_spill] sm:$0xff] %v18908_v2  ;;  %v5110_v58 = vcombine.high %v5108_v47, %v5108_v47  ;;  %v5127_v27 = vcombine.high %v5125_v1, %v5125_v1  ;;  %v5943_v24 = vsel %vm5494_vm5, %v5101_v19, 0.0  ;;  %v5957_v30 = vsel %vm5494_vm5, %v5108_v47, 0.0 }
 0x4b1   : > { %24281 = vst [vmem:[#allocation145_spill] sm:$0xff] %v18914_v54  ;;  %v5144_v11 = vcombine.high %v5142_v35, %v5142_v35  ;;  %v18924_v57 = vsel %vm5494_vm5, %v5109_v25, 0.0  ;;  %v5971_v32 = vsel %vm5494_vm5, %v5118_v39, 0.0  ;;  %v5944_v40 = vrot.slane %v5943_v24, 4 }
 0x4b2   : > { %24282 = vst [vmem:[#allocation146_spill] sm:$0xff] %v18924_v57  ;;  %v5958_v9 = vrot.slane %v5957_v30, 4  ;;  %v5964_v42 = vsel %vm5494_vm5, %v5110_v58, 0.0  ;;  %v5972_v20 = vrot.slane %v5971_v32, 4  ;;  %v18931_v17 = vsel %vm5494_vm5, %v5126_v52, 0.0 }
 0x4b3   : > { %v5965_v2 = vrot.slane %v5964_v42, 4  ;;  %v5985_v19 = vsel %vm5494_vm5, %v5125_v1, 0.0  ;;  %v18934_v60 = vadd.f32 %v5944_v40, %v5943_v24  ;;  %v5992_v7 = vsel %vm5494_vm5, %v5127_v27, 0.0 }
 0x4b4   : > { %v5959_v25 = vadd.f32 %v5958_v9, %v5957_v30  ;;  %v5986_v14 = vrot.slane %v5985_v19, 4  ;;  %v18939_v41 = vadd.f32 %v5972_v20, %v5971_v32  ;;  %v18944_v58 = vsel %vm5494_vm5, %v18904_v50, 0.0 }
 0x4b5   : > { %24283 = vst [vmem:[#allocation147_spill] sm:$0xff] %v18934_v60  ;;  %v18937_v39 = vadd.f32 %v5965_v2, %v5964_v42  ;;  %24286 = vst [vmem:[#allocation150_spill] sm:$0xff] %v18944_v58  ;;  %v5993_v48 = vrot.slane %v5992_v7, 4  ;;  %v6013_v1 = vsel %vm5494_vm5, %v5142_v35, 0.0  ;;  %v18950_v2 = vsel %vm5494_vm5, %v5144_v11, 0.0 }
 0x4b6   : > { %24285 = vst [vmem:[#allocation149_spill] sm:$0xff] %v18939_v41  ;;  %v5960_v52 = vrot.slane %v5959_v25, 2  ;;  %v5987_v57 = vadd.f32 %v5986_v14, %v5985_v19  ;;  %24287 = vst [vmem:[#allocation151_spill] sm:$0xff] %v18950_v2  ;;  %v18954_v32 = vsel %vm5494_vm5, %v18914_v54, 0.0  ;;  %v6014_v14 = vrot.slane %v6013_v1, 4 }
 0x4b7   : > { %24284 = vst [vmem:[#allocation148_spill] sm:$0xff] %v18937_v39  ;;  %24288 = vst [vmem:[#allocation152_spill] sm:$0xff] %v18954_v32  ;;  %v18958_v42 = vadd.f32 %v5993_v48, %v5992_v7  ;;  %v6407_v35 = vmul.f32 %v18890_v36, %v18890_v36  ;;  %v6408_v11 = vmul.f32 %v18892_v13, %v18892_v13 }
 0x4b8   : > { %v18956_v20 = vadd.f32 %v5960_v52, %v5959_v25  ;;  %v5988_v27 = vrot.slane %v5987_v57, 2  ;;  %v18969_v25 = vadd.f32 %v6014_v14, %v6013_v1  ;;  %v6409_v48 = vmul.f32 %v18894_v62, %v18894_v62 }
 0x4b9   : > { %24290 = vst [vmem:[#allocation154_spill] sm:$0xff] %v18958_v42  ;;  %v6410_v7 = vmul.f32 %v18896_v59, %v18896_v59  ;;  %v6727_v52 = vcombine.high %v6407_v35, %v6407_v35  ;;  %v18976_v30 = vrot.slane %v6407_v35, %v18281_v33  ;;  %v6744_v24 = vcombine.high %v6408_v11, %v6408_v11 }
 0x4ba   : > { %24289 = vst [vmem:[#allocation153_spill] sm:$0xff] %v18956_v20  ;;  %v18966_v19 = vadd.f32 %v5988_v27, %v5987_v57  ;;  %24292 = vst [vmem:[#allocation156_spill] sm:$0xff] %v18969_v25  ;;  %v18979_v9 = vrot.slane %v6408_v11, %v18281_v33  ;;  %v6761_v57 = vcombine.high %v6409_v48, %v6409_v48 }
 0x4bb   : > { %24293 = vst [vmem:[#allocation157_spill] sm:$0xff] %v18976_v30  ;;  %v18982_v27 = vrot.slane %v6409_v48, %v18281_v33  ;;  %v24296_v1 = vcombine.low %v18857_v23, %v18862_v37  ;;  %v18989_v40 = vrot.slane %v6727_v52, %v18281_v33  ;;  %v18994_v47 = vrot.slane %v6744_v24, %v18281_v33 }
 0x4bc   : > { %24291 = vst [vmem:[#allocation155_spill] sm:$0xff] %v18966_v19  ;;  %24294 = vst [vmem:[#allocation158_spill] sm:$0xff] %v18979_v9  ;;  %v6778_v11 = vcombine.high %v6410_v7, %v6410_v7  ;;  %v18999_v48 = vrot.slane %v6761_v57, %v18281_v33  ;;  %v19015_v59 = vsel %vm5494_vm5, %v18976_v30, 0.0  ;;  %v19020_v62 = vsel %vm5494_vm5, %v18979_v9, 0.0 }
 0x4bd   : > { %24295 = vst [vmem:[#allocation159_spill] sm:$0xff] %v18982_v27  ;;  %v4692_v14 = vrot.slane %v24296_v1, %v18281_v33  ;;  %24297 = vst [vmem:[#allocation160_spill] sm:$0xff] %v18989_v40  ;;  %v19004_v1 = vrot.slane %v6410_v7, %v18281_v33  ;;  %v24304_v7 = vcombine.high %v18857_v23, %v18862_v37 }
 0x4be   : > { %24298 = vst [vmem:[#allocation161_spill] sm:$0xff] %v18994_v47  ;;  %24299 = vst [vmem:[#allocation162_spill] sm:$0xff] %v18999_v48  ;;  %v19011_v35 = vrot.slane %v6778_v11, %v18281_v33  ;;  %v4684_v24 = vcombine.low %v18864_v5, %v18882_v46  ;;  %v4137_v11 = vpop.permute.xlu1 %4136  ;;  %v4685_v36 = vcombine.high %v18864_v5, %v18882_v46 }
 0x4bf   : > { %24300 = vst [vmem:[#allocation163_spill] sm:$0xff] %v19004_v1  ;;  %24302 = vst [vmem:[#allocation165_spill] sm:$0xff] %v19015_v59  ;;  %v4699_v52 = vrot.slane %v24304_v7, %v18281_v33  ;;  %v4718_v57 = vcombine.low %v18884_v63, %v18886_v43  ;;  %v4719_v59 = vcombine.high %v18884_v63, %v18886_v43 }
 0x4c0   : > { %24301 = vst [vmem:[#allocation164_spill] sm:$0xff] %v19011_v35  ;;  %24303 = vst [vmem:[#allocation166_spill] sm:$0xff] %v19020_v62  ;;  %v4706_v47 = vrot.slane %v4684_v24, %v18281_v33  ;;  %v4382_v37 = vadd.f32 %v18411_v29, %v18860_v45  ;;  %v4273_v23 = vadd.f32 %v18420_v38, %v4137_v11  ;;  %v4419_v62 = vld [vmem:[%s18274_s30 + $0xe8] sm:$0xff]  ;;  %v4420_v35 = vld [vmem:[%s18274_s30 + $0xf0] sm:$0xff] }
 0x4c1   : > { %v4275_v7 = vadd.f32 %v18428_v56, %v4137_v11  ;;  %v19041_v5 = vrot.slane %v4685_v36, %v18281_v33  ;;  %v4728_v46 = vrot.slane %v4718_v57, %v18281_v33  ;;  %v4735_v13 = vrot.slane %v4719_v59, %v18281_v33  ;;  %v4418_v57 = vld [vmem:[%s18274_s30 + $0xe0] sm:$0xff] }
 0x4c2   : > { %v4386_v63 = vadd.f32 %v18430_v15, %v4137_v11  ;;  %v19046_v43 = vcombine.low %v4692_v14, %v4706_v47  ;;  %v19048_v24 = vcombine.high %v4692_v14, %v4706_v47  ;;  %v14465_v29 = vcombine.low %v4706_v47, %v4706_v47  ;;  %v4417_v15 = vld [vmem:[%s18274_s30 + $0xd8] sm:$0xff] }
 0x4c3   : > { %v14466_v45 = vcombine.high %v4706_v47, %v4706_v47  ;;  %v19051_v38 = vcombine.low %v4699_v52, %v19041_v5  ;;  %v19054_v56 = vcombine.high %v4699_v52, %v19041_v5  ;;  %v14467_v36 = vcombine.low %v19041_v5, %v19041_v5 }
 0x4c4   : > { %24305 = vst [vmem:[#allocation167_spill] sm:$0xff] %v19046_v43  ;;  %24306 = vst [vmem:[#allocation168_spill] sm:$0xff] %v19048_v24  ;;  %v19065_v14 = vrot.slane %v19046_v43, %v18281_v33  ;;  %v19068_v47 = vrot.slane %v14465_v29, %v18281_v33  ;;  %v19072_v52 = vrot.slane %v19048_v24, %v18281_v33 }
 0x4c5   : > { %24307 = vst [vmem:[#allocation169_spill] sm:$0xff] %v19051_v38  ;;  %24308 = vst [vmem:[#allocation170_spill] sm:$0xff] %v19054_v56  ;;  %v19075_v40 = vrot.slane %v14466_v45, %v18281_v33  ;;  %v19079_v59 = vrot.slane %v14467_v36, %v18281_v33  ;;  %v19083_v48 = vmul.f32 %v19046_v43, %v19046_v43 }
 0x4c6   : > { %24309 = vst [vmem:[#allocation171_spill] sm:$0xff] %v19068_v47  ;;  %v19087_v29 = vmul.f32 %v19048_v24, %v19048_v24  ;;  %v19091_v27 = vmul.f32 %v19051_v38, %v19051_v38  ;;  %v4449_v9 = vadd.f32 %v4417_v15, %v4382_v37  ;;  %v4450_v30 = vadd.f32 %v4418_v57, %v4273_v23  ;;  %v4421_v23 = vld [vmem:[%s18274_s30 + $0xf8] sm:$0xff]  ;;  %s24798_s30 = smov 127  }
 0x4c7   : > { %24310 = vst [vmem:[#allocation172_spill] sm:$0xff] %v19083_v48  ;;  %v4451_v36 = vadd.f32 %v4419_v62, %v4275_v7  ;;  %v19099_v43 = vrot.slane %v19083_v48, %v18281_v33  ;;  %v19103_v32 = vadd.f32 %v4420_v35, %v4386_v63  ;;  %v4388_v62 = vadd.f32 %v18440_v53, %v4137_v11 }
 0x4c8   : > { %24311 = vst [vmem:[#allocation173_spill] sm:$0xff] %v19087_v29  ;;  %24312 = vst [vmem:[#allocation174_spill] sm:$0xff] %v19091_v27  ;;  %v4720_v27 = vcombine.low %v18888_v3, %v4449_v9  ;;  %v4721_v25 = vcombine.high %v18888_v3, %v4449_v9  ;;  %v19115_v57 = vrot.slane %v18544_v21, %v18281_v33 }
 0x4c9   : > { %24313 = vst [vmem:[#allocation175_spill] sm:$0xff] %v19099_v43  ;;  %v4754_v45 = vcombine.low %v4450_v30, %v4451_v36  ;;  %v4755_v37 = vcombine.high %v4450_v30, %v4451_v36  ;;  %v19125_v53 = vadd.f32 %v4421_v23, %v4388_v62  ;;  %v19131_v11 = vrot.slane %v18547_v4, %v18281_v33 }
 0x4ca   : > { %v4742_v35 = vrot.slane %v4720_v27, %v18281_v33  ;;  %v4749_v63 = vrot.slane %v4721_v25, %v18281_v33  ;;  %v24314_v27 = vrot.slane %v18360_v22, 4 }
 0x4cb   : > { %v19120_v3 = vrot.slane %v4754_v45, %v18281_v33  ;;  %v19123_v9 = vrot.slane %v4755_v37, %v18281_v33 }
 0x4cc   : > { %v19136_v36 = vadd.f32 %v24314_v27, %v18360_v22  ;;  %v19138_v25 = vcombine.low %v4728_v46, %v4742_v35  ;;  %v19140_v45 = vcombine.high %v4728_v46, %v4742_v35  ;;  %v19142_v37 = vcombine.low %v4735_v13, %v4749_v63 }
 0x4cd   : > { %v19144_v23 = vcombine.high %v4735_v13, %v4749_v63  ;;  %v14469_v62 = vcombine.low %v4742_v35, %v4742_v35  ;;  %v14470_v24 = vcombine.high %v4742_v35, %v4742_v35  ;;  %v14471_v1 = vcombine.low %v4749_v63, %v4749_v63 }
 0x4ce   : > { %24315 = vst [vmem:[#allocation176_spill] sm:$0xff] %v19138_v25  ;;  %24316 = vst [vmem:[#allocation177_spill] sm:$0xff] %v19140_v45  ;;  %v14472_v30 = vcombine.high %v4749_v63, %v4749_v63  ;;  %v5237_v15 = vrot.slane %v19138_v25, %v18281_v33  ;;  %v5254_v7 = vrot.slane %v19140_v45, %v18281_v33 }
 0x4cf   : > { %24317 = vst [vmem:[#allocation178_spill] sm:$0xff] %v19142_v37  ;;  %24318 = vst [vmem:[#allocation179_spill] sm:$0xff] %v19144_v23  ;;  %v19152_v22 = vrot.slane %v19142_v37, %v18281_v33  ;;  %v19156_v46 = vrot.slane %v19144_v23, %v18281_v33  ;;  %v5244_v13 = vrot.slane %v14469_v62, %v18281_v33 }
 0x4d0   : > { %v5261_v35 = vrot.slane %v14470_v24, %v18281_v33  ;;  %v5278_v63 = vrot.slane %v14471_v1, %v18281_v33  ;;  %v19162_v27 = vrot.slane %v14472_v30, %v18281_v33  ;;  %v5245_v21 = vcombine.high %v5237_v15, %v5237_v15 }
 0x4d1   : > { %24319 = vst [vmem:[#allocation180_spill] sm:$0xff] %v19156_v46  ;;  %v5262_v48 = vcombine.high %v5254_v7, %v5254_v7  ;;  %v5246_v4 = vcombine.high %v5244_v13, %v5244_v13  ;;  %v6167_v24 = vsel %vm5494_vm5, %v5237_v15, 0.0  ;;  %v6181_v30 = vsel %vm5494_vm5, %v5244_v13, 0.0 }
 0x4d2   : > { %24320 = vst [vmem:[#allocation181_spill] sm:$0xff] %v19162_v27  ;;  %v5263_v19 = vcombine.high %v5261_v35, %v5261_v35  ;;  %v5280_v20 = vcombine.high %v5278_v63, %v5278_v63  ;;  %v19172_v1 = vsel %vm5494_vm5, %v5245_v21, 0.0  ;;  %v6195_v58 = vsel %vm5494_vm5, %v5254_v7, 0.0 }
 0x4d3   : > { %24321 = vst [vmem:[#allocation182_spill] sm:$0xff] %v19172_v1  ;;  %v6168_v41 = vrot.slane %v6167_v24, 4  ;;  %v6182_v60 = vrot.slane %v6181_v30, 4  ;;  %v6188_v43 = vsel %vm5494_vm5, %v5246_v4, 0.0  ;;  %v6196_v47 = vrot.slane %v6195_v58, 4 }
 0x4d4   : > { %v6189_v46 = vrot.slane %v6188_v43, 4  ;;  %v19179_v54 = vsel %vm5494_vm5, %v5262_v48, 0.0  ;;  %v6209_v15 = vsel %vm5494_vm5, %v5261_v35, 0.0  ;;  %v6216_v29 = vsel %vm5494_vm5, %v5263_v19, 0.0 }
 0x4d5   : > { %v19182_v62 = vadd.f32 %v6168_v41, %v6167_v24  ;;  %v6183_v21 = vadd.f32 %v6182_v60, %v6181_v30  ;;  %v6210_v2 = vrot.slane %v6209_v15, 4  ;;  %v19187_v42 = vadd.f32 %v6196_v47, %v6195_v58 }
 0x4d6   : > { %v19185_v7 = vadd.f32 %v6189_v46, %v6188_v43  ;;  %v19192_v4 = vsel %vm5494_vm5, %v19152_v22, 0.0  ;;  %v6217_v39 = vrot.slane %v6216_v29, 4  ;;  %v6237_v35 = vsel %vm5494_vm5, %v5278_v63, 0.0 }
 0x4d7   : > { %24322 = vst [vmem:[#allocation183_spill] sm:$0xff] %v19182_v62  ;;  %24324 = vst [vmem:[#allocation185_spill] sm:$0xff] %v19187_v42  ;;  %v6184_v48 = vrot.slane %v6183_v21, 2  ;;  %v6211_v1 = vadd.f32 %v6210_v2, %v6209_v15  ;;  %v19198_v43 = vsel %vm5494_vm5, %v5280_v20, 0.0  ;;  %v19202_v58 = vsel %vm5494_vm5, %v19162_v27, 0.0 }
 0x4d8   : > { %24323 = vst [vmem:[#allocation184_spill] sm:$0xff] %v19185_v7  ;;  %24325 = vst [vmem:[#allocation186_spill] sm:$0xff] %v19192_v4  ;;  %v19206_v46 = vadd.f32 %v6217_v39, %v6216_v29  ;;  %v6238_v2 = vrot.slane %v6237_v35, 4  ;;  %v6415_v63 = vmul.f32 %v19138_v25, %v19138_v25  ;;  %v6416_v20 = vmul.f32 %v19140_v45, %v19140_v45 }
 0x4d9   : > { %24326 = vst [vmem:[#allocation187_spill] sm:$0xff] %v19198_v43  ;;  %24327 = vst [vmem:[#allocation188_spill] sm:$0xff] %v19202_v58  ;;  %v19204_v19 = vadd.f32 %v6184_v48, %v6183_v21  ;;  %v6212_v47 = vrot.slane %v6211_v1, 2  ;;  %v6417_v39 = vmul.f32 %v19142_v37, %v19142_v37  ;;  %v6418_v29 = vmul.f32 %v19144_v23, %v19144_v23 }
 0x4da   : > { %24329 = vst [vmem:[#allocation190_spill] sm:$0xff] %v19206_v46  ;;  %v19217_v21 = vadd.f32 %v6238_v2, %v6237_v35  ;;  %v6863_v48 = vcombine.high %v6415_v63, %v6415_v63  ;;  %v19224_v30 = vrot.slane %v6415_v63, %v18281_v33  ;;  %v6880_v24 = vcombine.high %v6416_v20, %v6416_v20 }
 0x4db   : > { %24328 = vst [vmem:[#allocation189_spill] sm:$0xff] %v19204_v19  ;;  %v19214_v15 = vadd.f32 %v6212_v47, %v6211_v1  ;;  %v19227_v60 = vrot.slane %v6416_v20, %v18281_v33  ;;  %v6897_v1 = vcombine.high %v6417_v39, %v6417_v39  ;;  %v19230_v47 = vrot.slane %v6417_v39, %v18281_v33 }
 0x4dc   : > { %24331 = vst [vmem:[#allocation192_spill] sm:$0xff] %v19217_v21  ;;  %24332 = vst [vmem:[#allocation193_spill] sm:$0xff] %v19224_v30  ;;  %v4756_v35 = vcombine.low %v19103_v32, %v19125_v53  ;;  %v19235_v2 = vrot.slane %v6863_v48, %v18281_v33  ;;  %v19240_v63 = vrot.slane %v6880_v24, %v18281_v33  ;;  %v19261_v20 = vsel %vm5494_vm5, %v19224_v30, 0.0 }
 0x4dd   : > { %24330 = vst [vmem:[#allocation191_spill] sm:$0xff] %v19214_v15  ;;  %24333 = vst [vmem:[#allocation194_spill] sm:$0xff] %v19227_v60  ;;  %v6914_v13 = vcombine.high %v6418_v29, %v6418_v29  ;;  %v19245_v23 = vrot.slane %v6897_v1, %v18281_v33  ;;  %v19250_v37 = vrot.slane %v6418_v29, %v18281_v33  ;;  %v19266_v39 = vsel %vm5494_vm5, %v19227_v60, 0.0 }
 0x4de   : > { %24334 = vst [vmem:[#allocation195_spill] sm:$0xff] %v19230_v47  ;;  %24335 = vst [vmem:[#allocation196_spill] sm:$0xff] %v19235_v2  ;;  %v4757_v29 = vcombine.high %v19103_v32, %v19125_v53  ;;  %v4778_v48 = vrot.slane %v4756_v35, %v18281_v33  ;;  %v5505_v45 = vrot.slane %v19136_v36, 2  ;;  %v24342_v25 = vrot.slane %v18373_v10, 4 }
 0x4df   : > { %24336 = vst [vmem:[#allocation197_spill] sm:$0xff] %v19240_v63  ;;  %24337 = vst [vmem:[#allocation198_spill] sm:$0xff] %v19245_v23  ;;  %v19257_v41 = vrot.slane %v6914_v13, %v18281_v33  ;;  %v4956_v13 = vcombine.high %v19131_v11, %v19131_v11  ;;  %v24345_v2 = vcombine.high %v18332_v34, %v18332_v34 }
 0x4e0   : > { %24338 = vst [vmem:[#allocation199_spill] sm:$0xff] %v19250_v37  ;;  %24340 = vst [vmem:[#allocation201_spill] sm:$0xff] %v19261_v20  ;;  %v5532_v1 = vadd.f32 %v24342_v25, %v18373_v10  ;;  %v19279_v20 = vrot.slane %v4757_v29, %v18281_v33  ;;  %v19282_v63 = vcombine.low %v19120_v3, %v4778_v48 }
 0x4e1   : > { %24339 = vst [vmem:[#allocation200_spill] sm:$0xff] %v19257_v41  ;;  %24341 = vst [vmem:[#allocation202_spill] sm:$0xff] %v19266_v39  ;;  %v19285_v32 = vcombine.high %v19120_v3, %v4778_v48  ;;  %v14473_v53 = vcombine.low %v4778_v48, %v4778_v48  ;;  %v14474_v35 = vcombine.high %v4778_v48, %v4778_v48  ;;  %v5558_v41 = vsel %vm5494_vm5, %v24345_v2, 0.0 }
 0x4e2   : > { %24343 = vst [vmem:[#allocation203_spill] sm:$0xff] %v19282_v63  ;;  %v5506_v24 = vadd.f32 %v5505_v45, %v19136_v36  ;;  %v5533_v39 = vrot.slane %v5532_v1, 2  ;;  %v19294_v10 = vcombine.low %v19123_v9, %v19279_v20  ;;  %v19298_v25 = vcombine.high %v19123_v9, %v19279_v20 }
 0x4e3   : > { %24344 = vst [vmem:[#allocation204_spill] sm:$0xff] %v19285_v32  ;;  %v19302_v3 = vrot.slane %v19282_v63, %v18281_v33  ;;  %v19305_v36 = vrot.slane %v14473_v53, %v18281_v33  ;;  %v19309_v34 = vrot.slane %v19285_v32, %v18281_v33  ;;  %v19312_v45 = vrot.slane %v14474_v35, %v18281_v33 }
 0x4e4   : > { %24346 = vst [vmem:[#allocation205_spill] sm:$0xff] %v19294_v10  ;;  %24347 = vst [vmem:[#allocation206_spill] sm:$0xff] %v19298_v25  ;;  %v14475_v2 = vcombine.low %v19279_v20, %v19279_v20  ;;  %v19322_v29 = vmul.f32 %v19282_v63, %v19282_v63  ;;  %v19326_v53 = vmul.f32 %v19285_v32, %v19285_v32  ;;  %v5507_v47 = vrot.slane %v5506_v24, 1 }
 0x4e5   : > { %24348 = vst [vmem:[#allocation207_spill] sm:$0xff] %v19305_v36  ;;  %v19330_v35 = vmul.f32 %v19294_v10, %v19294_v10  ;;  %v5534_v9 = vadd.f32 %v5533_v39, %v5532_v1  ;;  %v5559_v60 = vrot.slane %v5558_v41, 4  ;;  %v24353_v30 = vcombine.high %v18336_v16, %v18336_v16 }
 0x4e6   : > { %24349 = vst [vmem:[#allocation208_spill] sm:$0xff] %v19322_v29  ;;  %24350 = vst [vmem:[#allocation209_spill] sm:$0xff] %v19326_v53  ;;  %v19333_v23 = vrot.slane %v14475_v2, %v18281_v33  ;;  %v19339_v63 = vrot.slane %v19322_v29, %v18281_v33  ;;  %v5508_v2 = vadd.f32 %v5507_v47, %v5506_v24 }
 0x4e7   : > { %24351 = vst [vmem:[#allocation210_spill] sm:$0xff] %v19330_v35  ;;  %v5586_v35 = vsel %vm5494_vm5, %v24353_v30, 0.0  ;;  %v5535_v37 = vrot.slane %v5534_v9, 1  ;;  %v5560_v58 = vadd.f32 %v5559_v60, %v5558_v41  ;;  %v24354_v1 = vcombine.high %v18555_v18, %v18555_v18 }
 0x4e8   : > { %24352 = vst [vmem:[#allocation211_spill] sm:$0xff] %v19339_v63  ;;  %v5587_v39 = vrot.slane %v5586_v35, 4  ;;  %v24355_v29 = vcombine.high %v18559_v8, %v18559_v8  ;;  %v24356_v32 = vcombine.high %v19115_v57, %v19115_v57  ;;  %v5698_v30 = vsel %vm5494_vm5, %v4956_v13, 0.0 }
 0x4e9   : > { %v5614_v48 = vsel %vm5494_vm5, %v24354_v1, 0.0  ;;  %v5536_v47 = vadd.f32 %v5535_v37, %v5534_v9  ;;  %v5561_v41 = vrot.slane %v5560_v58, 2  ;;  %v5699_v21 = vrot.slane %v5698_v30, 4 }
 0x4ea   : > { %v5642_v63 = vsel %vm5494_vm5, %v24355_v29, 0.0  ;;  %v5670_v16 = vsel %vm5494_vm5, %v24356_v32, 0.0  ;;  %v5588_v60 = vadd.f32 %v5587_v39, %v5586_v35  ;;  %v5615_v24 = vrot.slane %v5614_v48, 4 }
 0x4eb   : > { %v5643_v53 = vrot.slane %v5642_v63, 4  ;;  %v5671_v18 = vrot.slane %v5670_v16, 4  ;;  %v5562_v1 = vadd.f32 %v5561_v41, %v5560_v58  ;;  %v5700_v42 = vadd.f32 %v5699_v21, %v5698_v30 }
 0x4ec   : > { %v5589_v15 = vrot.slane %v5588_v60, 2  ;;  %v5616_v19 = vadd.f32 %v5615_v24, %v5614_v48  ;;  %v8165_v21 = vsel %vm8151_vm6, %v5536_v47, %v5508_v2 }
 0x4ed   : > { %v5644_v29 = vadd.f32 %v5643_v53, %v5642_v63  ;;  %v5672_v4 = vadd.f32 %v5671_v18, %v5670_v16  ;;  %v5563_v62 = vrot.slane %v5562_v1, 1  ;;  %v5701_v9 = vrot.slane %v5700_v42, 2  ;;  %v24358_v18 = vld [vmem:[#allocation49_spill] sm:$0xff] }
 0x4ee   : > { %v5590_v32 = vadd.f32 %v5589_v15, %v5588_v60  ;;  %v5617_v36 = vrot.slane %v5616_v19, 2  ;;  %v4923_v15 = vcombine.high %v18573_v26, %v18573_v26 }
 0x4ef   : > { %v5645_v37 = vrot.slane %v5644_v29, 2  ;;  %v5673_v13 = vrot.slane %v5672_v4, 2  ;;  %v5564_v35 = vadd.f32 %v5563_v62, %v5562_v1  ;;  %v5702_v48 = vadd.f32 %v5701_v9, %v5700_v42 }
 0x4f0   : > { %v5591_v39 = vrot.slane %v5590_v32, 1  ;;  %v5618_v27 = vadd.f32 %v5617_v36, %v5616_v19  ;;  %v24357_v42 = vcombine.high %v18534_v0, %v18534_v0  ;;  %v24359_v1 = vrot.slane %v24358_v18, 2 }
 0x4f1   : > { %v5646_v58 = vadd.f32 %v5645_v37, %v5644_v29  ;;  %v5674_v41 = vadd.f32 %v5673_v13, %v5672_v4  ;;  %v5703_v60 = vrot.slane %v5702_v48, 1  ;;  %v8166_v24 = vsel %vm8153_vm7, %v5564_v35, %v8165_v21  ;;  %v24360_v37 = vld [vmem:[#allocation51_spill] sm:$0xff]  ;;  %v24366_v21 = vld [vmem:[#allocation97_spill] sm:$0xff] }
 0x4f2   : > { %v5592_v63 = vadd.f32 %v5591_v39, %v5590_v32  ;;  %v5619_v53 = vrot.slane %v5618_v27, 1  ;;  %v4940_v4 = vcombine.high %v18576_v44, %v18576_v44  ;;  %v19371_v36 = vrot.slane %v24357_v42, %v18281_v33  ;;  %v24362_v35 = vld [vmem:[#allocation55_spill] sm:$0xff] }
 0x4f3   : > { %v5647_v16 = vrot.slane %v5646_v58, 1  ;;  %v5675_v30 = vrot.slane %v5674_v41, 1  ;;  %v5704_v26 = vadd.f32 %v5703_v60, %v5702_v48  ;;  %v5520_v29 = vadd.f32 %v24359_v1, %v24358_v18  ;;  %v24364_v48 = vld [vmem:[#allocation54_spill] sm:$0xff] }
 0x4f4   : > { %v5620_v62 = vadd.f32 %v5619_v53, %v5618_v27  ;;  %v8167_v19 = vsel %vm8155_vm8, %v5592_v63, %v8166_v24  ;;  %v4957_v32 = vcombine.high %v19371_v36, %v19371_v36  ;;  %v24361_v13 = vrot.slane %v24360_v37, 2 }
 0x4f5   : > { %v5648_v2 = vadd.f32 %v5647_v16, %v5646_v58  ;;  %v5676_v47 = vadd.f32 %v5675_v30, %v5674_v41  ;;  %v24363_v0 = vrot.slane %v24362_v35, 4  ;;  %v5521_v41 = vrot.slane %v5520_v29, 1 }
 0x4f6   : > { %v8168_v27 = vsel %vm8157_vm9, %v5620_v62, %v8167_v19  ;;  %v5548_v9 = vadd.f32 %v24361_v13, %v24360_v37  ;;  %v24365_v63 = vcombine.high %v24364_v48, %v24364_v48  ;;  %v24367_v16 = vcombine.high %v24366_v21, %v24366_v21 }
 0x4f7   : > { %v5574_v39 = vadd.f32 %v24363_v0, %v24362_v35  ;;  %v8169_v58 = vsel %vm8159_vm10, %v5648_v2, %v8168_v27  ;;  %v5522_v18 = vadd.f32 %v5521_v41, %v5520_v29  ;;  %v5656_v1 = vsel %vm5494_vm5, %v4923_v15, 0.0 }
 0x4f8   : > { %v5600_v53 = vsel %vm5494_vm5, %v24365_v63, 0.0  ;;  %v5628_v30 = vsel %vm5494_vm5, %v24367_v16, 0.0  ;;  %v8170_v60 = vsel %vm8161_vm11, %v5676_v47, %v8169_v58  ;;  %v5549_v24 = vrot.slane %v5548_v9, 1  ;;  %v24368_v47 = vld [vmem:[#allocation75_spill] sm:$0xff] }
 0x4f9   : > { %v5575_v62 = vrot.slane %v5574_v39, 2  ;;  %v5601_v19 = vrot.slane %v5600_v53, 4  ;;  %v8171_v42 = vsel %vm8163_vm12, %v5704_v26, %v8170_v60  ;;  %v5629_v2 = vrot.slane %v5628_v30, 4 }
 0x4fa   : > { %8350 = vmatprep.mubr.f32.mxu0 %v8171_v42  ;;  %v5550_v27 = vadd.f32 %v5549_v24, %v5548_v9  ;;  %v5657_v35 = vrot.slane %v5656_v1, 4  ;;  %v5684_v48 = vsel %vm5494_vm5, %v4940_v4, 0.0  ;;  %v5712_v63 = vsel %vm5494_vm5, %v4957_v32, 0.0 }
 0x4fb   : > { %v5576_v37 = vadd.f32 %v5575_v62, %v5574_v39  ;;  %v5602_v13 = vadd.f32 %v5601_v19, %v5600_v53  ;;  %v5630_v0 = vadd.f32 %v5629_v2, %v5628_v30  ;;  %v5500_v58 = vrot.slane %v24368_v47, 1  ;;  %v24369_v62 = vld [vmem:[#allocation77_spill] sm:$0xff] }
 0x4fc   : > { %v5658_v43 = vadd.f32 %v5657_v35, %v5656_v1  ;;  %v5685_v26 = vrot.slane %v5684_v48, 4  ;;  %v5713_v41 = vrot.slane %v5712_v63, 4  ;;  %v8179_v15 = vsel %vm8151_vm6, %v5550_v27, %v5522_v18  ;;  %v24370_v19 = vld [vmem:[#allocation53_spill] sm:$0xff] }
 0x4fd   : > { %v5577_v21 = vrot.slane %v5576_v37, 1  ;;  %v5603_v16 = vrot.slane %v5602_v13, 2  ;;  %v5631_v29 = vrot.slane %v5630_v0, 2  ;;  %v5501_v9 = vadd.f32 %v5500_v58, %v24368_v47 }
 0x4fe   : > { %v5659_v60 = vrot.slane %v5658_v43, 2  ;;  %v5686_v30 = vadd.f32 %v5685_v26, %v5684_v48  ;;  %v5714_v4 = vadd.f32 %v5713_v41, %v5712_v63  ;;  %v5528_v32 = vrot.slane %v24369_v62, 1  ;;  %v24372_v63 = vld [vmem:[#allocation62_spill] sm:$0xff] }
 0x4ff   : > { %v5578_v39 = vadd.f32 %v5577_v21, %v5576_v37  ;;  %v5604_v53 = vadd.f32 %v5603_v16, %v5602_v13  ;;  %v5632_v24 = vadd.f32 %v5631_v29, %v5630_v0  ;;  %v24371_v42 = vrot.slane %v24370_v19, 2  ;;  %v24373_v29 = vld [vmem:[#allocation99_spill] sm:$0xff] }
 0x500   : > { %v5660_v35 = vadd.f32 %v5659_v60, %v5658_v43  ;;  %v5687_v46 = vrot.slane %v5686_v30, 2  ;;  %v5715_v27 = vrot.slane %v5714_v4, 2  ;;  %v5529_v37 = vadd.f32 %v5528_v32, %v24369_v62 }
 0x501   : > { %v5555_v2 = vadd.f32 %v24371_v42, %v24370_v19  ;;  %v5605_v1 = vrot.slane %v5604_v53, 1  ;;  %v8180_v7 = vsel %vm8153_vm7, %v5578_v39, %v8179_v15  ;;  %v5633_v18 = vrot.slane %v5632_v24, 1 }
 0x502   : > { %v5661_v48 = vrot.slane %v5660_v35, 1  ;;  %v5688_v0 = vadd.f32 %v5687_v46, %v5686_v30  ;;  %v5582_v58 = vrot.slane %v24372_v63, 2  ;;  %v5716_v16 = vadd.f32 %v5715_v27, %v5714_v4 }
 0x503   : > { %v5556_v13 = vrot.slane %v5555_v2, 1  ;;  %v5606_v47 = vadd.f32 %v5605_v1, %v5604_v53  ;;  %v5634_v21 = vadd.f32 %v5633_v18, %v5632_v24  ;;  %v24374_v41 = vrot.slane %v24373_v29, 4 }
 0x504   : > { %v5662_v60 = vadd.f32 %v5661_v48, %v5660_v35  ;;  %v5689_v19 = vrot.slane %v5688_v0, 1  ;;  %v5583_v39 = vadd.f32 %v5582_v58, %v24372_v63  ;;  %v5717_v62 = vrot.slane %v5716_v16, 1 }
 0x505   : > { %v5557_v26 = vadd.f32 %v5556_v13, %v5555_v2  ;;  %v5609_v43 = vadd.f32 %v24374_v41, %v24373_v29  ;;  %v8181_v15 = vsel %vm8155_vm8, %v5606_v47, %v8180_v7  ;;  %v5635_v46 = vsel %vm5494_vm5, %v18559_v8, 0.0 }
 0x506   : > { %v8182_v53 = vsel %vm8157_vm9, %v5634_v21, %v8181_v15  ;;  %v5690_v30 = vadd.f32 %v5689_v19, %v5688_v0  ;;  %v5584_v4 = vrot.slane %v5583_v39, 1  ;;  %v5636_v42 = vrot.slane %v5635_v46, 4 }
 0x507   : > { %v5610_v32 = vrot.slane %v5609_v43, 2  ;;  %v8183_v24 = vsel %vm8159_vm10, %v5662_v60, %v8182_v53  ;;  %v5718_v2 = vadd.f32 %v5717_v62, %v5716_v16  ;;  %v5663_v35 = vsel %vm5494_vm5, %v19115_v57, 0.0  ;;  %v24375_v57 = vld [vmem:[#allocation65_spill] sm:$0xff]  ;;  %v24376_v60 = vld [vmem:[#allocation64_spill] sm:$0xff] }
 0x508   : > { %v5691_v7 = vsel %vm5494_vm5, %v19131_v11, 0.0  ;;  %v8184_v18 = vsel %vm8161_vm11, %v5690_v30, %v8183_v24  ;;  %v5585_v27 = vadd.f32 %v5584_v4, %v5583_v39  ;;  %v5637_v13 = vadd.f32 %v5636_v42, %v5635_v46  ;;  %v24379_v30 = vld [vmem:[#allocation101_spill] sm:$0xff] }
 0x509   : > { %v5611_v1 = vadd.f32 %v5610_v32, %v5609_v43  ;;  %v5664_v47 = vrot.slane %v5663_v35, 4  ;;  %v8185_v8 = vsel %vm8163_vm12, %v5718_v2, %v8184_v18  ;;  %v5692_v0 = vrot.slane %v5691_v7, 4 }
 0x50a   : > { %v8152_v63 = vsel %vm8151_vm6, %v5529_v37, %v5501_v9  ;;  %8435 = vmatprep.mubr.f32.mxu1 %v8185_v8  ;;  %v5638_v58 = vrot.slane %v5637_v13, 2  ;;  %v5570_v29 = vrot.slane %v24375_v57, 1  ;;  %v24377_v19 = vrot.slane %v24376_v60, 2  ;;  %v24378_v9 = vld [vmem:[#allocation102_spill] sm:$0xff] }
 0x50b   : > { %v5612_v48 = vrot.slane %v5611_v1, 1  ;;  %v5665_v21 = vadd.f32 %v5664_v47, %v5663_v35  ;;  %v8154_v16 = vsel %vm8153_vm7, %v5557_v26, %v8152_v63  ;;  %v5693_v11 = vadd.f32 %v5692_v0, %v5691_v7 }
 0x50c   : > { %v8156_v43 = vsel %vm8155_vm8, %v5585_v27, %v8154_v16  ;;  %v5597_v15 = vadd.f32 %v24377_v19, %v24376_v60  ;;  %v5639_v39 = vadd.f32 %v5638_v58, %v5637_v13  ;;  %v5571_v53 = vadd.f32 %v5570_v29, %v24375_v57 }
 0x50d   : > { %v5613_v41 = vadd.f32 %v5612_v48, %v5611_v1  ;;  %v5666_v62 = vrot.slane %v5665_v21, 2  ;;  %v5624_v37 = vrot.slane %v24378_v9, 2  ;;  %v5694_v32 = vrot.slane %v5693_v11, 2 }
 0x50e   : > { %v5598_v26 = vrot.slane %v5597_v15, 1  ;;  %v24380_v24 = vrot.slane %v24379_v30, 4  ;;  %v5640_v42 = vrot.slane %v5639_v39, 1  ;;  %v5677_v35 = vsel %vm5494_vm5, %v18576_v44, 0.0  ;;  %v24382_v44 = vld [vmem:[#allocation70_spill] sm:$0xff] }
 0x50f   : > { %v8158_v46 = vsel %vm8157_vm9, %v5613_v41, %v8156_v43  ;;  %v5667_v2 = vadd.f32 %v5666_v62, %v5665_v21  ;;  %v5625_v1 = vadd.f32 %v5624_v37, %v24378_v9  ;;  %v5695_v7 = vadd.f32 %v5694_v32, %v5693_v11  ;;  %v24381_v43 = vld [vmem:[#allocation68_spill] sm:$0xff] }
 0x510   : > { %v5651_v4 = vadd.f32 %v24380_v24, %v24379_v30  ;;  %v5599_v18 = vadd.f32 %v5598_v26, %v5597_v15  ;;  %v5678_v13 = vrot.slane %v5677_v35, 4  ;;  %v5641_v47 = vadd.f32 %v5640_v42, %v5639_v39  ;;  %v24383_v42 = vld [vmem:[#allocation109_spill] sm:$0xff] }
 0x511   : > { %v5668_v8 = vrot.slane %v5667_v2, 1  ;;  %v5626_v48 = vrot.slane %v5625_v1, 1  ;;  %v5705_v0 = vsel %vm5494_vm5, %v19371_v36, 0.0  ;;  %v5696_v63 = vrot.slane %v5695_v7, 1 }
 0x512   : > { %v5652_v27 = vrot.slane %v5651_v4, 2  ;;  %v5679_v16 = vadd.f32 %v5678_v13, %v5677_v35  ;;  %v5706_v57 = vrot.slane %v5705_v0, 4  ;;  %v8160_v29 = vsel %vm8159_vm10, %v5641_v47, %v8158_v46  ;;  %v24385_v13 = vld [vmem:[#allocation14_spill] sm:$0xff] }
 0x513   : > { %v5669_v21 = vadd.f32 %v5668_v8, %v5667_v2  ;;  %v5627_v41 = vadd.f32 %v5626_v48, %v5625_v1  ;;  %v8172_v11 = vsel %vm8151_vm6, %v24382_v44, %v24381_v43  ;;  %v5697_v60 = vadd.f32 %v5696_v63, %v5695_v7  ;;  %v24387_v48 = vld [vmem:[#allocation16_spill] sm:$0xff]  ;;  %v24389_v44 = vld [vmem:[#allocation107_spill] sm:$0xff] }
 0x514   : > { %v5653_v58 = vadd.f32 %v5652_v27, %v5651_v4  ;;  %v5680_v15 = vrot.slane %v5679_v16, 2  ;;  %v5707_v39 = vadd.f32 %v5706_v57, %v5705_v0  ;;  %v8173_v36 = vsel %vm8153_vm7, %v5571_v53, %v8172_v11 }
 0x515   : > { %v8162_v62 = vsel %vm8161_vm11, %v5669_v21, %v8160_v29  ;;  %v5041_v9 = vcombine.high %v18815_v49, %v18815_v49  ;;  %v5058_v37 = vcombine.high %v18822_v12, %v18822_v12  ;;  %v8174_v24 = vsel %vm8155_vm8, %v5599_v18, %v8173_v36 }
 0x516   : > { %v5654_v19 = vrot.slane %v5653_v58, 1  ;;  %v8164_v32 = vsel %vm8163_vm12, %v5697_v60, %v8162_v62  ;;  %v5681_v26 = vadd.f32 %v5680_v15, %v5679_v16  ;;  %v5708_v30 = vrot.slane %v5707_v39, 2  ;;  %v24391_v62 = vld [vmem:[#allocation18_spill] sm:$0xff] }
 0x517   : > { %8351 = vmatmul.mubr.f32.vlgmr.msra.gmra.mrb[48].mxu0 %v8164_v32  ;;  %v19456_v4 = vrot.slane %v18803_v31, %v18281_v33  ;;  %v19460_v53 = vrot.slane %v18806_v28, %v18281_v33  ;;  %v24384_v2 = vrot.slane %v24383_v42, 4  ;;  %v8175_v27 = vsel %vm8157_vm9, %v5627_v41, %v8174_v24  ;;  %v24392_v24 = vld [vmem:[#allocation20_spill] sm:$0xff] }
 0x518   : > { %v5655_v46 = vadd.f32 %v5654_v19, %v5653_v58  ;;  %v5682_v35 = vrot.slane %v5681_v26, 1  ;;  %v5709_v7 = vadd.f32 %v5708_v30, %v5707_v39  ;;  %15168 = vmatpush3.bf16.msra.mxu0 %v24385_v13  ;;  %v24386_v18 = vrot.slane %v18683_v61, 4 }
 0x519   : > { %v5728_v1 = vadd.f32 %v24384_v2, %v24383_v42  ;;  %15170 = vmatprep.subr.bf16.mxu0 %v24387_v48  ;;  %v5075_v0 = vcombine.high %v19456_v4, %v19456_v4  ;;  %v5092_v63 = vcombine.high %v19460_v53, %v19460_v53  ;;  %v24388_v29 = vcombine.high %v18656_v6, %v18656_v6 }
 0x51a   : > { %v5756_v47 = vadd.f32 %v24386_v18, %v18683_v61  ;;  %v8176_v8 = vsel %vm8159_vm10, %v5655_v46, %v8175_v27  ;;  %v5683_v16 = vadd.f32 %v5682_v35, %v5681_v26  ;;  %v5710_v57 = vrot.slane %v5709_v7, 1  ;;  %v24393_v18 = vld [vmem:[#allocation15_spill] sm:$0xff] }
 0x51b   : > { %v5729_v58 = vrot.slane %v5728_v1, 2  ;;  %v5782_v41 = vsel %vm5494_vm5, %v24388_v29, 0.0  ;;  %v24390_v11 = vcombine.high %v24389_v44, %v24389_v44  ;;  %v5838_v19 = vsel %vm5494_vm5, %v5041_v9, 0.0 }
 0x51c   : > { %v5757_v21 = vrot.slane %v5756_v47, 2  ;;  %v5783_v43 = vrot.slane %v5782_v41, 4  ;;  %v5711_v15 = vadd.f32 %v5710_v57, %v5709_v7  ;;  %v8177_v39 = vsel %vm8161_vm11, %v5683_v16, %v8176_v8  ;;  %15172 = vmatpush3.bf16.msra.mxu0 %v24391_v62  ;;  %v24395_v16 = vld [vmem:[#allocation17_spill] sm:$0xff] }
 0x51d   : > { %v5730_v61 = vadd.f32 %v5729_v58, %v5728_v1  ;;  %v5810_v60 = vsel %vm5494_vm5, %v24390_v11, 0.0  ;;  %v5839_v26 = vrot.slane %v5838_v19, 4  ;;  %v5866_v30 = vsel %vm5494_vm5, %v5058_v37, 0.0  ;;  %15174 = vmatprep.subr.bf16.mxu0 %v24392_v24  ;;  %v24394_v37 = vld [vmem:[#allocation22_spill] sm:$0xff] }
 0x51e   : > { %v5758_v36 = vadd.f32 %v5757_v21, %v5756_v47  ;;  %v5811_v32 = vrot.slane %v5810_v60, 4  ;;  %v5784_v6 = vadd.f32 %v5783_v43, %v5782_v41  ;;  %v8178_v42 = vsel %vm8163_vm12, %v5711_v15, %v8177_v39 }
 0x51f   : > { %v5731_v46 = vrot.slane %v5730_v61, 1  ;;  %v5867_v35 = vrot.slane %v5866_v30, 4  ;;  %8436 = vmatmul.mubr.f32.vlgmr.msra.gmra.mrb[48].mxu1 %v8178_v42  ;;  %v5840_v27 = vadd.f32 %v5839_v26, %v5838_v19  ;;  %v5894_v13 = vsel %vm5494_vm5, %v5075_v0, 0.0  ;;  %v24398_v26 = vld [vmem:[#allocation26_spill] sm:$0xff] }
 0x520   : > { %v5759_v2 = vrot.slane %v5758_v36, 1  ;;  %v5812_v1 = vadd.f32 %v5811_v32, %v5810_v60  ;;  %v5785_v7 = vrot.slane %v5784_v6, 2  ;;  %15200 = vmatpush3.bf16.msra.mxu1 %v24393_v18  ;;  %v5895_v58 = vrot.slane %v5894_v13, 4  ;;  %15176 = vmatpush3.bf16.msra.mxu0 %v24394_v37  ;;  %v24399_v42 = vld [vmem:[#allocation130_spill] sm:$0xff] }
 0x521   : > { %v5732_v9 = vadd.f32 %v5731_v46, %v5730_v61  ;;  %v5868_v48 = vadd.f32 %v5867_v35, %v5866_v30  ;;  %15202 = vmatprep.subr.bf16.mxu1 %v24395_v16  ;;  %v5841_v21 = vrot.slane %v5840_v27, 2  ;;  %v5922_v29 = vsel %vm5494_vm5, %v5092_v63, 0.0  ;;  %v24396_v61 = vld [vmem:[#allocation24_spill] sm:$0xff]  ;;  %v24401_v35 = vld [vmem:[#allocation111_spill] sm:$0xff] }
 0x522   : > { %v5760_v47 = vadd.f32 %v5759_v2, %v5758_v36  ;;  %v5813_v8 = vrot.slane %v5812_v1, 2  ;;  %v5786_v57 = vadd.f32 %v5785_v7, %v5784_v6  ;;  %v5059_v41 = vcombine.high %v18825_v55, %v18825_v55  ;;  %15178 = vmatprep.subr.bf16.mxu0 %v24396_v61  ;;  %v24397_v36 = vld [vmem:[#allocation19_spill] sm:$0xff] }
 0x523   : > { %v5869_v43 = vrot.slane %v5868_v48, 2  ;;  %v5896_v11 = vadd.f32 %v5895_v58, %v5894_v13  ;;  %v5923_v60 = vrot.slane %v5922_v29, 4  ;;  %v5842_v15 = vadd.f32 %v5841_v21, %v5840_v27  ;;  %v24403_v27 = vld [vmem:[#allocation21_spill] sm:$0xff]  ;;  %v24404_v13 = vld [vmem:[#allocation28_spill] sm:$0xff] }
 0x524   : > { %v5814_v0 = vadd.f32 %v5813_v8, %v5812_v1  ;;  %v5787_v19 = vrot.slane %v5786_v57, 1  ;;  %v8193_v39 = vsel %vm8151_vm6, %v5760_v47, %v5732_v9  ;;  %v5076_v62 = vcombine.high %v18829_v51, %v18829_v51  ;;  %15204 = vmatpush3.bf16.msra.mxu1 %v24397_v36  ;;  %15180 = vmatpush3.bf16.msra.mxu0 %v24398_v26  ;;  %v24407_v36 = vld [vmem:[#allocation117_spill] sm:$0xff] }
 0x525   : > { %v5870_v63 = vadd.f32 %v5869_v43, %v5868_v48  ;;  %v5897_v46 = vrot.slane %v5896_v11, 2  ;;  %v5924_v6 = vadd.f32 %v5923_v60, %v5922_v29  ;;  %v5843_v24 = vrot.slane %v5842_v15, 1  ;;  %15206 = vmatprep.subr.bf16.mxu1 %v24403_v27  ;;  %15182 = vmatprep.subr.bf16.mxu0 %v24404_v13  ;;  %v24405_v60 = vld [vmem:[#allocation23_spill] sm:$0xff] }
 0x526   : > { %v5815_v32 = vrot.slane %v5814_v0, 1  ;;  %v5788_v30 = vadd.f32 %v5787_v19, %v5786_v57  ;;  %v24400_v2 = vcombine.high %v24399_v42, %v24399_v42  ;;  %v24402_v9 = vrot.slane %v24401_v35, 2  ;;  %v24406_v19 = vld [vmem:[#allocation31_spill] sm:$0xff]  ;;  %v24412_v42 = vld [vmem:[#allocation108_spill] sm:$0xff] }
 0x527   : > { %v5871_v47 = vrot.slane %v5870_v63, 1  ;;  %v5898_v8 = vadd.f32 %v5897_v46, %v5896_v11  ;;  %v5925_v48 = vrot.slane %v5924_v6, 2  ;;  %v5844_v58 = vadd.f32 %v5843_v24, %v5842_v15 }
 0x528   : > { %v19507_v1 = vrot.slane %v24400_v2, %v18281_v33  ;;  %v5744_v7 = vadd.f32 %v24402_v9, %v24401_v35  ;;  %v5816_v18 = vadd.f32 %v5815_v32, %v5814_v0  ;;  %v8194_v37 = vsel %vm8153_vm7, %v5788_v30, %v8193_v39  ;;  %15208 = vmatpush3.bf16.msra.mxu1 %v24405_v60  ;;  %v24409_v32 = vld [vmem:[#allocation114_spill] sm:$0xff]  ;;  %v24414_v9 = vld [vmem:[#allocation33_spill] sm:$0xff] }
 0x529   : > { %v5872_v21 = vadd.f32 %v5871_v47, %v5870_v63  ;;  %v5899_v29 = vrot.slane %v5898_v8, 1  ;;  %v5926_v61 = vadd.f32 %v5925_v48, %v5924_v6  ;;  %15184 = vmatpush3.bf16.msra.mxu0 %v24406_v19  ;;  %v24408_v15 = vrot.slane %v24407_v36, 2  ;;  %v24411_v63 = vld [vmem:[#allocation25_spill] sm:$0xff] }
 0x52a   : > { %v5093_v16 = vcombine.high %v19507_v1, %v19507_v1  ;;  %v5745_v57 = vrot.slane %v5744_v7, 1  ;;  %v8195_v43 = vsel %vm8155_vm8, %v5816_v18, %v8194_v37  ;;  %v24410_v46 = vrot.slane %v24409_v32, 4  ;;  %15210 = vmatprep.subr.bf16.mxu1 %v24411_v63  ;;  %15186 = vmatprep.subr.bf16.mxu0 %v24414_v9  ;;  %v24415_v18 = vld [vmem:[#allocation135_spill] sm:$0xff]  ;;  %v24422_v9 = vld [vmem:[#allocation32_spill] sm:$0xff] }
 0x52b   : > { %v8196_v0 = vsel %vm8157_vm9, %v5844_v58, %v8195_v43  ;;  %v5772_v39 = vadd.f32 %v24408_v15, %v24407_v36  ;;  %v5900_v6 = vadd.f32 %v5899_v29, %v5898_v8  ;;  %v5927_v30 = vrot.slane %v5926_v61, 1  ;;  %v24418_v29 = vld [vmem:[#allocation36_spill] sm:$0xff]  ;;  %v24419_v36 = vld [vmem:[#allocation29_spill] sm:$0xff]  ;;  %v24420_v15 = vld [vmem:[#allocation38_spill] sm:$0xff] }
 0x52c   : > { %v5746_v11 = vadd.f32 %v5745_v57, %v5744_v7  ;;  %v5798_v26 = vadd.f32 %v24410_v46, %v24409_v32  ;;  %v8197_v24 = vsel %vm8159_vm10, %v5872_v21, %v8196_v0  ;;  %v24413_v2 = vcombine.high %v24412_v42, %v24412_v42  ;;  %v24417_v21 = vld [vmem:[#allocation27_spill] sm:$0xff] }
 0x52d   : > { %v5773_v7 = vrot.slane %v5772_v39, 1  ;;  %v24416_v47 = vcombine.high %v24415_v18, %v24415_v18  ;;  %v5928_v58 = vadd.f32 %v5927_v30, %v5926_v61  ;;  %v8198_v8 = vsel %vm8161_vm11, %v5900_v6, %v8197_v24  ;;  %15212 = vmatpush3.bf16.msra.mxu1 %v24417_v21  ;;  %15188 = vmatpush3.bf16.msra.mxu0 %v24418_v29 }
 0x52e   : > { %v5824_v35 = vsel %vm5494_vm5, %v24413_v2, 0.0  ;;  %v5799_v27 = vrot.slane %v5798_v26, 2  ;;  %v5880_v57 = vsel %vm5494_vm5, %v5059_v41, 0.0  ;;  %15214 = vmatprep.subr.bf16.mxu1 %v24419_v36  ;;  %15190 = vmatprep.subr.bf16.mxu0 %v24420_v15  ;;  %v5908_v46 = vsel %vm5494_vm5, %v5076_v62, 0.0  ;;  %v24421_v2 = vld [vmem:[#allocation110_spill] sm:$0xff] }
 0x52f   : > { %v5825_v13 = vrot.slane %v5824_v35, 4  ;;  %v5852_v48 = vsel %vm5494_vm5, %v24416_v47, 0.0  ;;  %v5774_v43 = vadd.f32 %v5773_v7, %v5772_v39  ;;  %v5881_v0 = vrot.slane %v5880_v57, 4  ;;  %v24423_v7 = vld [vmem:[#allocation40_spill] sm:$0xff] }
 0x530   : > { %v5853_v37 = vrot.slane %v5852_v48, 4  ;;  %v5800_v60 = vadd.f32 %v5799_v27, %v5798_v26  ;;  %v8199_v32 = vsel %vm8163_vm12, %v5928_v58, %v8198_v8  ;;  %v5936_v63 = vsel %vm5494_vm5, %v5093_v16, 0.0  ;;  %v24424_v16 = vld [vmem:[#allocation34_spill] sm:$0xff] }
 0x531   : > { %v5826_v19 = vadd.f32 %v5825_v13, %v5824_v35  ;;  %8355 = vmatprep.mubr.f32.mxu0 %v8199_v32  ;;  %v5882_v30 = vadd.f32 %v5881_v0, %v5880_v57  ;;  %v5909_v24 = vrot.slane %v5908_v46, 4  ;;  %v5937_v26 = vrot.slane %v5936_v63, 4  ;;  %15216 = vmatpush3.bf16.msra.mxu1 %v24422_v9  ;;  %v24426_v57 = vld [vmem:[#allocation112_spill] sm:$0xff]  ;;  %v24427_v32 = vld [vmem:[#allocation37_spill] sm:$0xff] }
 0x532   : > { %v5854_v61 = vadd.f32 %v5853_v37, %v5852_v48  ;;  %v5801_v41 = vrot.slane %v5800_v60, 1  ;;  %v8207_v42 = vsel %vm8151_vm6, %v5774_v43, %v5746_v11  ;;  %v5722_v35 = vrot.slane %v24421_v2, 2  ;;  %15192 = vmatpush3.bf16.msra.mxu0 %v24423_v7  ;;  %15218 = vmatprep.subr.bf16.mxu1 %v24424_v16  ;;  %v24425_v48 = vld [vmem:[#allocation42_spill] sm:$0xff] }
 0x533   : > { %v5827_v6 = vrot.slane %v5826_v19, 2  ;;  %v5883_v62 = vrot.slane %v5882_v30, 2  ;;  %v5910_v47 = vadd.f32 %v5909_v24, %v5908_v46  ;;  %15194 = vmatprep.subr.bf16.mxu0 %v24425_v48  ;;  %v5938_v8 = vadd.f32 %v5937_v26, %v5936_v63  ;;  %v24428_v46 = vld [vmem:[#allocation44_spill] sm:$0xff] }
 0x534   : > { %v5855_v39 = vrot.slane %v5854_v61, 2  ;;  %v5802_v27 = vadd.f32 %v5801_v41, %v5800_v60  ;;  %v5723_v37 = vadd.f32 %v5722_v35, %v24421_v2  ;;  %v5750_v11 = vrot.slane %v24426_v57, 2  ;;  %v24432_v26 = vld [vmem:[#allocation56_spill] sm:$0xff] }
 0x535   : > { %v5828_v13 = vadd.f32 %v5827_v6, %v5826_v19  ;;  %v5884_v29 = vadd.f32 %v5883_v62, %v5882_v30  ;;  %v5911_v43 = vrot.slane %v5910_v47, 2  ;;  %v5939_v60 = vrot.slane %v5938_v8, 2  ;;  %15220 = vmatpush3.bf16.msra.mxu1 %v24427_v32  ;;  %v24429_v6 = vld [vmem:[#allocation113_spill] sm:$0xff]  ;;  %v24431_v30 = vld [vmem:[#allocation39_spill] sm:$0xff] }
 0x536   : > { %v5856_v58 = vadd.f32 %v5855_v39, %v5854_v61  ;;  %v8208_v0 = vsel %vm8153_vm7, %v5802_v27, %v8207_v42  ;;  %v5724_v19 = vrot.slane %v5723_v37, 1  ;;  %v5751_v15 = vadd.f32 %v5750_v11, %v24426_v57  ;;  %15196 = vmatpush3.bf16.msra.mxu0 %v24428_v46  ;;  %15222 = vmatprep.subr.bf16.mxu1 %v24431_v30  ;;  %v24433_v11 = vld [vmem:[#allocation41_spill] sm:$0xff] }
 0x537   : > { %v5829_v21 = vrot.slane %v5828_v13, 1  ;;  %v5885_v63 = vrot.slane %v5884_v29, 1  ;;  %v5912_v41 = vadd.f32 %v5911_v43, %v5910_v47  ;;  %v24430_v24 = vrot.slane %v24429_v6, 4  ;;  %14477 = vmatprep.subr.msk.mxu0 %vm1868_vm0, %v24432_v26  ;;  %v24434_v43 = vld [vmem:[#allocation43_spill] sm:$0xff] }
 0x538   : > { %v5857_v36 = vrot.slane %v5856_v58, 1  ;;  %v5940_v2 = vadd.f32 %v5939_v60, %v5938_v8  ;;  %v5725_v35 = vadd.f32 %v5724_v19, %v5723_v37  ;;  %v5752_v9 = vrot.slane %v5751_v15, 1 }
 0x539   : > { %v5830_v61 = vadd.f32 %v5829_v21, %v5828_v13  ;;  %v5777_v39 = vadd.f32 %v24430_v24, %v24429_v6  ;;  %v5886_v7 = vadd.f32 %v5885_v63, %v5884_v29  ;;  %v5913_v27 = vrot.slane %v5912_v41, 1  ;;  %15224 = vmatpush3.bf16.msra.mxu1 %v24433_v11  ;;  %v24435_v6 = vld [vmem:[#allocation45_spill] sm:$0xff]  ;;  %v24438_v11 = vld [vmem:[#allocation118_spill] sm:$0xff] }
 0x53a   : > { %v5858_v42 = vadd.f32 %v5857_v36, %v5856_v58  ;;  %v5941_v16 = vrot.slane %v5940_v2, 1  ;;  %v5753_v48 = vadd.f32 %v5752_v9, %v5751_v15  ;;  %v5803_v57 = vsel %vm5494_vm5, %v24389_v44, 0.0  ;;  %15226 = vmatprep.subr.bf16.mxu1 %v24434_v43  ;;  %v24437_v9 = vld [vmem:[#allocation116_spill] sm:$0xff]  ;;  %v24439_v43 = vld [vmem:[#allocation119_spill] sm:$0xff] }
 0x53b   : > { %v8209_v62 = vsel %vm8155_vm8, %v5830_v61, %v8208_v0  ;;  %v5778_v13 = vrot.slane %v5777_v39, 2  ;;  %v5914_v21 = vadd.f32 %v5913_v27, %v5912_v41  ;;  %v5804_v37 = vrot.slane %v5803_v57, 4 }
 0x53c   : > { %v8210_v47 = vsel %vm8157_vm9, %v5858_v42, %v8209_v62  ;;  %v5942_v29 = vadd.f32 %v5941_v16, %v5940_v2  ;;  %v5831_v0 = vsel %vm5494_vm5, %v18815_v49, 0.0  ;;  %v5859_v36 = vsel %vm5494_vm5, %v18822_v12, 0.0 }
 0x53d   : > { %v8211_v58 = vsel %vm8159_vm10, %v5886_v7, %v8210_v47  ;;  %v5779_v8 = vadd.f32 %v5778_v13, %v5777_v39  ;;  %v5887_v60 = vsel %vm5494_vm5, %v19456_v4, 0.0  ;;  %v5805_v15 = vadd.f32 %v5804_v37, %v5803_v57  ;;  %15228 = vmatpush3.bf16.msra.mxu1 %v24435_v6  ;;  %v24436_v4 = vld [vmem:[#allocation57_spill] sm:$0xff] }
 0x53e   : > { %v8212_v44 = vsel %vm8161_vm11, %v5914_v21, %v8211_v58  ;;  %v5832_v32 = vrot.slane %v5831_v0, 4  ;;  %v5860_v61 = vrot.slane %v5859_v36, 4  ;;  %v5888_v63 = vrot.slane %v5887_v60, 4  ;;  %14483 = vmatprep.subr.msk.mxu1 %vm1868_vm0, %v24436_v4 }
 0x53f   : > { %v5780_v19 = vrot.slane %v5779_v8, 1  ;;  %v8213_v46 = vsel %vm8163_vm12, %v5942_v29, %v8212_v44  ;;  %v5915_v41 = vsel %vm5494_vm5, %v19460_v53, 0.0  ;;  %v5806_v12 = vrot.slane %v5805_v15, 2 }
 0x540   : > { %8440 = vmatprep.mubr.f32.mxu1 %v8213_v46  ;;  %v5833_v24 = vadd.f32 %v5832_v32, %v5831_v0  ;;  %v5916_v39 = vrot.slane %v5915_v41, 4  ;;  %v5861_v30 = vadd.f32 %v5860_v61, %v5859_v36  ;;  %v5889_v42 = vadd.f32 %v5888_v63, %v5887_v60  ;;  %v24440_v36 = vld [vmem:[#allocation115_spill] sm:$0xff] }
 0x541   : > { %v5781_v49 = vadd.f32 %v5780_v19, %v5779_v8  ;;  %v8186_v2 = vsel %vm8151_vm6, %v5753_v48, %v5725_v35  ;;  %v5738_v7 = vrot.slane %v24437_v9, 1  ;;  %v5807_v27 = vadd.f32 %v5806_v12, %v5805_v15 }
 0x542   : > { %v5834_v62 = vrot.slane %v5833_v24, 2  ;;  %v5917_v13 = vadd.f32 %v5916_v39, %v5915_v41  ;;  %v5862_v16 = vrot.slane %v5861_v30, 2  ;;  %v5890_v47 = vrot.slane %v5889_v42, 2 }
 0x543   : > { %v8187_v53 = vsel %vm8153_vm7, %v5781_v49, %v8186_v2  ;;  %v5739_v57 = vadd.f32 %v5738_v7, %v24437_v9  ;;  %v5766_v21 = vrot.slane %v24438_v11, 1  ;;  %v5808_v58 = vrot.slane %v5807_v27, 1 }
 0x544   : > { %v5835_v8 = vadd.f32 %v5834_v62, %v5833_v24  ;;  %v5918_v37 = vrot.slane %v5917_v13, 2  ;;  %v5792_v29 = vrot.slane %v24439_v43, 2  ;;  %v5863_v0 = vadd.f32 %v5862_v16, %v5861_v30 }
 0x545   : > { %v5891_v35 = vadd.f32 %v5890_v47, %v5889_v42  ;;  %v5767_v48 = vadd.f32 %v5766_v21, %v24438_v11  ;;  %v24441_v60 = vrot.slane %v24440_v36, 4  ;;  %v5809_v19 = vadd.f32 %v5808_v58, %v5807_v27 }
 0x546   : > { %v5836_v15 = vrot.slane %v5835_v8, 1  ;;  %v5919_v32 = vadd.f32 %v5918_v37, %v5917_v13  ;;  %v5793_v46 = vadd.f32 %v5792_v29, %v24439_v43  ;;  %v5864_v61 = vrot.slane %v5863_v0, 1 }
 0x547   : > { %v5819_v44 = vadd.f32 %v24441_v60, %v24440_v36  ;;  %v5892_v63 = vrot.slane %v5891_v35, 1  ;;  %v5845_v6 = vsel %vm5494_vm5, %v24415_v18, 0.0  ;;  %v8188_v24 = vsel %vm8155_vm8, %v5809_v19, %v8187_v53 }
 0x548   : > { %v5837_v49 = vadd.f32 %v5836_v15, %v5835_v8  ;;  %v5920_v12 = vrot.slane %v5919_v32, 1  ;;  %v5794_v39 = vrot.slane %v5793_v46, 1  ;;  %v5865_v30 = vadd.f32 %v5864_v61, %v5863_v0 }
 0x549   : > { %v5820_v41 = vrot.slane %v5819_v44, 2  ;;  %v5893_v42 = vadd.f32 %v5892_v63, %v5891_v35  ;;  %v5846_v9 = vrot.slane %v5845_v6, 4  ;;  %v5873_v13 = vsel %vm5494_vm5, %v18825_v55, 0.0  ;;  %v24442_v63 = vld [vmem:[#allocation146_spill] sm:$0xff] }
 0x54a   : > { %v5921_v7 = vadd.f32 %v5920_v12, %v5919_v32  ;;  %v8189_v27 = vsel %vm8157_vm9, %v5837_v49, %v8188_v24  ;;  %v5795_v62 = vadd.f32 %v5794_v39, %v5793_v46  ;;  %v5874_v11 = vrot.slane %v5873_v13, 4 }
 0x54b   : > { %v5821_v2 = vadd.f32 %v5820_v41, %v5819_v44  ;;  %v8190_v16 = vsel %vm8159_vm10, %v5865_v30, %v8189_v27  ;;  %v5847_v18 = vadd.f32 %v5846_v9, %v5845_v6  ;;  %v5901_v53 = vsel %vm5494_vm5, %v18829_v51, 0.0 }
 0x54c   : > { %v8191_v21 = vsel %vm8161_vm11, %v5893_v42, %v8190_v16  ;;  %v5929_v58 = vsel %vm5494_vm5, %v19507_v1, 0.0  ;;  %v8200_v8 = vsel %vm8151_vm6, %v5767_v48, %v5739_v57  ;;  %v5875_v55 = vadd.f32 %v5874_v11, %v5873_v13 }
 0x54d   : > { %v5822_v47 = vrot.slane %v5821_v2, 1  ;;  %v8192_v37 = vsel %vm8163_vm12, %v5921_v7, %v8191_v21  ;;  %v5848_v29 = vrot.slane %v5847_v18, 2  ;;  %v5902_v0 = vrot.slane %v5901_v53, 4 }
 0x54e   : > { %8356 = vmatmul.mubr.f32.gmra.mrb[50].mxu0 %v8192_v37  ;;  %v5930_v35 = vrot.slane %v5929_v58, 4  ;;  %v8201_v36 = vsel %vm8153_vm7, %v5795_v62, %v8200_v8  ;;  %v5177_v60 = vcombine.high %v19065_v14, %v19065_v14  ;;  %v5876_v51 = vrot.slane %v5875_v55, 2 }
 0x54f   : > { %v5823_v43 = vadd.f32 %v5822_v47, %v5821_v2  ;;  %v5849_v44 = vadd.f32 %v5848_v29, %v5847_v18  ;;  %v5194_v1 = vcombine.high %v19072_v52, %v19072_v52  ;;  %v5903_v57 = vadd.f32 %v5902_v0, %v5901_v53 }
 0x550   : > { %v5931_v48 = vadd.f32 %v5930_v35, %v5929_v58  ;;  %v19618_v15 = vrot.slane %v19051_v38, %v18281_v33  ;;  %v19622_v32 = vrot.slane %v19054_v56, %v18281_v33  ;;  %v5877_v61 = vadd.f32 %v5876_v51, %v5875_v55 }
 0x551   : > { %v8202_v19 = vsel %vm8155_vm8, %v5823_v43, %v8201_v36  ;;  %v5850_v46 = vrot.slane %v5849_v44, 1  ;;  %v24443_v41 = vrot.slane %v24442_v63, 4  ;;  %v24444_v49 = vrot.slane %v18931_v17, 4 }
 0x552   : > { %v5904_v24 = vrot.slane %v5903_v57, 2  ;;  %v5932_v39 = vrot.slane %v5931_v48, 2  ;;  %v5211_v30 = vcombine.high %v19618_v15, %v19618_v15  ;;  %v5228_v42 = vcombine.high %v19622_v32, %v19622_v32 }
 0x553   : > { %v5952_v6 = vadd.f32 %v24443_v41, %v24442_v63  ;;  %v5980_v12 = vadd.f32 %v24444_v49, %v18931_v17  ;;  %v5851_v2 = vadd.f32 %v5850_v46, %v5849_v44  ;;  %v5878_v9 = vrot.slane %v5877_v61, 1  ;;  %v24446_v17 = vld [vmem:[#allocation144_spill] sm:$0xff] }
 0x554   : > { %v5905_v62 = vadd.f32 %v5904_v24, %v5903_v57  ;;  %v5933_v13 = vadd.f32 %v5932_v39, %v5931_v48  ;;  %v24445_v16 = vcombine.high %v18904_v50, %v18904_v50  ;;  %v24447_v18 = vcombine.high %v24446_v17, %v24446_v17 }
 0x555   : > { %v5953_v7 = vrot.slane %v5952_v6, 2  ;;  %v5981_v27 = vrot.slane %v5980_v12, 2  ;;  %v5879_v21 = vadd.f32 %v5878_v9, %v5877_v61  ;;  %v8203_v53 = vsel %vm8157_vm9, %v5851_v2, %v8202_v19 }
 0x556   : > { %v6006_v47 = vsel %vm5494_vm5, %v24445_v16, 0.0  ;;  %v6034_v11 = vsel %vm5494_vm5, %v24447_v18, 0.0  ;;  %v5906_v37 = vrot.slane %v5905_v62, 1  ;;  %v5934_v43 = vrot.slane %v5933_v13, 1 }
 0x557   : > { %v5954_v58 = vadd.f32 %v5953_v7, %v5952_v6  ;;  %v5982_v8 = vadd.f32 %v5981_v27, %v5980_v12  ;;  %v6007_v29 = vrot.slane %v6006_v47, 4  ;;  %v6035_v55 = vrot.slane %v6034_v11, 4 }
 0x558   : > { %v8204_v0 = vsel %vm8159_vm10, %v5879_v21, %v8203_v53  ;;  %v6062_v36 = vsel %vm5494_vm5, %v5177_v60, 0.0  ;;  %v5907_v44 = vadd.f32 %v5906_v37, %v5905_v62  ;;  %v5935_v51 = vadd.f32 %v5934_v43, %v5933_v13 }
 0x559   : > { %v5955_v35 = vrot.slane %v5954_v58, 1  ;;  %v5983_v50 = vrot.slane %v5982_v8, 1  ;;  %v6008_v57 = vadd.f32 %v6007_v29, %v6006_v47  ;;  %v6036_v48 = vadd.f32 %v6035_v55, %v6034_v11 }
 0x55a   : > { %v6063_v63 = vrot.slane %v6062_v36, 4  ;;  %v6090_v19 = vsel %vm5494_vm5, %v5194_v1, 0.0  ;;  %v8205_v41 = vsel %vm8161_vm11, %v5907_v44, %v8204_v0  ;;  %v6118_v2 = vsel %vm5494_vm5, %v5211_v30, 0.0  ;;  %v24449_v44 = vld [vmem:[#allocation148_spill] sm:$0xff] }
 0x55b   : > { %v5956_v46 = vadd.f32 %v5955_v35, %v5954_v58  ;;  %v5984_v61 = vadd.f32 %v5983_v50, %v5982_v8  ;;  %v6009_v6 = vrot.slane %v6008_v57, 2  ;;  %v6037_v49 = vrot.slane %v6036_v48, 2 }
 0x55c   : > { %v6091_v12 = vrot.slane %v6090_v19, 4  ;;  %v8206_v24 = vsel %vm8163_vm12, %v5935_v51, %v8205_v41  ;;  %v6064_v39 = vadd.f32 %v6063_v63, %v6062_v36  ;;  %v6146_v60 = vsel %vm5494_vm5, %v5228_v42, 0.0 }
 0x55d   : > { %8441 = vmatmul.mubr.f32.gmra.mrb[50].mxu1 %v8206_v24  ;;  %v6010_v9 = vadd.f32 %v6009_v6, %v6008_v57  ;;  %v6038_v7 = vadd.f32 %v6037_v49, %v6036_v48  ;;  %v6119_v62 = vrot.slane %v6118_v2, 4  ;;  %v6147_v16 = vrot.slane %v6146_v60, 4 }
 0x55e   : > { %v6092_v27 = vadd.f32 %v6091_v12, %v6090_v19  ;;  %v6065_v13 = vrot.slane %v6064_v39, 2  ;;  %v8221_v1 = vsel %vm8151_vm6, %v5984_v61, %v5956_v46  ;;  %v5195_v47 = vcombine.high %v19075_v40, %v19075_v40 }
 0x55f   : > { %v6011_v18 = vrot.slane %v6010_v9, 1  ;;  %v6039_v11 = vrot.slane %v6038_v7, 1  ;;  %v6120_v53 = vadd.f32 %v6119_v62, %v6118_v2  ;;  %v6148_v30 = vadd.f32 %v6147_v16, %v6146_v60  ;;  %v24453_v60 = vld [vmem:[#allocation151_spill] sm:$0xff]  ;;  %v24455_v16 = vld [vmem:[#allocation145_spill] sm:$0xff] }
 0x560   : > { %v6093_v21 = vrot.slane %v6092_v27, 2  ;;  %v6066_v58 = vadd.f32 %v6065_v13, %v6064_v39  ;;  %v5212_v42 = vcombine.high %v19079_v59, %v19079_v59  ;;  %v24448_v8 = vcombine.high %v19041_v5, %v19041_v5  ;;  %v24451_v5 = vld [vmem:[#allocation154_spill] sm:$0xff] }
 0x561   : > { %v6012_v43 = vadd.f32 %v6011_v18, %v6010_v9  ;;  %v6040_v29 = vadd.f32 %v6039_v11, %v6038_v7  ;;  %v6121_v0 = vrot.slane %v6120_v53, 2  ;;  %v6149_v50 = vrot.slane %v6148_v30, 2 }
 0x562   : > { %v19659_v37 = vrot.slane %v24448_v8, %v18281_v33  ;;  %v6094_v55 = vadd.f32 %v6093_v21, %v6092_v27  ;;  %v6067_v35 = vrot.slane %v6066_v58, 1  ;;  %v24450_v51 = vrot.slane %v24449_v44, 2 }
 0x563   : > { %v6122_v46 = vadd.f32 %v6121_v0, %v6120_v53  ;;  %v8222_v61 = vsel %vm8153_vm7, %v6012_v43, %v8221_v1  ;;  %v24452_v63 = vrot.slane %v24451_v5, 2  ;;  %v6150_v6 = vadd.f32 %v6149_v50, %v6148_v30  ;;  %v24457_v43 = vld [vmem:[#allocation171_spill] sm:$0xff] }
 0x564   : > { %v5229_v36 = vcombine.high %v19659_v37, %v19659_v37  ;;  %v5968_v57 = vadd.f32 %v24450_v51, %v24449_v44  ;;  %v6095_v48 = vrot.slane %v6094_v55, 1  ;;  %v6068_v41 = vadd.f32 %v6067_v35, %v6066_v58 }
 0x565   : > { %v5996_v19 = vadd.f32 %v24452_v63, %v24451_v5  ;;  %v8223_v49 = vsel %vm8155_vm8, %v6040_v29, %v8222_v61  ;;  %v6123_v39 = vrot.slane %v6122_v46, 1  ;;  %v24454_v9 = vrot.slane %v24453_v60, 4 }
 0x566   : > { %v5969_v12 = vrot.slane %v5968_v57, 1  ;;  %v6096_v24 = vadd.f32 %v6095_v48, %v6094_v55  ;;  %v6151_v27 = vrot.slane %v6150_v6, 1  ;;  %v8224_v62 = vsel %vm8157_vm9, %v6068_v41, %v8223_v49 }
 0x567   : > { %v5997_v2 = vrot.slane %v5996_v19, 1  ;;  %v6022_v7 = vadd.f32 %v24454_v9, %v24453_v60  ;;  %v24456_v1 = vcombine.high %v24455_v16, %v24455_v16  ;;  %v6124_v11 = vadd.f32 %v6123_v39, %v6122_v46 }
 0x568   : > { %v5970_v13 = vadd.f32 %v5969_v12, %v5968_v57  ;;  %v8225_v21 = vsel %vm8159_vm10, %v6096_v24, %v8224_v62  ;;  %v6152_v30 = vadd.f32 %v6151_v27, %v6150_v6  ;;  %v24458_v29 = vcombine.high %v24457_v43, %v24457_v43  ;;  %v24459_v12 = vld [vmem:[#allocation147_spill] sm:$0xff] }
 0x569   : > { %v6048_v18 = vsel %vm5494_vm5, %v24456_v1, 0.0  ;;  %v5998_v53 = vadd.f32 %v5997_v2, %v5996_v19  ;;  %v6023_v58 = vrot.slane %v6022_v7, 2  ;;  %v6104_v0 = vsel %vm5494_vm5, %v5195_v47, 0.0 }
 0x56a   : > { %v6049_v8 = vrot.slane %v6048_v18, 4  ;;  %v6076_v55 = vsel %vm5494_vm5, %v24458_v29, 0.0  ;;  %v8226_v35 = vsel %vm8161_vm11, %v6124_v11, %v8225_v21  ;;  %v6105_v51 = vrot.slane %v6104_v0, 4 }
 0x56b   : > { %v6024_v50 = vadd.f32 %v6023_v58, %v6022_v7  ;;  %v6077_v44 = vrot.slane %v6076_v55, 4  ;;  %v8227_v57 = vsel %vm8163_vm12, %v6152_v30, %v8226_v35  ;;  %v6132_v46 = vsel %vm5494_vm5, %v5212_v42, 0.0 }
 0x56c   : > { %v6050_v48 = vadd.f32 %v6049_v8, %v6048_v18  ;;  %v6160_v61 = vsel %vm5494_vm5, %v5229_v36, 0.0  ;;  %8360 = vmatprep.mubr.f32.mxu0 %v8227_v57  ;;  %v6106_v19 = vadd.f32 %v6105_v51, %v6104_v0  ;;  %v6133_v41 = vrot.slane %v6132_v46, 4  ;;  %v24460_v36 = vld [vmem:[#allocation149_spill] sm:$0xff] }
 0x56d   : > { %v6025_v5 = vrot.slane %v6024_v50, 1  ;;  %v6078_v63 = vadd.f32 %v6077_v44, %v6076_v55  ;;  %v6161_v49 = vrot.slane %v6160_v61, 4  ;;  %v8235_v47 = vsel %vm8151_vm6, %v5998_v53, %v5970_v13  ;;  %v24461_v55 = vld [vmem:[#allocation150_spill] sm:$0xff] }
 0x56e   : > { %v6051_v6 = vrot.slane %v6050_v48, 2  ;;  %v5946_v24 = vrot.slane %v24459_v12, 2  ;;  %v6107_v60 = vrot.slane %v6106_v19, 2  ;;  %v6134_v9 = vadd.f32 %v6133_v41, %v6132_v46 }
 0x56f   : > { %v6026_v39 = vadd.f32 %v6025_v5, %v6024_v50  ;;  %v6079_v2 = vrot.slane %v6078_v63, 2  ;;  %v6162_v27 = vadd.f32 %v6161_v49, %v6160_v61  ;;  %v5974_v62 = vrot.slane %v24460_v36, 2 }
 0x570   : > { %v6052_v7 = vadd.f32 %v6051_v6, %v6050_v48  ;;  %v5947_v42 = vadd.f32 %v5946_v24, %v24459_v12  ;;  %v6108_v1 = vadd.f32 %v6107_v60, %v6106_v19  ;;  %v6135_v18 = vrot.slane %v6134_v9, 2 }
 0x571   : > { %v6080_v16 = vadd.f32 %v6079_v2, %v6078_v63  ;;  %v8236_v11 = vsel %vm8153_vm7, %v6026_v39, %v8235_v47  ;;  %v6163_v58 = vrot.slane %v6162_v27, 2  ;;  %v5975_v53 = vadd.f32 %v5974_v62, %v24460_v36 }
 0x572   : > { %v6053_v21 = vrot.slane %v6052_v7, 1  ;;  %v5948_v13 = vrot.slane %v5947_v42, 1  ;;  %v6109_v8 = vrot.slane %v6108_v1, 1  ;;  %v6136_v29 = vadd.f32 %v6135_v18, %v6134_v9 }
 0x573   : > { %v6081_v30 = vrot.slane %v6080_v16, 1  ;;  %v24462_v0 = vrot.slane %v24461_v55, 4  ;;  %v6164_v44 = vadd.f32 %v6163_v58, %v6162_v27  ;;  %v5976_v57 = vrot.slane %v5975_v53, 1 }
 0x574   : > { %v6054_v50 = vadd.f32 %v6053_v21, %v6052_v7  ;;  %v5949_v51 = vadd.f32 %v5948_v13, %v5947_v42  ;;  %v6110_v46 = vadd.f32 %v6109_v8, %v6108_v1  ;;  %v6137_v61 = vrot.slane %v6136_v29, 1 }
 0x575   : > { %v6001_v35 = vadd.f32 %v24462_v0, %v24461_v55  ;;  %v6082_v48 = vadd.f32 %v6081_v30, %v6080_v16  ;;  %v6165_v63 = vrot.slane %v6164_v44, 1  ;;  %v5977_v41 = vadd.f32 %v5976_v57, %v5975_v53  ;;  %v24463_v53 = vld [vmem:[#allocation153_spill] sm:$0xff] }
 0x576   : > { %v8237_v19 = vsel %vm8155_vm8, %v6054_v50, %v8236_v11  ;;  %v6027_v6 = vsel %vm5494_vm5, %v24446_v17, 0.0  ;;  %v6138_v49 = vadd.f32 %v6137_v61, %v6136_v29  ;;  %v6055_v60 = vsel %vm5494_vm5, %v19065_v14, 0.0  ;;  %v24464_v50 = vld [vmem:[#allocation155_spill] sm:$0xff]  ;;  %v24465_v61 = vld [vmem:[#allocation156_spill] sm:$0xff] }
 0x577   : > { %v6002_v5 = vrot.slane %v6001_v35, 2  ;;  %v8238_v47 = vsel %vm8157_vm9, %v6082_v48, %v8237_v19  ;;  %v6028_v24 = vrot.slane %v6027_v6, 4  ;;  %v6166_v39 = vadd.f32 %v6165_v63, %v6164_v44 }
 0x578   : > { %v8239_v2 = vsel %vm8159_vm10, %v6110_v46, %v8238_v47  ;;  %v6083_v9 = vsel %vm5494_vm5, %v19072_v52, 0.0  ;;  %v6056_v36 = vrot.slane %v6055_v60, 4  ;;  %v6111_v16 = vsel %vm5494_vm5, %v19618_v15, 0.0 }
 0x579   : > { %v6003_v12 = vadd.f32 %v6002_v5, %v6001_v35  ;;  %v8240_v7 = vsel %vm8161_vm11, %v6138_v49, %v8239_v2  ;;  %v6029_v42 = vadd.f32 %v6028_v24, %v6027_v6  ;;  %v6084_v62 = vrot.slane %v6083_v9, 4 }
 0x57a   : > { %v8241_v17 = vsel %vm8163_vm12, %v6166_v39, %v8240_v7  ;;  %v6139_v1 = vsel %vm5494_vm5, %v19622_v32, 0.0  ;;  %v6057_v11 = vadd.f32 %v6056_v36, %v6055_v60  ;;  %v6112_v21 = vrot.slane %v6111_v16, 4 }
 0x57b   : > { %v6004_v27 = vrot.slane %v6003_v12, 1  ;;  %8445 = vmatprep.mubr.f32.mxu1 %v8241_v17  ;;  %v6030_v14 = vrot.slane %v6029_v42, 2  ;;  %v6085_v52 = vadd.f32 %v6084_v62, %v6083_v9  ;;  %v6140_v58 = vrot.slane %v6139_v1, 4 }
 0x57c   : > { %v8214_v13 = vsel %vm8151_vm6, %v5977_v41, %v5949_v51  ;;  %v5962_v30 = vrot.slane %v24463_v53, 1  ;;  %v6058_v29 = vrot.slane %v6057_v11, 2  ;;  %v6113_v55 = vadd.f32 %v6112_v21, %v6111_v16  ;;  %v24466_v41 = vld [vmem:[#allocation152_spill] sm:$0xff] }
 0x57d   : > { %v6005_v18 = vadd.f32 %v6004_v27, %v6003_v12  ;;  %v6031_v8 = vadd.f32 %v6030_v14, %v6029_v42  ;;  %v6086_v15 = vrot.slane %v6085_v52, 2  ;;  %v6141_v35 = vadd.f32 %v6140_v58, %v6139_v1 }
 0x57e   : > { %v5963_v32 = vadd.f32 %v5962_v30, %v24463_v53  ;;  %v5990_v44 = vrot.slane %v24464_v50, 1  ;;  %v6059_v48 = vadd.f32 %v6058_v29, %v6057_v11  ;;  %v6114_v46 = vrot.slane %v6113_v55, 2 }
 0x57f   : > { %v8215_v0 = vsel %vm8153_vm7, %v6005_v18, %v8214_v13  ;;  %v6032_v57 = vrot.slane %v6031_v8, 1  ;;  %v6016_v5 = vrot.slane %v24465_v61, 2  ;;  %v6087_v63 = vadd.f32 %v6086_v15, %v6085_v52 }
 0x580   : > { %v6142_v51 = vrot.slane %v6141_v35, 2  ;;  %v5991_v19 = vadd.f32 %v5990_v44, %v24464_v50  ;;  %v24467_v6 = vrot.slane %v24466_v41, 4  ;;  %v6060_v12 = vrot.slane %v6059_v48, 1 }
 0x581   : > { %v6033_v47 = vadd.f32 %v6032_v57, %v6031_v8  ;;  %v6115_v24 = vadd.f32 %v6114_v46, %v6113_v55  ;;  %v6017_v39 = vadd.f32 %v6016_v5, %v24465_v61  ;;  %v6088_v2 = vrot.slane %v6087_v63, 1 }
 0x582   : > { %v6043_v49 = vadd.f32 %v24467_v6, %v24466_v41  ;;  %v6143_v60 = vadd.f32 %v6142_v51, %v6141_v35  ;;  %v6069_v7 = vsel %vm5494_vm5, %v24457_v43, 0.0  ;;  %v6061_v27 = vadd.f32 %v6060_v12, %v6059_v48 }
 0x583   : > { %v6116_v42 = vrot.slane %v6115_v24, 1  ;;  %v8216_v36 = vsel %vm8155_vm8, %v6033_v47, %v8215_v0  ;;  %v6018_v17 = vrot.slane %v6017_v39, 1  ;;  %v6089_v62 = vadd.f32 %v6088_v2, %v6087_v63 }
 0x584   : > { %v6044_v9 = vrot.slane %v6043_v49, 2  ;;  %v6144_v16 = vrot.slane %v6143_v60, 1  ;;  %v6070_v18 = vrot.slane %v6069_v7, 4  ;;  %v8217_v11 = vsel %vm8157_vm9, %v6061_v27, %v8216_v36 }
 0x585   : > { %v6117_v14 = vadd.f32 %v6116_v42, %v6115_v24  ;;  %v6019_v21 = vadd.f32 %v6018_v17, %v6017_v39  ;;  %v6097_v52 = vsel %vm5494_vm5, %v19075_v40, 0.0  ;;  %v8218_v13 = vsel %vm8159_vm10, %v6089_v62, %v8217_v11 }
 0x586   : > { %v6045_v1 = vadd.f32 %v6044_v9, %v6043_v49  ;;  %v6145_v58 = vadd.f32 %v6144_v16, %v6143_v60  ;;  %v6071_v53 = vadd.f32 %v6070_v18, %v6069_v7  ;;  %v6098_v8 = vrot.slane %v6097_v52, 4  ;;  %v24468_v49 = vld [vmem:[#allocation182_spill] sm:$0xff] }
 0x587   : > { %v8219_v30 = vsel %vm8161_vm11, %v6117_v14, %v8218_v13  ;;  %v6125_v29 = vsel %vm5494_vm5, %v19079_v59, 0.0  ;;  %v6153_v55 = vsel %vm5494_vm5, %v19659_v37, 0.0  ;;  %v8228_v57 = vsel %vm8151_vm6, %v5991_v19, %v5963_v32 }
 0x588   : > { %v6046_v43 = vrot.slane %v6045_v1, 1  ;;  %v8220_v0 = vsel %vm8163_vm12, %v6145_v58, %v8219_v30  ;;  %v6072_v35 = vrot.slane %v6071_v53, 2  ;;  %v6126_v50 = vrot.slane %v6125_v29, 4 }
 0x589   : > { %8361 = vmatmul.mubr.f32.gmra.mrb[52].mxu0 %v8220_v0  ;;  %v6099_v40 = vadd.f32 %v6098_v8, %v6097_v52  ;;  %v6154_v44 = vrot.slane %v6153_v55, 4  ;;  %v5313_v48 = vcombine.high %v19302_v3, %v19302_v3  ;;  %v8229_v59 = vsel %vm8153_vm7, %v6019_v21, %v8228_v57 }
 0x58a   : > { %v6047_v15 = vadd.f32 %v6046_v43, %v6045_v1  ;;  %v6073_v46 = vadd.f32 %v6072_v35, %v6071_v53  ;;  %v6127_v61 = vadd.f32 %v6126_v50, %v6125_v29  ;;  %v5330_v37 = vcombine.high %v19309_v34, %v19309_v34  ;;  %v24472_v43 = vld [vmem:[#allocation180_spill] sm:$0xff] }
 0x58b   : > { %v6100_v5 = vrot.slane %v6099_v40, 2  ;;  %v6155_v63 = vadd.f32 %v6154_v44, %v6153_v55  ;;  %v19746_v41 = vrot.slane %v19294_v10, %v18281_v33  ;;  %v19750_v19 = vrot.slane %v19298_v25, %v18281_v33 }
 0x58c   : > { %v8230_v51 = vsel %vm8155_vm8, %v6047_v15, %v8229_v59  ;;  %v6074_v6 = vrot.slane %v6073_v46, 1  ;;  %v6128_v32 = vrot.slane %v6127_v61, 2  ;;  %v24469_v47 = vrot.slane %v24468_v49, 4 }
 0x58d   : > { %v6101_v24 = vadd.f32 %v6100_v5, %v6099_v40  ;;  %v6156_v39 = vrot.slane %v6155_v63, 2  ;;  %v5347_v2 = vcombine.high %v19746_v41, %v19746_v41  ;;  %v24470_v60 = vrot.slane %v19179_v54, 4 }
 0x58e   : > { %v6176_v12 = vadd.f32 %v24469_v47, %v24468_v49  ;;  %v6075_v7 = vadd.f32 %v6074_v6, %v6073_v46  ;;  %v6129_v27 = vadd.f32 %v6128_v32, %v6127_v61  ;;  %v5364_v42 = vcombine.high %v19750_v19, %v19750_v19 }
 0x58f   : > { %v6204_v9 = vadd.f32 %v24470_v60, %v19179_v54  ;;  %v6102_v17 = vrot.slane %v6101_v24, 1  ;;  %v6157_v62 = vadd.f32 %v6156_v39, %v6155_v63  ;;  %v24471_v1 = vcombine.high %v19152_v22, %v19152_v22 }
 0x590   : > { %v6177_v36 = vrot.slane %v6176_v12, 2  ;;  %v6130_v14 = vrot.slane %v6129_v27, 1  ;;  %v8231_v11 = vsel %vm8157_vm9, %v6075_v7, %v8230_v51  ;;  %v24473_v53 = vcombine.high %v24472_v43, %v24472_v43 }
 0x591   : > { %v6205_v16 = vrot.slane %v6204_v9, 2  ;;  %v6230_v18 = vsel %vm5494_vm5, %v24471_v1, 0.0  ;;  %v6103_v54 = vadd.f32 %v6102_v17, %v6101_v24  ;;  %v6158_v58 = vrot.slane %v6157_v62, 1 }
 0x592   : > { %v6178_v21 = vadd.f32 %v6177_v36, %v6176_v12  ;;  %v6231_v52 = vrot.slane %v6230_v18, 4  ;;  %v6258_v30 = vsel %vm5494_vm5, %v24473_v53, 0.0  ;;  %v6131_v8 = vadd.f32 %v6130_v14, %v6129_v27 }
 0x593   : > { %v6206_v13 = vadd.f32 %v6205_v16, %v6204_v9  ;;  %v6259_v0 = vrot.slane %v6258_v30, 4  ;;  %v6159_v22 = vadd.f32 %v6158_v58, %v6157_v62  ;;  %v8232_v15 = vsel %vm8159_vm10, %v6103_v54, %v8231_v11 }
 0x594   : > { %v6179_v29 = vrot.slane %v6178_v21, 1  ;;  %v6232_v55 = vadd.f32 %v6231_v52, %v6230_v18  ;;  %v6286_v50 = vsel %vm5494_vm5, %v5313_v48, 0.0  ;;  %v8233_v40 = vsel %vm8161_vm11, %v6131_v8, %v8232_v15 }
 0x595   : > { %v6207_v35 = vrot.slane %v6206_v13, 1  ;;  %v6260_v46 = vadd.f32 %v6259_v0, %v6258_v30  ;;  %v8234_v61 = vsel %vm8163_vm12, %v6159_v22, %v8233_v40  ;;  %v6287_v5 = vrot.slane %v6286_v50, 4 }
 0x596   : > { %v6180_v44 = vadd.f32 %v6179_v29, %v6178_v21  ;;  %v6233_v57 = vrot.slane %v6232_v55, 2  ;;  %v6314_v63 = vsel %vm5494_vm5, %v5330_v37, 0.0  ;;  %8446 = vmatmul.mubr.f32.gmra.mrb[52].mxu1 %v8234_v61  ;;  %v6342_v49 = vsel %vm5494_vm5, %v5347_v2, 0.0  ;;  %v24475_v21 = vld [vmem:[#allocation184_spill] sm:$0xff]  ;;  %v24479_v61 = vld [vmem:[#allocation187_spill] sm:$0xff] }
 0x597   : > { %v6208_v59 = vadd.f32 %v6207_v35, %v6206_v13  ;;  %v6261_v6 = vrot.slane %v6260_v46, 2  ;;  %v6315_v32 = vrot.slane %v6314_v63, 4  ;;  %v6288_v47 = vadd.f32 %v6287_v5, %v6286_v50  ;;  %v24477_v35 = vld [vmem:[#allocation190_spill] sm:$0xff] }
 0x598   : > { %v6234_v51 = vadd.f32 %v6233_v57, %v6232_v55  ;;  %v6343_v12 = vrot.slane %v6342_v49, 4  ;;  %v6370_v48 = vsel %vm5494_vm5, %v5364_v42, 0.0  ;;  %v5331_v37 = vcombine.high %v19312_v45, %v19312_v45 }
 0x599   : > { %v8249_v24 = vsel %vm8151_vm6, %v6208_v59, %v6180_v44  ;;  %v6262_v60 = vadd.f32 %v6261_v6, %v6260_v46  ;;  %v6316_v9 = vadd.f32 %v6315_v32, %v6314_v63  ;;  %v6371_v7 = vrot.slane %v6370_v48, 4  ;;  %v24481_v32 = vld [vmem:[#allocation181_spill] sm:$0xff] }
 0x59a   : > { %v6235_v39 = vrot.slane %v6234_v51, 1  ;;  %v6289_v27 = vrot.slane %v6288_v47, 2  ;;  %v6344_v36 = vadd.f32 %v6343_v12, %v6342_v49  ;;  %v5348_v17 = vcombine.high %v19333_v23, %v19333_v23 }
 0x59b   : > { %v6263_v2 = vrot.slane %v6262_v60, 1  ;;  %v6317_v16 = vrot.slane %v6316_v9, 2  ;;  %v6372_v1 = vadd.f32 %v6371_v7, %v6370_v48  ;;  %v24474_v14 = vcombine.high %v19279_v20, %v19279_v20 }
 0x59c   : > { %v6236_v62 = vadd.f32 %v6235_v39, %v6234_v51  ;;  %v6290_v18 = vadd.f32 %v6289_v27, %v6288_v47  ;;  %v6345_v42 = vrot.slane %v6344_v36, 2  ;;  %v24476_v52 = vrot.slane %v24475_v21, 2  ;;  %v24483_v27 = vld [vmem:[#allocation207_spill] sm:$0xff] }
 0x59d   : > { %v19787_v11 = vrot.slane %v24474_v14, %v18281_v33  ;;  %v6264_v58 = vadd.f32 %v6263_v2, %v6262_v60  ;;  %v6318_v13 = vadd.f32 %v6317_v16, %v6316_v9  ;;  %v6373_v53 = vrot.slane %v6372_v1, 2 }
 0x59e   : > { %v6192_v54 = vadd.f32 %v24476_v52, %v24475_v21  ;;  %v8250_v30 = vsel %vm8153_vm7, %v6236_v62, %v8249_v24  ;;  %v6291_v8 = vrot.slane %v6290_v18, 1  ;;  %v6346_v29 = vadd.f32 %v6345_v42, %v6344_v36 }
 0x59f   : > { %v5365_v55 = vcombine.high %v19787_v11, %v19787_v11  ;;  %v6319_v22 = vrot.slane %v6318_v13, 1  ;;  %v6374_v15 = vadd.f32 %v6373_v53, %v6372_v1  ;;  %v8251_v20 = vsel %vm8155_vm8, %v6264_v58, %v8250_v30 }
 0x5a0   : > { %v6193_v0 = vrot.slane %v6192_v54, 1  ;;  %v24478_v50 = vrot.slane %v24477_v35, 2  ;;  %v6292_v44 = vadd.f32 %v6291_v8, %v6290_v18  ;;  %v6347_v57 = vrot.slane %v6346_v29, 1 }
 0x5a1   : > { %v24480_v59 = vrot.slane %v24479_v61, 4  ;;  %v6320_v63 = vadd.f32 %v6319_v22, %v6318_v13  ;;  %v6375_v51 = vrot.slane %v6374_v15, 1  ;;  %v24482_v49 = vcombine.high %v24481_v32, %v24481_v32 }
 0x5a2   : > { %v6220_v40 = vadd.f32 %v24478_v50, %v24477_v35  ;;  %v6194_v46 = vadd.f32 %v6193_v0, %v6192_v54  ;;  %v6348_v12 = vadd.f32 %v6347_v57, %v6346_v29  ;;  %v8252_v48 = vsel %vm8157_vm9, %v6292_v44, %v8251_v20  ;;  %v24485_v0 = vld [vmem:[#allocation183_spill] sm:$0xff] }
 0x5a3   : > { %v6246_v5 = vadd.f32 %v24480_v59, %v24479_v61  ;;  %v6272_v47 = vsel %vm5494_vm5, %v24482_v49, 0.0  ;;  %v6376_v60 = vadd.f32 %v6375_v51, %v6374_v15  ;;  %v8253_v9 = vsel %vm8159_vm10, %v6320_v63, %v8252_v48 }
 0x5a4   : > { %v6221_v6 = vrot.slane %v6220_v40, 1  ;;  %v6273_v39 = vrot.slane %v6272_v47, 4  ;;  %v24484_v36 = vcombine.high %v24483_v27, %v24483_v27  ;;  %v8254_v2 = vsel %vm8161_vm11, %v6348_v12, %v8253_v9  ;;  %v24487_v12 = vld [vmem:[#allocation186_spill] sm:$0xff] }
 0x5a5   : > { %v6247_v24 = vrot.slane %v6246_v5, 2  ;;  %v8255_v42 = vsel %vm8163_vm12, %v6376_v60, %v8254_v2  ;;  %v6328_v14 = vsel %vm5494_vm5, %v5331_v37, 0.0  ;;  %v6356_v21 = vsel %vm5494_vm5, %v5348_v17, 0.0 }
 0x5a6   : > { %v6222_v7 = vadd.f32 %v6221_v6, %v6220_v40  ;;  %v6300_v62 = vsel %vm5494_vm5, %v24484_v36, 0.0  ;;  %v6274_v1 = vadd.f32 %v6273_v39, %v6272_v47  ;;  %v6384_v52 = vsel %vm5494_vm5, %v5365_v55, 0.0  ;;  %8365 = vmatprep.mubr.f32.mxu0 %v8255_v42  ;;  %v24486_v55 = vld [vmem:[#allocation185_spill] sm:$0xff] }
 0x5a7   : > { %v6248_v16 = vadd.f32 %v6247_v24, %v6246_v5  ;;  %v6301_v18 = vrot.slane %v6300_v62, 4  ;;  %v6329_v53 = vrot.slane %v6328_v14, 4  ;;  %v6357_v30 = vrot.slane %v6356_v21, 4 }
 0x5a8   : > { %v6275_v58 = vrot.slane %v6274_v1, 2  ;;  %v6385_v8 = vrot.slane %v6384_v52, 4  ;;  %v8263_v29 = vsel %vm8151_vm6, %v6222_v7, %v6194_v46  ;;  %v6170_v22 = vrot.slane %v24485_v0, 2 }
 0x5a9   : > { %v6249_v54 = vrot.slane %v6248_v16, 1  ;;  %v6302_v13 = vadd.f32 %v6301_v18, %v6300_v62  ;;  %v6330_v50 = vadd.f32 %v6329_v53, %v6328_v14  ;;  %v6358_v37 = vadd.f32 %v6357_v30, %v6356_v21 }
 0x5aa   : > { %v6276_v20 = vadd.f32 %v6275_v58, %v6274_v1  ;;  %v6386_v40 = vadd.f32 %v6385_v8, %v6384_v52  ;;  %v6171_v17 = vadd.f32 %v6170_v22, %v24485_v0  ;;  %v6198_v44 = vrot.slane %v24486_v55, 2 }
 0x5ab   : > { %v6250_v15 = vadd.f32 %v6249_v54, %v6248_v16  ;;  %v6303_v35 = vrot.slane %v6302_v13, 2  ;;  %v6331_v59 = vrot.slane %v6330_v50, 2  ;;  %v6359_v63 = vrot.slane %v6358_v37, 2 }
 0x5ac   : > { %v6277_v57 = vrot.slane %v6276_v20, 1  ;;  %v6387_v51 = vrot.slane %v6386_v40, 2  ;;  %v6172_v46 = vrot.slane %v6171_v17, 1  ;;  %v6199_v6 = vadd.f32 %v6198_v44, %v24486_v55 }
 0x5ad   : > { %v6304_v61 = vadd.f32 %v6303_v35, %v6302_v13  ;;  %v8264_v5 = vsel %vm8153_vm7, %v6250_v15, %v8263_v29  ;;  %v6332_v47 = vadd.f32 %v6331_v59, %v6330_v50  ;;  %v24488_v48 = vrot.slane %v24487_v12, 4 }
 0x5ae   : > { %v6278_v32 = vadd.f32 %v6277_v57, %v6276_v20  ;;  %v6360_v39 = vadd.f32 %v6359_v63, %v6358_v37  ;;  %v6388_v60 = vadd.f32 %v6387_v51, %v6386_v40  ;;  %v6173_v9 = vadd.f32 %v6172_v46, %v6171_v17  ;;  %v24489_v63 = vld [vmem:[#allocation189_spill] sm:$0xff] }
 0x5af   : > { %v6305_v49 = vrot.slane %v6304_v61, 1  ;;  %v6225_v24 = vadd.f32 %v24488_v48, %v24487_v12  ;;  %v6200_v7 = vrot.slane %v6199_v6, 1  ;;  %v6333_v62 = vrot.slane %v6332_v47, 1  ;;  %v24491_v48 = vld [vmem:[#allocation192_spill] sm:$0xff] }
 0x5b0   : > { %v8265_v2 = vsel %vm8155_vm8, %v6278_v32, %v8264_v5  ;;  %v6361_v1 = vrot.slane %v6360_v39, 1  ;;  %v6389_v18 = vrot.slane %v6388_v60, 1  ;;  %v6251_v14 = vsel %vm5494_vm5, %v24472_v43, 0.0 }
 0x5b1   : > { %v6306_v36 = vadd.f32 %v6305_v49, %v6304_v61  ;;  %v6226_v16 = vrot.slane %v6225_v24, 2  ;;  %v6201_v42 = vadd.f32 %v6200_v7, %v6199_v6  ;;  %v6334_v21 = vadd.f32 %v6333_v62, %v6332_v47  ;;  %v24490_v6 = vld [vmem:[#allocation191_spill] sm:$0xff] }
 0x5b2   : > { %v6252_v58 = vrot.slane %v6251_v14, 4  ;;  %v6362_v13 = vadd.f32 %v6361_v1, %v6360_v39  ;;  %v6390_v53 = vadd.f32 %v6389_v18, %v6388_v60  ;;  %v6279_v30 = vsel %vm5494_vm5, %v19302_v3, 0.0 }
 0x5b3   : > { %v8266_v52 = vsel %vm8157_vm9, %v6306_v36, %v8265_v2  ;;  %v6227_v54 = vadd.f32 %v6226_v16, %v6225_v24  ;;  %v6307_v8 = vsel %vm5494_vm5, %v19309_v34, 0.0  ;;  %v6280_v15 = vrot.slane %v6279_v30, 4  ;;  %v24492_v16 = vld [vmem:[#allocation188_spill] sm:$0xff] }
 0x5b4   : > { %v8267_v29 = vsel %vm8159_vm10, %v6334_v21, %v8266_v52  ;;  %v6253_v22 = vadd.f32 %v6252_v58, %v6251_v14  ;;  %v6308_v20 = vrot.slane %v6307_v8, 4  ;;  %v6335_v35 = vsel %vm5494_vm5, %v19746_v41, 0.0 }
 0x5b5   : > { %v6228_v0 = vrot.slane %v6227_v54, 1  ;;  %v8268_v43 = vsel %vm8161_vm11, %v6362_v13, %v8267_v29  ;;  %v6363_v50 = vsel %vm5494_vm5, %v19750_v19, 0.0  ;;  %v6281_v17 = vadd.f32 %v6280_v15, %v6279_v30 }
 0x5b6   : > { %v8269_v37 = vsel %vm8163_vm12, %v6390_v53, %v8268_v43  ;;  %v6254_v40 = vrot.slane %v6253_v22, 2  ;;  %v6309_v34 = vadd.f32 %v6308_v20, %v6307_v8  ;;  %v6336_v55 = vrot.slane %v6335_v35, 4 }
 0x5b7   : > { %v6229_v3 = vadd.f32 %v6228_v0, %v6227_v54  ;;  %8450 = vmatprep.mubr.f32.mxu1 %v8269_v37  ;;  %v6364_v44 = vrot.slane %v6363_v50, 4  ;;  %v8242_v57 = vsel %vm8151_vm6, %v6201_v42, %v6173_v9  ;;  %v6282_v59 = vrot.slane %v6281_v17, 2 }
 0x5b8   : > { %v6255_v61 = vadd.f32 %v6254_v40, %v6253_v22  ;;  %v6186_v41 = vrot.slane %v24489_v63, 1  ;;  %v6310_v51 = vrot.slane %v6309_v34, 2  ;;  %v6337_v46 = vadd.f32 %v6336_v55, %v6335_v35 }
 0x5b9   : > { %v8243_v5 = vsel %vm8153_vm7, %v6229_v3, %v8242_v57  ;;  %v6365_v19 = vadd.f32 %v6364_v44, %v6363_v50  ;;  %v6214_v32 = vrot.slane %v24490_v6, 1  ;;  %v6283_v47 = vadd.f32 %v6282_v59, %v6281_v17 }
 0x5ba   : > { %v6256_v49 = vrot.slane %v6255_v61, 1  ;;  %v6187_v12 = vadd.f32 %v6186_v41, %v24489_v63  ;;  %v6240_v24 = vrot.slane %v24491_v48, 2  ;;  %v6311_v39 = vadd.f32 %v6310_v51, %v6309_v34 }
 0x5bb   : > { %v6338_v60 = vrot.slane %v6337_v46, 2  ;;  %v6366_v9 = vrot.slane %v6365_v19, 2  ;;  %v6215_v7 = vadd.f32 %v6214_v32, %v24490_v6  ;;  %v6284_v62 = vrot.slane %v6283_v47, 1  ;;  %v24494_v6 = vld [vmem:[#allocation94_spill] sm:$0xff] }
 0x5bc   : > { %v6257_v36 = vadd.f32 %v6256_v49, %v6255_v61  ;;  %v6241_v2 = vadd.f32 %v6240_v24, %v24491_v48  ;;  %v24493_v1 = vrot.slane %v24492_v16, 4  ;;  %v6312_v42 = vrot.slane %v6311_v39, 1  ;;  %v24495_v49 = vld [vmem:[#allocation82_spill] sm:$0xff] }
 0x5bd   : > { %v6339_v14 = vadd.f32 %v6338_v60, %v6337_v46  ;;  %v6367_v21 = vadd.f32 %v6366_v9, %v6365_v19  ;;  %v6293_v52 = vsel %vm5494_vm5, %v24483_v27, 0.0  ;;  %v6285_v54 = vadd.f32 %v6284_v62, %v6283_v47  ;;  %v24498_v62 = vld [vmem:[#allocation98_spill] sm:$0xff] }
 0x5be   : > { %v6267_v18 = vadd.f32 %v24493_v1, %v24492_v16  ;;  %v8244_v58 = vsel %vm8155_vm8, %v6257_v36, %v8243_v5  ;;  %v6242_v13 = vrot.slane %v6241_v2, 1  ;;  %v6313_v30 = vadd.f32 %v6312_v42, %v6311_v39 }
 0x5bf   : > { %v6340_v8 = vrot.slane %v6339_v14, 1  ;;  %v6368_v29 = vrot.slane %v6367_v21, 1  ;;  %v6294_v0 = vrot.slane %v6293_v52, 4  ;;  %v8245_v22 = vsel %vm8157_vm9, %v6285_v54, %v8244_v58 }
 0x5c0   : > { %v6268_v53 = vrot.slane %v6267_v18, 2  ;;  %v6243_v15 = vadd.f32 %v6242_v13, %v6241_v2  ;;  %v6321_v20 = vsel %vm5494_vm5, %v19312_v45, 0.0  ;;  %v8246_v27 = vsel %vm8159_vm10, %v6313_v30, %v8245_v22 }
 0x5c1   : > { %v6341_v35 = vadd.f32 %v6340_v8, %v6339_v14  ;;  %v6369_v50 = vadd.f32 %v6368_v29, %v6367_v21  ;;  %v6295_v37 = vadd.f32 %v6294_v0, %v6293_v52  ;;  %v6322_v40 = vrot.slane %v6321_v20, 4  ;;  %v24499_v14 = vld [vmem:[#allocation71_spill] sm:$0xff] }
 0x5c2   : > { %v6269_v43 = vadd.f32 %v6268_v53, %v6267_v18  ;;  %v6349_v17 = vsel %vm5494_vm5, %v19333_v23, 0.0  ;;  %v6377_v34 = vsel %vm5494_vm5, %v19787_v11, 0.0  ;;  %v8256_v63 = vsel %vm8151_vm6, %v6215_v7, %v6187_v12  ;;  %v24496_v12 = vld [vmem:[#allocation100_spill] sm:$0xff] }
 0x5c3   : > { %v8247_v55 = vsel %vm8161_vm11, %v6341_v35, %v8246_v27  ;;  %v6296_v44 = vrot.slane %v6295_v37, 2  ;;  %v6350_v57 = vrot.slane %v6349_v17, 4  ;;  %v6378_v61 = vrot.slane %v6377_v34, 4  ;;  %v24497_v7 = vld [vmem:[#allocation96_spill] sm:$0xff] }
 0x5c4   : > { %v6270_v3 = vrot.slane %v6269_v43, 1  ;;  %v8248_v45 = vsel %vm8163_vm12, %v6369_v50, %v8247_v55  ;;  %v6323_v5 = vadd.f32 %v6322_v40, %v6321_v20  ;;  %v8257_v23 = vsel %vm8153_vm7, %v6243_v15, %v8256_v63  ;;  %v24501_v15 = vld [vmem:[#allocation61_spill] sm:$0xff]  ;;  %v24503_v35 = vld [vmem:[#allocation12_spill] sm:$0xff] }
 0x5c5   : > { %8366 = vmatmul.mubr.f32.gmra.mrb[54].mxu0 %v8248_v45  ;;  %v6297_v41 = vadd.f32 %v6296_v44, %v6295_v37  ;;  %v6351_v51 = vadd.f32 %v6350_v57, %v6349_v17  ;;  %v6379_v46 = vadd.f32 %v6378_v61, %v6377_v34  ;;  %v19870_v32 = vmul.f32 %v24494_v6, %v24494_v6 }
 0x5c6   : > { %v6271_v59 = vadd.f32 %v6270_v3, %v6269_v43  ;;  %v6324_v19 = vrot.slane %v6323_v5, 2  ;;  %v6521_v47 = vcombine.high %v24495_v49, %v24495_v49  ;;  %v6538_v60 = vcombine.high %v24496_v12, %v24496_v12 }
 0x5c7   : > { %v6298_v48 = vrot.slane %v6297_v41, 1  ;;  %v6352_v24 = vrot.slane %v6351_v51, 2  ;;  %v6380_v39 = vrot.slane %v6379_v46, 2  ;;  %v19878_v36 = vrot.slane %v24497_v7, %v18281_v33 }
 0x5c8   : > { %v8258_v11 = vsel %vm8155_vm8, %v6271_v59, %v8257_v23  ;;  %v6325_v9 = vadd.f32 %v6324_v19, %v6323_v5  ;;  %v19882_v2 = vrot.slane %v24498_v62, %v18281_v33  ;;  %v19886_v16 = vrot.slane %v19870_v32, %v18281_v33 }
 0x5c9   : > { %v6299_v1 = vadd.f32 %v6298_v48, %v6297_v41  ;;  %v6353_v18 = vadd.f32 %v6352_v24, %v6351_v51  ;;  %v6381_v42 = vadd.f32 %v6380_v39, %v6379_v46  ;;  %v24500_v21 = vcombine.high %v24499_v14, %v24499_v14 }
 0x5ca   : > { %v6326_v54 = vrot.slane %v6325_v9, 1  ;;  %v6555_v58 = vcombine.high %v19878_v36, %v19878_v36  ;;  %v6572_v13 = vcombine.high %v19882_v2, %v19882_v2  ;;  %v6589_v53 = vcombine.high %v19886_v16, %v19886_v16 }
 0x5cb   : > { %v7134_v52 = vsel %vm5494_vm5, %v24500_v21, 0.0  ;;  %v6354_v30 = vrot.slane %v6353_v18, 1  ;;  %v6382_v8 = vrot.slane %v6381_v42, 1  ;;  %v8259_v29 = vsel %vm8157_vm9, %v6299_v1, %v8258_v11 }
 0x5cc   : > { %v7135_v0 = vrot.slane %v7134_v52, 4  ;;  %v6327_v22 = vadd.f32 %v6326_v54, %v6325_v9  ;;  %v24502_v43 = vcombine.high %v24501_v15, %v24501_v15  ;;  %v24504_v50 = vcombine.high %v24503_v35, %v24503_v35 }
 0x5cd   : > { %v7218_v37 = vsel %vm5494_vm5, %v6521_v47, 0.0  ;;  %v6355_v3 = vadd.f32 %v6354_v30, %v6353_v18  ;;  %v6383_v40 = vadd.f32 %v6382_v8, %v6381_v42  ;;  %v7246_v61 = vsel %vm5494_vm5, %v6538_v60, 0.0 }
 0x5ce   : > { %v7162_v20 = vsel %vm5494_vm5, %v24502_v43, 0.0  ;;  %v7190_v27 = vsel %vm5494_vm5, %v24504_v50, 0.0  ;;  %v7136_v17 = vadd.f32 %v7135_v0, %v7134_v52  ;;  %v8260_v55 = vsel %vm8159_vm10, %v6327_v22, %v8259_v29 }
 0x5cf   : > { %v7163_v34 = vrot.slane %v7162_v20, 4  ;;  %v7191_v44 = vrot.slane %v7190_v27, 4  ;;  %v7219_v57 = vrot.slane %v7218_v37, 4  ;;  %v8261_v45 = vsel %vm8161_vm11, %v6355_v3, %v8260_v55 }
 0x5d0   : > { %v7137_v59 = vrot.slane %v7136_v17, 2  ;;  %v7247_v63 = vrot.slane %v7246_v61, 4  ;;  %v8262_v41 = vsel %vm8163_vm12, %v6383_v40, %v8261_v45  ;;  %v7274_v23 = vsel %vm5494_vm5, %v6555_v58, 0.0 }
 0x5d1   : > { %v7164_v5 = vadd.f32 %v7163_v34, %v7162_v20  ;;  %v7192_v51 = vadd.f32 %v7191_v44, %v7190_v27  ;;  %v7220_v46 = vadd.f32 %v7219_v57, %v7218_v37  ;;  %8451 = vmatmul.mubr.f32.gmra.mrb[54].mxu1 %v8262_v41  ;;  %v7275_v47 = vrot.slane %v7274_v23, 4  ;;  %v24506_v44 = vld [vmem:[#allocation83_spill] sm:$0xff] }
 0x5d2   : > { %v7138_v19 = vadd.f32 %v7137_v59, %v7136_v17  ;;  %v7248_v49 = vadd.f32 %v7247_v63, %v7246_v61  ;;  %v7302_v39 = vsel %vm5494_vm5, %v6572_v13, 0.0  ;;  %v7330_v60 = vsel %vm5494_vm5, %v6589_v53, 0.0  ;;  %v24505_v53 = vld [vmem:[#allocation81_spill] sm:$0xff] }
 0x5d3   : > { %v7165_v11 = vrot.slane %v7164_v5, 2  ;;  %v7193_v48 = vrot.slane %v7192_v51, 2  ;;  %v7221_v24 = vrot.slane %v7220_v46, 2  ;;  %v7276_v42 = vadd.f32 %v7275_v47, %v7274_v23 }
 0x5d4   : > { %v7139_v9 = vrot.slane %v7138_v19, 1  ;;  %v7249_v18 = vrot.slane %v7248_v49, 2  ;;  %v7303_v52 = vrot.slane %v7302_v39, 4  ;;  %v7331_v54 = vrot.slane %v7330_v60, 4 }
 0x5d5   : > { %v7166_v1 = vadd.f32 %v7165_v11, %v7164_v5  ;;  %v7194_v14 = vadd.f32 %v7193_v48, %v7192_v51  ;;  %v7222_v21 = vadd.f32 %v7221_v24, %v7220_v46  ;;  %v7277_v29 = vrot.slane %v7276_v42, 2  ;;  %v24507_v5 = vld [vmem:[#allocation95_spill] sm:$0xff] }
 0x5d6   : > { %v7140_v58 = vadd.f32 %v7139_v9, %v7138_v19  ;;  %v7250_v8 = vadd.f32 %v7249_v18, %v7248_v49  ;;  %v7304_v15 = vadd.f32 %v7303_v52, %v7302_v39  ;;  %v7332_v43 = vadd.f32 %v7331_v54, %v7330_v60  ;;  %v24510_v18 = vld [vmem:[#allocation13_spill] sm:$0xff] }
 0x5d7   : > { %v7167_v30 = vrot.slane %v7166_v1, 1  ;;  %v7195_v0 = vrot.slane %v7194_v14, 1  ;;  %v7223_v22 = vrot.slane %v7222_v21, 1  ;;  %v7278_v35 = vadd.f32 %v7277_v29, %v7276_v42 }
 0x5d8   : > { %v7251_v13 = vrot.slane %v7250_v8, 1  ;;  %v6505_v50 = vcombine.high %v24505_v53, %v24505_v53  ;;  %v7305_v3 = vrot.slane %v7304_v15, 2  ;;  %v7333_v40 = vrot.slane %v7332_v43, 2 }
 0x5d9   : > { %v7168_v20 = vadd.f32 %v7167_v30, %v7166_v1  ;;  %v7196_v27 = vadd.f32 %v7195_v0, %v7194_v14  ;;  %v7224_v37 = vadd.f32 %v7223_v22, %v7222_v21  ;;  %v7279_v34 = vrot.slane %v7278_v35, 1  ;;  %v24512_v21 = vld [vmem:[#allocation80_spill] sm:$0xff] }
 0x5da   : > { %v7252_v17 = vadd.f32 %v7251_v13, %v7250_v8  ;;  %v6522_v57 = vcombine.high %v24506_v44, %v24506_v44  ;;  %v7306_v61 = vadd.f32 %v7305_v3, %v7304_v15  ;;  %v7334_v45 = vadd.f32 %v7333_v40, %v7332_v43 }
 0x5db   : > { %v8591_v55 = vsel %vm8151_vm6, %v7168_v20, %v7140_v58  ;;  %v24508_v63 = vcombine.high %v24507_v5, %v24507_v5  ;;  %v7280_v51 = vadd.f32 %v7279_v34, %v7278_v35  ;;  %v24509_v23 = vcombine.high %v24497_v7, %v24497_v7 }
 0x5dc   : > { %v8592_v59 = vsel %vm8153_vm7, %v7196_v27, %v8591_v55  ;;  %v6557_v11 = vcombine.high %v24498_v62, %v24498_v62  ;;  %v7307_v49 = vrot.slane %v7306_v61, 1  ;;  %v7335_v47 = vrot.slane %v7334_v45, 1 }
 0x5dd   : > { %v19925_v41 = vrot.slane %v24508_v63, %v18281_v33  ;;  %v8593_v46 = vsel %vm8155_vm8, %v7224_v37, %v8592_v59  ;;  %v19932_v19 = vrot.slane %v24509_v23, %v18281_v33  ;;  %v6574_v7 = vcombine.high %v19870_v32, %v19870_v32 }
 0x5de   : > { %v8594_v48 = vsel %vm8157_vm9, %v7252_v17, %v8593_v46  ;;  %v19943_v9 = vrot.slane %v6557_v11, %v18281_v33  ;;  %v7308_v1 = vadd.f32 %v7307_v49, %v7306_v61  ;;  %v7336_v62 = vadd.f32 %v7335_v47, %v7334_v45 }
 0x5df   : > { %v6539_v24 = vcombine.high %v19925_v41, %v19925_v41  ;;  %v8595_v39 = vsel %vm8159_vm10, %v7280_v51, %v8594_v48  ;;  %v6556_v60 = vcombine.high %v19932_v19, %v19932_v19  ;;  %v24511_v42 = vcombine.high %v24510_v18, %v24510_v18 }
 0x5e0   : > { %v24513_v52 = vcombine.high %v24512_v21, %v24512_v21  ;;  %v6573_v58 = vcombine.high %v19943_v9, %v19943_v9  ;;  %v19958_v30 = vrot.slane %v6574_v7, %v18281_v33  ;;  %v8596_v29 = vsel %vm8161_vm11, %v7308_v1, %v8595_v39 }
 0x5e1   : > { %v7148_v14 = vsel %vm5494_vm5, %v24511_v42, 0.0  ;;  %v7204_v0 = vsel %vm5494_vm5, %v6505_v50, 0.0  ;;  %v7232_v22 = vsel %vm5494_vm5, %v6522_v57, 0.0  ;;  %v7260_v15 = vsel %vm5494_vm5, %v6539_v24, 0.0 }
 0x5e2   : > { %v7176_v54 = vsel %vm5494_vm5, %v24513_v52, 0.0  ;;  %v7149_v8 = vrot.slane %v7148_v14, 4  ;;  %v8597_v43 = vsel %vm8163_vm12, %v7336_v62, %v8596_v29  ;;  %v6590_v20 = vcombine.high %v19958_v30, %v19958_v30 }
 0x5e3   : > { %v7177_v32 = vrot.slane %v7176_v54, 4  ;;  %8776 = vmatprep.mubr.f32.mxu0 %v8597_v43  ;;  %v7205_v53 = vrot.slane %v7204_v0, 4  ;;  %v7233_v27 = vrot.slane %v7232_v22, 4  ;;  %v7261_v37 = vrot.slane %v7260_v15, 4 }
 0x5e4   : > { %v7150_v13 = vadd.f32 %v7149_v8, %v7148_v14  ;;  %v7288_v3 = vsel %vm5494_vm5, %v6556_v60, 0.0  ;;  %v7316_v34 = vsel %vm5494_vm5, %v6573_v58, 0.0  ;;  %v7344_v51 = vsel %vm5494_vm5, %v6590_v20, 0.0 }
 0x5e5   : > { %v7178_v35 = vadd.f32 %v7177_v32, %v7176_v54  ;;  %v7289_v50 = vrot.slane %v7288_v3, 4  ;;  %v7206_v55 = vadd.f32 %v7205_v53, %v7204_v0  ;;  %v7234_v57 = vadd.f32 %v7233_v27, %v7232_v22  ;;  %v24514_v22 = vld [vmem:[#allocation84_spill] sm:$0xff] }
 0x5e6   : > { %v7151_v40 = vrot.slane %v7150_v13, 2  ;;  %v7262_v61 = vadd.f32 %v7261_v37, %v7260_v15  ;;  %v7317_v45 = vrot.slane %v7316_v34, 4  ;;  %v7345_v39 = vrot.slane %v7344_v51, 4 }
 0x5e7   : > { %v7179_v17 = vrot.slane %v7178_v35, 2  ;;  %v7290_v63 = vadd.f32 %v7289_v50, %v7288_v3  ;;  %v7207_v46 = vrot.slane %v7206_v55, 2  ;;  %v7235_v23 = vrot.slane %v7234_v57, 2 }
 0x5e8   : > { %v7152_v59 = vadd.f32 %v7151_v40, %v7150_v13  ;;  %v7263_v11 = vrot.slane %v7262_v61, 2  ;;  %v7318_v49 = vadd.f32 %v7317_v45, %v7316_v34  ;;  %v7346_v21 = vadd.f32 %v7345_v39, %v7344_v51  ;;  %v24516_v40 = vld [vmem:[#allocation88_spill] sm:$0xff]  ;;  %v24519_v45 = vld [vmem:[#allocation86_spill] sm:$0xff] }
 0x5e9   : > { %v7180_v5 = vadd.f32 %v7179_v17, %v7178_v35  ;;  %v7291_v24 = vrot.slane %v7290_v63, 2  ;;  %v7208_v60 = vadd.f32 %v7207_v46, %v7206_v55  ;;  %v7236_v7 = vadd.f32 %v7235_v23, %v7234_v57  ;;  %v24518_v57 = vld [vmem:[#allocation90_spill] sm:$0xff] }
 0x5ea   : > { %v7153_v47 = vrot.slane %v7152_v59, 1  ;;  %v7264_v1 = vadd.f32 %v7263_v11, %v7262_v61  ;;  %v7319_v62 = vrot.slane %v7318_v49, 2  ;;  %v7347_v29 = vrot.slane %v7346_v21, 2 }
 0x5eb   : > { %v7181_v48 = vrot.slane %v7180_v5, 1  ;;  %v7292_v14 = vadd.f32 %v7291_v24, %v7290_v63  ;;  %v7209_v52 = vrot.slane %v7208_v60, 1  ;;  %v7237_v54 = vrot.slane %v7236_v7, 1 }
 0x5ec   : > { %v7154_v18 = vadd.f32 %v7153_v47, %v7152_v59  ;;  %v7265_v58 = vrot.slane %v7264_v1, 1  ;;  %v7320_v8 = vadd.f32 %v7319_v62, %v7318_v49  ;;  %v24515_v15 = vrot.slane %v24514_v22, 2 }
 0x5ed   : > { %v7182_v42 = vadd.f32 %v7181_v48, %v7180_v5  ;;  %v7293_v32 = vrot.slane %v7292_v14, 1  ;;  %v7210_v20 = vadd.f32 %v7209_v52, %v7208_v60  ;;  %v7238_v13 = vadd.f32 %v7237_v54, %v7236_v7 }
 0x5ee   : > { %v7131_v43 = vadd.f32 %v24515_v15, %v24514_v22  ;;  %v7266_v35 = vadd.f32 %v7265_v58, %v7264_v1  ;;  %v7321_v53 = vrot.slane %v7320_v8, 1  ;;  %v7348_v37 = vadd.f32 %v7347_v29, %v7346_v21 }
 0x5ef   : > { %v8605_v0 = vsel %vm8151_vm6, %v7182_v42, %v7154_v18  ;;  %v7294_v27 = vadd.f32 %v7293_v32, %v7292_v14  ;;  %v24517_v17 = vrot.slane %v24516_v40, 2  ;;  %v7186_v61 = vrot.slane %v24518_v57, 2 }
 0x5f0   : > { %v7132_v3 = vrot.slane %v7131_v43, 1  ;;  %v7322_v34 = vadd.f32 %v7321_v53, %v7320_v8  ;;  %v8606_v55 = vsel %vm8153_vm7, %v7210_v20, %v8605_v0  ;;  %v24520_v59 = vrot.slane %v24519_v45, 4 }
 0x5f1   : > { %v7159_v50 = vadd.f32 %v24517_v17, %v24516_v40  ;;  %v7349_v63 = vrot.slane %v7348_v37, 1  ;;  %v8607_v51 = vsel %vm8155_vm8, %v7238_v13, %v8606_v55  ;;  %v7187_v49 = vadd.f32 %v7186_v61, %v24518_v57  ;;  %v24521_v13 = vld [vmem:[#allocation87_spill] sm:$0xff] }
 0x5f2   : > { %v7213_v5 = vadd.f32 %v24520_v59, %v24519_v45  ;;  %v7133_v46 = vadd.f32 %v7132_v3, %v7131_v43  ;;  %v8608_v11 = vsel %vm8157_vm9, %v7266_v35, %v8607_v51  ;;  %v7239_v48 = vsel %vm5494_vm5, %v24496_v12, 0.0 }
 0x5f3   : > { %v7160_v23 = vrot.slane %v7159_v50, 1  ;;  %v7350_v24 = vadd.f32 %v7349_v63, %v7348_v37  ;;  %v8609_v39 = vsel %vm8159_vm10, %v7294_v27, %v8608_v11  ;;  %v7240_v7 = vrot.slane %v7239_v48, 4  ;;  %v24522_v37 = vld [vmem:[#allocation89_spill] sm:$0xff] }
 0x5f4   : > { %v7214_v47 = vrot.slane %v7213_v5, 2  ;;  %v8610_v1 = vsel %vm8161_vm11, %v7322_v34, %v8609_v39  ;;  %v7188_v62 = vrot.slane %v7187_v49, 1  ;;  %v7267_v42 = vsel %vm5494_vm5, %v19878_v36, 0.0 }
 0x5f5   : > { %v7161_v60 = vadd.f32 %v7160_v23, %v7159_v50  ;;  %v8611_v14 = vsel %vm8163_vm12, %v7350_v24, %v8610_v1  ;;  %v7241_v21 = vadd.f32 %v7240_v7, %v7239_v48  ;;  %v7268_v52 = vrot.slane %v7267_v42, 4  ;;  %v24523_v50 = vld [vmem:[#allocation85_spill] sm:$0xff] }
 0x5f6   : > { %v7215_v18 = vadd.f32 %v7214_v47, %v7213_v5  ;;  %v7295_v54 = vsel %vm5494_vm5, %v19882_v2, 0.0  ;;  %8861 = vmatprep.mubr.f32.mxu1 %v8611_v14  ;;  %v7189_v12 = vadd.f32 %v7188_v62, %v7187_v49  ;;  %v7323_v32 = vsel %vm5494_vm5, %v19886_v16, 0.0 }
 0x5f7   : > { %v7296_v8 = vrot.slane %v7295_v54, 4  ;;  %v7242_v29 = vrot.slane %v7241_v21, 2  ;;  %v7269_v0 = vadd.f32 %v7268_v52, %v7267_v42  ;;  %v7324_v22 = vrot.slane %v7323_v32, 4 }
 0x5f8   : > { %v7216_v58 = vrot.slane %v7215_v18, 1  ;;  %v8584_v15 = vsel %vm8151_vm6, %v7161_v60, %v7133_v46  ;;  %v7144_v35 = vrot.slane %v24521_v13, 2  ;;  %v7172_v3 = vrot.slane %v24522_v37, 2 }
 0x5f9   : > { %v7297_v43 = vadd.f32 %v7296_v8, %v7295_v54  ;;  %v8585_v20 = vsel %vm8153_vm7, %v7189_v12, %v8584_v15  ;;  %v7243_v53 = vadd.f32 %v7242_v29, %v7241_v21  ;;  %v7270_v2 = vrot.slane %v7269_v0, 2 }
 0x5fa   : > { %v7217_v36 = vadd.f32 %v7216_v58, %v7215_v18  ;;  %v7325_v27 = vadd.f32 %v7324_v22, %v7323_v32  ;;  %v7145_v16 = vadd.f32 %v7144_v35, %v24521_v13  ;;  %v24524_v34 = vrot.slane %v24523_v50, 4 }
 0x5fb   : > { %v7298_v40 = vrot.slane %v7297_v43, 2  ;;  %v7244_v57 = vrot.slane %v7243_v53, 1  ;;  %v7271_v61 = vadd.f32 %v7270_v2, %v7269_v0  ;;  %v7173_v59 = vadd.f32 %v7172_v3, %v24522_v37 }
 0x5fc   : > { %v8586_v17 = vsel %vm8155_vm8, %v7217_v36, %v8585_v20  ;;  %v7199_v55 = vadd.f32 %v24524_v34, %v24523_v50  ;;  %v7326_v45 = vrot.slane %v7325_v27, 2  ;;  %v7146_v63 = vrot.slane %v7145_v16, 1  ;;  %v24526_v34 = vld [vmem:[#allocation139_spill] sm:$0xff] }
 0x5fd   : > { %v7299_v5 = vadd.f32 %v7298_v40, %v7297_v43  ;;  %v7225_v46 = vsel %vm5494_vm5, %v24506_v44, 0.0  ;;  %v7245_v23 = vadd.f32 %v7244_v57, %v7243_v53  ;;  %v7272_v11 = vrot.slane %v7271_v61, 1  ;;  %v24527_v57 = vld [vmem:[#allocation137_spill] sm:$0xff] }
 0x5fe   : > { %v7200_v51 = vrot.slane %v7199_v55, 2  ;;  %v7327_v49 = vadd.f32 %v7326_v45, %v7325_v27  ;;  %v7174_v47 = vrot.slane %v7173_v59, 1  ;;  %v7147_v24 = vadd.f32 %v7146_v63, %v7145_v16  ;;  %v24525_v27 = vld [vmem:[#allocation126_spill] sm:$0xff] }
 0x5ff   : > { %v7300_v48 = vrot.slane %v7299_v5, 1  ;;  %v7226_v60 = vrot.slane %v7225_v46, 4  ;;  %v7273_v7 = vadd.f32 %v7272_v11, %v7271_v61  ;;  %v8587_v62 = vsel %vm8157_vm9, %v7245_v23, %v8586_v17 }
 0x600   : > { %v7201_v39 = vadd.f32 %v7200_v51, %v7199_v55  ;;  %v7328_v1 = vrot.slane %v7327_v49, 1  ;;  %v7175_v18 = vadd.f32 %v7174_v47, %v7173_v59  ;;  %v7253_v52 = vsel %vm5494_vm5, %v19925_v41, 0.0 }
 0x601   : > { %v7301_v42 = vadd.f32 %v7300_v48, %v7299_v5  ;;  %v7227_v21 = vadd.f32 %v7226_v60, %v7225_v46  ;;  %v8588_v54 = vsel %vm8159_vm10, %v7273_v7, %v8587_v62  ;;  %v7254_v12 = vrot.slane %v7253_v52, 4 }
 0x602   : > { %v7202_v14 = vrot.slane %v7201_v39, 1  ;;  %v7329_v44 = vadd.f32 %v7328_v1, %v7327_v49  ;;  %v7281_v58 = vsel %vm5494_vm5, %v19932_v19, 0.0  ;;  %v7309_v36 = vsel %vm5494_vm5, %v19943_v9, 0.0  ;;  %v15781_v9 = vld [vmem:[%s23427_s13] sm:$0xff] }
 0x603   : > { %v8589_v8 = vsel %vm8161_vm11, %v7301_v42, %v8588_v54  ;;  %v7228_v29 = vrot.slane %v7227_v21, 2  ;;  %v7282_v0 = vrot.slane %v7281_v58, 4  ;;  %v7255_v15 = vadd.f32 %v7254_v12, %v7253_v52  ;;  %v24529_v1 = vld [vmem:[#allocation120_spill] sm:$0xff]  ;;  %v24531_v54 = vld [vmem:[#allocation121_spill] sm:$0xff] }
 0x604   : > { %v7203_v32 = vadd.f32 %v7202_v14, %v7201_v39  ;;  %v8590_v22 = vsel %vm8163_vm12, %v7329_v44, %v8589_v8  ;;  %v7337_v41 = vsel %vm5494_vm5, %v19958_v30, 0.0  ;;  %v7310_v13 = vrot.slane %v7309_v36, 4  ;;  %v24533_v8 = vld [vmem:[#allocation122_spill] sm:$0xff] }
 0x605   : > { %8777 = vmatmul.mubr.f32.vlgmr.msra.gmra.mrb[56].mxu0 %v8590_v22  ;;  %v7229_v43 = vadd.f32 %v7228_v29, %v7227_v21  ;;  %v7283_v20 = vadd.f32 %v7282_v0, %v7281_v58  ;;  %v7338_v35 = vrot.slane %v7337_v41, 4  ;;  %v7256_v19 = vrot.slane %v7255_v15, 2 }
 0x606   : > { %v8598_v53 = vsel %vm8151_vm6, %v7175_v18, %v7147_v24  ;;  %v20023_v2 = vmul.f32 %v18806_v28, %v18806_v28  ;;  %v6657_v37 = vcombine.high %v24525_v27, %v24525_v27  ;;  %14478 = vmatpush1.msk.msra.mxu0 %vm1868_vm0, %v15781_v9  ;;  %v7311_v40 = vadd.f32 %v7310_v13, %v7309_v36 }
 0x607   : > { %v7230_v30 = vrot.slane %v7229_v43, 1  ;;  %v7284_v3 = vrot.slane %v7283_v20, 2  ;;  %v7339_v17 = vadd.f32 %v7338_v35, %v7337_v41  ;;  %14489 = vmatprep.subr.msk.mxu0 %vm1868_vm0, %v24432_v26  ;;  %v7257_v16 = vadd.f32 %v7256_v19, %v7255_v15  ;;  %v24528_v26 = vld [vmem:[#allocation138_spill] sm:$0xff] }
 0x608   : > { %v8599_v50 = vsel %vm8153_vm7, %v7203_v32, %v8598_v53  ;;  %v6674_v55 = vcombine.high %v24526_v34, %v24526_v34  ;;  %v20038_v61 = vrot.slane %v24527_v57, %v18281_v33  ;;  %v7312_v5 = vrot.slane %v7311_v40, 2 }
 0x609   : > { %v7231_v45 = vadd.f32 %v7230_v30, %v7229_v43  ;;  %v7285_v59 = vadd.f32 %v7284_v3, %v7283_v20  ;;  %v7340_v63 = vrot.slane %v7339_v17, 2  ;;  %v7258_v51 = vrot.slane %v7257_v16, 1 }
 0x60a   : > { %v6691_v46 = vcombine.high %v20038_v61, %v20038_v61  ;;  %v20044_v23 = vrot.slane %v24528_v26, %v18281_v33  ;;  %v20048_v11 = vrot.slane %v20023_v2, %v18281_v33  ;;  %v7313_v47 = vadd.f32 %v7312_v5, %v7311_v40 }
 0x60b   : > { %v7286_v49 = vrot.slane %v7285_v59, 1  ;;  %v7341_v48 = vadd.f32 %v7340_v63, %v7339_v17  ;;  %v8600_v24 = vsel %vm8155_vm8, %v7231_v45, %v8599_v50  ;;  %v7259_v39 = vadd.f32 %v7258_v51, %v7257_v16 }
 0x60c   : > { %v6708_v60 = vcombine.high %v20044_v23, %v20044_v23  ;;  %v6725_v7 = vcombine.high %v20048_v11, %v20048_v11  ;;  %v24530_v62 = vcombine.high %v24529_v1, %v24529_v1  ;;  %v7314_v14 = vrot.slane %v7313_v47, 1 }
 0x60d   : > { %v7287_v42 = vadd.f32 %v7286_v49, %v7285_v59  ;;  %v7342_v21 = vrot.slane %v7341_v48, 1  ;;  %v8601_v44 = vsel %vm8157_vm9, %v7259_v39, %v8600_v24  ;;  %v24532_v12 = vcombine.high %v24531_v54, %v24531_v54  ;;  %v15782_v49 = vld [vmem:[%s23427_s13 + $0x8] sm:$0xff] }
 0x60e   : > { %v7358_v18 = vsel %vm5494_vm5, %v24530_v62, 0.0  ;;  %v24534_v32 = vcombine.high %v24533_v8, %v24533_v8  ;;  %v7442_v0 = vsel %vm5494_vm5, %v6657_v37, 0.0  ;;  %v7315_v22 = vadd.f32 %v7314_v14, %v7313_v47 }
 0x60f   : > { %v7359_v52 = vrot.slane %v7358_v18, 4  ;;  %v7386_v58 = vsel %vm5494_vm5, %v24532_v12, 0.0  ;;  %v7343_v15 = vadd.f32 %v7342_v21, %v7341_v48  ;;  %v8602_v36 = vsel %vm8159_vm10, %v7287_v42, %v8601_v44 }
 0x610   : > { %v7414_v29 = vsel %vm5494_vm5, %v24534_v32, 0.0  ;;  %v7387_v43 = vrot.slane %v7386_v58, 4  ;;  %v7443_v13 = vrot.slane %v7442_v0, 4  ;;  %v7470_v35 = vsel %vm5494_vm5, %v6674_v55, 0.0 }
 0x611   : > { %v7360_v41 = vadd.f32 %v7359_v52, %v7358_v18  ;;  %v7415_v20 = vrot.slane %v7414_v29, 4  ;;  %v8603_v19 = vsel %vm8161_vm11, %v7315_v22, %v8602_v36  ;;  %v7471_v9 = vrot.slane %v7470_v35, 4 }
 0x612   : > { %v7498_v30 = vsel %vm5494_vm5, %v6691_v46, 0.0  ;;  %v8604_v3 = vsel %vm8163_vm12, %v7343_v15, %v8603_v19  ;;  %v7388_v40 = vadd.f32 %v7387_v43, %v7386_v58  ;;  %v7444_v17 = vadd.f32 %v7443_v13, %v7442_v0  ;;  %v24535_v0 = vld [vmem:[#allocation125_spill] sm:$0xff]  ;;  %v24536_v13 = vld [vmem:[#allocation127_spill] sm:$0xff] }
 0x613   : > { %v7361_v53 = vrot.slane %v7360_v41, 2  ;;  %v7416_v37 = vadd.f32 %v7415_v20, %v7414_v29  ;;  %8862 = vmatmul.mubr.f32.vlgmr.msra.gmra.mrb[56].mxu1 %v8604_v3  ;;  %v7472_v50 = vadd.f32 %v7471_v9, %v7470_v35  ;;  %v7499_v45 = vrot.slane %v7498_v30, 4  ;;  %v24537_v9 = vld [vmem:[#allocation136_spill] sm:$0xff] }
 0x614   : > { %v7526_v59 = vsel %vm5494_vm5, %v6708_v60, 0.0  ;;  %v7389_v5 = vrot.slane %v7388_v40, 2  ;;  %v7445_v55 = vrot.slane %v7444_v17, 2  ;;  %14484 = vmatpush1.msk.msra.mxu1 %vm1868_vm0, %v15782_v49  ;;  %v7554_v24 = vsel %vm5494_vm5, %v6725_v7, 0.0 }
 0x615   : > { %v7362_v16 = vadd.f32 %v7361_v53, %v7360_v41  ;;  %v7417_v63 = vrot.slane %v7416_v37, 2  ;;  %v7527_v51 = vrot.slane %v7526_v59, 4  ;;  %v7473_v47 = vrot.slane %v7472_v50, 2  ;;  %14495 = vmatprep.subr.msk.mxu1 %vm1868_vm0, %v24436_v4 }
 0x616   : > { %v7500_v48 = vadd.f32 %v7499_v45, %v7498_v30  ;;  %v7390_v39 = vadd.f32 %v7389_v5, %v7388_v40  ;;  %v7446_v1 = vadd.f32 %v7445_v55, %v7444_v17  ;;  %v7555_v21 = vrot.slane %v7554_v24, 4 }
 0x617   : > { %v7363_v46 = vrot.slane %v7362_v16, 1  ;;  %v7418_v60 = vadd.f32 %v7417_v63, %v7416_v37  ;;  %v7528_v62 = vadd.f32 %v7527_v51, %v7526_v59  ;;  %v7474_v42 = vadd.f32 %v7473_v47, %v7472_v50  ;;  %v24540_v47 = vld [vmem:[#allocation123_spill] sm:$0xff] }
 0x618   : > { %v7501_v14 = vrot.slane %v7500_v48, 2  ;;  %v7391_v52 = vrot.slane %v7390_v39, 1  ;;  %v7447_v54 = vrot.slane %v7446_v1, 1  ;;  %v7556_v29 = vadd.f32 %v7555_v21, %v7554_v24 }
 0x619   : > { %v7364_v18 = vadd.f32 %v7363_v46, %v7362_v16  ;;  %v7419_v44 = vrot.slane %v7418_v60, 1  ;;  %v7529_v12 = vrot.slane %v7528_v62, 2  ;;  %v7475_v58 = vrot.slane %v7474_v42, 1 }
 0x61a   : > { %v7502_v32 = vadd.f32 %v7501_v14, %v7500_v48  ;;  %v6641_v7 = vcombine.high %v24535_v0, %v24535_v0  ;;  %v7392_v22 = vadd.f32 %v7391_v52, %v7390_v39  ;;  %v7448_v15 = vadd.f32 %v7447_v54, %v7446_v1  ;;  %v24542_v39 = vld [vmem:[#allocation124_spill] sm:$0xff] }
 0x61b   : > { %v7420_v4 = vadd.f32 %v7419_v44, %v7418_v60  ;;  %v7530_v36 = vadd.f32 %v7529_v12, %v7528_v62  ;;  %v7476_v41 = vadd.f32 %v7475_v58, %v7474_v42  ;;  %v7557_v20 = vrot.slane %v7556_v29, 2 }
 0x61c   : > { %v7503_v43 = vrot.slane %v7502_v32, 1  ;;  %v6658_v35 = vcombine.high %v24536_v13, %v24536_v13  ;;  %v8619_v53 = vsel %vm8151_vm6, %v7392_v22, %v7364_v18  ;;  %v24538_v30 = vcombine.high %v24537_v9, %v24537_v9 }
 0x61d   : > { %v7531_v19 = vrot.slane %v7530_v36, 1  ;;  %v24539_v40 = vcombine.high %v24527_v57, %v24527_v57  ;;  %v7558_v16 = vadd.f32 %v7557_v20, %v7556_v29  ;;  %v8620_v50 = vsel %vm8153_vm7, %v7420_v4, %v8619_v53 }
 0x61e   : > { %v20091_v3 = vrot.slane %v24538_v30, %v18281_v33  ;;  %v7504_v17 = vadd.f32 %v7503_v43, %v7502_v32  ;;  %v6693_v45 = vcombine.high %v24528_v26, %v24528_v26  ;;  %v8621_v5 = vsel %vm8155_vm8, %v7448_v15, %v8620_v50 }
 0x61f   : > { %v20097_v37 = vrot.slane %v24539_v40, %v18281_v33  ;;  %v7532_v59 = vadd.f32 %v7531_v19, %v7530_v36  ;;  %v7559_v51 = vrot.slane %v7558_v16, 1  ;;  %v8622_v57 = vsel %vm8157_vm9, %v7476_v41, %v8621_v5 }
 0x620   : > { %v6675_v63 = vcombine.high %v20091_v3, %v20091_v3  ;;  %v20109_v49 = vrot.slane %v6693_v45, %v18281_v33  ;;  %v6710_v46 = vcombine.high %v20023_v2, %v20023_v2  ;;  %v8623_v26 = vsel %vm8159_vm10, %v7504_v17, %v8622_v57 }
 0x621   : > { %v6692_v55 = vcombine.high %v20097_v37, %v20097_v37  ;;  %v24541_v48 = vcombine.high %v24540_v47, %v24540_v47  ;;  %v24543_v60 = vcombine.high %v24542_v39, %v24542_v39  ;;  %v7428_v62 = vsel %vm5494_vm5, %v6641_v7, 0.0 }
 0x622   : > { %v7560_v18 = vadd.f32 %v7559_v51, %v7558_v16  ;;  %v8624_v42 = vsel %vm8161_vm11, %v7532_v59, %v8623_v26  ;;  %v6709_v2 = vcombine.high %v20109_v49, %v20109_v49  ;;  %v20127_v14 = vrot.slane %v6710_v46, %v18281_v33 }
 0x623   : > { %v7372_v24 = vsel %vm5494_vm5, %v24541_v48, 0.0  ;;  %v7400_v1 = vsel %vm5494_vm5, %v24543_v60, 0.0  ;;  %v7429_v44 = vrot.slane %v7428_v62, 4  ;;  %v7456_v54 = vsel %vm5494_vm5, %v6658_v35, 0.0 }
 0x624   : > { %v7373_v21 = vrot.slane %v7372_v24, 4  ;;  %v7401_v52 = vrot.slane %v7400_v1, 4  ;;  %v8625_v12 = vsel %vm8163_vm12, %v7560_v18, %v8624_v42  ;;  %v6726_v58 = vcombine.high %v20127_v14, %v20127_v14 }
 0x625   : > { %v7457_v32 = vrot.slane %v7456_v54, 4  ;;  %v7484_v29 = vsel %vm5494_vm5, %v6675_v63, 0.0  ;;  %8781 = vmatprep.mubr.f32.mxu0 %v8625_v12  ;;  %v7430_v4 = vadd.f32 %v7429_v44, %v7428_v62  ;;  %v7512_v41 = vsel %vm5494_vm5, %v6692_v55, 0.0 }
 0x626   : > { %v7374_v7 = vadd.f32 %v7373_v21, %v7372_v24  ;;  %v7402_v22 = vadd.f32 %v7401_v52, %v7400_v1  ;;  %v7485_v15 = vrot.slane %v7484_v29, 4  ;;  %v7540_v43 = vsel %vm5494_vm5, %v6709_v2, 0.0 }
 0x627   : > { %v7458_v36 = vadd.f32 %v7457_v32, %v7456_v54  ;;  %v7568_v20 = vsel %vm5494_vm5, %v6726_v58, 0.0  ;;  %v7431_v53 = vrot.slane %v7430_v4, 2  ;;  %v7513_v40 = vrot.slane %v7512_v41, 4 }
 0x628   : > { %v7375_v35 = vrot.slane %v7374_v7, 2  ;;  %v7403_v19 = vrot.slane %v7402_v22, 2  ;;  %v7486_v9 = vadd.f32 %v7485_v15, %v7484_v29  ;;  %v7541_v17 = vrot.slane %v7540_v43, 4  ;;  %v24546_v15 = vld [vmem:[#allocation129_spill] sm:$0xff] }
 0x629   : > { %v7459_v30 = vrot.slane %v7458_v36, 2  ;;  %v7569_v16 = vrot.slane %v7568_v20, 4  ;;  %v7432_v59 = vadd.f32 %v7431_v53, %v7430_v4  ;;  %v7514_v51 = vadd.f32 %v7513_v40, %v7512_v41 }
 0x62a   : > { %v7376_v50 = vadd.f32 %v7375_v35, %v7374_v7  ;;  %v7404_v45 = vadd.f32 %v7403_v19, %v7402_v22  ;;  %v7487_v5 = vrot.slane %v7486_v9, 2  ;;  %v7542_v57 = vadd.f32 %v7541_v17, %v7540_v43  ;;  %v24544_v7 = vld [vmem:[#allocation128_spill] sm:$0xff] }
 0x62b   : > { %v7460_v63 = vadd.f32 %v7459_v30, %v7458_v36  ;;  %v7570_v55 = vadd.f32 %v7569_v16, %v7568_v20  ;;  %v7433_v48 = vrot.slane %v7432_v59, 1  ;;  %v7515_v1 = vrot.slane %v7514_v51, 2 }
 0x62c   : > { %v7377_v46 = vrot.slane %v7376_v50, 1  ;;  %v7405_v26 = vrot.slane %v7404_v45, 1  ;;  %v7488_v24 = vadd.f32 %v7487_v5, %v7486_v9  ;;  %v7543_v62 = vrot.slane %v7542_v57, 2 }
 0x62d   : > { %v7461_v60 = vrot.slane %v7460_v63, 1  ;;  %v7571_v18 = vrot.slane %v7570_v55, 2  ;;  %v7434_v21 = vadd.f32 %v7433_v48, %v7432_v59  ;;  %v7516_v54 = vadd.f32 %v7515_v1, %v7514_v51 }
 0x62e   : > { %v7378_v42 = vadd.f32 %v7377_v46, %v7376_v50  ;;  %v7406_v2 = vadd.f32 %v7405_v26, %v7404_v45  ;;  %v7489_v52 = vrot.slane %v7488_v24, 1  ;;  %v7544_v12 = vadd.f32 %v7543_v62, %v7542_v57 }
 0x62f   : > { %v7462_v44 = vadd.f32 %v7461_v60, %v7460_v63  ;;  %v7572_v58 = vadd.f32 %v7571_v18, %v7570_v55  ;;  %v24545_v22 = vrot.slane %v24544_v7, 4  ;;  %v24547_v36 = vrot.slane %v24546_v15, 4 }
 0x630   : > { %v7490_v32 = vadd.f32 %v7489_v52, %v7488_v24  ;;  %v8633_v29 = vsel %vm8151_vm6, %v7406_v2, %v7378_v42  ;;  %v7517_v43 = vrot.slane %v7516_v54, 1  ;;  %v7545_v20 = vrot.slane %v7544_v12, 1 }
 0x631   : > { %v7353_v4 = vadd.f32 %v24545_v22, %v24544_v7  ;;  %v7381_v41 = vadd.f32 %v24547_v36, %v24546_v15  ;;  %v7573_v35 = vrot.slane %v7572_v58, 1  ;;  %v8634_v19 = vsel %vm8153_vm7, %v7434_v21, %v8633_v29 }
 0x632   : > { %v8635_v53 = vsel %vm8155_vm8, %v7462_v44, %v8634_v19  ;;  %v7407_v40 = vsel %vm5494_vm5, %v24533_v8, 0.0  ;;  %v7518_v17 = vadd.f32 %v7517_v43, %v7516_v54  ;;  %v7546_v16 = vadd.f32 %v7545_v20, %v7544_v12 }
 0x633   : > { %v7354_v9 = vrot.slane %v7353_v4, 2  ;;  %v7382_v30 = vrot.slane %v7381_v41, 2  ;;  %v7574_v50 = vadd.f32 %v7573_v35, %v7572_v58  ;;  %v8636_v45 = vsel %vm8157_vm9, %v7490_v32, %v8635_v53 }
 0x634   : > { %v7408_v63 = vrot.slane %v7407_v40, 4  ;;  %v7435_v51 = vsel %vm5494_vm5, %v24525_v27, 0.0  ;;  %v8637_v57 = vsel %vm8159_vm10, %v7518_v17, %v8636_v45  ;;  %v7463_v46 = vsel %vm5494_vm5, %v24526_v34, 0.0 }
 0x635   : > { %v7355_v59 = vadd.f32 %v7354_v9, %v7353_v4  ;;  %v7383_v5 = vadd.f32 %v7382_v30, %v7381_v41  ;;  %v7436_v55 = vrot.slane %v7435_v51, 4  ;;  %v7491_v8 = vsel %vm5494_vm5, %v20038_v61, 0.0 }
 0x636   : > { %v8638_v26 = vsel %vm8161_vm11, %v7546_v16, %v8637_v57  ;;  %v7409_v60 = vadd.f32 %v7408_v63, %v7407_v40  ;;  %v7464_v18 = vrot.slane %v7463_v46, 4  ;;  %v7492_v42 = vrot.slane %v7491_v8, 4 }
 0x637   : > { %v7356_v48 = vrot.slane %v7355_v59, 1  ;;  %v7384_v24 = vrot.slane %v7383_v5, 1  ;;  %v8639_v1 = vsel %vm8163_vm12, %v7574_v50, %v8638_v26  ;;  %v7437_v62 = vadd.f32 %v7436_v55, %v7435_v51 }
 0x638   : > { %8866 = vmatprep.mubr.f32.mxu1 %v8639_v1  ;;  %v7410_v21 = vrot.slane %v7409_v60, 2  ;;  %v7519_v34 = vsel %vm5494_vm5, %v20044_v23, 0.0  ;;  %v7465_v44 = vadd.f32 %v7464_v18, %v7463_v46  ;;  %v7493_v61 = vadd.f32 %v7492_v42, %v7491_v8 }
 0x639   : > { %v7357_v27 = vadd.f32 %v7356_v48, %v7355_v59  ;;  %v7385_v2 = vadd.f32 %v7384_v24, %v7383_v5  ;;  %v7438_v52 = vrot.slane %v7437_v62, 2  ;;  %v7520_v54 = vrot.slane %v7519_v34, 4 }
 0x63a   : > { %v7411_v12 = vadd.f32 %v7410_v21, %v7409_v60  ;;  %v7547_v58 = vsel %vm5494_vm5, %v20048_v11, 0.0  ;;  %v7365_v29 = vsel %vm5494_vm5, %v24540_v47, 0.0  ;;  %v7466_v22 = vrot.slane %v7465_v44, 2 }
 0x63b   : > { %v8612_v32 = vsel %vm8151_vm6, %v7385_v2, %v7357_v27  ;;  %v7439_v7 = vadd.f32 %v7438_v52, %v7437_v62  ;;  %v7494_v4 = vrot.slane %v7493_v61, 2  ;;  %v7521_v15 = vadd.f32 %v7520_v54, %v7519_v34 }
 0x63c   : > { %v7412_v36 = vrot.slane %v7411_v12, 1  ;;  %v7548_v41 = vrot.slane %v7547_v58, 4  ;;  %v7366_v23 = vrot.slane %v7365_v29, 4  ;;  %v7393_v43 = vsel %vm5494_vm5, %v24542_v39, 0.0 }
 0x63d   : > { %v7440_v20 = vrot.slane %v7439_v7, 1  ;;  %v7467_v35 = vadd.f32 %v7466_v22, %v7465_v44  ;;  %v7495_v19 = vadd.f32 %v7494_v4, %v7493_v61  ;;  %v7522_v53 = vrot.slane %v7521_v15, 2 }
 0x63e   : > { %v7413_v11 = vadd.f32 %v7412_v36, %v7411_v12  ;;  %v7549_v9 = vadd.f32 %v7548_v41, %v7547_v58  ;;  %v7367_v30 = vadd.f32 %v7366_v23, %v7365_v29  ;;  %v7394_v40 = vrot.slane %v7393_v43, 4 }
 0x63f   : > { %v7441_v17 = vadd.f32 %v7440_v20, %v7439_v7  ;;  %v7468_v47 = vrot.slane %v7467_v35, 1  ;;  %v7496_v16 = vrot.slane %v7495_v19, 1  ;;  %v7523_v50 = vadd.f32 %v7522_v53, %v7521_v15 }
 0x640   : > { %v7550_v45 = vrot.slane %v7549_v9, 2  ;;  %v8613_v59 = vsel %vm8153_vm7, %v7413_v11, %v8612_v32  ;;  %v7368_v5 = vrot.slane %v7367_v30, 2  ;;  %v7395_v63 = vadd.f32 %v7394_v40, %v7393_v43 }
 0x641   : > { %v7469_v51 = vadd.f32 %v7468_v47, %v7467_v35  ;;  %v7497_v57 = vadd.f32 %v7496_v16, %v7495_v19  ;;  %v7524_v39 = vrot.slane %v7523_v50, 1  ;;  %v8614_v55 = vsel %vm8155_vm8, %v7441_v17, %v8613_v59  ;;  %v24548_v17 = vld [vmem:[#allocation163_spill] sm:$0xff] }
 0x642   : > { %v7551_v46 = vadd.f32 %v7550_v45, %v7549_v9  ;;  %v7369_v8 = vadd.f32 %v7368_v5, %v7367_v30  ;;  %v7396_v26 = vrot.slane %v7395_v63, 2  ;;  %v7421_v48 = vsel %vm5494_vm5, %v24535_v0, 0.0  ;;  %v24549_v45 = vld [vmem:[#allocation175_spill] sm:$0xff] }
 0x643   : > { %v7525_v24 = vadd.f32 %v7524_v39, %v7523_v50  ;;  %v8615_v60 = vsel %vm8157_vm9, %v7469_v51, %v8614_v55  ;;  %v7422_v1 = vrot.slane %v7421_v48, 4  ;;  %v7449_v62 = vsel %vm5494_vm5, %v24536_v13, 0.0 }
 0x644   : > { %v7552_v18 = vrot.slane %v7551_v46, 1  ;;  %v8616_v42 = vsel %vm8159_vm10, %v7497_v57, %v8615_v60  ;;  %v7370_v27 = vrot.slane %v7369_v8, 1  ;;  %v7397_v2 = vadd.f32 %v7396_v26, %v7395_v63  ;;  %v24550_v57 = vld [vmem:[#allocation173_spill] sm:$0xff]  ;;  %v24551_v26 = vld [vmem:[#allocation174_spill] sm:$0xff] }
 0x645   : > { %v8617_v21 = vsel %vm8161_vm11, %v7525_v24, %v8616_v42  ;;  %v7423_v34 = vadd.f32 %v7422_v1, %v7421_v48  ;;  %v7450_v52 = vrot.slane %v7449_v62, 4  ;;  %v7477_v44 = vsel %vm5494_vm5, %v20091_v3, 0.0 }
 0x646   : > { %v7553_v0 = vadd.f32 %v7552_v18, %v7551_v46  ;;  %v7371_v61 = vadd.f32 %v7370_v27, %v7369_v8  ;;  %v7398_v54 = vrot.slane %v7397_v2, 1  ;;  %v7478_v12 = vrot.slane %v7477_v44, 4 }
 0x647   : > { %v7424_v58 = vrot.slane %v7423_v34, 2  ;;  %v7451_v32 = vadd.f32 %v7450_v52, %v7449_v62  ;;  %v7505_v13 = vsel %vm5494_vm5, %v20097_v37, 0.0  ;;  %v7533_v29 = vsel %vm5494_vm5, %v20109_v49, 0.0 }
 0x648   : > { %v8618_v7 = vsel %vm8163_vm12, %v7553_v0, %v8617_v21  ;;  %v7399_v22 = vadd.f32 %v7398_v54, %v7397_v2  ;;  %v7479_v4 = vadd.f32 %v7478_v12, %v7477_v44  ;;  %v7506_v15 = vrot.slane %v7505_v13, 4  ;;  %v24552_v44 = vld [vmem:[#allocation157_spill] sm:$0xff] }
 0x649   : > { %8782 = vmatmul.mubr.f32.gmra.mrb[58].mxu0 %v8618_v7  ;;  %v7425_v36 = vadd.f32 %v7424_v58, %v7423_v34  ;;  %v7452_v3 = vrot.slane %v7451_v32, 2  ;;  %v7534_v41 = vrot.slane %v7533_v29, 4  ;;  %v7561_v23 = vsel %vm5494_vm5, %v20127_v14, 0.0 }
 0x64a   : > { %v7480_v43 = vrot.slane %v7479_v4, 2  ;;  %v7507_v20 = vadd.f32 %v7506_v15, %v7505_v13  ;;  %v7562_v35 = vrot.slane %v7561_v23, 4  ;;  %v8626_v37 = vsel %vm8151_vm6, %v7399_v22, %v7371_v61  ;;  %v24556_v15 = vld [vmem:[#allocation159_spill] sm:$0xff] }
 0x64b   : > { %v7426_v19 = vrot.slane %v7425_v36, 1  ;;  %v7453_v53 = vadd.f32 %v7452_v3, %v7451_v32  ;;  %v7535_v49 = vadd.f32 %v7534_v41, %v7533_v29  ;;  %v20188_v11 = vmul.f32 %v19054_v56, %v19054_v56  ;;  %v24554_v32 = vld [vmem:[#allocation158_spill] sm:$0xff] }
 0x64c   : > { %v7481_v9 = vadd.f32 %v7480_v43, %v7479_v4  ;;  %v7508_v30 = vrot.slane %v7507_v20, 2  ;;  %v7563_v40 = vadd.f32 %v7562_v35, %v7561_v23  ;;  %v6793_v47 = vcombine.high %v24548_v17, %v24548_v17 }
 0x64d   : > { %v7427_v16 = vadd.f32 %v7426_v19, %v7425_v36  ;;  %v7454_v14 = vrot.slane %v7453_v53, 1  ;;  %v7536_v50 = vrot.slane %v7535_v49, 2  ;;  %v6810_v59 = vcombine.high %v24549_v45, %v24549_v45 }
 0x64e   : > { %v7482_v5 = vrot.slane %v7481_v9, 1  ;;  %v7509_v63 = vadd.f32 %v7508_v30, %v7507_v20  ;;  %v7564_v51 = vrot.slane %v7563_v40, 2  ;;  %v20196_v39 = vrot.slane %v24550_v57, %v18281_v33 }
 0x64f   : > { %v7455_v55 = vadd.f32 %v7454_v14, %v7453_v53  ;;  %v7537_v46 = vadd.f32 %v7536_v50, %v7535_v49  ;;  %v8627_v8 = vsel %vm8153_vm7, %v7427_v16, %v8626_v37  ;;  %v20201_v48 = vrot.slane %v24551_v26, %v18281_v33 }
 0x650   : > { %v7483_v24 = vadd.f32 %v7482_v5, %v7481_v9  ;;  %v7510_v60 = vrot.slane %v7509_v63, 1  ;;  %v7565_v1 = vadd.f32 %v7564_v51, %v7563_v40  ;;  %v6827_v62 = vcombine.high %v20196_v39, %v20196_v39 }
 0x651   : > { %v7538_v18 = vrot.slane %v7537_v46, 1  ;;  %v8628_v42 = vsel %vm8155_vm8, %v7455_v55, %v8627_v8  ;;  %v6844_v27 = vcombine.high %v20201_v48, %v20201_v48  ;;  %v20210_v2 = vrot.slane %v20188_v11, %v18281_v33 }
 0x652   : > { %v7511_v21 = vadd.f32 %v7510_v60, %v7509_v63  ;;  %v7566_v34 = vrot.slane %v7565_v1, 1  ;;  %v8629_v52 = vsel %vm8157_vm9, %v7483_v24, %v8628_v42  ;;  %v24553_v0 = vcombine.high %v24552_v44, %v24552_v44 }
 0x653   : > { %v7539_v54 = vadd.f32 %v7538_v18, %v7537_v46  ;;  %v6861_v12 = vcombine.high %v20210_v2, %v20210_v2  ;;  %v24555_v13 = vcombine.high %v24554_v32, %v24554_v32  ;;  %v24557_v36 = vcombine.high %v24556_v15, %v24556_v15 }
 0x654   : > { %v7582_v61 = vsel %vm5494_vm5, %v24553_v0, 0.0  ;;  %v7567_v7 = vadd.f32 %v7566_v34, %v7565_v1  ;;  %v8630_v22 = vsel %vm8159_vm10, %v7511_v21, %v8629_v52  ;;  %v7666_v20 = vsel %vm5494_vm5, %v6793_v47, 0.0 }
 0x655   : > { %v7583_v58 = vrot.slane %v7582_v61, 4  ;;  %v7610_v29 = vsel %vm5494_vm5, %v24555_v13, 0.0  ;;  %v7638_v3 = vsel %vm5494_vm5, %v24557_v36, 0.0  ;;  %v8631_v41 = vsel %vm8161_vm11, %v7539_v54, %v8630_v22  ;;  %v20235_v54 = vpop.f32.mrb[48].mxu0 }
 0x656   : > { %v7611_v4 = vrot.slane %v7610_v29, 4  ;;  %v7639_v43 = vrot.slane %v7638_v3, 4  ;;  %v8632_v35 = vsel %vm8163_vm12, %v7567_v7, %v8631_v41  ;;  %v7667_v19 = vrot.slane %v7666_v20, 4  ;;  %v20239_v7 = vpop.f32.mrb[49].mxu0  ;;  %v24558_v41 = vld [vmem:[#allocation162_spill] sm:$0xff] }
 0x657   : > { %v7584_v23 = vadd.f32 %v7583_v58, %v7582_v61  ;;  %v7694_v53 = vsel %vm5494_vm5, %v6810_v59, 0.0  ;;  %8867 = vmatmul.mubr.f32.gmra.mrb[58].mxu1 %v8632_v35  ;;  %v7722_v40 = vsel %vm5494_vm5, %v6827_v62, 0.0  ;;  %v7750_v5 = vsel %vm5494_vm5, %v6844_v27, 0.0  ;;  %v20237_v58 = vpop.f32.mrb[48].mxu1 }
 0x658   : > { %v7612_v37 = vadd.f32 %v7611_v4, %v7610_v29  ;;  %v7640_v9 = vadd.f32 %v7639_v43, %v7638_v3  ;;  %v7695_v30 = vrot.slane %v7694_v53, 4  ;;  %v7668_v14 = vadd.f32 %v7667_v19, %v7666_v20  ;;  %v20241_v22 = vpop.f32.mrb[49].mxu1  ;;  %v20245_v43 = vpop.f32.mrb[50].mxu0 }
 0x659   : > { %v7585_v49 = vrot.slane %v7584_v23, 2  ;;  %v7723_v50 = vrot.slane %v7722_v40, 4  ;;  %v7751_v55 = vrot.slane %v7750_v5, 4  ;;  %v7778_v59 = vsel %vm5494_vm5, %v6861_v12, 0.0  ;;  %v20247_v20 = vpop.f32.mrb[50].mxu1 }
 0x65a   : > { %v7613_v16 = vrot.slane %v7612_v37, 2  ;;  %v7641_v51 = vrot.slane %v7640_v9, 2  ;;  %v7696_v47 = vadd.f32 %v7695_v30, %v7694_v53  ;;  %v7669_v8 = vrot.slane %v7668_v14, 2 }
 0x65b   : > { %v7586_v63 = vadd.f32 %v7585_v49, %v7584_v23  ;;  %v7724_v24 = vadd.f32 %v7723_v50, %v7722_v40  ;;  %v7752_v42 = vadd.f32 %v7751_v55, %v7750_v5  ;;  %v7779_v52 = vrot.slane %v7778_v59, 4  ;;  %v24559_v40 = vld [vmem:[#allocation164_spill] sm:$0xff]  ;;  %v20255_v50 = vpop.f32.mrb[51].mxu1 }
 0x65c   : > { %v7614_v46 = vadd.f32 %v7613_v16, %v7612_v37  ;;  %v7642_v1 = vadd.f32 %v7641_v51, %v7640_v9  ;;  %v7697_v18 = vrot.slane %v7696_v47, 2  ;;  %v7670_v62 = vadd.f32 %v7669_v8, %v7668_v14  ;;  %v20253_v14 = vpop.f32.mrb[51].mxu0 }
 0x65d   : > { %v7587_v60 = vrot.slane %v7586_v63, 1  ;;  %v7725_v34 = vrot.slane %v7724_v24, 2  ;;  %v7753_v61 = vrot.slane %v7752_v42, 2  ;;  %v7780_v12 = vadd.f32 %v7779_v52, %v7778_v59 }
 0x65e   : > { %v7615_v21 = vrot.slane %v7614_v46, 1  ;;  %v7643_v0 = vrot.slane %v7642_v1, 1  ;;  %v7698_v27 = vadd.f32 %v7697_v18, %v7696_v47  ;;  %v7671_v13 = vrot.slane %v7670_v62, 1  ;;  %v24560_v47 = vld [vmem:[#allocation172_spill] sm:$0xff] }
 0x65f   : > { %v7588_v44 = vadd.f32 %v7587_v60, %v7586_v63  ;;  %v7726_v29 = vadd.f32 %v7725_v34, %v7724_v24  ;;  %v7754_v3 = vadd.f32 %v7753_v61, %v7752_v42  ;;  %v6777_v23 = vcombine.high %v24558_v41, %v24558_v41  ;;  %v20278_v34 = vpop.f32.mrb[52].mxu0 }
 0x660   : > { %v7616_v32 = vadd.f32 %v7615_v21, %v7614_v46  ;;  %v7644_v4 = vadd.f32 %v7643_v0, %v7642_v1  ;;  %v7699_v36 = vrot.slane %v7698_v27, 1  ;;  %v7672_v35 = vadd.f32 %v7671_v13, %v7670_v62  ;;  %v20290_v61 = vpop.f32.mrb[53].mxu0 }
 0x661   : > { %v7727_v37 = vrot.slane %v7726_v29, 1  ;;  %v7781_v19 = vrot.slane %v7780_v12, 2  ;;  %v7755_v9 = vrot.slane %v7754_v3, 1  ;;  %v6794_v16 = vcombine.high %v24559_v40, %v24559_v40 }
 0x662   : > { %v8647_v53 = vsel %vm8151_vm6, %v7616_v32, %v7588_v44  ;;  %v7700_v49 = vadd.f32 %v7699_v36, %v7698_v27  ;;  %v24561_v55 = vcombine.high %v24560_v47, %v24560_v47  ;;  %v24562_v59 = vcombine.high %v24550_v57, %v24550_v57 }
 0x663   : > { %v8648_v30 = vsel %vm8153_vm7, %v7644_v4, %v8647_v53  ;;  %v7728_v5 = vadd.f32 %v7727_v37, %v7726_v29  ;;  %v7782_v63 = vadd.f32 %v7781_v19, %v7780_v12  ;;  %v7756_v8 = vadd.f32 %v7755_v9, %v7754_v3  ;;  %v24565_v29 = vld [vmem:[#allocation161_spill] sm:$0xff] }
 0x664   : > { %v8649_v51 = vsel %vm8155_vm8, %v7672_v35, %v8648_v30  ;;  %v20262_v46 = vrot.slane %v24561_v55, %v18281_v33  ;;  %v20269_v60 = vrot.slane %v24562_v59, %v18281_v33  ;;  %v6829_v1 = vcombine.high %v24551_v26, %v24551_v26  ;;  %v24563_v26 = vld [vmem:[#allocation160_spill] sm:$0xff] }
 0x665   : > { %v8650_v24 = vsel %vm8157_vm9, %v7700_v49, %v8649_v51  ;;  %v7783_v18 = vrot.slane %v7782_v63, 1  ;;  %v6846_v62 = vcombine.high %v20188_v11, %v20188_v11  ;;  %v24564_v0 = vcombine.high %v24563_v26, %v24563_v26 }
 0x666   : > { %v8651_v42 = vsel %vm8159_vm10, %v7728_v5, %v8650_v24  ;;  %v6811_v21 = vcombine.high %v20262_v46, %v20262_v46  ;;  %v6828_v57 = vcombine.high %v20269_v60, %v20269_v60  ;;  %v20284_v44 = vrot.slane %v6829_v1, %v18281_v33 }
 0x667   : > { %v8652_v52 = vsel %vm8161_vm11, %v7756_v8, %v8651_v42  ;;  %v7596_v27 = vsel %vm5494_vm5, %v24564_v0, 0.0  ;;  %v7784_v32 = vadd.f32 %v7783_v18, %v7782_v63  ;;  %v20293_v11 = vrot.slane %v6846_v62, %v18281_v33 }
 0x668   : > { %v7597_v13 = vrot.slane %v7596_v27, 4  ;;  %v24566_v12 = vcombine.high %v24565_v29, %v24565_v29  ;;  %v6845_v36 = vcombine.high %v20284_v44, %v20284_v44  ;;  %v7652_v35 = vsel %vm5494_vm5, %v6777_v23, 0.0 }
 0x669   : > { %v7680_v37 = vsel %vm5494_vm5, %v6794_v16, 0.0  ;;  %v8653_v19 = vsel %vm8163_vm12, %v7784_v32, %v8652_v52  ;;  %v6862_v53 = vcombine.high %v20293_v11, %v20293_v11  ;;  %v7653_v9 = vrot.slane %v7652_v35, 4 }
 0x66a   : > { %v7624_v4 = vsel %vm5494_vm5, %v24566_v12, 0.0  ;;  %v7598_v49 = vadd.f32 %v7597_v13, %v7596_v27  ;;  %8786 = vmatprep.mubr.f32.mxu0 %v8653_v19  ;;  %v7681_v5 = vrot.slane %v7680_v37, 4  ;;  %v7708_v63 = vsel %vm5494_vm5, %v6811_v21, 0.0 }
 0x66b   : > { %v7625_v3 = vrot.slane %v7624_v4, 4  ;;  %v7736_v51 = vsel %vm5494_vm5, %v6828_v57, 0.0  ;;  %v7654_v55 = vadd.f32 %v7653_v9, %v7652_v35  ;;  %v7709_v8 = vrot.slane %v7708_v63, 4 }
 0x66c   : > { %v7599_v47 = vrot.slane %v7598_v49, 2  ;;  %v7737_v23 = vrot.slane %v7736_v51, 4  ;;  %v7682_v16 = vadd.f32 %v7681_v5, %v7680_v37  ;;  %v7764_v59 = vsel %vm5494_vm5, %v6845_v36, 0.0 }
 0x66d   : > { %v7626_v30 = vadd.f32 %v7625_v3, %v7624_v4  ;;  %v7792_v1 = vsel %vm5494_vm5, %v6862_v53, 0.0  ;;  %v7655_v42 = vrot.slane %v7654_v55, 2  ;;  %v7710_v62 = vadd.f32 %v7709_v8, %v7708_v63 }
 0x66e   : > { %v7600_v18 = vadd.f32 %v7599_v47, %v7598_v49  ;;  %v7738_v52 = vadd.f32 %v7737_v23, %v7736_v51  ;;  %v7683_v27 = vrot.slane %v7682_v16, 2  ;;  %v7765_v32 = vrot.slane %v7764_v59, 4 }
 0x66f   : > { %v7627_v24 = vrot.slane %v7626_v30, 2  ;;  %v7793_v21 = vrot.slane %v7792_v1, 4  ;;  %v7656_v57 = vadd.f32 %v7655_v42, %v7654_v55  ;;  %v7711_v12 = vrot.slane %v7710_v62, 2  ;;  %v24567_v55 = vld [vmem:[#allocation165_spill] sm:$0xff] }
 0x670   : > { %v7601_v13 = vrot.slane %v7600_v18, 1  ;;  %v7739_v4 = vrot.slane %v7738_v52, 2  ;;  %v7684_v35 = vadd.f32 %v7683_v27, %v7682_v16  ;;  %v7766_v19 = vadd.f32 %v7765_v32, %v7764_v59 }
 0x671   : > { %v7628_v0 = vadd.f32 %v7627_v24, %v7626_v30  ;;  %v7794_v37 = vadd.f32 %v7793_v21, %v7792_v1  ;;  %v7657_v36 = vrot.slane %v7656_v57, 1  ;;  %v7712_v5 = vadd.f32 %v7711_v12, %v7710_v62  ;;  %v20310_v30 = vpop.f32.mrb[52].mxu1  ;;  %v24569_v12 = vld [vmem:[#allocation166_spill] sm:$0xff] }
 0x672   : > { %v7602_v9 = vadd.f32 %v7601_v13, %v7600_v18  ;;  %v7740_v53 = vadd.f32 %v7739_v4, %v7738_v52  ;;  %v7685_v47 = vrot.slane %v7684_v35, 1  ;;  %v7767_v63 = vrot.slane %v7766_v19, 2  ;;  %v20315_v16 = vpop.f32.mrb[53].mxu1 }
 0x673   : > { %v7629_v3 = vrot.slane %v7628_v0, 1  ;;  %v7795_v51 = vrot.slane %v7794_v37, 2  ;;  %v7658_v8 = vadd.f32 %v7657_v36, %v7656_v57  ;;  %v7713_v23 = vrot.slane %v7712_v5, 1 }
 0x674   : > { %v7741_v24 = vrot.slane %v7740_v53, 1  ;;  %v24568_v42 = vrot.slane %v24567_v55, 4  ;;  %v7686_v59 = vadd.f32 %v7685_v47, %v7684_v35  ;;  %v7768_v1 = vadd.f32 %v7767_v63, %v7766_v19 }
 0x675   : > { %v7630_v49 = vadd.f32 %v7629_v3, %v7628_v0  ;;  %v7796_v18 = vadd.f32 %v7795_v51, %v7794_v37  ;;  %v7714_v52 = vadd.f32 %v7713_v23, %v7712_v5  ;;  %v24570_v4 = vrot.slane %v24569_v12, 4 }
 0x676   : > { %v7577_v10 = vadd.f32 %v24568_v42, %v24567_v55  ;;  %v7742_v0 = vadd.f32 %v7741_v24, %v7740_v53  ;;  %v7769_v21 = vrot.slane %v7768_v1, 1  ;;  %v7631_v19 = vsel %vm5494_vm5, %v24556_v15, 0.0 }
 0x677   : > { %v8661_v62 = vsel %vm8151_vm6, %v7630_v49, %v7602_v9  ;;  %v7797_v13 = vrot.slane %v7796_v18, 1  ;;  %v7605_v3 = vadd.f32 %v24570_v4, %v24569_v12  ;;  %v7659_v37 = vsel %vm5494_vm5, %v24548_v17, 0.0 }
 0x678   : > { %v8662_v27 = vsel %vm8153_vm7, %v7658_v8, %v8661_v62  ;;  %v7578_v32 = vrot.slane %v7577_v10, 2  ;;  %v7770_v9 = vadd.f32 %v7769_v21, %v7768_v1  ;;  %v7632_v63 = vrot.slane %v7631_v19, 4 }
 0x679   : > { %v8663_v57 = vsel %vm8155_vm8, %v7686_v59, %v8662_v27  ;;  %v7798_v5 = vadd.f32 %v7797_v13, %v7796_v18  ;;  %v7606_v49 = vrot.slane %v7605_v3, 2  ;;  %v7660_v51 = vrot.slane %v7659_v37, 4 }
 0x67a   : > { %v8664_v36 = vsel %vm8157_vm9, %v7714_v52, %v8663_v57  ;;  %v7579_v35 = vadd.f32 %v7578_v32, %v7577_v10  ;;  %v7687_v8 = vsel %vm5494_vm5, %v24549_v45, 0.0  ;;  %v7715_v15 = vsel %vm5494_vm5, %v20196_v39, 0.0 }
 0x67b   : > { %v8665_v53 = vsel %vm8159_vm10, %v7742_v0, %v8664_v36  ;;  %v7607_v10 = vadd.f32 %v7606_v49, %v7605_v3  ;;  %v7688_v24 = vrot.slane %v7687_v8, 4  ;;  %v7633_v42 = vadd.f32 %v7632_v63, %v7631_v19 }
 0x67c   : > { %v7580_v47 = vrot.slane %v7579_v35, 1  ;;  %v8666_v23 = vsel %vm8161_vm11, %v7770_v9, %v8665_v53  ;;  %v7661_v59 = vadd.f32 %v7660_v51, %v7659_v37  ;;  %v7716_v62 = vrot.slane %v7715_v15, 4 }
 0x67d   : > { %v8667_v17 = vsel %vm8163_vm12, %v7798_v5, %v8666_v23  ;;  %v7608_v1 = vrot.slane %v7607_v10, 1  ;;  %v7689_v18 = vadd.f32 %v7688_v24, %v7687_v8  ;;  %v7743_v52 = vsel %vm5494_vm5, %v20201_v48, 0.0 }
 0x67e   : > { %v7581_v55 = vadd.f32 %v7580_v47, %v7579_v35  ;;  %8871 = vmatprep.mubr.f32.mxu1 %v8667_v17  ;;  %v7634_v45 = vrot.slane %v7633_v42, 2  ;;  %v7662_v0 = vrot.slane %v7661_v59, 2  ;;  %v7744_v27 = vrot.slane %v7743_v52, 4 }
 0x67f   : > { %v7771_v32 = vsel %vm5494_vm5, %v20210_v2, 0.0  ;;  %v7609_v21 = vadd.f32 %v7608_v1, %v7607_v10  ;;  %v7690_v39 = vrot.slane %v7689_v18, 2  ;;  %v7717_v13 = vadd.f32 %v7716_v62, %v7715_v15 }
 0x680   : > { %v7772_v57 = vrot.slane %v7771_v32, 4  ;;  %v7635_v12 = vadd.f32 %v7634_v45, %v7633_v42  ;;  %v7663_v4 = vadd.f32 %v7662_v0, %v7661_v59  ;;  %v7745_v3 = vadd.f32 %v7744_v27, %v7743_v52 }
 0x681   : > { %v7589_v36 = vsel %vm5494_vm5, %v24563_v26, 0.0  ;;  %v7691_v35 = vadd.f32 %v7690_v39, %v7689_v18  ;;  %v7718_v19 = vrot.slane %v7717_v13, 2  ;;  %v8640_v48 = vsel %vm8151_vm6, %v7609_v21, %v7581_v55 }
 0x682   : > { %v7773_v37 = vadd.f32 %v7772_v57, %v7771_v32  ;;  %v7636_v9 = vrot.slane %v7635_v12, 1  ;;  %v7664_v5 = vrot.slane %v7663_v4, 1  ;;  %v7746_v53 = vrot.slane %v7745_v3, 2 }
 0x683   : > { %v7590_v49 = vrot.slane %v7589_v36, 4  ;;  %v7692_v2 = vrot.slane %v7691_v35, 1  ;;  %v7719_v47 = vadd.f32 %v7718_v19, %v7717_v13  ;;  %v7617_v51 = vsel %vm5494_vm5, %v24565_v29, 0.0 }
 0x684   : > { %v7774_v63 = vrot.slane %v7773_v37, 2  ;;  %v7637_v8 = vadd.f32 %v7636_v9, %v7635_v12  ;;  %v7665_v23 = vadd.f32 %v7664_v5, %v7663_v4  ;;  %v7747_v10 = vadd.f32 %v7746_v53, %v7745_v3 }
 0x685   : > { %v7591_v24 = vadd.f32 %v7590_v49, %v7589_v36  ;;  %v7693_v26 = vadd.f32 %v7692_v2, %v7691_v35  ;;  %v7720_v15 = vrot.slane %v7719_v47, 1  ;;  %v7618_v42 = vrot.slane %v7617_v51, 4 }
 0x686   : > { %v7775_v17 = vadd.f32 %v7774_v63, %v7773_v37  ;;  %v7748_v59 = vrot.slane %v7747_v10, 1  ;;  %v8641_v55 = vsel %vm8153_vm7, %v7637_v8, %v8640_v48  ;;  %v7645_v18 = vsel %vm5494_vm5, %v24558_v41, 0.0 }
 0x687   : > { %v7592_v1 = vrot.slane %v7591_v24, 2  ;;  %v7721_v62 = vadd.f32 %v7720_v15, %v7719_v47  ;;  %v8642_v45 = vsel %vm8155_vm8, %v7665_v23, %v8641_v55  ;;  %v7619_v29 = vadd.f32 %v7618_v42, %v7617_v51 }
 0x688   : > { %v7776_v52 = vrot.slane %v7775_v17, 1  ;;  %v7749_v0 = vadd.f32 %v7748_v59, %v7747_v10  ;;  %v8643_v27 = vsel %vm8157_vm9, %v7693_v26, %v8642_v45  ;;  %v7646_v21 = vrot.slane %v7645_v18, 4 }
 0x689   : > { %v7593_v32 = vadd.f32 %v7592_v1, %v7591_v24  ;;  %v8644_v13 = vsel %vm8159_vm10, %v7721_v62, %v8643_v27  ;;  %v7620_v57 = vrot.slane %v7619_v29, 2  ;;  %v7673_v12 = vsel %vm5494_vm5, %v24559_v40, 0.0 }
 0x68a   : > { %v7777_v39 = vadd.f32 %v7776_v52, %v7775_v17  ;;  %v8645_v4 = vsel %vm8161_vm11, %v7749_v0, %v8644_v13  ;;  %v7647_v3 = vadd.f32 %v7646_v21, %v7645_v18  ;;  %v7674_v36 = vrot.slane %v7673_v12, 4 }
 0x68b   : > { %v7594_v41 = vrot.slane %v7593_v32, 1  ;;  %v7621_v19 = vadd.f32 %v7620_v57, %v7619_v29  ;;  %v7701_v37 = vsel %vm5494_vm5, %v20262_v46, 0.0  ;;  %v7729_v48 = vsel %vm5494_vm5, %v20269_v60, 0.0 }
 0x68c   : > { %v8646_v35 = vsel %vm8163_vm12, %v7777_v39, %v8645_v4  ;;  %v7648_v5 = vrot.slane %v7647_v3, 2  ;;  %v7675_v53 = vadd.f32 %v7674_v36, %v7673_v12  ;;  %v7702_v49 = vrot.slane %v7701_v37, 4  ;;  %v24573_v39 = vld [vmem:[#allocation209_spill] sm:$0xff] }
 0x68d   : > { %8787 = vmatmul.mubr.f32.gmra.mrb[60].mxu0 %v8646_v35  ;;  %v7595_v9 = vadd.f32 %v7594_v41, %v7593_v32  ;;  %v7622_v40 = vrot.slane %v7621_v19, 1  ;;  %v7730_v2 = vrot.slane %v7729_v48, 4  ;;  %v7757_v47 = vsel %vm5494_vm5, %v20284_v44, 0.0  ;;  %v24572_v32 = vld [vmem:[#allocation211_spill] sm:$0xff] }
 0x68e   : > { %v7785_v63 = vsel %vm5494_vm5, %v20293_v11, 0.0  ;;  %v7649_v51 = vadd.f32 %v7648_v5, %v7647_v3  ;;  %v7676_v8 = vrot.slane %v7675_v53, 2  ;;  %v7703_v23 = vadd.f32 %v7702_v49, %v7701_v37  ;;  %v24571_v11 = vld [vmem:[#allocation199_spill] sm:$0xff] }
 0x68f   : > { %v7758_v46 = vrot.slane %v7757_v47, 4  ;;  %v7623_v10 = vadd.f32 %v7622_v40, %v7621_v19  ;;  %v7731_v24 = vadd.f32 %v7730_v2, %v7729_v48  ;;  %v7786_v60 = vrot.slane %v7785_v63, 4  ;;  %v24574_v19 = vld [vmem:[#allocation210_spill] sm:$0xff] }
 0x690   : > { %v20364_v26 = vmul.f32 %v19298_v25, %v19298_v25  ;;  %v7650_v15 = vrot.slane %v7649_v51, 1  ;;  %v7677_v17 = vadd.f32 %v7676_v8, %v7675_v53  ;;  %v7704_v42 = vrot.slane %v7703_v23, 2 }
 0x691   : > { %v7759_v59 = vadd.f32 %v7758_v46, %v7757_v47  ;;  %v7732_v55 = vrot.slane %v7731_v24, 2  ;;  %v7787_v44 = vadd.f32 %v7786_v60, %v7785_v63  ;;  %v8654_v1 = vsel %vm8151_vm6, %v7623_v10, %v7595_v9  ;;  %v24575_v47 = vld [vmem:[#allocation193_spill] sm:$0xff] }
 0x692   : > { %v6929_v18 = vcombine.high %v24571_v11, %v24571_v11  ;;  %v7651_v62 = vadd.f32 %v7650_v15, %v7649_v51  ;;  %v7678_v52 = vrot.slane %v7677_v17, 1  ;;  %v7705_v45 = vadd.f32 %v7704_v42, %v7703_v23  ;;  %v24577_v15 = vld [vmem:[#allocation194_spill] sm:$0xff] }
 0x693   : > { %v7760_v29 = vrot.slane %v7759_v59, 2  ;;  %v7733_v0 = vadd.f32 %v7732_v55, %v7731_v24  ;;  %v7788_v27 = vrot.slane %v7787_v44, 2  ;;  %v6946_v21 = vcombine.high %v24572_v32, %v24572_v32 }
 0x694   : > { %v20373_v13 = vrot.slane %v24573_v39, %v18281_v33  ;;  %v7679_v57 = vadd.f32 %v7678_v52, %v7677_v17  ;;  %v7706_v12 = vrot.slane %v7705_v45, 1  ;;  %v8655_v41 = vsel %vm8153_vm7, %v7651_v62, %v8654_v1 }
 0x695   : > { %v7761_v4 = vadd.f32 %v7760_v29, %v7759_v59  ;;  %v7734_v3 = vrot.slane %v7733_v0, 1  ;;  %v7789_v36 = vadd.f32 %v7788_v27, %v7787_v44  ;;  %v20380_v37 = vrot.slane %v24574_v19, %v18281_v33  ;;  %v24579_v59 = vld [vmem:[#allocation195_spill] sm:$0xff] }
 0x696   : > { %v6963_v35 = vcombine.high %v20373_v13, %v20373_v13  ;;  %v7707_v48 = vadd.f32 %v7706_v12, %v7705_v45  ;;  %v8656_v5 = vsel %vm8155_vm8, %v7679_v57, %v8655_v41  ;;  %v20385_v53 = vrot.slane %v20364_v26, %v18281_v33 }
 0x697   : > { %v7762_v9 = vrot.slane %v7761_v4, 1  ;;  %v7735_v49 = vadd.f32 %v7734_v3, %v7733_v0  ;;  %v7790_v40 = vrot.slane %v7789_v36, 1  ;;  %v6980_v2 = vcombine.high %v20380_v37, %v20380_v37 }
 0x698   : > { %v24576_v63 = vcombine.high %v24575_v47, %v24575_v47  ;;  %v8657_v23 = vsel %vm8157_vm9, %v7707_v48, %v8656_v5  ;;  %v6997_v46 = vcombine.high %v20385_v53, %v20385_v53  ;;  %v24578_v17 = vcombine.high %v24577_v15, %v24577_v15 }
 0x699   : > { %v7763_v8 = vadd.f32 %v7762_v9, %v7761_v4  ;;  %v7791_v24 = vadd.f32 %v7790_v40, %v7789_v36  ;;  %v8658_v60 = vsel %vm8159_vm10, %v7735_v49, %v8657_v23  ;;  %v24580_v55 = vcombine.high %v24579_v59, %v24579_v59 }
 0x69a   : > { %v7806_v51 = vsel %vm5494_vm5, %v24576_v63, 0.0  ;;  %v7834_v42 = vsel %vm5494_vm5, %v24578_v17, 0.0  ;;  %v7890_v0 = vsel %vm5494_vm5, %v6929_v18, 0.0  ;;  %v7918_v27 = vsel %vm5494_vm5, %v6946_v21, 0.0 }
 0x69b   : > { %v7807_v10 = vrot.slane %v7806_v51, 4  ;;  %v7862_v44 = vsel %vm5494_vm5, %v24580_v55, 0.0  ;;  %v8659_v1 = vsel %vm8161_vm11, %v7763_v8, %v8658_v60  ;;  %v7835_v52 = vrot.slane %v7834_v42, 4 }
 0x69c   : > { %v7863_v45 = vrot.slane %v7862_v44, 4  ;;  %v8660_v29 = vsel %vm8163_vm12, %v7791_v24, %v8659_v1  ;;  %v7946_v57 = vsel %vm5494_vm5, %v6963_v35, 0.0  ;;  %v7891_v3 = vrot.slane %v7890_v0, 4  ;;  %v20412_v35 = vpop.f32.mrb[54].mxu0 }
 0x69d   : > { %v7808_v62 = vadd.f32 %v7807_v10, %v7806_v51  ;;  %8872 = vmatmul.mubr.f32.gmra.mrb[60].mxu1 %v8660_v29  ;;  %v7836_v4 = vadd.f32 %v7835_v52, %v7834_v42  ;;  %v7919_v36 = vrot.slane %v7918_v27, 4  ;;  %v7947_v48 = vrot.slane %v7946_v57, 4  ;;  %v20414_v15 = vpop.f32.mrb[55].mxu0 }
 0x69e   : > { %v7864_v41 = vadd.f32 %v7863_v45, %v7862_v44  ;;  %v7974_v9 = vsel %vm5494_vm5, %v6980_v2, 0.0  ;;  %v8002_v5 = vsel %vm5494_vm5, %v6997_v46, 0.0  ;;  %v7892_v63 = vadd.f32 %v7891_v3, %v7890_v0 }
 0x69f   : > { %v7809_v12 = vrot.slane %v7808_v62, 2  ;;  %v7837_v40 = vrot.slane %v7836_v4, 2  ;;  %v7920_v18 = vadd.f32 %v7919_v36, %v7918_v27  ;;  %v7948_v51 = vadd.f32 %v7947_v48, %v7946_v57 }
 0x6a0   : > { %v7865_v47 = vrot.slane %v7864_v41, 2  ;;  %v7975_v21 = vrot.slane %v7974_v9, 4  ;;  %v8003_v8 = vrot.slane %v8002_v5, 4  ;;  %v7893_v60 = vrot.slane %v7892_v63, 2 }
 0x6a1   : > { %v7810_v49 = vadd.f32 %v7809_v12, %v7808_v62  ;;  %v7838_v10 = vadd.f32 %v7837_v40, %v7836_v4  ;;  %v7921_v17 = vrot.slane %v7920_v18, 2  ;;  %v7949_v2 = vrot.slane %v7948_v51, 2  ;;  %v24581_v4 = vld [vmem:[#allocation198_spill] sm:$0xff] }
 0x6a2   : > { %v7866_v24 = vadd.f32 %v7865_v47, %v7864_v41  ;;  %v7976_v42 = vadd.f32 %v7975_v21, %v7974_v9  ;;  %v8004_v46 = vadd.f32 %v8003_v8, %v8002_v5  ;;  %v7894_v62 = vadd.f32 %v7893_v60, %v7892_v63  ;;  %v24583_v63 = vld [vmem:[#allocation208_spill] sm:$0xff] }
 0x6a3   : > { %v7811_v23 = vrot.slane %v7810_v49, 1  ;;  %v7839_v44 = vrot.slane %v7838_v10, 1  ;;  %v7922_v52 = vadd.f32 %v7921_v17, %v7920_v18  ;;  %v7950_v45 = vadd.f32 %v7949_v2, %v7948_v51 }
 0x6a4   : > { %v7867_v1 = vrot.slane %v7866_v24, 1  ;;  %v7977_v29 = vrot.slane %v7976_v42, 2  ;;  %v8005_v0 = vrot.slane %v8004_v46, 2  ;;  %v7895_v12 = vrot.slane %v7894_v62, 1 }
 0x6a5   : > { %v7812_v55 = vadd.f32 %v7811_v23, %v7810_v49  ;;  %v7840_v27 = vadd.f32 %v7839_v44, %v7838_v10  ;;  %v6913_v41 = vcombine.high %v24581_v4, %v24581_v4  ;;  %v7923_v3 = vrot.slane %v7922_v52, 1  ;;  %v24582_v49 = vld [vmem:[#allocation200_spill] sm:$0xff] }
 0x6a6   : > { %v7868_v57 = vadd.f32 %v7867_v1, %v7866_v24  ;;  %v7951_v36 = vrot.slane %v7950_v45, 1  ;;  %v7978_v48 = vadd.f32 %v7977_v29, %v7976_v42  ;;  %v8006_v40 = vadd.f32 %v8005_v0, %v8004_v46 }
 0x6a7   : > { %v7896_v9 = vadd.f32 %v7895_v12, %v7894_v62  ;;  %v8675_v5 = vsel %vm8151_vm6, %v7840_v27, %v7812_v55  ;;  %v6930_v47 = vcombine.high %v24582_v49, %v24582_v49  ;;  %v24584_v18 = vcombine.high %v24583_v63, %v24583_v63 }
 0x6a8   : > { %v7924_v21 = vadd.f32 %v7923_v3, %v7922_v52  ;;  %v7952_v8 = vadd.f32 %v7951_v36, %v7950_v45  ;;  %v7979_v23 = vrot.slane %v7978_v48, 1  ;;  %v8007_v10 = vrot.slane %v8006_v40, 1  ;;  %v20459_v36 = vpop.f32.mrb[54].mxu1 }
 0x6a9   : > { %v20425_v51 = vrot.slane %v24584_v18, %v18281_v33  ;;  %v8676_v24 = vsel %vm8153_vm7, %v7868_v57, %v8675_v5  ;;  %v24585_v17 = vcombine.high %v24573_v39, %v24573_v39  ;;  %v6965_v42 = vcombine.high %v24574_v19, %v24574_v19  ;;  %v24586_v39 = vld [vmem:[#allocation196_spill] sm:$0xff]  ;;  %v20465_v63 = vpop.f32.mrb[55].mxu1 }
 0x6aa   : > { %v7980_v46 = vadd.f32 %v7979_v23, %v7978_v48  ;;  %v8008_v55 = vadd.f32 %v8007_v10, %v8006_v40  ;;  %v8677_v44 = vsel %vm8155_vm8, %v7896_v9, %v8676_v24  ;;  %v6982_v1 = vcombine.high %v20364_v26, %v20364_v26  ;;  %v24588_v26 = vld [vmem:[#allocation197_spill] sm:$0xff] }
 0x6ab   : > { %v6947_v60 = vcombine.high %v20425_v51, %v20425_v51  ;;  %v20434_v2 = vrot.slane %v24585_v17, %v18281_v33  ;;  %v8678_v62 = vsel %vm8157_vm9, %v7924_v21, %v8677_v44  ;;  %v20445_v45 = vrot.slane %v6965_v42, %v18281_v33 }
 0x6ac   : > { %v24587_v29 = vcombine.high %v24586_v39, %v24586_v39  ;;  %v8679_v0 = vsel %vm8159_vm10, %v7952_v8, %v8678_v62  ;;  %v20453_v27 = vrot.slane %v6982_v1, %v18281_v33  ;;  %v24589_v12 = vcombine.high %v24588_v26, %v24588_v26 }
 0x6ad   : > { %v6964_v52 = vcombine.high %v20434_v2, %v20434_v2  ;;  %v8680_v48 = vsel %vm8161_vm11, %v7980_v46, %v8679_v0  ;;  %v6981_v40 = vcombine.high %v20445_v45, %v20445_v45  ;;  %v7876_v5 = vsel %vm5494_vm5, %v6913_v41, 0.0 }
 0x6ae   : > { %v7820_v19 = vsel %vm5494_vm5, %v24587_v29, 0.0  ;;  %v7848_v3 = vsel %vm5494_vm5, %v24589_v12, 0.0  ;;  %v8681_v18 = vsel %vm8163_vm12, %v8008_v55, %v8680_v48  ;;  %v6998_v21 = vcombine.high %v20453_v27, %v20453_v27 }
 0x6af   : > { %v7821_v57 = vrot.slane %v7820_v19, 4  ;;  %v7849_v9 = vrot.slane %v7848_v3, 4  ;;  %v7877_v23 = vrot.slane %v7876_v5, 4  ;;  %8791 = vmatprep.mubr.f32.mxu0 %v8681_v18  ;;  %v7904_v24 = vsel %vm5494_vm5, %v6930_v47, 0.0 }
 0x6b0   : > { %v7932_v17 = vsel %vm5494_vm5, %v6947_v60, 0.0  ;;  %v7960_v42 = vsel %vm5494_vm5, %v6964_v52, 0.0  ;;  %v7905_v41 = vrot.slane %v7904_v24, 4  ;;  %v7988_v55 = vsel %vm5494_vm5, %v6981_v40, 0.0 }
 0x6b1   : > { %v7822_v8 = vadd.f32 %v7821_v57, %v7820_v19  ;;  %v7850_v10 = vadd.f32 %v7849_v9, %v7848_v3  ;;  %v7878_v44 = vadd.f32 %v7877_v23, %v7876_v5  ;;  %v7933_v1 = vrot.slane %v7932_v17, 4 }
 0x6b2   : > { %v7961_v29 = vrot.slane %v7960_v42, 4  ;;  %v8016_v0 = vsel %vm5494_vm5, %v6998_v21, 0.0  ;;  %v7906_v12 = vadd.f32 %v7905_v41, %v7904_v24  ;;  %v7989_v9 = vrot.slane %v7988_v55, 4 }
 0x6b3   : > { %v7823_v46 = vrot.slane %v7822_v8, 2  ;;  %v7851_v62 = vrot.slane %v7850_v10, 2  ;;  %v7879_v57 = vrot.slane %v7878_v44, 2  ;;  %v7934_v3 = vadd.f32 %v7933_v1, %v7932_v17  ;;  %v24590_v1 = vld [vmem:[#allocation201_spill] sm:$0xff] }
 0x6b4   : > { %v7962_v47 = vadd.f32 %v7961_v29, %v7960_v42  ;;  %v8017_v60 = vrot.slane %v8016_v0, 4  ;;  %v7907_v25 = vrot.slane %v7906_v12, 2  ;;  %v7990_v38 = vadd.f32 %v7989_v9, %v7988_v55 }
 0x6b5   : > { %v7824_v19 = vadd.f32 %v7823_v46, %v7822_v8  ;;  %v7852_v48 = vadd.f32 %v7851_v62, %v7850_v10  ;;  %v7880_v52 = vadd.f32 %v7879_v57, %v7878_v44  ;;  %v7935_v5 = vrot.slane %v7934_v3, 2 }
 0x6b6   : > { %v7963_v56 = vrot.slane %v7962_v47, 2  ;;  %v8018_v28 = vadd.f32 %v8017_v60, %v8016_v0  ;;  %v7908_v6 = vadd.f32 %v7907_v25, %v7906_v12  ;;  %v7991_v24 = vrot.slane %v7990_v38, 2 }
 0x6b7   : > { %v7825_v18 = vrot.slane %v7824_v19, 1  ;;  %v7853_v23 = vrot.slane %v7852_v48, 1  ;;  %v7881_v40 = vrot.slane %v7880_v52, 1  ;;  %v7936_v21 = vadd.f32 %v7935_v5, %v7934_v3 }
 0x6b8   : > { %v7964_v46 = vadd.f32 %v7963_v56, %v7962_v47  ;;  %v8019_v17 = vrot.slane %v8018_v28, 2  ;;  %v7909_v42 = vrot.slane %v7908_v6, 1  ;;  %v24591_v44 = vrot.slane %v24590_v1, 4  ;;  %v24592_v47 = vld [vmem:[#allocation202_spill] sm:$0xff] }
 0x6b9   : > { %v7826_v31 = vadd.f32 %v7825_v18, %v7824_v19  ;;  %v7854_v8 = vadd.f32 %v7853_v23, %v7852_v48  ;;  %v7882_v10 = vadd.f32 %v7881_v40, %v7880_v52  ;;  %v7937_v41 = vrot.slane %v7936_v21, 1 }
 0x6ba   : > { %v7801_v62 = vadd.f32 %v24591_v44, %v24590_v1  ;;  %v7965_v29 = vrot.slane %v7964_v46, 1  ;;  %v7992_v57 = vadd.f32 %v7991_v24, %v7990_v38  ;;  %v8020_v33 = vadd.f32 %v8019_v17, %v8018_v28 }
 0x6bb   : > { %v8689_v55 = vsel %vm8151_vm6, %v7854_v8, %v7826_v31  ;;  %v7910_v0 = vadd.f32 %v7909_v42, %v7908_v6  ;;  %v7938_v19 = vadd.f32 %v7937_v41, %v7936_v21  ;;  %v24593_v9 = vrot.slane %v24592_v47, 4 }
 0x6bc   : > { %v8690_v25 = vsel %vm8153_vm7, %v7882_v10, %v8689_v55  ;;  %v7802_v12 = vrot.slane %v7801_v62, 2  ;;  %v7966_v56 = vadd.f32 %v7965_v29, %v7964_v46  ;;  %v7993_v3 = vrot.slane %v7992_v57, 1 }
 0x6bd   : > { %v8021_v48 = vrot.slane %v8020_v33, 1  ;;  %v7829_v60 = vadd.f32 %v24593_v9, %v24592_v47  ;;  %v8691_v18 = vsel %vm8155_vm8, %v7910_v0, %v8690_v25  ;;  %v7855_v28 = vsel %vm5494_vm5, %v24579_v59, 0.0 }
 0x6be   : > { %v7803_v52 = vadd.f32 %v7802_v12, %v7801_v62  ;;  %v7883_v31 = vsel %vm5494_vm5, %v24571_v11, 0.0  ;;  %v7994_v38 = vadd.f32 %v7993_v3, %v7992_v57  ;;  %v8692_v5 = vsel %vm8157_vm9, %v7938_v19, %v8691_v18 }
 0x6bf   : > { %v8022_v6 = vadd.f32 %v8021_v48, %v8020_v33  ;;  %v7830_v23 = vrot.slane %v7829_v60, 2  ;;  %v8693_v40 = vsel %vm8159_vm10, %v7966_v56, %v8692_v5  ;;  %v7856_v8 = vrot.slane %v7855_v28, 4 }
 0x6c0   : > { %v7804_v21 = vrot.slane %v7803_v52, 1  ;;  %v7884_v46 = vrot.slane %v7883_v31, 4  ;;  %v8694_v24 = vsel %vm8161_vm11, %v7994_v38, %v8693_v40  ;;  %v7911_v10 = vsel %vm5494_vm5, %v24572_v32, 0.0 }
 0x6c1   : > { %v7831_v17 = vadd.f32 %v7830_v23, %v7829_v60  ;;  %v7939_v59 = vsel %vm5494_vm5, %v20373_v13, 0.0  ;;  %v8695_v11 = vsel %vm8163_vm12, %v8022_v6, %v8694_v24  ;;  %v7857_v42 = vadd.f32 %v7856_v8, %v7855_v28 }
 0x6c2   : > { %v7805_v33 = vadd.f32 %v7804_v21, %v7803_v52  ;;  %v7885_v41 = vadd.f32 %v7884_v46, %v7883_v31  ;;  %8876 = vmatprep.mubr.f32.mxu1 %v8695_v11  ;;  %v7912_v44 = vrot.slane %v7911_v10, 4  ;;  %v7940_v62 = vrot.slane %v7939_v59, 4 }
 0x6c3   : > { %v7832_v1 = vrot.slane %v7831_v17, 1  ;;  %v7967_v29 = vsel %vm5494_vm5, %v20380_v37, 0.0  ;;  %v7858_v57 = vrot.slane %v7857_v42, 2  ;;  %v7995_v32 = vsel %vm5494_vm5, %v20385_v53, 0.0 }
 0x6c4   : > { %v7886_v55 = vrot.slane %v7885_v41, 2  ;;  %v7968_v0 = vrot.slane %v7967_v29, 4  ;;  %v7913_v13 = vadd.f32 %v7912_v44, %v7911_v10  ;;  %v7941_v25 = vadd.f32 %v7940_v62, %v7939_v59 }
 0x6c5   : > { %v7833_v19 = vadd.f32 %v7832_v1, %v7831_v17  ;;  %v7996_v12 = vrot.slane %v7995_v32, 4  ;;  %v7859_v56 = vadd.f32 %v7858_v57, %v7857_v42  ;;  %v7813_v47 = vsel %vm5494_vm5, %v24586_v39, 0.0 }
 0x6c6   : > { %v7887_v3 = vadd.f32 %v7886_v55, %v7885_v41  ;;  %v7969_v48 = vadd.f32 %v7968_v0, %v7967_v29  ;;  %v7914_v9 = vrot.slane %v7913_v13, 2  ;;  %v7942_v60 = vrot.slane %v7941_v25, 2 }
 0x6c7   : > { %v7997_v18 = vadd.f32 %v7996_v12, %v7995_v32  ;;  %v8668_v37 = vsel %vm8151_vm6, %v7833_v19, %v7805_v33  ;;  %v7860_v52 = vrot.slane %v7859_v56, 1  ;;  %v7814_v38 = vrot.slane %v7813_v47, 4 }
 0x6c8   : > { %v7888_v28 = vrot.slane %v7887_v3, 1  ;;  %v7970_v31 = vrot.slane %v7969_v48, 2  ;;  %v7915_v53 = vadd.f32 %v7914_v9, %v7913_v13  ;;  %v7943_v6 = vadd.f32 %v7942_v60, %v7941_v25 }
 0x6c9   : > { %v7998_v5 = vrot.slane %v7997_v18, 2  ;;  %v7841_v23 = vsel %vm5494_vm5, %v24588_v26, 0.0  ;;  %v7861_v40 = vadd.f32 %v7860_v52, %v7859_v56  ;;  %v7815_v46 = vadd.f32 %v7814_v38, %v7813_v47 }
 0x6ca   : > { %v7889_v21 = vadd.f32 %v7888_v28, %v7887_v3  ;;  %v7971_v8 = vadd.f32 %v7970_v31, %v7969_v48  ;;  %v7916_v39 = vrot.slane %v7915_v53, 1  ;;  %v7944_v24 = vrot.slane %v7943_v6, 1 }
 0x6cb   : > { %v7999_v17 = vadd.f32 %v7998_v5, %v7997_v18  ;;  %v7842_v10 = vrot.slane %v7841_v23, 4  ;;  %v8669_v11 = vsel %vm8153_vm7, %v7861_v40, %v8668_v37  ;;  %v7816_v33 = vrot.slane %v7815_v46, 2 }
 0x6cc   : > { %v7972_v59 = vrot.slane %v7971_v8, 1  ;;  %v7869_v42 = vsel %vm5494_vm5, %v24581_v4, 0.0  ;;  %v7917_v41 = vadd.f32 %v7916_v39, %v7915_v53  ;;  %v7945_v1 = vadd.f32 %v7944_v24, %v7943_v6 }
 0x6cd   : > { %v8000_v44 = vrot.slane %v7999_v17, 1  ;;  %v8670_v26 = vsel %vm8155_vm8, %v7889_v21, %v8669_v11  ;;  %v7817_v29 = vadd.f32 %v7816_v33, %v7815_v46  ;;  %v7843_v57 = vadd.f32 %v7842_v10, %v7841_v23 }
 0x6ce   : > { %v7973_v62 = vadd.f32 %v7972_v59, %v7971_v8  ;;  %v7870_v55 = vrot.slane %v7869_v42, 4  ;;  %v8671_v32 = vsel %vm8157_vm9, %v7917_v41, %v8670_v26  ;;  %v7897_v19 = vsel %vm5494_vm5, %v24582_v49, 0.0 }
 0x6cf   : > { %v8001_v0 = vadd.f32 %v8000_v44, %v7999_v17  ;;  %v7925_v13 = vsel %vm5494_vm5, %v20425_v51, 0.0  ;;  %v8672_v4 = vsel %vm8159_vm10, %v7945_v1, %v8671_v32  ;;  %v7818_v25 = vrot.slane %v7817_v29, 1 }
 0x6d0   : > { %v7844_v12 = vrot.slane %v7843_v57, 2  ;;  %v7871_v56 = vadd.f32 %v7870_v55, %v7869_v42  ;;  %v8673_v3 = vsel %vm8161_vm11, %v7973_v62, %v8672_v4  ;;  %v7898_v48 = vrot.slane %v7897_v19, 4 }
 0x6d1   : > { %v7926_v47 = vrot.slane %v7925_v13, 4  ;;  %v7953_v9 = vsel %vm5494_vm5, %v20434_v2, 0.0  ;;  %v8674_v60 = vsel %vm8163_vm12, %v8001_v0, %v8673_v3  ;;  %v7819_v18 = vadd.f32 %v7818_v25, %v7817_v29 }
 0x6d2   : > { %v7845_v37 = vadd.f32 %v7844_v12, %v7843_v57  ;;  %v7872_v49 = vrot.slane %v7871_v56, 2  ;;  %8792 = vmatmul.mubr.f32.gmra.mrb[62].mxu0 %v8674_v60  ;;  %v7899_v52 = vadd.f32 %v7898_v48, %v7897_v19  ;;  %v7954_v28 = vrot.slane %v7953_v9, 4 }
 0x6d3   : > { %v7927_v51 = vadd.f32 %v7926_v47, %v7925_v13  ;;  %v7981_v31 = vsel %vm5494_vm5, %v20445_v45, 0.0  ;;  %v8009_v5 = vsel %vm5494_vm5, %v20453_v27, 0.0  ;;  %v24594_v23 = vmov 0.0  }
 0x6d4   : > { %v7846_v38 = vrot.slane %v7845_v37, 1  ;;  %v7873_v53 = vadd.f32 %v7872_v49, %v7871_v56  ;;  %v7982_v6 = vrot.slane %v7981_v31, 4  ;;  %8982 = vmatprep.mubr.f32.mxu0 %v24594_v23  ;;  %v7900_v2 = vrot.slane %v7899_v52, 2 }
 0x6d5   : > { %v7928_v40 = vrot.slane %v7927_v51, 2  ;;  %v7955_v21 = vadd.f32 %v7954_v28, %v7953_v9  ;;  %v8010_v8 = vrot.slane %v8009_v5, 4  ;;  %v14783_v17 = vadd.f32 %v20239_v7, %v20235_v54 }
 0x6d6   : > { %v7847_v46 = vadd.f32 %v7846_v38, %v7845_v37  ;;  %v7874_v39 = vrot.slane %v7873_v53, 1  ;;  %v7983_v24 = vadd.f32 %v7982_v6, %v7981_v31  ;;  %v7901_v10 = vadd.f32 %v7900_v2, %v7899_v52 }
 0x6d7   : > { %v7929_v45 = vadd.f32 %v7928_v40, %v7927_v51  ;;  %v7956_v59 = vrot.slane %v7955_v21, 2  ;;  %v8011_v11 = vadd.f32 %v8010_v8, %v8009_v5  ;;  %v14827_v41 = vadd.f32 %v20241_v22, %v20237_v58 }
 0x6d8   : > { %v7875_v33 = vadd.f32 %v7874_v39, %v7873_v53  ;;  %v7984_v42 = vrot.slane %v7983_v24, 2  ;;  %v8682_v27 = vsel %vm8151_vm6, %v7847_v46, %v7819_v18  ;;  %v7902_v1 = vrot.slane %v7901_v10, 1  ;;  %v14869_v9 = vpop.f32.mrb[56].mxu0  ;;  %v15783_v18 = vld [vmem:[%s23427_s13] sm:$0xff] }
 0x6d9   : > { %v7930_v44 = vrot.slane %v7929_v45, 1  ;;  %v7957_v26 = vadd.f32 %v7956_v59, %v7955_v21  ;;  %v8012_v62 = vrot.slane %v8011_v11, 2  ;;  %v8438_v55 = vadd.f32 %v14827_v41, %v14783_v17  ;;  %v14870_v60 = vpop.f32.mrb[57].mxu0 }
 0x6da   : > { %v7985_v29 = vadd.f32 %v7984_v42, %v7983_v24  ;;  %v8683_v57 = vsel %vm8153_vm7, %v7875_v33, %v8682_v27  ;;  %v14786_v54 = vadd.f32 %v20253_v14, %v20245_v43  ;;  %v7903_v7 = vadd.f32 %v7902_v1, %v7901_v10 }
 0x6db   : > { %v7931_v0 = vadd.f32 %v7930_v44, %v7929_v45  ;;  %v7958_v32 = vrot.slane %v7957_v26, 1  ;;  %v8013_v19 = vadd.f32 %v8012_v62, %v8011_v11  ;;  %v8882_v4 = vmul.f32 0.00390625, %v8438_v55 }
 0x6dc   : > { %v7986_v13 = vrot.slane %v7985_v29, 1  ;;  %v14830_v58 = vadd.f32 %v20255_v50, %v20247_v20  ;;  %v14789_v22 = vadd.f32 %v20290_v61, %v20278_v34  ;;  %v8684_v56 = vsel %vm8155_vm8, %v7903_v7, %v8683_v57 }
 0x6dd   : > { %v7959_v25 = vadd.f32 %v7958_v32, %v7957_v26  ;;  %v8014_v12 = vrot.slane %v8013_v19, 1  ;;  %v14833_v3 = vadd.f32 %v20315_v16, %v20310_v30  ;;  %v8685_v14 = vsel %vm8157_vm9, %v7931_v0, %v8684_v56  ;;  %14479 = vmatmul.mubr.msk.f32.vlgmr.msra.gmra.mrb[64].mxu0 %vm1855_vm1, %v8882_v4  ;;  %v20588_v0 = vpop.permute.xlu1 %12108 }
 0x6de   : > { %v7987_v43 = vadd.f32 %v7986_v13, %v7985_v29  ;;  %v8443_v48 = vadd.f32 %v14830_v58, %v14786_v54  ;;  %v14792_v47 = vadd.f32 %v20414_v15, %v20412_v35  ;;  %8988 = vmatprep.mubr.f32.mxu0 %v24594_v23  ;;  %v14836_v61 = vadd.f32 %v20465_v63, %v20459_v36  ;;  %v15784_v63 = vld [vmem:[%s23427_s13 + $0x8] sm:$0xff] }
 0x6df   : > { %v8015_v20 = vadd.f32 %v8014_v12, %v8013_v19  ;;  %v8686_v50 = vsel %vm8159_vm10, %v7959_v25, %v8685_v14  ;;  %v8448_v34 = vadd.f32 %v14833_v3, %v14789_v22  ;;  %14490 = vmatpush1.msk.msra.mxu0 %vm1868_vm0, %v15783_v18  ;;  %v14871_v37 = vadd.f32 %v14870_v60, %v14869_v9 }
 0x6e0   : > { %v8687_v30 = vsel %vm8161_vm11, %v7987_v43, %v8686_v50  ;;  %v8883_v16 = vmul.f32 0.00390625, %v8443_v48  ;;  %v8453_v15 = vadd.f32 %v14836_v61, %v14792_v47  ;;  %v8890_v53 = vmul.f32 %v8882_v4, %v8882_v4  ;;  %24595 = vst [vmem:[#allocation49_spill] sm:$0xff] %v20588_v0 }
 0x6e1   : > { %v8688_v35 = vsel %vm8163_vm12, %v8015_v20, %v8687_v30  ;;  %v8884_v49 = vmul.f32 0.00390625, %v8448_v34  ;;  %v20590_v32 = vpop.permute.xlu1 %12428  ;;  %v15871_v47 = vmov 269488144   ;;  %v15872_v50 = vmov 842150450  }
 0x6e2   : > { %8877 = vmatmul.mubr.f32.gmra.mrb[62].mxu1 %v8688_v35  ;;  %14480 = vmatmul.mubr.msk.f32.gmra.mrb[66].mxu0 %vm1855_vm1, %v8883_v16  ;;  %v20558_v36 = vmul.f32 0.00390625, %v8453_v15  ;;  %v8891_v45 = vmul.f32 %v8883_v16, %v8883_v16  ;;  %24596 = vst [vmem:[#allocation51_spill] sm:$0xff] %v20590_v32  ;;  %v12135_v20 = vunpack.c.l.s4 %v15871_v47  ;;  %v12142_v34 = vunpack.c.l.s4 %v15872_v50  ;;  %v24619_v50 = vld [vmem:[#allocation60_spill] sm:$0xff] }
 0x6e3   : > { %9071 = vmatprep.mubr.f32.mxu1 %v24594_v23  ;;  %8994 = vmatprep.mubr.f32.mxu0 %v24594_v23  ;;  %v8892_v57 = vmul.f32 %v8884_v49, %v8884_v49  ;;  %v15873_v61 = vmov 1414812756   ;;  %v15874_v60 = vmov 1987475062  }
 0x6e4   : > { %v12149_v9 = vunpack.c.l.s4 %v15873_v61  ;;  %v12156_v18 = vunpack.c.l.s4 %v15874_v60  ;;  %v24618_v60 = vld [vmem:[#allocation59_spill] sm:$0xff] }
 0x6e5   : > { %v20594_v22 = vpop.permute.xlu1 %12116 }
 0x6e6   : > { %14485 = vmatmul.mubr.msk.f32.vlgmr.msra.gmra.mrb[64].mxu1 %vm1855_vm1, %v8882_v4  ;;  %14481 = vmatmul.mubr.msk.f32.gmra.mrb[68].mxu0 %vm1855_vm1, %v8884_v49  ;;  %v14913_v52 = vpop.f32.mrb[56].mxu1  ;;  %v20592_v4 = vpop.permute.xlu0 %12104  ;;  %24598 = vst [vmem:[#allocation54_spill] sm:$0xff] %v20594_v22 }
 0x6e7   : > { %9077 = vmatprep.mubr.f32.mxu1 %v24594_v23  ;;  %9000 = vmatprep.mubr.f32.mxu0 %v24594_v23  ;;  %v14914_v51 = vpop.f32.mrb[57].mxu1  ;;  %24597 = vst [vmem:[#allocation55_spill] sm:$0xff] %v20592_v4 }
 0x6e8   : > { %14496 = vmatpush1.msk.msra.mxu1 %vm1868_vm0, %v15784_v63  ;;  %v14915_v28 = vadd.f32 %v14914_v51, %v14913_v52  ;;  %v12136_v51 = vunpack.c.0.s8 %v12135_v20 }
 0x6e9   : > { %v20598_v56 = vpop.permute.xlu1 %12436 }
 0x6ea   : > { %14486 = vmatmul.mubr.msk.f32.gmra.mrb[66].mxu1 %vm1855_vm1, %v8883_v16  ;;  %14482 = vmatmul.mubr.msk.f32.gmra.mrb[70].mxu0 %vm1855_vm1, %v20558_v36  ;;  %v8864_v31 = vadd.f32 %v14915_v28, %v14871_v37  ;;  %v20596_v25 = vpop.permute.xlu0 %12424  ;;  %24600 = vst [vmem:[#allocation75_spill] sm:$0xff] %v20598_v56  ;;  %v12143_v28 = vunpack.c.0.s8 %v12142_v34 }
 0x6eb   : > { %9083 = vmatprep.mubr.f32.mxu1 %v24594_v23  ;;  %9172 = vmatprep.mubr.f32.mxu0 %v24594_v23  ;;  %24599 = vst [vmem:[#allocation97_spill] sm:$0xff] %v20596_v25 }
 0x6ec   : > { %v8886_v38 = vmul.f32 0.00390625, %v8864_v31  ;;  %v12150_v31 = vunpack.c.0.s8 %v12149_v9 }
 0x6ed   : > { %v20610_v52 = vpop.permute.xlu1 %12124 }
 0x6ee   : > { %14487 = vmatmul.mubr.msk.f32.gmra.mrb[68].mxu1 %vm1855_vm1, %v8884_v49  ;;  %v8894_v6 = vsub.f32 %v8886_v38, %v8890_v53  ;;  %v20600_v48 = vpop.permute.xlu0 %12112  ;;  %24602 = vst [vmem:[#allocation53_spill] sm:$0xff] %v20610_v52 }
 0x6ef   : > { %9089 = vmatprep.mubr.f32.mxu1 %v24594_v23  ;;  %24601 = vst [vmem:[#allocation77_spill] sm:$0xff] %v20600_v48 }
 0x6f0   : > { %v8898_v5 = vadd.f32 1e-05, %v8894_v6 }
 0x6f2   : > { %14488 = vmatmul.mubr.msk.f32.gmra.mrb[70].mxu1 %vm1855_vm1, %v20558_v36  ;;  %15645 = vrsqrt.f32 %v8898_v5  ;;  %v12157_v5 = vunpack.c.0.s8 %v12156_v18 }
 0x6f3   : > { %9261 = vmatprep.mubr.f32.mxu1 %v24594_v23 }
 0x6fc   : > { %v15646_v2 = vpop.eup %15645 }
 0x6fd   : > { %14491 = vmatmul.mubr.msk.f32.vlgmr.msra.gmra.mrb[72].mxu0 %vm1855_vm1, %v15646_v2  ;;  %14497 = vmatmul.mubr.msk.f32.vlgmr.msra.gmra.mrb[72].mxu1 %vm1855_vm1, %v15646_v2  ;;  %v8893_v2 = vmul.f32 %v20558_v36, %v20558_v36 }
 0x6fe   : > { %9178 = vmatprep.mubr.f32.mxu0 %v24594_v23  ;;  %9267 = vmatprep.mubr.f32.mxu1 %v24594_v23 }
 0x71c   : > { %v14872_v40 = vpop.f32.mrb[58].mxu0 }
 0x71d   : > { %v14873_v21 = vpop.f32.mrb[59].mxu0 }
 0x71e   : > { %v14874_v8 = vadd.f32 %v14873_v21, %v14872_v40  ;;  %v24603_v40 = vld [vmem:[#allocation35_spill] sm:$0xff] }
 0x72a   : > { %v14916_v46 = vpop.f32.mrb[58].mxu1 }
 0x72b   : > { %v14917_v39 = vpop.f32.mrb[59].mxu1 }
 0x72c   : > { %v14918_v24 = vadd.f32 %v14917_v39, %v14916_v46 }
 0x72e   : > { %v8869_v17 = vadd.f32 %v14918_v24, %v14874_v8  ;;  %v20624_v24 = vpop.permute.xlu0 %12432 }
 0x72f   : > { %24604 = vst [vmem:[#allocation62_spill] sm:$0xff] %v20624_v24 }
 0x730   : > { %v8887_v10 = vmul.f32 0.00390625, %v8869_v17 }
 0x732   : > { %v8895_v59 = vsub.f32 %v8887_v10, %v8891_v45  ;;  %v20670_v34 = vpop.permute.xlu0 %12120 }
 0x733   : > { %24611 = vst [vmem:[#allocation68_spill] sm:$0xff] %v20670_v34 }
 0x734   : > { %v8899_v11 = vadd.f32 1e-05, %v8895_v59 }
 0x736   : > { %15647 = vrsqrt.f32 %v8899_v11 }
 0x740   : > { %v15648_v33 = vpop.eup %15647 }
 0x741   : > { %14492 = vmatmul.mubr.msk.f32.gmra.mrb[74].mxu0 %vm1855_vm1, %v15648_v33  ;;  %14498 = vmatmul.mubr.msk.f32.gmra.mrb[74].mxu1 %vm1855_vm1, %v15648_v33 }
 0x742   : > { %9184 = vmatprep.mubr.f32.mxu0 %v24594_v23  ;;  %9273 = vmatprep.mubr.f32.mxu1 %v24594_v23 }
 0x760   : > { %v14875_v42 = vpop.f32.mrb[60].mxu0 }
 0x761   : > { %v14876_v27 = vpop.f32.mrb[61].mxu0 }
 0x762   : > { %v14877_v41 = vadd.f32 %v14876_v27, %v14875_v42 }
 0x770   : > { %v14919_v1 = vpop.f32.mrb[60].mxu1 }
 0x771   : > { %v14920_v44 = vpop.f32.mrb[61].mxu1 }
 0x772   : > { %v14921_v26 = vadd.f32 %v14920_v44, %v14919_v1  ;;  %v24605_v1 = vld [vmem:[#allocation30_spill] sm:$0xff] }
 0x773   : > { %v20639_v44 = vsub.s32 %v12136_v51, %v24605_v1 }
 0x774   : > { %v8874_v62 = vadd.f32 %v14921_v26, %v14877_v41  ;;  %v20642_v26 = vsub.s32 %v12143_v28, %v24605_v1 }
 0x775   : > { %24606 = vst [vmem:[#allocation99_spill] sm:$0xff] %v20639_v44 }
 0x776   : > { %v8888_v29 = vmul.f32 0.00390625, %v8874_v62  ;;  %24607 = vst [vmem:[#allocation65_spill] sm:$0xff] %v20642_v26  ;;  %v20645_v62 = vsub.s32 %v12150_v31, %v24605_v1 }
 0x778   : > { %v8896_v55 = vsub.f32 %v8888_v29, %v8892_v57  ;;  %24608 = vst [vmem:[#allocation64_spill] sm:$0xff] %v20645_v62  ;;  %v20648_v29 = vsub.s32 %v12157_v5, %v24605_v1 }
 0x77a   : > { %v8900_v54 = vadd.f32 1e-05, %v8896_v55  ;;  %24609 = vst [vmem:[#allocation102_spill] sm:$0xff] %v20648_v29 }
 0x77c   : > { %15649 = vrsqrt.f32 %v8900_v54 }
 0x786   : > { %v15650_v7 = vpop.eup %15649 }
 0x787   : > { %14493 = vmatmul.mubr.msk.f32.gmra.mrb[76].mxu0 %vm1855_vm1, %v15650_v7  ;;  %14499 = vmatmul.mubr.msk.f32.gmra.mrb[76].mxu1 %vm1855_vm1, %v15650_v7 }
 0x788   : > { %9190 = vmatprep.mubr.f32.mxu0 %v24594_v23  ;;  %9279 = vmatprep.mubr.f32.mxu1 %v24594_v23 }
 0x7a5   : > { %v14878_v19 = vpop.f32.mrb[62].mxu0 }
 0x7a6   : > { %v14879_v13 = vpop.f32.mrb[63].mxu0 }
 0x7a7   : > { %v14880_v58 = vadd.f32 %v14879_v13, %v14878_v19 }
 0x7b0   : > { %v8984_v12 = vpop.f32.mrb[64].mxu0 }
 0x7b1   : > { %v8986_v3 = vpop.f32.mrb[65].mxu0 }
 0x7b2   : > { %v9302_v43 = vcombine.low %v8984_v12, %v8986_v3  ;;  %v9303_v14 = vcombine.high %v8984_v12, %v8986_v3 }
 0x7b4   : > { %v20617_v21 = vrot.slane %v9302_v43, %v24603_v40  ;;  %v20620_v8 = vrot.slane %v9303_v14, %v24603_v40 }
 0x7b5   : > { %v14922_v30 = vpop.f32.mrb[62].mxu1  ;;  %v20602_v16 = vpop.f32.mrb[66].mxu0 }
 0x7b6   : > { %v14923_v35 = vpop.f32.mrb[63].mxu1  ;;  %v20604_v15 = vpop.f32.mrb[67].mxu0 }
 0x7b7   : > { %v14924_v37 = vadd.f32 %v14923_v35, %v14922_v30  ;;  %v9370_v49 = vcombine.low %v20602_v16, %v20604_v15  ;;  %v9371_v63 = vcombine.high %v20602_v16, %v20604_v15 }
 0x7b9   : > { %v8879_v38 = vadd.f32 %v14924_v37, %v14880_v58  ;;  %v9073_v53 = vpop.f32.mrb[64].mxu1  ;;  %v20612_v6 = vpop.f32.mrb[68].mxu0  ;;  %v20716_v1 = vrot.slane %v9370_v49, %v24603_v40  ;;  %v24617_v37 = vld [vmem:[#allocation58_spill] sm:$0xff] }
 0x7ba   : > { %v9075_v46 = vpop.f32.mrb[65].mxu1  ;;  %v20622_v39 = vpop.f32.mrb[69].mxu0 }
 0x7bb   : > { %v8889_v17 = vmul.f32 0.00390625, %v8879_v38  ;;  %v9304_v10 = vcombine.low %v9073_v53, %v9075_v46  ;;  %v9305_v45 = vcombine.high %v9073_v53, %v9075_v46  ;;  %v9438_v59 = vcombine.low %v20612_v6, %v20622_v39  ;;  %v20658_v58 = vpop.permute.xlu1 %12444 }
 0x7bc   : > { %v9439_v36 = vcombine.high %v20612_v6, %v20622_v39  ;;  %24610 = vst [vmem:[#allocation101_spill] sm:$0xff] %v20658_v58 }
 0x7bd   : > { %v8897_v11 = vsub.f32 %v8889_v17, %v8893_v2  ;;  %v20631_v33 = vrot.slane %v9304_v10, %v24603_v40  ;;  %v20634_v42 = vrot.slane %v9305_v45, %v24603_v40  ;;  %v9079_v27 = vpop.f32.mrb[66].mxu1  ;;  %v20636_v41 = vpop.f32.mrb[70].mxu0  ;;  %v20822_v51 = vrot.slane %v9438_v59, %v24603_v40 }
 0x7be   : > { %v9081_v57 = vpop.f32.mrb[67].mxu1  ;;  %v20650_v55 = vpop.f32.mrb[71].mxu0 }
 0x7bf   : > { %v8901_v54 = vadd.f32 1e-05, %v8897_v11  ;;  %v9334_v7 = vcombine.low %v20617_v21, %v20631_v33  ;;  %v9335_v19 = vcombine.high %v20617_v21, %v20631_v33  ;;  %v9336_v13 = vcombine.low %v20620_v8, %v20634_v42  ;;  %v20736_v2 = vpop.permute.xlu0 %12440 }
 0x7c0   : > { %v9337_v12 = vcombine.high %v20620_v8, %v20634_v42  ;;  %v9372_v3 = vcombine.low %v9079_v27, %v9081_v57  ;;  %v9373_v43 = vcombine.high %v9079_v27, %v9081_v57  ;;  %v9506_v14 = vcombine.low %v20636_v41, %v20650_v55  ;;  %v20710_v27 = vpop.permute.xlu1 %12132  ;;  %24613 = vst [vmem:[#allocation109_spill] sm:$0xff] %v20736_v2 }
 0x7c1   : > { %15651 = vrsqrt.f32 %v8901_v54  ;;  %v20672_v61 = vpop.f32.mrb[68].mxu1  ;;  %24612 = vst [vmem:[#allocation70_spill] sm:$0xff] %v20710_v27  ;;  %v20722_v57 = vrot.slane %v9371_v63, %v24603_v40  ;;  %v20828_v63 = vrot.slane %v9439_v36, %v24603_v40  ;;  %v9358_v36 = vrot.slane %v9335_v19, %v24603_v40 }
 0x7c2   : > { %v20680_v18 = vpop.f32.mrb[69].mxu1  ;;  %v20725_v54 = vrot.slane %v9372_v3, %v24603_v40  ;;  %v20728_v45 = vrot.slane %v9373_v43, %v24603_v40  ;;  %v9351_v33 = vrot.slane %v9336_v13, %v24603_v40  ;;  %v9365_v59 = vrot.slane %v9337_v12, %v24603_v40 }
 0x7c3   : > { %v9440_v31 = vcombine.low %v20672_v61, %v20680_v18  ;;  %v9441_v10 = vcombine.high %v20672_v61, %v20680_v18  ;;  %v20786_v16 = vpop.permute.xlu0 %12128  ;;  %v9593_v47 = vrot.slane %v9358_v36, %v24617_v37  ;;  %v9597_v39 = vrot.slane %v9358_v36, %v24618_v60 }
 0x7c4   : > { %v20780_v46 = vpop.permute.xlu1 %12452  ;;  %24615 = vst [vmem:[#allocation16_spill] sm:$0xff] %v20786_v16  ;;  %v9601_v61 = vrot.slane %v9358_v36, %v24619_v50  ;;  %v9649_v20 = vrot.slane %v9351_v33, %v24619_v50  ;;  %v9657_v38 = vrot.slane %v9365_v59, %v24617_v37  ;;  %v9661_v5 = vrot.slane %v9365_v59, %v24618_v60 }
 0x7c5   : > { %v20708_v11 = vpop.f32.mrb[70].mxu1  ;;  %24614 = vst [vmem:[#allocation14_spill] sm:$0xff] %v20780_v46  ;;  %v20831_v15 = vrot.slane %v9440_v31, %v24603_v40  ;;  %v20834_v3 = vrot.slane %v9441_v10, %v24603_v40  ;;  %v20868_v31 = vrot.slane %v9506_v14, %v24603_v40  ;;  %v9665_v43 = vrot.slane %v9365_v59, %v24619_v50 }
 0x7c6   : > { %v20730_v53 = vpop.f32.mrb[71].mxu1  ;;  %v20923_v28 = vcombine.high %v9351_v33, %v9351_v33  ;;  %v24621_v23 = vcombine.low %v20716_v1, %v20725_v54  ;;  %v20938_v2 = vcombine.high %v9358_v36, %v9358_v36  ;;  %v20940_v34 = vcombine.high %v9365_v59, %v9365_v59 }
 0x7c7   : > { %v9508_v17 = vcombine.low %v20708_v11, %v20730_v53  ;;  %v20850_v10 = vpop.permute.xlu0 %12448  ;;  %v9509_v19 = vcombine.high %v20708_v11, %v20730_v53  ;;  %v24620_v11 = vld [vmem:[#allocation63_spill] sm:$0xff]  ;;  %v20946_v52 = vcombine.low %v9593_v47, %v9597_v39  ;;  %v24624_v47 = vcombine.low %v20722_v57, %v20728_v45 }
 0x7c8   : > { %24616 = vst [vmem:[#allocation107_spill] sm:$0xff] %v20850_v10  ;;  %v9605_v6 = vrot.slane %v9358_v36, %v24620_v11  ;;  %v9653_v8 = vrot.slane %v9351_v33, %v24620_v11  ;;  %v9669_v35 = vrot.slane %v9365_v59, %v24620_v11  ;;  %v9412_v16 = vrot.slane %v24621_v23, %v24603_v40 }
 0x7c9   : > { %v20887_v14 = vrot.slane %v9508_v17, %v24603_v40  ;;  %v24622_v10 = vcombine.high %v20636_v41, %v20650_v55  ;;  %v20936_v27 = vrot.slane %v9509_v19, %v24603_v40  ;;  %v24623_v41 = vcombine.high %v20716_v1, %v20725_v54 }
 0x7ca   : > { %v20948_v23 = vcombine.low %v9601_v61, %v9605_v6  ;;  %v20958_v36 = vcombine.low %v9657_v38, %v9661_v5  ;;  %v20960_v59 = vcombine.low %v9665_v43, %v9669_v35  ;;  %v24625_v61 = vcombine.high %v20722_v57, %v20728_v45 }
 0x7cb   : > { %v15652_v49 = vpop.eup %15651  ;;  %v20933_v46 = vrot.slane %v24622_v10, %v24603_v40  ;;  %v9426_v55 = vrot.slane %v24623_v41, %v24603_v40  ;;  %v20956_v10 = vcombine.low %v9649_v20, %v9653_v8  ;;  %v9705_v39 = vrot.slane %v9412_v16, %v24617_v37 }
 0x7cc   : > { %14494 = vmatmul.mubr.msk.f32.gmra.mrb[78].mxu0 %vm1855_vm1, %v15652_v49  ;;  %14500 = vmatmul.mubr.msk.f32.gmra.mrb[78].mxu1 %vm1855_vm1, %v15652_v49  ;;  %v9344_v49 = vrot.slane %v9334_v7, %v24603_v40  ;;  %v9645_v7 = vrot.slane %v9351_v33, %v24618_v60  ;;  %v9433_v6 = vrot.slane %v24625_v61, %v24603_v40 }
 0x7cd   : > { %v9709_v57 = vrot.slane %v9412_v16, %v24618_v60  ;;  %v9713_v54 = vrot.slane %v9412_v16, %v24619_v50  ;;  %v9717_v43 = vrot.slane %v9412_v16, %v24620_v11  ;;  %v9729_v19 = vrot.slane %v9426_v55, %v24619_v50 }
 0x7ce   : > { %v20893_v18 = vcombine.high %v9344_v49, %v9344_v49  ;;  %v9577_v21 = vrot.slane %v9344_v49, %v24617_v37  ;;  %v9581_v30 = vrot.slane %v9344_v49, %v24618_v60  ;;  %v9585_v53 = vrot.slane %v9344_v49, %v24619_v50 }
 0x7cf   : > { %v9589_v17 = vrot.slane %v9344_v49, %v24620_v11  ;;  %v9641_v49 = vrot.slane %v9351_v33, %v24617_v37  ;;  %v9797_v41 = vrot.slane %v9433_v6, %v24620_v11  ;;  %v21002_v38 = vcombine.high %v9412_v16, %v9412_v16 }
 0x7d0   : > { %v20897_v9 = vpop.f32.mrb[72].mxu0  ;;  %v20899_v13 = vpop.f32.mrb[72].mxu1  ;;  %v20942_v33 = vcombine.low %v9577_v21, %v9581_v30  ;;  %v9419_v30 = vrot.slane %v24624_v47, %v24603_v40  ;;  %v9725_v21 = vrot.slane %v9426_v55, %v24618_v60  ;;  %v24626_v47 = vcombine.low %v20822_v51, %v20831_v15 }
 0x7d1   : > { %v20907_v42 = vpop.f32.mrb[73].mxu0  ;;  %v20909_v12 = vpop.f32.mrb[73].mxu1  ;;  %v20944_v58 = vcombine.low %v9585_v53, %v9589_v17  ;;  %v20950_v24 = vcombine.low %v9641_v49, %v9645_v7  ;;  %v9721_v7 = vrot.slane %v9426_v55, %v24617_v37  ;;  %v9793_v49 = vrot.slane %v9433_v6, %v24619_v50 }
 0x7d2   : > { %v10710_v35 = vcombine.low %v20897_v9, %v20907_v42  ;;  %v10711_v5 = vcombine.high %v20897_v9, %v20907_v42  ;;  %v10712_v1 = vcombine.low %v20899_v13, %v20909_v12  ;;  %v10713_v45 = vcombine.high %v20899_v13, %v20909_v12 }
 0x7d3   : > { %v9733_v9 = vrot.slane %v9426_v55, %v24620_v11  ;;  %v9769_v53 = vrot.slane %v9419_v30, %v24617_v37  ;;  %v9773_v17 = vrot.slane %v9419_v30, %v24618_v60  ;;  %v9777_v13 = vrot.slane %v9419_v30, %v24619_v50 }
 0x7d4   : > { %v9781_v8 = vrot.slane %v9419_v30, %v24620_v11  ;;  %v9785_v42 = vrot.slane %v9433_v6, %v24617_v37  ;;  %v9789_v12 = vrot.slane %v9433_v6, %v24618_v60  ;;  %v9480_v61 = vrot.slane %v24626_v47, %v24603_v40 }
 0x7d5   : > { %v24627_v20 = vcombine.low %v20828_v63, %v20834_v3  ;;  %v24628_v56 = vcombine.high %v20822_v51, %v20831_v15  ;;  %v24629_v25 = vcombine.high %v20828_v63, %v20834_v3  ;;  %v21016_v32 = vcombine.high %v9419_v30, %v9419_v30 }
 0x7d6   : > { %v21018_v47 = vcombine.high %v9426_v55, %v9426_v55  ;;  %v21020_v16 = vcombine.high %v9433_v6, %v9433_v6  ;;  %v21022_v29 = vcombine.low %v9705_v39, %v9709_v57  ;;  %v21024_v62 = vcombine.low %v9713_v54, %v9717_v43 }
 0x7d7   : > { %v9487_v48 = vrot.slane %v24627_v20, %v24603_v40  ;;  %v9494_v22 = vrot.slane %v24628_v56, %v24603_v40  ;;  %v9501_v4 = vrot.slane %v24629_v25, %v24603_v40  ;;  %v21026_v20 = vcombine.low %v9721_v7, %v9725_v21 }
 0x7d8   : > { %v21028_v26 = vcombine.low %v9729_v19, %v9733_v9  ;;  %v21030_v56 = vcombine.low %v9769_v53, %v9773_v17  ;;  %v21032_v51 = vcombine.low %v9777_v13, %v9781_v8  ;;  %v21034_v15 = vcombine.low %v9785_v42, %v9789_v12 }
 0x7d9   : > { %v21036_v25 = vcombine.low %v9793_v49, %v9797_v41  ;;  %v21038_v63 = vcombine.high %v9480_v61, %v9480_v61  ;;  %v21040_v3 = vcombine.high %v9487_v48, %v9487_v48  ;;  %v21042_v55 = vcombine.high %v9494_v22, %v9494_v22 }
 0x7da   : > { %v21044_v30 = vcombine.high %v9501_v4, %v9501_v4  ;;  %v9833_v6 = vrot.slane %v9480_v61, %v24617_v37  ;;  %v9837_v39 = vrot.slane %v9480_v61, %v24618_v60  ;;  %v9841_v57 = vrot.slane %v9480_v61, %v24619_v50 }
 0x7db   : > { %24630 = vst [vmem:[#allocation18_spill] sm:$0xff] %v21038_v63  ;;  %24631 = vst [vmem:[#allocation20_spill] sm:$0xff] %v21040_v3  ;;  %v9845_v54 = vrot.slane %v9480_v61, %v24620_v11  ;;  %v9849_v43 = vrot.slane %v9494_v22, %v24617_v37  ;;  %v9853_v7 = vrot.slane %v9494_v22, %v24618_v60 }
 0x7dc   : > { %24632 = vst [vmem:[#allocation15_spill] sm:$0xff] %v21042_v55  ;;  %24633 = vst [vmem:[#allocation22_spill] sm:$0xff] %v21044_v30  ;;  %v9857_v21 = vrot.slane %v9494_v22, %v24619_v50  ;;  %v9861_v19 = vrot.slane %v9494_v22, %v24620_v11  ;;  %v9897_v9 = vrot.slane %v9487_v48, %v24617_v37 }
 0x7dd   : > { %v9901_v53 = vrot.slane %v9487_v48, %v24618_v60  ;;  %v9905_v17 = vrot.slane %v9487_v48, %v24619_v50  ;;  %v9909_v13 = vrot.slane %v9487_v48, %v24620_v11  ;;  %v24634_v8 = vcombine.low %v20868_v31, %v20887_v14 }
 0x7de   : > { %v9913_v12 = vrot.slane %v9501_v4, %v24617_v37  ;;  %v9917_v49 = vrot.slane %v9501_v4, %v24618_v60  ;;  %v9921_v41 = vrot.slane %v9501_v4, %v24619_v50  ;;  %v9925_v22 = vrot.slane %v9501_v4, %v24620_v11 }
 0x7df   : > { %v9548_v42 = vrot.slane %v24634_v8, %v24603_v40  ;;  %v21066_v61 = vcombine.low %v9833_v6, %v9837_v39  ;;  %v24636_v55 = vcombine.high %v20868_v31, %v20887_v14  ;;  %v10720_v63 = vrot.slane %v10710_v35, %v24603_v40 }
 0x7e0   : > { %v10727_v44 = vrot.slane %v10711_v5, %v24603_v40  ;;  %v21074_v8 = vcombine.low %v9841_v57, %v9845_v54  ;;  %v21076_v0 = vcombine.low %v9849_v43, %v9853_v7  ;;  %v10734_v30 = vrot.slane %v10712_v1, %v24603_v40 }
 0x7e1   : > { %24635 = vst [vmem:[#allocation17_spill] sm:$0xff] %v21066_v61  ;;  %v9562_v48 = vrot.slane %v24636_v55, %v24603_v40  ;;  %v10741_v3 = vrot.slane %v10713_v45, %v24603_v40  ;;  %v21080_v4 = vcombine.low %v9857_v21, %v9861_v19  ;;  %v24640_v6 = vcombine.low %v20933_v46, %v20936_v27 }
 0x7e2   : > { %24637 = vst [vmem:[#allocation24_spill] sm:$0xff] %v21074_v8  ;;  %24638 = vst [vmem:[#allocation19_spill] sm:$0xff] %v21076_v0  ;;  %v24641_v14 = vcombine.high %v20933_v46, %v20936_v27  ;;  %v21090_v5 = vcombine.high %v9548_v42, %v9548_v42  ;;  %v10742_v55 = vcombine.low %v10720_v63, %v10734_v30 }
 0x7e3   : > { %24639 = vst [vmem:[#allocation26_spill] sm:$0xff] %v21080_v4  ;;  %v9555_v31 = vrot.slane %v24640_v6, %v24603_v40  ;;  %v10743_v39 = vcombine.high %v10720_v63, %v10734_v30  ;;  %v10744_v57 = vcombine.low %v10727_v44, %v10741_v3  ;;  %v10745_v1 = vcombine.high %v10727_v44, %v10741_v3 }
 0x7e4   : > { %v9569_v35 = vrot.slane %v24641_v14, %v24603_v40  ;;  %24642 = vst [vmem:[#allocation130_spill] sm:$0xff] %v21090_v5  ;;  %v21092_v54 = vcombine.low %v9897_v9, %v9901_v53  ;;  %v21094_v45 = vcombine.low %v9905_v17, %v9909_v13  ;;  %v21096_v43 = vcombine.low %v9913_v12, %v9917_v49 }
 0x7e5   : > { %v21098_v7 = vcombine.high %v9562_v48, %v9562_v48  ;;  %v21100_v21 = vcombine.low %v9921_v41, %v9925_v22  ;;  %v9961_v19 = vrot.slane %v9548_v42, %v24617_v37  ;;  %v9965_v46 = vrot.slane %v9548_v42, %v24618_v60 }
 0x7e6   : > { %24643 = vst [vmem:[#allocation111_spill] sm:$0xff] %v21092_v54  ;;  %24644 = vst [vmem:[#allocation21_spill] sm:$0xff] %v21094_v45  ;;  %v9969_v27 = vrot.slane %v9548_v42, %v24619_v50  ;;  %v21105_v6 = vcombine.high %v9555_v31, %v9555_v31  ;;  %v21107_v63 = vcombine.high %v9569_v35, %v9569_v35 }
 0x7e7   : > { %24645 = vst [vmem:[#allocation28_spill] sm:$0xff] %v21096_v43  ;;  %24646 = vst [vmem:[#allocation23_spill] sm:$0xff] %v21098_v7  ;;  %v9973_v44 = vrot.slane %v9548_v42, %v24620_v11  ;;  %v9977_v3 = vrot.slane %v9562_v48, %v24617_v37  ;;  %v9981_v30 = vrot.slane %v9562_v48, %v24618_v60 }
 0x7e8   : > { %24647 = vst [vmem:[#allocation31_spill] sm:$0xff] %v21100_v21  ;;  %24648 = vst [vmem:[#allocation117_spill] sm:$0xff] %v21105_v6  ;;  %v9985_v9 = vrot.slane %v9562_v48, %v24619_v50  ;;  %v9989_v53 = vrot.slane %v9562_v48, %v24620_v11  ;;  %v10025_v41 = vrot.slane %v9555_v31, %v24617_v37 }
 0x7e9   : > { %24649 = vst [vmem:[#allocation114_spill] sm:$0xff] %v21107_v63  ;;  %v10029_v22 = vrot.slane %v9555_v31, %v24618_v60  ;;  %v10033_v48 = vrot.slane %v9555_v31, %v24619_v50  ;;  %v10037_v14 = vrot.slane %v9555_v31, %v24620_v11  ;;  %v10041_v17 = vrot.slane %v9569_v35, %v24617_v37 }
 0x7ea   : > { %v10045_v13 = vrot.slane %v9569_v35, %v24618_v60  ;;  %v10049_v12 = vrot.slane %v9569_v35, %v24619_v50  ;;  %v10053_v4 = vrot.slane %v9569_v35, %v24620_v11  ;;  %v21146_v61 = vcombine.low %v9961_v19, %v9965_v46 }
 0x7eb   : > { %v21148_v42 = vcombine.low %v9969_v27, %v9973_v44  ;;  %v21150_v49 = vcombine.low %v9977_v3, %v9981_v30  ;;  %v21152_v21 = vcombine.low %v9985_v9, %v9989_v53  ;;  %v21154_v5 = vcombine.low %v10025_v41, %v10029_v22  ;;  %v24658_v30 = vld [vmem:[#allocation48_spill] sm:$0xff] }
 0x7ec   : > { %24650 = vst [vmem:[#allocation25_spill] sm:$0xff] %v21146_v61  ;;  %v21156_v31 = vcombine.low %v10033_v48, %v10037_v14  ;;  %v21158_v7 = vcombine.low %v10041_v17, %v10045_v13  ;;  %v21160_v0 = vcombine.low %v10049_v12, %v10053_v4  ;;  %v21163_v8 = vrot.slane %v10742_v55, %v24603_v40  ;;  %v24661_v61 = vld [vmem:[#allocation93_spill] sm:$0xff] }
 0x7ed   : > { %24651 = vst [vmem:[#allocation108_spill] sm:$0xff] %v21148_v42  ;;  %24652 = vst [vmem:[#allocation33_spill] sm:$0xff] %v21150_v49  ;;  %v21168_v46 = vrot.slane %v10744_v57, %v24603_v40  ;;  %v21171_v27 = vrot.slane %v10743_v39, %v24603_v40  ;;  %v21174_v44 = vrot.slane %v10745_v1, %v24603_v40 }
 0x7ee   : > { %24653 = vst [vmem:[#allocation135_spill] sm:$0xff] %v21152_v21  ;;  %24654 = vst [vmem:[#allocation27_spill] sm:$0xff] %v21154_v5  ;;  %v21200_v41 = vcombine.high %v21163_v8, %v21163_v8  ;;  %v9673_v19 = vrot.slane %v20923_v28, %v24617_v37  ;;  %v9677_v3 = vrot.slane %v20923_v28, %v24618_v60 }
 0x7ef   : > { %24655 = vst [vmem:[#allocation36_spill] sm:$0xff] %v21156_v31  ;;  %24656 = vst [vmem:[#allocation29_spill] sm:$0xff] %v21158_v7  ;;  %v21204_v22 = vcombine.high %v21168_v46, %v21168_v46  ;;  %v21208_v48 = vcombine.high %v21171_v27, %v21171_v27  ;;  %v21212_v14 = vcombine.high %v21174_v44, %v21174_v44 }
 0x7f0   : > { %24657 = vst [vmem:[#allocation38_spill] sm:$0xff] %v21160_v0  ;;  %v9681_v4 = vrot.slane %v20923_v28, %v24619_v50  ;;  %v9685_v55 = vrot.slane %v20923_v28, %v24620_v11  ;;  %v9689_v9 = vrot.slane %v20940_v34, %v24617_v37  ;;  %v9693_v57 = vrot.slane %v20940_v34, %v24618_v60 }
 0x7f1   : > { %v9697_v39 = vrot.slane %v20940_v34, %v24619_v50  ;;  %v9701_v1 = vrot.slane %v20940_v34, %v24620_v11  ;;  %v10162_v17 = vrot.slane %v20950_v24, %v24658_v30  ;;  %v10169_v12 = vrot.slane %v20956_v10, %v24658_v30 }
 0x7f2   : > { %v10179_v28 = vrot.slane %v20958_v36, %v24658_v30  ;;  %v10186_v53 = vrot.slane %v20960_v59, %v24658_v30  ;;  %v10188_v35 = vcombine.low %v9673_v19, %v9677_v3  ;;  %v10189_v13 = vcombine.low %v9681_v4, %v9685_v55 }
 0x7f3   : > { %v10205_v49 = vcombine.low %v9689_v9, %v9693_v57  ;;  %v10206_v21 = vcombine.low %v9697_v39, %v9701_v1  ;;  %v21268_v24 = vcombine.low %v10162_v17, %v10169_v12  ;;  %v9609_v59 = vrot.slane %v20893_v18, %v24617_v37  ;;  %v24659_v17 = vld [vmem:[#allocation91_spill] sm:$0xff]  ;;  %v24660_v12 = vld [vmem:[#allocation92_spill] sm:$0xff] }
 0x7f4   : > { %v21270_v42 = vcombine.low %v10179_v28, %v10186_v53  ;;  %v10196_v10 = vrot.slane %v10188_v35, %v24658_v30  ;;  %v10203_v36 = vrot.slane %v10189_v13, %v24658_v30  ;;  %v9613_v19 = vrot.slane %v20893_v18, %v24618_v60 }
 0x7f5   : > { %v10213_v3 = vrot.slane %v10205_v49, %v24658_v30  ;;  %v10220_v4 = vrot.slane %v10206_v21, %v24658_v30  ;;  %v9617_v55 = vrot.slane %v20893_v18, %v24619_v50  ;;  %v9621_v9 = vrot.slane %v20893_v18, %v24620_v11 }
 0x7f6   : > { %v21286_v57 = vcombine.low %v10196_v10, %v10203_v36  ;;  %v9625_v39 = vrot.slane %v20938_v2, %v24617_v37  ;;  %v9629_v1 = vrot.slane %v20938_v2, %v24618_v60  ;;  %v9633_v21 = vrot.slane %v20938_v2, %v24619_v50 }
 0x7f7   : > { %v9637_v49 = vrot.slane %v20938_v2, %v24620_v11  ;;  %v10094_v18 = vrot.slane %v20942_v33, %v24658_v30  ;;  %v10101_v53 = vrot.slane %v20944_v58, %v24658_v30  ;;  %v10111_v10 = vrot.slane %v20946_v52, %v24658_v30 }
 0x7f8   : > { %v10118_v36 = vrot.slane %v20948_v23, %v24658_v30  ;;  %v21308_v34 = vcombine.low %v10213_v3, %v10220_v4  ;;  %v10120_v2 = vcombine.low %v9609_v59, %v9613_v19  ;;  %v10121_v35 = vcombine.low %v9617_v55, %v9621_v9 }
 0x7f9   : > { %v10137_v33 = vcombine.low %v9625_v39, %v9629_v1  ;;  %v21312_v63 = vcombine.low %v10094_v18, %v10101_v53  ;;  %v10138_v13 = vcombine.low %v9633_v21, %v9637_v49  ;;  %v9801_v28 = vrot.slane %v21016_v32, %v24617_v37 }
 0x7fa   : > { %v10128_v6 = vrot.slane %v10120_v2, %v24658_v30  ;;  %v10135_v52 = vrot.slane %v10121_v35, %v24658_v30  ;;  %v9805_v59 = vrot.slane %v21016_v32, %v24618_v60  ;;  %v21321_v19 = vcombine.low %v10111_v10, %v10118_v36  ;;  %v24663_v2 = vld [vmem:[#allocation74_spill] sm:$0xff] }
 0x7fb   : > { %v10145_v23 = vrot.slane %v10137_v33, %v24658_v30  ;;  %v10152_v3 = vrot.slane %v10138_v13, %v24658_v30  ;;  %v9809_v4 = vrot.slane %v21016_v32, %v24619_v50  ;;  %v9813_v55 = vrot.slane %v21016_v32, %v24620_v11 }
 0x7fc   : > { %v21328_v9 = vcombine.low %v10128_v6, %v10135_v52  ;;  %v9817_v35 = vrot.slane %v21020_v16, %v24617_v37  ;;  %v9821_v39 = vrot.slane %v21020_v16, %v24618_v60  ;;  %v9825_v1 = vrot.slane %v21020_v16, %v24619_v50  ;;  %v24662_v6 = vld [vmem:[#allocation94_spill] sm:$0xff] }
 0x7fd   : > { %v21336_v21 = vcombine.low %v10145_v23, %v10152_v3  ;;  %v9829_v49 = vrot.slane %v21020_v16, %v24620_v11  ;;  %v10298_v18 = vrot.slane %v21030_v56, %v24658_v30  ;;  %v10305_v32 = vrot.slane %v21032_v51, %v24658_v30  ;;  %v24664_v23 = vld [vmem:[#allocation50_spill] sm:$0xff]  ;;  %v24669_v51 = vld [vmem:[#allocation132_spill] sm:$0xff] }
 0x7fe   : > { %v10315_v13 = vrot.slane %v21034_v15, %v24658_v30  ;;  %v10322_v10 = vrot.slane %v21036_v25, %v24658_v30  ;;  %v10324_v36 = vcombine.low %v9801_v28, %v9805_v59  ;;  %v10325_v52 = vcombine.low %v9809_v4, %v9813_v55  ;;  %v24666_v25 = vld [vmem:[#allocation76_spill] sm:$0xff] }
 0x7ff   : > { %v21352_v16 = vcombine.low %v10298_v18, %v10305_v32  ;;  %v10341_v56 = vcombine.low %v9817_v35, %v9821_v39  ;;  %v10342_v58 = vcombine.low %v9825_v1, %v9829_v49  ;;  %v24667_v59 = vld [vmem:[#allocation52_spill] sm:$0xff]  ;;  %v9737_v4 = vrot.slane %v21002_v38, %v24617_v37  ;;  %v24668_v1 = vld [vmem:[#allocation131_spill] sm:$0xff] }
 0x800   : > { %v21356_v3 = vcombine.low %v10315_v13, %v10322_v10  ;;  %v10332_v53 = vrot.slane %v10324_v36, %v24658_v30  ;;  %v10339_v18 = vrot.slane %v10325_v52, %v24658_v30  ;;  %v9741_v13 = vrot.slane %v21002_v38, %v24618_v60 }
 0x801   : > { %v10349_v39 = vrot.slane %v10341_v56, %v24658_v30  ;;  %v10356_v32 = vrot.slane %v10342_v58, %v24658_v30  ;;  %v9745_v56 = vrot.slane %v21002_v38, %v24619_v50  ;;  %v9749_v58 = vrot.slane %v21002_v38, %v24620_v11 }
 0x802   : > { %24665 = vst [vmem:[#allocation110_spill] sm:$0xff] %v21356_v3  ;;  %v21372_v52 = vcombine.low %v10332_v53, %v10339_v18  ;;  %v24671_v53 = vld [vmem:[#allocation133_spill] sm:$0xff]  ;;  %v24694_v45 = vrot.slane %v21174_v44, %v24620_v11 }
 0x814   : > { %v9180_v15 = vpop.f32.mrb[74].mxu0  ;;  %v9269_v7 = vpop.f32.mrb[74].mxu1 }
 0x815   : > { %v9182_v55 = vpop.f32.mrb[75].mxu0  ;;  %v9271_v35 = vpop.f32.mrb[75].mxu1 }
 0x816   : > { %v10778_v10 = vcombine.low %v9180_v15, %v9182_v55  ;;  %v10779_v36 = vcombine.high %v9180_v15, %v9182_v55  ;;  %v10780_v33 = vcombine.low %v9269_v7, %v9271_v35  ;;  %v10781_v28 = vcombine.high %v9269_v7, %v9271_v35 }
 0x817   : > { %v21384_v7 = vcombine.low %v10349_v39, %v10356_v32  ;;  %v9753_v55 = vrot.slane %v21018_v47, %v24617_v37  ;;  %v9757_v35 = vrot.slane %v21018_v47, %v24618_v60  ;;  %v10247_v39 = vrot.slane %v21026_v20, %v24658_v30 }
 0x818   : > { %v10788_v49 = vrot.slane %v10778_v10, %v24603_v40  ;;  %v10795_v5 = vrot.slane %v10779_v36, %v24603_v40  ;;  %v10802_v31 = vrot.slane %v10780_v33, %v24603_v40  ;;  %v10809_v15 = vrot.slane %v10781_v28, %v24603_v40 }
 0x819   : > { %24670 = vst [vmem:[#allocation32_spill] sm:$0xff] %v21384_v7  ;;  %v10230_v33 = vrot.slane %v21022_v29, %v24658_v30  ;;  %v10237_v28 = vrot.slane %v21024_v62, %v24658_v30  ;;  %v10254_v32 = vrot.slane %v21028_v26, %v24658_v30  ;;  %v24674_v62 = vld [vmem:[#allocation134_spill] sm:$0xff]  ;;  %v9761_v20 = vrot.slane %v21018_v47, %v24619_v50 }
 0x81a   : > { %v10810_v38 = vcombine.low %v10788_v49, %v10802_v31  ;;  %v10811_v0 = vcombine.high %v10788_v49, %v10802_v31  ;;  %v10812_v10 = vcombine.low %v10795_v5, %v10809_v15  ;;  %v10813_v3 = vcombine.high %v10795_v5, %v10809_v15 }
 0x81b   : > { %v9765_v26 = vrot.slane %v21018_v47, %v24620_v11  ;;  %v21418_v49 = vcombine.low %v10230_v33, %v10237_v28 }
 0x81c   : > { %v21401_v36 = vrot.slane %v10810_v38, %v24603_v40  ;;  %v21404_v18 = vrot.slane %v10812_v10, %v24603_v40  ;;  %v21407_v5 = vrot.slane %v10811_v0, %v24603_v40  ;;  %v21410_v29 = vrot.slane %v10813_v3, %v24603_v40 }
 0x81d   : > { %24675 = vst [vmem:[#allocation42_spill] sm:$0xff] %v21418_v49  ;;  %v21424_v0 = vcombine.low %v10247_v39, %v10254_v32  ;;  %v10256_v38 = vcombine.low %v9737_v4, %v9741_v13  ;;  %v10257_v3 = vcombine.low %v9745_v56, %v9749_v58  ;;  %v10273_v32 = vcombine.low %v9753_v55, %v9757_v35  ;;  %v24678_v56 = vld [vmem:[#allocation20_spill] sm:$0xff] }
 0x81e   : > { %24672 = vst [vmem:[#allocation40_spill] sm:$0xff] %v21401_v36  ;;  %24673 = vst [vmem:[#allocation34_spill] sm:$0xff] %v21407_v5  ;;  %v21422_v15 = vcombine.high %v21401_v36, %v21401_v36  ;;  %v21428_v10 = vcombine.high %v21404_v18, %v21404_v18  ;;  %v21432_v31 = vcombine.high %v21407_v5, %v21407_v5 }
 0x81f   : > { %24676 = vst [vmem:[#allocation112_spill] sm:$0xff] %v21424_v0  ;;  %v21436_v47 = vcombine.high %v21410_v29, %v21410_v29  ;;  %v10264_v39 = vrot.slane %v10256_v38, %v24658_v30  ;;  %v10271_v28 = vrot.slane %v10257_v3, %v24658_v30  ;;  %v10274_v40 = vcombine.low %v9761_v20, %v9765_v26 }
 0x820   : > { %24677 = vst [vmem:[#allocation37_spill] sm:$0xff] %v21432_v31  ;;  %v9929_v5 = vrot.slane %v24678_v56, %v24617_v37  ;;  %v10281_v38 = vrot.slane %v10273_v32, %v24658_v30  ;;  %v9933_v55 = vrot.slane %v24678_v56, %v24618_v60  ;;  %v24683_v32 = vld [vmem:[#allocation22_spill] sm:$0xff]  ;;  %v11081_v4 = vrot.slane %v21204_v22, %v24617_v37 }
 0x821   : > { %v21474_v36 = vcombine.low %v10264_v39, %v10271_v28  ;;  %v10288_v3 = vrot.slane %v10274_v40, %v24658_v30  ;;  %v11085_v28 = vrot.slane %v21204_v22, %v24618_v60  ;;  %v11093_v40 = vrot.slane %v21204_v22, %v24620_v11 }
 0x822   : > { %v21510_v26 = vcombine.low %v9929_v5, %v9933_v55  ;;  %v11097_v58 = vrot.slane %v21212_v14, %v24617_v37  ;;  %v11101_v0 = vrot.slane %v21212_v14, %v24618_v60  ;;  %v11105_v5 = vrot.slane %v21212_v14, %v24619_v50 }
 0x823   : > { %24679 = vst [vmem:[#allocation44_spill] sm:$0xff] %v21474_v36  ;;  %v21488_v39 = vcombine.low %v10281_v38, %v10288_v3  ;;  %v11089_v38 = vrot.slane %v21204_v22, %v24619_v50  ;;  %v11109_v55 = vrot.slane %v21212_v14, %v24620_v11  ;;  %v24688_v13 = vrot.slane %v21168_v46, %v24618_v60 }
 0x824   : > { %24687 = vst [vmem:[#allocation39_spill] sm:$0xff] %v21510_v26  ;;  %v24690_v22 = vrot.slane %v21168_v46, %v24620_v11  ;;  %v24691_v26 = vrot.slane %v21168_v46, %v24619_v50  ;;  %v24692_v20 = vrot.slane %v21174_v44, %v24618_v60  ;;  %v24693_v14 = vrot.slane %v21174_v44, %v24617_v37 }
 0x825   : > { %24682 = vst [vmem:[#allocation113_spill] sm:$0xff] %v21488_v39  ;;  %v24689_v39 = vrot.slane %v21168_v46, %v24617_v37  ;;  %v11596_v36 = vcombine.low %v11081_v4, %v11085_v28  ;;  %v11597_v33 = vcombine.low %v11089_v38, %v11093_v40  ;;  %v11613_v49 = vcombine.low %v11097_v58, %v11101_v0 }
 0x826   : > { %v11563_v43 = vcombine.low %v24691_v26, %v24690_v22  ;;  %v11579_v54 = vcombine.low %v24693_v14, %v24692_v20  ;;  %v11614_v35 = vcombine.low %v11105_v5, %v11109_v55  ;;  %v11017_v0 = vrot.slane %v21200_v41, %v24617_v37 }
 0x827   : > { %v11562_v3 = vcombine.low %v24689_v39, %v24688_v13  ;;  %v24695_v13 = vrot.slane %v21174_v44, %v24619_v50  ;;  %v11604_v20 = vrot.slane %v11596_v36, %v24658_v30  ;;  %v11611_v14 = vrot.slane %v11597_v33, %v24658_v30 }
 0x828   : > { %v11577_v26 = vrot.slane %v11563_v43, %v24658_v30  ;;  %v11587_v22 = vrot.slane %v11579_v54, %v24658_v30  ;;  %v11621_v7 = vrot.slane %v11613_v49, %v24658_v30  ;;  %v11021_v43 = vrot.slane %v21200_v41, %v24618_v60 }
 0x829   : > { %v11580_v39 = vcombine.low %v24695_v13, %v24694_v45  ;;  %v11570_v46 = vrot.slane %v11562_v3, %v24658_v30  ;;  %v11628_v45 = vrot.slane %v11614_v35, %v24658_v30  ;;  %v11612_v58 = vcombine.low %v11604_v20, %v11611_v14  ;;  %v24709_v20 = vld [vmem:[#allocation64_spill] sm:$0xff] }
 0x82a   : > { %v11025_v28 = vrot.slane %v21200_v41, %v24619_v50  ;;  %v11029_v36 = vrot.slane %v21200_v41, %v24620_v11  ;;  %v24696_v49 = vsub.f32 %v24659_v17, %v21268_v24  ;;  %v11033_v40 = vrot.slane %v21208_v48, %v24617_v37  ;;  %v24700_v17 = vld [vmem:[#allocation49_spill] sm:$0xff] }
 0x82b   : > { %v11594_v31 = vrot.slane %v11580_v39, %v24658_v30  ;;  %v11578_v44 = vcombine.low %v11570_v46, %v11577_v26  ;;  %v11629_v54 = vcombine.low %v11621_v7, %v11628_v45  ;;  %v11037_v7 = vrot.slane %v21208_v48, %v24618_v60  ;;  %v24703_v39 = vld [vmem:[#allocation65_spill] sm:$0xff] }
 0x82c   : > { %v24698_v38 = vsub.f32 %v24661_v61, %v21286_v57  ;;  %v24699_v41 = vsub.f32 %v24662_v6, %v21308_v34  ;;  %v11041_v24 = vrot.slane %v21208_v48, %v24619_v50  ;;  %v24704_v46 = vrot.slane %v24700_v17, %v24703_v39 }
 0x82d   : > { %v11595_v4 = vcombine.low %v11587_v22, %v11594_v31  ;;  %v12074_v33 = vmul.f32 %v11578_v44, %v24696_v49  ;;  %v24697_v31 = vsub.f32 %v24660_v12, %v21270_v42  ;;  %v11045_v42 = vrot.slane %v21208_v48, %v24620_v11  ;;  %v24701_v12 = vld [vmem:[#allocation99_spill] sm:$0xff]  ;;  %v24711_v44 = vld [vmem:[#allocation102_spill] sm:$0xff] }
 0x82e   : > { %v12076_v3 = vmul.f32 %v11612_v58, %v24698_v38  ;;  %v12077_v5 = vmul.f32 %v11629_v54, %v24699_v41  ;;  %v24702_v55 = vrot.slane %v24700_v17, %v24701_v12  ;;  %v24705_v61 = vrot.slane %v21163_v8, %v24618_v60  ;;  %v24717_v38 = vld [vmem:[#allocation51_spill] sm:$0xff] }
 0x82f   : > { %v12075_v35 = vmul.f32 %v11595_v4, %v24697_v31  ;;  %v24706_v34 = vrot.slane %v21163_v8, %v24617_v37  ;;  %v24707_v6 = vrot.slane %v21163_v8, %v24620_v11  ;;  %v24708_v48 = vrot.slane %v21163_v8, %v24619_v50 }
 0x830   : > { %v12394_v13 = vmul.f32 %v24702_v55, %v12074_v33  ;;  %v24710_v14 = vrot.slane %v24700_v17, %v24709_v20  ;;  %v24712_v4 = vrot.slane %v24700_v17, %v24711_v44  ;;  %v24713_v54 = vrot.slane %v21171_v27, %v24618_v60 }
 0x831   : > { %v12395_v26 = vmul.f32 %v24704_v46, %v12075_v35  ;;  %v11494_v57 = vcombine.low %v24706_v34, %v24705_v61  ;;  %v11495_v22 = vcombine.low %v24708_v48, %v24707_v6  ;;  %v24714_v49 = vrot.slane %v21171_v27, %v24617_v37 }
 0x832   : > { %v12396_v45 = vmul.f32 %v24710_v14, %v12076_v3  ;;  %v12397_v58 = vmul.f32 %v24712_v4, %v12077_v5  ;;  %v24715_v31 = vrot.slane %v21171_v27, %v24620_v11  ;;  %v24716_v8 = vrot.slane %v21171_v27, %v24619_v50 }
 0x833   : > { %v11511_v33 = vcombine.low %v24714_v49, %v24713_v54  ;;  %v24718_v3 = vrot.slane %v24717_v38, %v24701_v12  ;;  %v24719_v5 = vrot.slane %v24717_v38, %v24703_v39  ;;  %v11502_v55 = vrot.slane %v11494_v57, %v24658_v30 }
 0x834   : > { %v11512_v35 = vcombine.low %v24716_v8, %v24715_v31  ;;  %v11509_v46 = vrot.slane %v11495_v22, %v24658_v30  ;;  %v24720_v61 = vrot.slane %v24717_v38, %v24709_v20  ;;  %v24721_v27 = vrot.slane %v24717_v38, %v24711_v44 }
 0x835   : > { %v21627_v41 = vadd.f32 %v24718_v3, %v12394_v13  ;;  %v21632_v17 = vadd.f32 %v24719_v5, %v12395_v26  ;;  %v11519_v13 = vrot.slane %v11511_v33, %v24658_v30  ;;  %v11528_v22 = vcombine.low %v11017_v0, %v11021_v43 }
 0x836   : > { %v21639_v34 = vadd.f32 %v24720_v61, %v12396_v45  ;;  %v21644_v6 = vadd.f32 %v24721_v27, %v12397_v58  ;;  %v11526_v48 = vrot.slane %v11512_v35, %v24658_v30  ;;  %v11510_v14 = vcombine.low %v11502_v55, %v11509_v46  ;;  %v24728_v27 = vld [vmem:[#allocation97_spill] sm:$0xff] }
 0x837   : > { %v14505_v26 = vmul.f32 -1.442695, %v21627_v41  ;;  %v14506_v57 = vmul.f32 -1.442695, %v21632_v17  ;;  %v11529_v49 = vcombine.low %v11025_v28, %v11029_v36  ;;  %v11536_v58 = vrot.slane %v11528_v22, %v24658_v30 }
 0x838   : > { %v14507_v4 = vmul.f32 -1.442695, %v21639_v34  ;;  %v14508_v45 = vmul.f32 -1.442695, %v21644_v6  ;;  %v11527_v54 = vcombine.low %v11519_v13, %v11526_v48  ;;  %v11545_v31 = vcombine.low %v11033_v40, %v11037_v7  ;;  %v24724_v7 = vld [vmem:[#allocation55_spill] sm:$0xff] }
 0x839   : > { %15653 = vpow2.f32 %v14505_v26  ;;  %v11546_v8 = vcombine.low %v11041_v24, %v11045_v42  ;;  %v11543_v33 = vrot.slane %v11529_v49, %v24658_v30  ;;  %v24722_v35 = vsub.f32 %v24663_v2, %v21312_v63 }
 0x83a   : > { %15655 = vpow2.f32 %v14506_v57  ;;  %v24723_v0 = vsub.f32 %v24664_v23, %v21321_v19  ;;  %v11553_v3 = vrot.slane %v11545_v31, %v24658_v30  ;;  %v11209_v36 = vrot.slane %v21428_v10, %v24617_v37 }
 0x83b   : > { %v12070_v38 = vmul.f32 %v11510_v14, %v24722_v35  ;;  %15657 = vpow2.f32 %v14507_v4  ;;  %v11560_v28 = vrot.slane %v11546_v8, %v24658_v30  ;;  %v11544_v40 = vcombine.low %v11536_v58, %v11543_v33 }
 0x83c   : > { %v12071_v43 = vmul.f32 %v11527_v54, %v24723_v0  ;;  %15659 = vpow2.f32 %v14508_v45  ;;  %v24725_v24 = vrot.slane %v24724_v7, %v24701_v12  ;;  %v24726_v63 = vrot.slane %v24724_v7, %v24703_v39 }
 0x83d   : > { %v11561_v19 = vcombine.low %v11553_v3, %v11560_v28  ;;  %v11213_v23 = vrot.slane %v21428_v10, %v24618_v60  ;;  %v11217_v5 = vrot.slane %v21428_v10, %v24619_v50  ;;  %v11221_v55 = vrot.slane %v21428_v10, %v24620_v11 }
 0x83e   : > { %v12390_v42 = vmul.f32 %v24725_v24, %v12070_v38  ;;  %v12391_v2 = vmul.f32 %v24726_v63, %v12071_v43  ;;  %v24727_v46 = vsub.f32 %v24666_v25, %v21328_v9  ;;  %v24729_v13 = vrot.slane %v24728_v27, %v24701_v12 }
 0x83f   : > { %v24730_v26 = vrot.slane %v24728_v27, %v24703_v39  ;;  %v11225_v14 = vrot.slane %v21436_v47, %v24617_v37  ;;  %v24731_v10 = vsub.f32 %v24667_v59, %v21336_v21  ;;  %v11229_v9 = vrot.slane %v21436_v47, %v24618_v60 }
 0x840   : > { %v12072_v61 = vmul.f32 %v11544_v40, %v24727_v46  ;;  %v21682_v48 = vadd.f32 %v24729_v13, %v12390_v42  ;;  %v11233_v25 = vrot.slane %v21436_v47, %v24619_v50  ;;  %v11237_v4 = vrot.slane %v21436_v47, %v24620_v11 }
 0x841   : > { %v21687_v57 = vadd.f32 %v24730_v26, %v12391_v2  ;;  %v12073_v22 = vmul.f32 %v11561_v19, %v24731_v10  ;;  %v24732_v45 = vrot.slane %v24724_v7, %v24709_v20  ;;  %v24733_v21 = vrot.slane %v21404_v18, %v24618_v60 }
 0x842   : > { %v14501_v49 = vmul.f32 -1.442695, %v21682_v48  ;;  %v24734_v59 = vrot.slane %v21404_v18, %v24617_v37  ;;  %v24735_v8 = vrot.slane %v24724_v7, %v24711_v44  ;;  %v24736_v47 = vrot.slane %v21404_v18, %v24620_v11 }
 0x843   : > { %v12392_v54 = vmul.f32 %v24732_v45, %v12072_v61  ;;  %v14502_v58 = vmul.f32 -1.442695, %v21687_v57  ;;  %v24737_v35 = vrot.slane %v21404_v18, %v24619_v50  ;;  %v24738_v0 = vrot.slane %v21410_v29, %v24618_v60  ;;  %v15654_v2 = vpop.eup %15653 }
 0x844   : > { %v11698_v31 = vcombine.low %v24734_v59, %v24733_v21  ;;  %v12393_v33 = vmul.f32 %v24735_v8, %v12073_v22  ;;  %v24739_v43 = vrot.slane %v21410_v29, %v24617_v37  ;;  %v24740_v28 = vrot.slane %v21410_v29, %v24620_v11  ;;  %v15656_v13 = vpop.eup %15655 }
 0x845   : > { %v11699_v38 = vcombine.low %v24737_v35, %v24736_v47  ;;  %v24741_v40 = vrot.slane %v21410_v29, %v24619_v50  ;;  %v24742_v24 = vrot.slane %v24728_v27, %v24709_v20  ;;  %15661 = vpow2.f32 %v14501_v49 }
 0x846   : > { %v11715_v3 = vcombine.low %v24739_v43, %v24738_v0  ;;  %v11706_v18 = vrot.slane %v11698_v31, %v24658_v30  ;;  %v11732_v63 = vcombine.low %v11209_v36, %v11213_v23  ;;  %v24743_v19 = vrot.slane %v24728_v27, %v24711_v44 }
 0x847   : > { %v11716_v7 = vcombine.low %v24741_v40, %v24740_v28  ;;  %v21735_v42 = vadd.f32 %v24742_v24, %v12392_v54  ;;  %15663 = vpow2.f32 %v14502_v58  ;;  %v11713_v61 = vrot.slane %v11699_v38, %v24658_v30  ;;  %v15658_v54 = vpop.eup %15657  ;;  %v24745_v38 = vld [vmem:[#allocation110_spill] sm:$0xff] }
 0x848   : > { %v21741_v46 = vadd.f32 %v24743_v19, %v12393_v33  ;;  %v11723_v29 = vrot.slane %v11715_v3, %v24658_v30  ;;  %v12842_v26 = vadd.f32 1.0, %v15654_v2  ;;  %v11733_v45 = vcombine.low %v11217_v5, %v11221_v55  ;;  %v15660_v21 = vpop.eup %15659 }
 0x849   : > { %v14503_v10 = vmul.f32 -1.442695, %v21735_v42  ;;  %v11730_v22 = vrot.slane %v11716_v7, %v24658_v30  ;;  %v12843_v36 = vadd.f32 1.0, %v15656_v13  ;;  %v11714_v49 = vcombine.low %v11706_v18, %v11713_v61 }
 0x84a   : > { %v14504_v23 = vmul.f32 -1.442695, %v21741_v46  ;;  %v11740_v27 = vrot.slane %v11732_v63, %v24658_v30  ;;  %v12844_v58 = vadd.f32 1.0, %v15658_v54  ;;  %15665 = vrcp.f32 %v12842_v26  ;;  %v24758_v26 = vld [vmem:[#allocation75_spill] sm:$0xff] }
 0x84b   : > { %v11731_v59 = vcombine.low %v11723_v29, %v11730_v22  ;;  %v11747_v31 = vrot.slane %v11733_v45, %v24658_v30  ;;  %v12845_v8 = vadd.f32 1.0, %v15660_v21  ;;  %15667 = vrcp.f32 %v12843_v36 }
 0x84c   : > { %v11749_v33 = vcombine.low %v11225_v14, %v11229_v9  ;;  %v11750_v47 = vcombine.low %v11233_v25, %v11237_v4  ;;  %15669 = vrcp.f32 %v12844_v58  ;;  %v24744_v5 = vsub.f32 %v24668_v1, %v21352_v16 }
 0x84d   : > { %v11748_v35 = vcombine.low %v11740_v27, %v11747_v31  ;;  %v24746_v0 = vsub.f32 %v24669_v51, %v24745_v38  ;;  %15671 = vrcp.f32 %v12845_v8  ;;  %v24747_v40 = vrot.slane %v24678_v56, %v24620_v11  ;;  %v24750_v51 = vld [vmem:[#allocation54_spill] sm:$0xff]  ;;  %v24765_v38 = vld [vmem:[#allocation37_spill] sm:$0xff] }
 0x84e   : > { %v12082_v55 = vmul.f32 %v11714_v49, %v24744_v5  ;;  %v11757_v3 = vrot.slane %v11749_v33, %v24658_v30  ;;  %v11764_v28 = vrot.slane %v11750_v47, %v24658_v30  ;;  %v24748_v14 = vrot.slane %v24678_v56, %v24619_v50  ;;  %v24761_v49 = vld [vmem:[#allocation32_spill] sm:$0xff] }
 0x84f   : > { %v12083_v43 = vmul.f32 %v11731_v59, %v24746_v0  ;;  %15673 = vpow2.f32 %v14503_v10  ;;  %v24749_v16 = vsub.f32 %v24671_v53, %v21372_v52  ;;  %v24751_v25 = vrot.slane %v24750_v51, %v24701_v12  ;;  %v15662_v61 = vpop.eup %15661 }
 0x850   : > { %v21764_v9 = vcombine.low %v24748_v14, %v24747_v40  ;;  %v24752_v7 = vrot.slane %v24750_v51, %v24703_v39  ;;  %15675 = vpow2.f32 %v14504_v23  ;;  %v11765_v18 = vcombine.low %v11757_v3, %v11764_v28  ;;  %v24766_v28 = vld [vmem:[#allocation40_spill] sm:$0xff] }
 0x851   : > { %v12084_v1 = vmul.f32 %v11748_v35, %v24749_v16  ;;  %v12402_v4 = vmul.f32 %v24751_v25, %v12082_v55  ;;  %v24753_v56 = vrot.slane %v24683_v32, %v24618_v60  ;;  %v24754_v63 = vrot.slane %v24683_v32, %v24617_v37  ;;  %v15664_v36 = vpop.eup %15663 }
 0x852   : > { %v12403_v24 = vmul.f32 %v24752_v7, %v12083_v43  ;;  %v24755_v52 = vrot.slane %v24683_v32, %v24620_v11  ;;  %v24756_v53 = vrot.slane %v24683_v32, %v24619_v50  ;;  %v24757_v29 = vrot.slane %v24750_v51, %v24709_v20 }
 0x853   : > { %v21781_v2 = vcombine.low %v24754_v63, %v24753_v56  ;;  %v24759_v10 = vrot.slane %v24758_v26, %v24701_v12  ;;  %v24760_v45 = vrot.slane %v24758_v26, %v24703_v39  ;;  %v11145_v32 = vrot.slane %v21422_v15, %v24617_v37 }
 0x854   : > { %v21789_v19 = vcombine.low %v24756_v53, %v24755_v52  ;;  %v12404_v13 = vmul.f32 %v24757_v29, %v12084_v1  ;;  %v12838_v23 = vadd.f32 1.0, %v15662_v61  ;;  %v24762_v27 = vsub.f32 %v24674_v62, %v24761_v49  ;;  %v15666_v43 = vpop.eup %15665  ;;  %v24772_v29 = vld [vmem:[#allocation34_spill] sm:$0xff] }
 0x855   : > { %v21797_v22 = vadd.f32 %v24759_v10, %v12402_v4  ;;  %v21802_v54 = vadd.f32 %v24760_v45, %v12403_v24  ;;  %v11149_v58 = vrot.slane %v21422_v15, %v24618_v60  ;;  %v11153_v59 = vrot.slane %v21422_v15, %v24619_v50  ;;  %v15668_v4 = vpop.eup %15667 }
 0x856   : > { %v12085_v21 = vmul.f32 %v11765_v18, %v24762_v27  ;;  %v12839_v31 = vadd.f32 1.0, %v15664_v36  ;;  %v24763_v8 = vrot.slane %v24758_v26, %v24709_v20  ;;  %v11157_v35 = vrot.slane %v21422_v15, %v24620_v11  ;;  %v15670_v63 = vpop.eup %15669 }
 0x857   : > { %v14513_v47 = vmul.f32 -1.442695, %v21797_v22  ;;  %15677 = vrcp.f32 %v12838_v23  ;;  %v24764_v62 = vrot.slane %v24750_v51, %v24711_v44  ;;  %v14514_v55 = vmul.f32 -1.442695, %v21802_v54 }
 0x858   : > { %v21816_v33 = vadd.f32 %v24763_v8, %v12404_v13  ;;  %v11161_v0 = vrot.slane %v24765_v38, %v24617_v37  ;;  %15679 = vrcp.f32 %v12839_v31  ;;  %v11165_v3 = vrot.slane %v24765_v38, %v24618_v60 }
 0x859   : > { %v12405_v5 = vmul.f32 %v24764_v62, %v12085_v21  ;;  %v24767_v40 = vrot.slane %v24766_v28, %v24618_v60  ;;  %v24768_v14 = vrot.slane %v24766_v28, %v24617_v37  ;;  %v24769_v1 = vrot.slane %v24766_v28, %v24620_v11 }
 0x85a   : > { %v24770_v51 = vrot.slane %v24766_v28, %v24619_v50  ;;  %v12938_v7 = vmul.f32 %v15666_v43, %v21627_v41  ;;  %v24771_v24 = vrot.slane %v24758_v26, %v24711_v44  ;;  %15681 = vpow2.f32 %v14513_v47  ;;  %v15672_v26 = vpop.eup %15671  ;;  %v9186_v43 = vpop.f32.mrb[76].mxu0 }
 0x85b   : > { %v11630_v16 = vcombine.low %v24768_v14, %v24767_v40  ;;  %v14515_v56 = vmul.f32 -1.442695, %v21816_v33  ;;  %v12939_v52 = vmul.f32 %v15668_v4, %v21632_v17  ;;  %v24773_v13 = vrot.slane %v24772_v29, %v24618_v60  ;;  %v15674_v27 = vpop.eup %15673  ;;  %v9275_v28 = vpop.f32.mrb[76].mxu1 }
 0x85c   : > { %v11631_v25 = vcombine.low %v24770_v51, %v24769_v1  ;;  %v21845_v18 = vadd.f32 %v24771_v24, %v12405_v5  ;;  %v24774_v41 = vrot.slane %v24772_v29, %v24617_v37  ;;  %v12940_v45 = vmul.f32 %v15670_v63, %v21639_v34  ;;  %v15676_v62 = vpop.eup %15675  ;;  %v9277_v1 = vpop.f32.mrb[77].mxu1 }
 0x85d   : > { %v11638_v53 = vrot.slane %v11630_v16, %v24658_v30  ;;  %15683 = vpow2.f32 %v14514_v55  ;;  %v24775_v17 = vrot.slane %v24772_v29, %v24620_v11  ;;  %v24776_v23 = vrot.slane %v24772_v29, %v24619_v50 }
 0x85e   : > { %v11645_v61 = vrot.slane %v11631_v25, %v24658_v30  ;;  %v21857_v10 = vcombine.low %v24774_v41, %v24773_v13  ;;  %v14516_v36 = vmul.f32 -1.442695, %v21845_v18  ;;  %v12941_v21 = vmul.f32 %v15672_v26, %v21644_v6  ;;  %v9188_v6 = vpop.f32.mrb[77].mxu0  ;;  %v24777_v41 = vld [vmem:[#allocation35_spill] sm:$0xff] }
 0x85f   : > { %v11648_v49 = vcombine.low %v24776_v23, %v24775_v17  ;;  %v13058_v31 = vcombine.low %v12938_v7, %v12939_v52  ;;  %v13059_v8 = vcombine.high %v12938_v7, %v12939_v52  ;;  %v11169_v47 = vrot.slane %v24765_v38, %v24619_v50 }
 0x860   : > { %v12840_v34 = vadd.f32 1.0, %v15674_v27  ;;  %15685 = vpow2.f32 %v14515_v56  ;;  %v11173_v5 = vrot.slane %v24765_v38, %v24620_v11  ;;  %v21872_v55 = vcombine.low %v11638_v53, %v11645_v61 }
 0x861   : > { %v13060_v40 = vcombine.low %v12940_v45, %v12941_v21  ;;  %v12841_v14 = vadd.f32 1.0, %v15676_v62  ;;  %v13061_v16 = vcombine.high %v12940_v45, %v12941_v21  ;;  %15687 = vpow2.f32 %v14516_v36  ;;  %v15678_v52 = vpop.eup %15677 }
 0x862   : > { %v13068_v51 = vrot.slane %v13058_v31, %v24658_v30  ;;  %15689 = vrcp.f32 %v12840_v34  ;;  %v11655_v25 = vrot.slane %v21857_v10, %v24658_v30  ;;  %v11662_v4 = vrot.slane %v11648_v49, %v24658_v30  ;;  %v15680_v13 = vpop.eup %15679 }
 0x863   : > { %v10846_v7 = vcombine.low %v9186_v43, %v9188_v6  ;;  %v10847_v24 = vcombine.high %v9186_v43, %v9188_v6  ;;  %v10848_v56 = vcombine.low %v9275_v28, %v9277_v1  ;;  %v10849_v63 = vcombine.high %v9275_v28, %v9277_v1 }
 0x864   : > { %v13082_v53 = vrot.slane %v13060_v40, %v24658_v30  ;;  %15691 = vrcp.f32 %v12841_v14  ;;  %v13075_v61 = vrot.slane %v13059_v8, %v24658_v30  ;;  %v13089_v29 = vrot.slane %v13061_v16, %v24658_v30  ;;  %v15682_v17 = vpop.eup %15681 }
 0x865   : > { %v10856_v26 = vrot.slane %v10846_v7, %v24777_v41  ;;  %v10863_v45 = vrot.slane %v10847_v24, %v24777_v41  ;;  %v10870_v10 = vrot.slane %v10848_v56, %v24777_v41  ;;  %v10877_v36 = vrot.slane %v10849_v63, %v24777_v41 }
 0x866   : > { %v21885_v23 = vcombine.low %v13068_v51, %v13082_v53  ;;  %v12934_v49 = vmul.f32 %v15678_v52, %v21682_v48  ;;  %v12935_v27 = vmul.f32 %v15680_v13, %v21687_v57  ;;  %v21889_v21 = vcombine.high %v13068_v51, %v13082_v53 }
 0x867   : > { %v10878_v31 = vcombine.low %v10856_v26, %v10870_v10  ;;  %v10879_v8 = vcombine.high %v10856_v26, %v10870_v10  ;;  %v10880_v62 = vcombine.low %v10863_v45, %v10877_v36  ;;  %v10881_v34 = vcombine.high %v10863_v45, %v10877_v36  ;;  %v15684_v43 = vpop.eup %15683 }
 0x868   : > { %13344 = vrot.lane.b32.xlu1 %v21885_v23, %s15868_s26  ;;  %v13022_v28 = vcombine.low %v12934_v49, %v12935_v27  ;;  %v21893_v40 = vcombine.low %v13075_v61, %v13089_v29  ;;  %v13023_v14 = vcombine.high %v12934_v49, %v12935_v27  ;;  %v21895_v16 = vcombine.high %v13075_v61, %v13089_v29 }
 0x869   : > { %v21898_v48 = vrot.slane %v10878_v31, %v24777_v41  ;;  %v21901_v57 = vrot.slane %v10880_v62, %v24777_v41  ;;  %v21904_v6 = vrot.slane %v10879_v8, %v24777_v41  ;;  %v21907_v1 = vrot.slane %v10881_v34, %v24777_v41 }
 0x86a   : > { %24778 = vst [vmem:[#allocation56_spill] sm:$0xff] %v21893_v40  ;;  %v15686_v51 = vpop.eup %15685  ;;  %v13032_v7 = vrot.slane %v13022_v28, %v24658_v30  ;;  %v11663_v24 = vcombine.low %v11655_v25, %v11662_v4  ;;  %v11664_v56 = vcombine.low %v11145_v32, %v11149_v58  ;;  %v11665_v63 = vcombine.low %v11153_v59, %v11157_v35 }
 0x86b   : > { %v15688_v52 = vpop.eup %15687  ;;  %v21924_v53 = vcombine.high %v21898_v48, %v21898_v48  ;;  %v13039_v25 = vrot.slane %v13023_v14, %v24658_v30  ;;  %v12850_v4 = vadd.f32 1.0, %v15682_v17  ;;  %v12851_v61 = vadd.f32 1.0, %v15684_v43 }
 0x86c   : > { %v15690_v29 = vpop.eup %15689  ;;  %v21929_v32 = vcombine.high %v21901_v57, %v21901_v57  ;;  %v21933_v58 = vcombine.high %v21904_v6, %v21904_v6  ;;  %v21937_v15 = vcombine.high %v21907_v1, %v21907_v1  ;;  %13360 = vrot.lane.b32.xlu1 %v21889_v21, %s15868_s26  ;;  %v11305_v17 = vrot.slane %v21901_v57, %v24617_v37 }
 0x86d   : > { %v11309_v49 = vrot.slane %v21901_v57, %v24618_v60  ;;  %v11313_v27 = vrot.slane %v21901_v57, %v24619_v50  ;;  %v11317_v31 = vrot.slane %v21901_v57, %v24620_v11  ;;  %v11321_v8 = vrot.slane %v21907_v1, %v24617_v37 }
 0x86e   : > { %v15692_v10 = vpop.eup %15691  ;;  %v11325_v62 = vrot.slane %v21907_v1, %v24618_v60  ;;  %v11329_v34 = vrot.slane %v21907_v1, %v24619_v50  ;;  %v12936_v43 = vmul.f32 %v15690_v29, %v21735_v42  ;;  %v12852_v14 = vadd.f32 1.0, %v15686_v51 }
 0x86f   : > { %v12937_v28 = vmul.f32 %v15692_v10, %v21741_v46  ;;  %v12853_v45 = vadd.f32 1.0, %v15688_v52  ;;  %15693 = vrcp.f32 %v12850_v4  ;;  %v11672_v36 = vrot.slane %v11664_v56, %v24658_v30  ;;  %v24780_v52 = vld [vmem:[#allocation42_spill] sm:$0xff] }
 0x870   : > { %13376 = vrot.lane.b32.xlu1 %v21893_v40, %s15868_s26  ;;  %v11679_v13 = vrot.slane %v11665_v63, %v24658_v30  ;;  %v11681_v26 = vcombine.low %v11161_v0, %v11165_v3  ;;  %15695 = vrcp.f32 %v12851_v61  ;;  %v11682_v46 = vcombine.low %v11169_v47, %v11173_v5  ;;  %v24779_v63 = vld [vmem:[#allocation103_spill] sm:$0xff]  ;;  %v24782_v47 = vld [vmem:[#allocation104_spill] sm:$0xff] }
 0x871   : > { %v13024_v42 = vcombine.low %v12936_v43, %v12937_v28  ;;  %v13025_v29 = vcombine.high %v12936_v43, %v12937_v28  ;;  %15697 = vrcp.f32 %v12852_v14  ;;  %v24781_v4 = vsub.f32 %v24779_v63, %v24780_v52  ;;  %v24783_v5 = vld [vmem:[#allocation112_spill] sm:$0xff]  ;;  %v24788_v14 = vld [vmem:[#allocation77_spill] sm:$0xff]  ;;  %v24792_v52 = vld [vmem:[#allocation111_spill] sm:$0xff] }
 0x872   : > { %v11680_v51 = vcombine.low %v11672_v36, %v11679_v13  ;;  %v11689_v56 = vrot.slane %v11681_v26, %v24658_v30  ;;  %15699 = vrcp.f32 %v12853_v45  ;;  %v11696_v38 = vrot.slane %v11682_v46, %v24658_v30  ;;  %v24785_v26 = vld [vmem:[#allocation105_spill] sm:$0xff]  ;;  %v24786_v36 = vld [vmem:[#allocation44_spill] sm:$0xff] }
 0x873   : > { %v12078_v10 = vmul.f32 %v21872_v55, %v24781_v4  ;;  %v13046_v0 = vrot.slane %v13024_v42, %v24658_v30  ;;  %v13053_v3 = vrot.slane %v13025_v29, %v24658_v30  ;;  %v24784_v61 = vsub.f32 %v24782_v47, %v24783_v5  ;;  %v24790_v63 = vld [vmem:[#allocation21_spill] sm:$0xff] }
 0x874   : > { %13392 = vrot.lane.b32.xlu1 %v21895_v16, %s15868_s26  ;;  %v24787_v43 = vsub.f32 %v24785_v26, %v24786_v36  ;;  %v24789_v55 = vrot.slane %v24788_v14, %v24701_v12  ;;  %v24791_v29 = vrot.slane %v24790_v63, %v24658_v30  ;;  %v24793_v45 = vrot.slane %v24792_v52, %v24658_v30 }
 0x875   : > { %v12079_v13 = vmul.f32 %v11663_v24, %v24784_v61  ;;  %v22012_v46 = vcombine.low %v13032_v7, %v13046_v0  ;;  %v22014_v47 = vcombine.high %v13032_v7, %v13046_v0  ;;  %v22016_v24 = vcombine.low %v13039_v25, %v13053_v3  ;;  %v24799_v7 = vld [vmem:[#allocation31_spill] sm:$0xff] }
 0x876   : > { %v12080_v28 = vmul.f32 %v11680_v51, %v24787_v43  ;;  %v12398_v42 = vmul.f32 %v24789_v55, %v12078_v10  ;;  %v22010_v4 = vcombine.low %v24793_v45, %v24791_v29  ;;  %v22018_v5 = vcombine.high %v13039_v25, %v13053_v3  ;;  %v24796_v43 = vld [vmem:[#allocation62_spill] sm:$0xff]  ;;  %v24805_v29 = vld [vmem:[#allocation113_spill] sm:$0xff] }
 0x877   : > { %v11697_v51 = vcombine.low %v11689_v56, %v11696_v38  ;;  %v24794_v10 = vrot.slane %v24788_v14, %v24703_v39  ;;  %v24795_v26 = vrot.slane %v24788_v14, %v24709_v20  ;;  %v24797_v55 = vrot.slane %v24796_v43, %v24701_v12  ;;  %13342 = vrot.lane.b32.xlu0 %v22012_v46, %s15868_s26  ;;  %v24801_v56 = vld [vmem:[#allocation28_spill] sm:$0xff]  ;;  %v24803_v38 = vld [vmem:[#allocation39_spill] sm:$0xff] }
 0x878   : > { %13472 = vrot.lane.b32.xlu1 %v21885_v23, %s24798_s30  ;;  %v24800_v25 = vrot.slane %v24799_v7, %v24658_v30  ;;  %v24802_v0 = vrot.slane %v24801_v56, %v24658_v30  ;;  %v11333_v56 = vrot.slane %v21907_v1, %v24620_v11  ;;  %v11361_v35 = vrot.slane %v21937_v15, %v24619_v50 }
 0x879   : > { %v12399_v61 = vmul.f32 %v24794_v10, %v12079_v13  ;;  %v12400_v36 = vmul.f32 %v24795_v26, %v12080_v28  ;;  %v22029_v63 = vadd.f32 %v24797_v55, %v12398_v42  ;;  %v10468_v13 = vrot.slane %v24803_v38, %v24658_v30  ;;  %v24804_v42 = vld [vmem:[#allocation106_spill] sm:$0xff] }
 0x87a   : > { %v22041_v3 = vcombine.low %v24802_v0, %v24800_v25  ;;  %v10475_v28 = vrot.slane %v21764_v9, %v24658_v30  ;;  %v24806_v52 = vsub.f32 %v24804_v42, %v24805_v29  ;;  %v24807_v10 = vrot.slane %v24796_v43, %v24703_v39 }
 0x87b   : > { %v24808_v55 = vrot.slane %v24796_v43, %v24709_v20  ;;  %v14509_v25 = vmul.f32 -1.442695, %v22029_v63  ;;  %v10492_v0 = vrot.slane %v21789_v19, %v24658_v30  ;;  %v24809_v38 = vrot.slane %v24788_v14, %v24711_v44  ;;  %13358 = vrot.lane.b32.xlu0 %v22014_v47, %s15868_s26 }
 0x87c   : > { %v12081_v45 = vmul.f32 %v11697_v51, %v24806_v52  ;;  %v22053_v26 = vadd.f32 %v24807_v10, %v12399_v61  ;;  %v22063_v9 = vcombine.low %v10468_v13, %v10475_v28  ;;  %v10485_v51 = vrot.slane %v21781_v2, %v24658_v30  ;;  %v15694_v61 = vpop.eup %15693  ;;  %13488 = vrot.lane.b32.xlu1 %v21889_v21, %s24798_s30  ;;  %v24810_v13 = vld [vmem:[#allocation167_spill] sm:$0xff] }
 0x87d   : > { %v22058_v7 = vadd.f32 %v24808_v55, %v12400_v36  ;;  %15701 = vpow2.f32 %v14509_v25  ;;  %v15696_v52 = vpop.eup %15695  ;;  %v12946_v2 = vmul.f32 %v15694_v61, %v21797_v22  ;;  %v24811_v10 = vrot.slane %v24796_v43, %v24711_v44  ;;  %v24812_v25 = vld [vmem:[#allocation168_spill] sm:$0xff] }
 0x87e   : > { %v12401_v42 = vmul.f32 %v24809_v38, %v12081_v45  ;;  %v14510_v36 = vmul.f32 -1.442695, %v22053_v26  ;;  %v22079_v19 = vcombine.low %v10485_v51, %v10492_v0  ;;  %v15698_v28 = vpop.eup %15697  ;;  %v12947_v45 = vmul.f32 %v15696_v52, %v21802_v54  ;;  %v24813_v51 = vld [vmem:[#allocation169_spill] sm:$0xff] }
 0x87f   : > { %v14511_v29 = vmul.f32 -1.442695, %v22058_v7  ;;  %v15700_v59 = vpop.eup %15699  ;;  %v12948_v22 = vmul.f32 %v15698_v28, %v21816_v33  ;;  %v11337_v61 = vrot.slane %v21929_v32, %v24617_v37  ;;  %13374 = vrot.lane.b32.xlu0 %v22016_v24, %s15868_s26  ;;  %v11341_v33 = vrot.slane %v21929_v32, %v24618_v60 }
 0x880   : > { %v22087_v55 = vadd.f32 %v24811_v10, %v12401_v42  ;;  %15703 = vpow2.f32 %v14510_v36  ;;  %v12949_v54 = vmul.f32 %v15700_v59, %v21845_v18  ;;  %v13130_v52 = vcombine.low %v12946_v2, %v12947_v45  ;;  %13504 = vrot.lane.b32.xlu1 %v21893_v40, %s24798_s30 }
 0x881   : > { %15705 = vpow2.f32 %v14511_v29  ;;  %v13131_v42 = vcombine.high %v12946_v2, %v12947_v45  ;;  %v11345_v36 = vrot.slane %v21929_v32, %v24619_v50  ;;  %v11349_v29 = vrot.slane %v21929_v32, %v24620_v11 }
 0x882   : > { %v14512_v43 = vmul.f32 -1.442695, %v22087_v55  ;;  %v13132_v18 = vcombine.low %v12948_v22, %v12949_v54  ;;  %v13140_v59 = vrot.slane %v13130_v52, %v24658_v30  ;;  %v13133_v2 = vcombine.high %v12948_v22, %v12949_v54 }
 0x883   : > { %v13147_v28 = vrot.slane %v13131_v42, %v24658_v30  ;;  %v11353_v45 = vrot.slane %v21937_v15, %v24617_v37  ;;  %v11357_v10 = vrot.slane %v21937_v15, %v24618_v60  ;;  %v11365_v52 = vrot.slane %v21937_v15, %v24620_v11  ;;  %13390 = vrot.lane.b32.xlu0 %v22018_v5, %s15868_s26 }
 0x884   : > { %15707 = vpow2.f32 %v14512_v43  ;;  %v13154_v0 = vrot.slane %v13132_v18, %v24658_v30  ;;  %v13161_v32 = vrot.slane %v13133_v2, %v24658_v30  ;;  %v11834_v22 = vcombine.low %v11305_v17, %v11309_v49  ;;  %13520 = vrot.lane.b32.xlu1 %v21895_v16, %s24798_s30 }
 0x885   : > { %v11835_v15 = vcombine.low %v11313_v27, %v11317_v31  ;;  %v11851_v17 = vcombine.low %v11321_v8, %v11325_v62  ;;  %v11852_v49 = vcombine.low %v11329_v34, %v11333_v56  ;;  %v11868_v34 = vcombine.low %v11337_v61, %v11341_v33 }
 0x886   : > { %v22145_v43 = vcombine.low %v13140_v59, %v13154_v0  ;;  %v22147_v42 = vcombine.high %v13140_v59, %v13154_v0  ;;  %v22149_v18 = vcombine.low %v13147_v28, %v13161_v32  ;;  %v22151_v57 = vcombine.high %v13147_v28, %v13161_v32 }
 0x887   : > { %v15702_v54 = vpop.eup %15701  ;;  %v11842_v31 = vrot.slane %v11834_v22, %v24658_v30  ;;  %v11849_v2 = vrot.slane %v11835_v15, %v24658_v30  ;;  %v11859_v8 = vrot.slane %v11851_v17, %v24658_v30  ;;  %v11866_v1 = vrot.slane %v11852_v49, %v24658_v30  ;;  %13470 = vrot.lane.b32.xlu0 %v22012_v46, %s24798_s30 }
 0x888   : > { %24814 = vst [vmem:[#allocation41_spill] sm:$0xff] %v22145_v43  ;;  %24815 = vst [vmem:[#allocation43_spill] sm:$0xff] %v22149_v18  ;;  %v12846_v27 = vadd.f32 1.0, %v15702_v54  ;;  %v11869_v56 = vcombine.low %v11345_v36, %v11349_v29  ;;  %v11885_v38 = vcombine.low %v11353_v45, %v11357_v10  ;;  %13348 = vrot.lane.b32.xlu1 %v22145_v43, %s15868_s26  ;;  %v24818_v10 = vld [vmem:[#allocation170_spill] sm:$0xff] }
 0x889   : > { %24816 = vst [vmem:[#allocation45_spill] sm:$0xff] %v22151_v57  ;;  %v11850_v59 = vcombine.low %v11842_v31, %v11849_v2  ;;  %v11886_v28 = vcombine.low %v11361_v35, %v11365_v52  ;;  %v11867_v22 = vcombine.low %v11859_v8, %v11866_v1  ;;  %v11876_v15 = vrot.slane %v11868_v34, %v24658_v30  ;;  %v24822_v31 = vld [vmem:[#allocation18_spill] sm:$0xff] }
 0x88a   : > { %v15704_v62 = vpop.eup %15703  ;;  %15709 = vrcp.f32 %v12846_v27  ;;  %v11883_v17 = vrot.slane %v11869_v56, %v24658_v30  ;;  %v11893_v61 = vrot.slane %v11885_v38, %v24658_v30  ;;  %v24817_v36 = vsub.f32 %v24810_v13, %v22010_v4  ;;  %v24820_v4 = vld [vmem:[#allocation53_spill] sm:$0xff] }
 0x88b   : > { %v15706_v14 = vpop.eup %15705  ;;  %v12847_v0 = vadd.f32 1.0, %v15704_v62  ;;  %v11900_v33 = vrot.slane %v11886_v28, %v24658_v30  ;;  %v10685_v35 = vsub.f32 %v24818_v10, %v22079_v19  ;;  %v24819_v52 = vsub.f32 %v24812_v25, %v22041_v3  ;;  %13486 = vrot.lane.b32.xlu0 %v22014_v47, %s24798_s30  ;;  %v24825_v56 = vld [vmem:[#allocation101_spill] sm:$0xff] }
 0x88c   : > { %v12848_v32 = vadd.f32 1.0, %v15706_v14  ;;  %v12090_v29 = vmul.f32 %v11850_v59, %v24817_v36  ;;  %v11884_v14 = vcombine.low %v11876_v15, %v11883_v17  ;;  %13364 = vrot.lane.b32.xlu1 %v22147_v42, %s15868_s26  ;;  %v24821_v13 = vrot.slane %v24820_v4, %v24701_v12  ;;  %v24829_v15 = vld [vmem:[#allocation15_spill] sm:$0xff]  ;;  %v24831_v10 = vld [vmem:[#allocation17_spill] sm:$0xff] }
 0x88d   : > { %15711 = vrcp.f32 %v12847_v0  ;;  %v12091_v49 = vmul.f32 %v11867_v22, %v24819_v52  ;;  %v11901_v54 = vcombine.low %v11893_v61, %v11900_v33  ;;  %v9865_v19 = vrot.slane %v24822_v31, %v24617_v37 }
 0x88e   : > { %v15708_v45 = vpop.eup %15707  ;;  %15713 = vrcp.f32 %v12848_v32  ;;  %v12410_v27 = vmul.f32 %v24821_v13, %v12090_v29  ;;  %v24823_v2 = vsub.f32 %v24813_v51, %v22063_v9  ;;  %v24824_v25 = vrot.slane %v24820_v4, %v24703_v39 }
 0x88f   : > { %v12849_v38 = vadd.f32 1.0, %v15708_v45  ;;  %v9869_v62 = vrot.slane %v24822_v31, %v24618_v60  ;;  %v9873_v1 = vrot.slane %v24822_v31, %v24619_v50  ;;  %v12093_v34 = vmul.f32 %v11901_v54, %v10685_v35  ;;  %13502 = vrot.lane.b32.xlu0 %v22016_v24, %s24798_s30  ;;  %v24833_v54 = vld [vmem:[#allocation24_spill] sm:$0xff] }
 0x890   : > { %v12092_v3 = vmul.f32 %v11884_v14, %v24823_v2  ;;  %v12411_v8 = vmul.f32 %v24824_v25, %v12091_v49  ;;  %v24826_v0 = vrot.slane %v24825_v56, %v24701_v12  ;;  %v9877_v9 = vrot.slane %v24822_v31, %v24620_v11  ;;  %13380 = vrot.lane.b32.xlu1 %v22149_v18, %s15868_s26  ;;  %v24835_v2 = vld [vmem:[#allocation19_spill] sm:$0xff] }
 0x891   : > { %15715 = vrcp.f32 %v12849_v38  ;;  %v24827_v51 = vrot.slane %v24820_v4, %v24709_v20  ;;  %v24828_v32 = vrot.slane %v24825_v56, %v24703_v39  ;;  %v9881_v17 = vrot.slane %v24829_v15, %v24617_v37 }
 0x892   : > { %v22195_v59 = vadd.f32 %v24826_v0, %v12410_v27  ;;  %v9885_v61 = vrot.slane %v24829_v15, %v24618_v60  ;;  %v24830_v33 = vrot.slane %v24820_v4, %v24711_v44  ;;  %v9889_v45 = vrot.slane %v24829_v15, %v24619_v50  ;;  %v24836_v0 = vld [vmem:[#allocation26_spill] sm:$0xff] }
 0x893   : > { %v12412_v28 = vmul.f32 %v24827_v51, %v12092_v3  ;;  %v22205_v22 = vadd.f32 %v24828_v32, %v12411_v8  ;;  %v10366_v35 = vrot.slane %v24831_v10, %v24658_v30  ;;  %v24832_v14 = vrot.slane %v24825_v56, %v24709_v20  ;;  %13518 = vrot.lane.b32.xlu0 %v22018_v5, %s24798_s30 }
 0x894   : > { %v12413_v36 = vmul.f32 %v24830_v33, %v12093_v34  ;;  %v14521_v29 = vmul.f32 -1.442695, %v22195_v59  ;;  %v9893_v38 = vrot.slane %v24829_v15, %v24620_v11  ;;  %v10373_v4 = vrot.slane %v24833_v54, %v24658_v30  ;;  %v15710_v13 = vpop.eup %15709  ;;  %13396 = vrot.lane.b32.xlu1 %v22151_v57, %s15868_s26 }
 0x895   : > { %v22226_v52 = vadd.f32 %v24832_v14, %v12412_v28  ;;  %v14522_v49 = vmul.f32 -1.442695, %v22205_v22  ;;  %v24834_v27 = vrot.slane %v24825_v56, %v24711_v44  ;;  %v10383_v3 = vrot.slane %v24835_v2, %v24658_v30 }
 0x896   : > { %15717 = vpow2.f32 %v14521_v29  ;;  %v10392_v25 = vcombine.low %v9865_v19, %v9869_v62  ;;  %v12942_v8 = vmul.f32 %v15710_v13, %v22029_v63  ;;  %v10390_v51 = vrot.slane %v24836_v0, %v24658_v30 }
 0x897   : > { %v22236_v31 = vadd.f32 %v24834_v27, %v12413_v36  ;;  %15719 = vpow2.f32 %v14522_v49  ;;  %v14523_v34 = vmul.f32 -1.442695, %v22226_v52  ;;  %v15712_v28 = vpop.eup %15711  ;;  %v22249_v32 = vcombine.low %v10366_v35, %v10373_v4 }
 0x898   : > { %v10393_v19 = vcombine.low %v9873_v1, %v9877_v9  ;;  %v10400_v63 = vrot.slane %v10392_v25, %v24658_v30  ;;  %v15714_v62 = vpop.eup %15713  ;;  %v12943_v15 = vmul.f32 %v15712_v28, %v22053_v26  ;;  %v10409_v33 = vcombine.low %v9881_v17, %v9885_v61  ;;  %13476 = vrot.lane.b32.xlu1 %v22145_v43, %s24798_s30 }
 0x899   : > { %v14524_v56 = vmul.f32 -1.442695, %v22236_v31  ;;  %15721 = vpow2.f32 %v14523_v34  ;;  %v10410_v36 = vcombine.low %v9889_v45, %v9893_v38  ;;  %v11265_v29 = vrot.slane %v21904_v6, %v24619_v50 }
 0x89a   : > { %v12944_v10 = vmul.f32 %v15714_v62, %v22058_v7  ;;  %v10407_v14 = vrot.slane %v10393_v19, %v24658_v30  ;;  %v13094_v49 = vcombine.low %v12942_v8, %v12943_v15  ;;  %v13095_v35 = vcombine.high %v12942_v8, %v12943_v15  ;;  %v24837_v7 = vld [vmem:[#allocation140_spill] sm:$0xff] }
 0x89b   : > { %15723 = vpow2.f32 %v14524_v56  ;;  %v10417_v1 = vrot.slane %v10409_v33, %v24658_v30  ;;  %v10424_v9 = vrot.slane %v10410_v36, %v24658_v30  ;;  %v15716_v54 = vpop.eup %15715  ;;  %v11269_v26 = vrot.slane %v21904_v6, %v24620_v11 }
 0x89c   : > { %v22263_v17 = vcombine.low %v10383_v3, %v10390_v51  ;;  %v22265_v61 = vcombine.low %v10400_v63, %v10407_v14  ;;  %v10678_v45 = vsub.f32 %v24837_v7, %v22249_v32  ;;  %v12945_v38 = vmul.f32 %v15716_v54, %v22087_v55  ;;  %13492 = vrot.lane.b32.xlu1 %v22147_v42, %s24798_s30 }
 0x89d   : > { %v13104_v4 = vrot.slane %v13094_v49, %v24658_v30  ;;  %v11273_v13 = vrot.slane %v21924_v53, %v24617_v37  ;;  %v11277_v27 = vrot.slane %v21924_v53, %v24618_v60  ;;  %v13111_v2 = vrot.slane %v13095_v35, %v24658_v30 }
 0x89e   : > { %v22276_v25 = vcombine.low %v10417_v1, %v10424_v9  ;;  %v11281_v3 = vrot.slane %v21924_v53, %v24619_v50  ;;  %v11285_v8 = vrot.slane %v21924_v53, %v24620_v11  ;;  %v13096_v34 = vcombine.low %v12944_v10, %v12945_v38 }
 0x89f   : > { %v13097_v55 = vcombine.high %v12944_v10, %v12945_v38  ;;  %v11289_v0 = vrot.slane %v21933_v58, %v24617_v37  ;;  %v11293_v51 = vrot.slane %v21933_v58, %v24618_v60  ;;  %v11297_v56 = vrot.slane %v21933_v58, %v24619_v50 }
 0x8a0   : > { %v15718_v28 = vpop.eup %15717  ;;  %v11301_v32 = vrot.slane %v21933_v58, %v24620_v11  ;;  %v24838_v53 = vrot.slane %v21898_v48, %v24618_v60  ;;  %v24839_v19 = vrot.slane %v21898_v48, %v24617_v37  ;;  %v24840_v62 = vrot.slane %v21898_v48, %v24620_v11  ;;  %13508 = vrot.lane.b32.xlu1 %v22149_v18, %s24798_s30 }
 0x8a1   : > { %v24841_v15 = vrot.slane %v21898_v48, %v24619_v50  ;;  %v15720_v36 = vpop.eup %15719  ;;  %v13118_v10 = vrot.slane %v13096_v34, %v24658_v30  ;;  %v13125_v14 = vrot.slane %v13097_v55, %v24658_v30  ;;  %v12858_v58 = vadd.f32 1.0, %v15718_v28 }
 0x8a2   : > { %v11766_v63 = vcombine.low %v24839_v19, %v24838_v53  ;;  %v24842_v49 = vrot.slane %v21904_v6, %v24618_v60  ;;  %v24843_v35 = vrot.slane %v21904_v6, %v24617_v37  ;;  %v12859_v9 = vadd.f32 1.0, %v15720_v36  ;;  %v24847_v36 = vld [vmem:[#allocation141_spill] sm:$0xff] }
 0x8a3   : > { %v11767_v33 = vcombine.low %v24841_v15, %v24840_v62  ;;  %v11784_v48 = vcombine.low %v11265_v29, %v11269_v26  ;;  %v15722_v38 = vpop.eup %15721  ;;  %v22314_v53 = vcombine.low %v13104_v4, %v13118_v10  ;;  %v22316_v34 = vcombine.high %v13104_v4, %v13118_v10 }
 0x8a4   : > { %v11783_v1 = vcombine.low %v24843_v35, %v24842_v49  ;;  %v11774_v54 = vrot.slane %v11766_v63, %v24658_v30  ;;  %v22318_v55 = vcombine.low %v13111_v2, %v13125_v14  ;;  %v22320_v28 = vcombine.high %v13111_v2, %v13125_v14  ;;  %v9192_v35 = vpop.f32.mrb[78].mxu0  ;;  %13524 = vrot.lane.b32.xlu1 %v22151_v57, %s24798_s30 }
 0x8a5   : > { %v11781_v7 = vrot.slane %v11767_v33, %v24658_v30  ;;  %24844 = vst [vmem:[#allocation57_spill] sm:$0xff] %v22314_v53  ;;  %v15724_v19 = vpop.eup %15723  ;;  %v12860_v6 = vadd.f32 1.0, %v15722_v38  ;;  %15725 = vrcp.f32 %v12858_v58  ;;  %13346 = vrot.lane.b32.xlu0 %v22314_v53, %s15868_s26  ;;  %v11798_v26 = vrot.slane %v11784_v48, %v24658_v30 }
 0x8a6   : > { %24845 = vst [vmem:[#allocation116_spill] sm:$0xff] %v22318_v55  ;;  %24846 = vst [vmem:[#allocation118_spill] sm:$0xff] %v22320_v28  ;;  %v11791_v63 = vrot.slane %v11783_v1, %v24658_v30  ;;  %v12861_v29 = vadd.f32 1.0, %v15724_v19  ;;  %15727 = vrcp.f32 %v12859_v9  ;;  %v11800_v4 = vcombine.low %v11273_v13, %v11277_v27  ;;  %v9281_v1 = vpop.f32.mrb[78].mxu1  ;;  %v24848_v9 = vld [vmem:[#allocation142_spill] sm:$0xff] }
 0x8a7   : > { %v11782_v62 = vcombine.low %v11774_v54, %v11781_v7  ;;  %15729 = vrcp.f32 %v12860_v6  ;;  %v11801_v2 = vcombine.low %v11281_v3, %v11285_v8  ;;  %v11817_v15 = vcombine.low %v11289_v0, %v11293_v51  ;;  %v9194_v8 = vpop.f32.mrb[79].mxu0 }
 0x8a8   : > { %v11818_v33 = vcombine.low %v11297_v56, %v11301_v32  ;;  %v10679_v10 = vsub.f32 %v24847_v36, %v22263_v17  ;;  %v11799_v14 = vcombine.low %v11791_v63, %v11798_v26  ;;  %v11808_v58 = vrot.slane %v11800_v4, %v24658_v30  ;;  %v9283_v17 = vpop.f32.mrb[79].mxu1  ;;  %v24850_v56 = vld [vmem:[#allocation68_spill] sm:$0xff]  ;;  %v24853_v4 = vld [vmem:[#allocation109_spill] sm:$0xff] }
 0x8a9   : > { %v12086_v49 = vmul.f32 %v11782_v62, %v10678_v45  ;;  %v10680_v54 = vsub.f32 %v24848_v9, %v22265_v61  ;;  %v11815_v13 = vrot.slane %v11801_v2, %v24658_v30  ;;  %v11825_v27 = vrot.slane %v11817_v15, %v24658_v30  ;;  %13362 = vrot.lane.b32.xlu0 %v22316_v34, %s15868_s26  ;;  %v24849_v45 = vld [vmem:[#allocation143_spill] sm:$0xff] }
 0x8aa   : > { %v11832_v3 = vrot.slane %v11818_v33, %v24658_v30  ;;  %15731 = vrcp.f32 %v12861_v29  ;;  %v10681_v0 = vsub.f32 %v24849_v45, %v22276_v25  ;;  %v12087_v51 = vmul.f32 %v11799_v14, %v10679_v10 }
 0x8ab   : > { %v24851_v32 = vrot.slane %v24850_v56, %v24701_v12  ;;  %v10914_v7 = vcombine.low %v9192_v35, %v9194_v8  ;;  %v10915_v48 = vcombine.high %v9192_v35, %v9194_v8  ;;  %v10916_v38 = vcombine.low %v9281_v1, %v9283_v17 }
 0x8ac   : > { %v10917_v19 = vcombine.high %v9281_v1, %v9283_v17  ;;  %v11816_v6 = vcombine.low %v11808_v58, %v11815_v13  ;;  %v11833_v62 = vcombine.low %v11825_v27, %v11832_v3  ;;  %v24852_v63 = vrot.slane %v24850_v56, %v24703_v39 }
 0x8ad   : > { %v12406_v61 = vmul.f32 %v24851_v32, %v12086_v49  ;;  %v24854_v29 = vrot.slane %v24853_v4, %v24701_v12  ;;  %v10924_v25 = vrot.slane %v10914_v7, %v24777_v41  ;;  %v10931_v15 = vrot.slane %v10915_v48, %v24777_v41  ;;  %13378 = vrot.lane.b32.xlu0 %v22318_v55, %s15868_s26 }
 0x8ae   : > { %v12407_v26 = vmul.f32 %v24852_v63, %v12087_v51  ;;  %v10938_v33 = vrot.slane %v10916_v38, %v24777_v41  ;;  %v10945_v36 = vrot.slane %v10917_v19, %v24777_v41  ;;  %v12088_v10 = vmul.f32 %v11816_v6, %v10680_v54  ;;  %v24858_v51 = vld [vmem:[#allocation36_spill] sm:$0xff]  ;;  %v24862_v63 = vld [vmem:[#allocation38_spill] sm:$0xff] }
 0x8af   : > { %v22351_v2 = vadd.f32 %v24854_v29, %v12406_v61  ;;  %v12089_v14 = vmul.f32 %v11833_v62, %v10681_v0  ;;  %v24855_v58 = vrot.slane %v24853_v4, %v24703_v39  ;;  %v15726_v1 = vpop.eup %15725  ;;  %v24856_v17 = vrot.slane %v24850_v56, %v24709_v20  ;;  %v24860_v61 = vld [vmem:[#allocation27_spill] sm:$0xff] }
 0x8b0   : > { %v10946_v9 = vcombine.low %v10924_v25, %v10938_v33  ;;  %v10947_v13 = vcombine.high %v10924_v25, %v10938_v33  ;;  %v10948_v27 = vcombine.low %v10931_v15, %v10945_v36  ;;  %v10949_v3 = vcombine.high %v10931_v15, %v10945_v36  ;;  %v15728_v8 = vpop.eup %15727 }
 0x8b1   : > { %v22362_v49 = vadd.f32 %v24855_v58, %v12407_v26  ;;  %v14517_v35 = vmul.f32 -1.442695, %v22351_v2  ;;  %v12408_v45 = vmul.f32 %v24856_v17, %v12088_v10  ;;  %v24857_v54 = vrot.slane %v24850_v56, %v24711_v44  ;;  %v15730_v38 = vpop.eup %15729  ;;  %v24864_v26 = vld [vmem:[#allocation29_spill] sm:$0xff]  ;;  %13394 = vrot.lane.b32.xlu0 %v22320_v28, %s15868_s26 }
 0x8b2   : > { %v24859_v32 = vrot.slane %v24858_v51, %v24658_v30  ;;  %v24861_v7 = vrot.slane %v24860_v61, %v24658_v30  ;;  %v10956_v19 = vrot.slane %v10946_v9, %v24777_v41  ;;  %v10963_v6 = vrot.slane %v10948_v27, %v24777_v41  ;;  %v24868_v58 = vld [vmem:[#allocation117_spill] sm:$0xff] }
 0x8b3   : > { %v12409_v0 = vmul.f32 %v24857_v54, %v12089_v14  ;;  %15733 = vpow2.f32 %v14517_v35  ;;  %v22382_v62 = vrot.slane %v10947_v13, %v24777_v41  ;;  %v24863_v56 = vrot.slane %v24862_v63, %v24658_v30 }
 0x8b4   : > { %v22377_v48 = vcombine.low %v24861_v7, %v24859_v32  ;;  %v24865_v29 = vrot.slane %v24864_v26, %v24658_v30  ;;  %v12954_v15 = vmul.f32 %v15726_v1, %v22195_v59  ;;  %v24866_v33 = vrot.slane %v24853_v4, %v24709_v20 }
 0x8b5   : > { %v24867_v10 = vrot.slane %v24853_v4, %v24711_v44  ;;  %v24869_v35 = vrot.slane %v24868_v58, %v24618_v60  ;;  %v24870_v9 = vrot.slane %v24868_v58, %v24617_v37  ;;  %v10977_v27 = vrot.slane %v10949_v3, %v24777_v41  ;;  %13474 = vrot.lane.b32.xlu0 %v22314_v53, %s24798_s30 }
 0x8b6   : > { %v22390_v25 = vcombine.low %v24865_v29, %v24863_v56  ;;  %v22398_v36 = vadd.f32 %v24866_v33, %v12408_v45  ;;  %v22412_v59 = vcombine.high %v10956_v19, %v10956_v19  ;;  %v12955_v1 = vmul.f32 %v15728_v8, %v22205_v22  ;;  %v15732_v45 = vpop.eup %15731 }
 0x8b7   : > { %v22403_v14 = vadd.f32 %v24867_v10, %v12409_v0  ;;  %v10596_v13 = vcombine.low %v24870_v9, %v24869_v35  ;;  %v12956_v17 = vmul.f32 %v15730_v38, %v22226_v52  ;;  %v22416_v54 = vcombine.high %v10963_v6, %v10963_v6 }
 0x8b8   : > { %v22420_v4 = vcombine.high %v22382_v62, %v22382_v62  ;;  %v11369_v0 = vrot.slane %v10956_v19, %v24617_v37  ;;  %v11373_v51 = vrot.slane %v10956_v19, %v24618_v60  ;;  %v11377_v32 = vrot.slane %v10956_v19, %v24619_v50 }
 0x8b9   : > { %v11381_v41 = vrot.slane %v10956_v19, %v24620_v11  ;;  %v11385_v22 = vrot.slane %v22382_v62, %v24617_v37  ;;  %v11389_v52 = vrot.slane %v22382_v62, %v24618_v60  ;;  %v11433_v3 = vrot.slane %v10963_v6, %v24617_v37  ;;  %13490 = vrot.lane.b32.xlu0 %v22316_v34, %s24798_s30 }
 0x8ba   : > { %v11437_v8 = vrot.slane %v10963_v6, %v24618_v60  ;;  %v11441_v61 = vrot.slane %v10963_v6, %v24619_v50  ;;  %v11445_v7 = vrot.slane %v10963_v6, %v24620_v11  ;;  %v22436_v38 = vcombine.high %v10977_v27, %v10977_v27 }
 0x8bb   : > { %v11449_v56 = vrot.slane %v10977_v27, %v24617_v37  ;;  %v11453_v26 = vrot.slane %v10977_v27, %v24618_v60  ;;  %v11457_v29 = vrot.slane %v10977_v27, %v24619_v50  ;;  %v11461_v33 = vrot.slane %v10977_v27, %v24620_v11 }
 0x8bc   : > { %v22446_v6 = vcombine.low %v11369_v0, %v11373_v51  ;;  %v22448_v10 = vcombine.low %v11377_v32, %v11381_v41  ;;  %v22450_v35 = vcombine.low %v11385_v22, %v11389_v52  ;;  %v11970_v9 = vcombine.low %v11433_v3, %v11437_v8 }
 0x8bd   : > { %v11971_v18 = vcombine.low %v11441_v61, %v11445_v7  ;;  %v15734_v19 = vpop.eup %15733  ;;  %v12957_v63 = vmul.f32 %v15732_v45, %v22236_v31  ;;  %v13202_v43 = vcombine.low %v12954_v15, %v12955_v1  ;;  %v14518_v53 = vmul.f32 -1.442695, %v22362_v49  ;;  %13506 = vrot.lane.b32.xlu0 %v22318_v55, %s24798_s30 }
 0x8be   : > { %v14519_v57 = vmul.f32 -1.442695, %v22398_v36  ;;  %v14520_v27 = vmul.f32 -1.442695, %v22403_v14  ;;  %v12854_v0 = vadd.f32 1.0, %v15734_v19  ;;  %v13203_v51 = vcombine.high %v12954_v15, %v12955_v1  ;;  %v24873_v1 = vld [vmem:[#allocation114_spill] sm:$0xff] }
 0x8bf   : > { %v24871_v32 = vrot.slane %v24868_v58, %v24620_v11  ;;  %v24872_v41 = vrot.slane %v24868_v58, %v24619_v50  ;;  %v13204_v52 = vcombine.low %v12956_v17, %v12957_v63  ;;  %v13212_v3 = vrot.slane %v13202_v43, %v24658_v30 }
 0x8c0   : > { %15735 = vpow2.f32 %v14518_v53  ;;  %v13205_v31 = vcombine.high %v12956_v17, %v12957_v63  ;;  %v13219_v45 = vrot.slane %v13203_v51, %v24658_v30  ;;  %v10604_v8 = vrot.slane %v10596_v13, %v24658_v30 }
 0x8c1   : > { %v10597_v22 = vcombine.low %v24872_v41, %v24871_v32  ;;  %15737 = vpow2.f32 %v14519_v57  ;;  %v13226_v15 = vrot.slane %v13204_v52, %v24658_v30  ;;  %v24874_v43 = vrot.slane %v24873_v1, %v24618_v60  ;;  %13522 = vrot.lane.b32.xlu0 %v22320_v28, %s24798_s30 }
 0x8c2   : > { %15739 = vpow2.f32 %v14520_v27  ;;  %v13233_v58 = vrot.slane %v13205_v31, %v24658_v30  ;;  %v24875_v57 = vrot.slane %v24873_v1, %v24617_v37  ;;  %v11987_v17 = vcombine.low %v11449_v56, %v11453_v26  ;;  %v24878_v26 = vld [vmem:[#allocation203_spill] sm:$0xff] }
 0x8c3   : > { %v10611_v61 = vrot.slane %v10597_v22, %v24658_v30  ;;  %v11988_v7 = vcombine.low %v11457_v29, %v11461_v33  ;;  %v24876_v19 = vrot.slane %v24873_v1, %v24620_v11  ;;  %v24877_v63 = vrot.slane %v24873_v1, %v24619_v50  ;;  %v24879_v33 = vld [vmem:[#allocation204_spill] sm:$0xff] }
 0x8c4   : > { %v10613_v53 = vcombine.low %v24875_v57, %v24874_v43  ;;  %v22484_v27 = vcombine.low %v13212_v3, %v13226_v15  ;;  %v22486_v32 = vcombine.high %v13212_v3, %v13226_v15  ;;  %v22488_v41 = vcombine.low %v13219_v45, %v13233_v58  ;;  %v24880_v57 = vld [vmem:[#allocation205_spill] sm:$0xff] }
 0x8c5   : > { %v10612_v13 = vcombine.low %v10604_v8, %v10611_v61  ;;  %v10614_v51 = vcombine.low %v24877_v63, %v24876_v19  ;;  %v22490_v22 = vcombine.high %v13219_v45, %v13233_v58  ;;  %v10690_v29 = vsub.f32 %v24878_v26, %v22377_v48 }
 0x8c6   : > { %v10621_v52 = vrot.slane %v10613_v53, %v24658_v30  ;;  %v10691_v31 = vsub.f32 %v24879_v33, %v22390_v25  ;;  %13352 = vrot.lane.b32.xlu1 %v22484_v27, %s15868_s26  ;;  %15741 = vrcp.f32 %v12854_v0  ;;  %v11465_v3 = vrot.slane %v22416_v54, %v24617_v37 }
 0x8c7   : > { %v10628_v56 = vrot.slane %v10614_v51, %v24658_v30  ;;  %v11469_v45 = vrot.slane %v22416_v54, %v24618_v60  ;;  %v11473_v8 = vrot.slane %v22416_v54, %v24619_v50  ;;  %v11477_v25 = vrot.slane %v22416_v54, %v24620_v11 }
 0x8c8   : > { %v11481_v61 = vrot.slane %v22436_v38, %v24617_v37  ;;  %v11485_v15 = vrot.slane %v22436_v38, %v24618_v60  ;;  %v11489_v0 = vrot.slane %v22436_v38, %v24619_v50  ;;  %v11493_v58 = vrot.slane %v22436_v38, %v24620_v11 }
 0x8c9   : > { %v10629_v48 = vcombine.low %v10621_v52, %v10628_v56  ;;  %v11978_v1 = vrot.slane %v11970_v9, %v24658_v30  ;;  %v11985_v43 = vrot.slane %v11971_v18, %v24658_v30  ;;  %v10692_v53 = vsub.f32 %v24880_v57, %v10612_v13  ;;  %v24881_v9 = vld [vmem:[#allocation206_spill] sm:$0xff] }
 0x8ca   : > { %v11995_v54 = vrot.slane %v11987_v17, %v24658_v30  ;;  %v12002_v19 = vrot.slane %v11988_v7, %v24658_v30  ;;  %v12004_v63 = vcombine.low %v11465_v3, %v11469_v45  ;;  %v15736_v51 = vpop.eup %15735  ;;  %13368 = vrot.lane.b32.xlu1 %v22486_v32, %s15868_s26  ;;  %v12005_v56 = vcombine.low %v11473_v8, %v11477_v25 }
 0x8cb   : > { %v11986_v52 = vcombine.low %v11978_v1, %v11985_v43  ;;  %v12021_v26 = vcombine.low %v11481_v61, %v11485_v15  ;;  %v12022_v33 = vcombine.low %v11489_v0, %v11493_v58  ;;  %v15738_v38 = vpop.eup %15737  ;;  %v12855_v55 = vadd.f32 1.0, %v15736_v51  ;;  %v24882_v15 = vld [vmem:[#allocation108_spill] sm:$0xff]  ;;  %v24884_v58 = vld [vmem:[#allocation25_spill] sm:$0xff] }
 0x8cc   : > { %v10693_v28 = vsub.f32 %v24881_v9, %v10629_v48  ;;  %v12003_v18 = vcombine.low %v11995_v54, %v12002_v19  ;;  %v12012_v13 = vrot.slane %v12004_v63, %v24658_v30  ;;  %v15740_v57 = vpop.eup %15739  ;;  %v12856_v17 = vadd.f32 1.0, %v15738_v38  ;;  %v24886_v54 = vld [vmem:[#allocation70_spill] sm:$0xff]  ;;  %v24889_v63 = vld [vmem:[#allocation135_spill] sm:$0xff] }
 0x8cd   : > { %v12019_v7 = vrot.slane %v12005_v56, %v24658_v30  ;;  %v12029_v3 = vrot.slane %v12021_v26, %v24658_v30  ;;  %v12036_v45 = vrot.slane %v12022_v33, %v24658_v30  ;;  %v12857_v40 = vadd.f32 1.0, %v15740_v57 }
 0x8ce   : > { %15743 = vrcp.f32 %v12855_v55  ;;  %v12098_v8 = vmul.f32 %v11986_v52, %v10690_v29  ;;  %v12099_v25 = vmul.f32 %v12003_v18, %v10691_v31  ;;  %13384 = vrot.lane.b32.xlu1 %v22488_v41, %s15868_s26  ;;  %v24883_v0 = vrot.slane %v24882_v15, %v24658_v30  ;;  %v24891_v52 = vld [vmem:[#allocation33_spill] sm:$0xff] }
 0x8cf   : > { %15745 = vrcp.f32 %v12856_v17  ;;  %v12020_v48 = vcombine.low %v12012_v13, %v12019_v7  ;;  %v12037_v61 = vcombine.low %v12029_v3, %v12036_v45  ;;  %v24885_v1 = vrot.slane %v24884_v58, %v24658_v30  ;;  %v24898_v45 = vld [vmem:[#allocation14_spill] sm:$0xff] }
 0x8d0   : > { %15747 = vrcp.f32 %v12857_v40  ;;  %v24887_v55 = vrot.slane %v24886_v54, %v24701_v12  ;;  %v24888_v31 = vrot.slane %v24886_v54, %v24703_v39  ;;  %v24890_v51 = vrot.slane %v24889_v63, %v24658_v30  ;;  %v15742_v33 = vpop.eup %15741  ;;  %v24893_v40 = vld [vmem:[#allocation130_spill] sm:$0xff] }
 0x8d1   : > { %v22538_v43 = vcombine.low %v24885_v1, %v24883_v0  ;;  %v24892_v56 = vrot.slane %v24891_v52, %v24658_v30  ;;  %v12100_v38 = vmul.f32 %v12020_v48, %v10692_v53  ;;  %v12101_v9 = vmul.f32 %v12037_v61, %v10693_v28  ;;  %v24901_v48 = vld [vmem:[#allocation23_spill] sm:$0xff] }
 0x8d2   : > { %v12418_v29 = vmul.f32 %v24887_v55, %v12098_v8  ;;  %v12419_v19 = vmul.f32 %v24888_v31, %v12099_v25  ;;  %v24894_v18 = vrot.slane %v24893_v40, %v24618_v60  ;;  %v24895_v13 = vrot.slane %v24893_v40, %v24617_v37  ;;  %13400 = vrot.lane.b32.xlu1 %v22490_v22, %s15868_s26 }
 0x8d3   : > { %v22552_v26 = vcombine.low %v24892_v56, %v24890_v51  ;;  %v24896_v17 = vrot.slane %v24893_v40, %v24620_v11  ;;  %v24897_v7 = vrot.slane %v24893_v40, %v24619_v50  ;;  %v24899_v8 = vrot.slane %v24898_v45, %v24701_v12 }
 0x8d4   : > { %v10528_v57 = vcombine.low %v24895_v13, %v24894_v18  ;;  %v24900_v28 = vrot.slane %v24898_v45, %v24703_v39  ;;  %v24902_v61 = vrot.slane %v24901_v48, %v24618_v60  ;;  %v24903_v15 = vrot.slane %v24901_v48, %v24617_v37 }
 0x8d5   : > { %v10529_v3 = vcombine.low %v24897_v7, %v24896_v17  ;;  %v22569_v25 = vadd.f32 %v24899_v8, %v12418_v29  ;;  %v24904_v58 = vrot.slane %v24901_v48, %v24620_v11  ;;  %v24905_v1 = vrot.slane %v24901_v48, %v24619_v50 }
 0x8d6   : > { %v22574_v53 = vadd.f32 %v24900_v28, %v12419_v19  ;;  %v10545_v0 = vcombine.low %v24903_v15, %v24902_v61  ;;  %v24906_v29 = vrot.slane %v24886_v54, %v24709_v20  ;;  %v24907_v19 = vrot.slane %v24886_v54, %v24711_v44  ;;  %v24913_v15 = vld [vmem:[#allocation177_spill] sm:$0xff] }
 0x8d7   : > { %v10546_v55 = vcombine.low %v24905_v1, %v24904_v58  ;;  %v10536_v51 = vrot.slane %v10528_v57, %v24658_v30  ;;  %v10543_v52 = vrot.slane %v10529_v3, %v24658_v30  ;;  %v14529_v56 = vmul.f32 -1.442695, %v22569_v25 }
 0x8d8   : > { %v12420_v31 = vmul.f32 %v24906_v29, %v12100_v38  ;;  %v12421_v63 = vmul.f32 %v24907_v19, %v12101_v9  ;;  %v14530_v40 = vmul.f32 -1.442695, %v22574_v53  ;;  %v10553_v18 = vrot.slane %v10545_v0, %v24658_v30  ;;  %v15744_v58 = vpop.eup %15743 }
 0x8d9   : > { %v10560_v13 = vrot.slane %v10546_v55, %v24658_v30  ;;  %v24908_v17 = vrot.slane %v22382_v62, %v24620_v11  ;;  %v24909_v38 = vrot.slane %v22382_v62, %v24619_v50  ;;  %v12950_v9 = vmul.f32 %v15742_v33, %v22351_v2  ;;  %v24912_v62 = vld [vmem:[#allocation176_spill] sm:$0xff]  ;;  %v15746_v29 = vpop.eup %15745 }
 0x8da   : > { %v24910_v57 = vrot.slane %v24898_v45, %v24709_v20  ;;  %v24911_v3 = vrot.slane %v24898_v45, %v24711_v44  ;;  %15749 = vpow2.f32 %v14529_v56  ;;  %v22619_v28 = vcombine.low %v10536_v51, %v10543_v52 }
 0x8db   : > { %v11920_v54 = vcombine.low %v24909_v38, %v24908_v17  ;;  %v22621_v48 = vcombine.low %v10553_v18, %v10560_v13  ;;  %v10686_v61 = vsub.f32 %v24912_v62, %v22538_v43  ;;  %15751 = vpow2.f32 %v14530_v40 }
 0x8dc   : > { %v22612_v7 = vadd.f32 %v24910_v57, %v12420_v31  ;;  %v22617_v8 = vadd.f32 %v24911_v3, %v12421_v63  ;;  %v10687_v0 = vsub.f32 %v24913_v15, %v22552_v26  ;;  %v11401_v45 = vrot.slane %v22412_v59, %v24617_v37  ;;  %v15748_v63 = vpop.eup %15747 }
 0x8dd   : > { %v11405_v1 = vrot.slane %v22412_v59, %v24618_v60  ;;  %v11409_v55 = vrot.slane %v22412_v59, %v24619_v50  ;;  %v11413_v43 = vrot.slane %v22412_v59, %v24620_v11  ;;  %v12951_v31 = vmul.f32 %v15744_v58, %v22362_v49 }
 0x8de   : > { %v14531_v2 = vmul.f32 -1.442695, %v22612_v7  ;;  %v14532_v33 = vmul.f32 -1.442695, %v22617_v8  ;;  %v11417_v26 = vrot.slane %v22420_v4, %v24617_v37  ;;  %v11421_v19 = vrot.slane %v22420_v4, %v24618_v60 }
 0x8df   : > { %v12952_v51 = vmul.f32 %v15746_v29, %v22398_v36  ;;  %v11425_v52 = vrot.slane %v22420_v4, %v24619_v50  ;;  %v11429_v59 = vrot.slane %v22420_v4, %v24620_v11  ;;  %v12953_v56 = vmul.f32 %v15748_v63, %v22403_v14 }
 0x8e0   : > { %15753 = vpow2.f32 %v14531_v2  ;;  %v13166_v49 = vcombine.low %v12950_v9, %v12951_v31  ;;  %v13167_v40 = vcombine.high %v12950_v9, %v12951_v31  ;;  %v11910_v37 = vrot.slane %v22446_v6, %v24658_v30 }
 0x8e1   : > { %15755 = vpow2.f32 %v14532_v33  ;;  %v11917_v60 = vrot.slane %v22448_v10, %v24658_v30  ;;  %v11927_v36 = vrot.slane %v22450_v35, %v24658_v30  ;;  %v11934_v18 = vrot.slane %v11920_v54, %v24658_v30  ;;  %v24914_v54 = vld [vmem:[#allocation178_spill] sm:$0xff] }
 0x8e2   : > { %v11936_v13 = vcombine.low %v11401_v45, %v11405_v1  ;;  %v13168_v50 = vcombine.low %v12952_v51, %v12953_v56  ;;  %v13176_v17 = vrot.slane %v13166_v49, %v24658_v30  ;;  %v13169_v11 = vcombine.high %v12952_v51, %v12953_v56 }
 0x8e3   : > { %v13183_v14 = vrot.slane %v13167_v40, %v24658_v30  ;;  %v11918_v4 = vcombine.low %v11910_v37, %v11917_v60  ;;  %v11935_v38 = vcombine.low %v11927_v36, %v11934_v18  ;;  %v11937_v9 = vcombine.low %v11409_v55, %v11413_v43  ;;  %v24919_v36 = vld [vmem:[#allocation179_spill] sm:$0xff] }
 0x8e4   : > { %v11944_v6 = vrot.slane %v11936_v13, %v24658_v30  ;;  %v13190_v57 = vrot.slane %v13168_v50, %v24658_v30  ;;  %v13197_v10 = vrot.slane %v13169_v11, %v24658_v30  ;;  %v11953_v3 = vcombine.low %v11417_v26, %v11421_v19  ;;  %v15750_v62 = vpop.eup %15749  ;;  %v22685_v50 = vpop.permute.xlu1 %13344 }
 0x8e5   : > { %v11954_v35 = vcombine.low %v11425_v52, %v11429_v59  ;;  %v10688_v2 = vsub.f32 %v24914_v54, %v22619_v28  ;;  %v11951_v33 = vrot.slane %v11937_v9, %v24658_v30  ;;  %v12094_v15 = vmul.f32 %v11918_v4, %v10686_v61  ;;  %v15752_v45 = vpop.eup %15751  ;;  %v24915_v28 = vld [vmem:[#allocation107_spill] sm:$0xff] }
 0x8e6   : > { %v12095_v58 = vmul.f32 %v11935_v38, %v10687_v0  ;;  %v22663_v1 = vcombine.low %v13176_v17, %v13190_v57  ;;  %v22665_v55 = vcombine.high %v13176_v17, %v13190_v57  ;;  %v22667_v43 = vcombine.low %v13183_v14, %v13197_v10  ;;  %v24916_v0 = vld [vmem:[#allocation16_spill] sm:$0xff] }
 0x8e7   : > { %v22669_v29 = vcombine.high %v13183_v14, %v13197_v10  ;;  %v12866_v31 = vadd.f32 1.0, %v15750_v62  ;;  %v12867_v26 = vadd.f32 1.0, %v15752_v45  ;;  %v11952_v19 = vcombine.low %v11944_v6, %v11951_v33 }
 0x8e8   : > { %v11961_v63 = vrot.slane %v11953_v3, %v24658_v30  ;;  %v12635_v52 = vrot.slane %v24915_v28, %v24703_v39  ;;  %13350 = vrot.lane.b32.xlu0 %v22663_v1, %s15868_s26  ;;  %v11968_v61 = vrot.slane %v11954_v35, %v24658_v30  ;;  %v24917_v59 = vrot.slane %v24916_v0, %v24701_v12  ;;  %v13361_v35 = vpop.permute.xlu1 %13360 }
 0x8e9   : > { %v24918_v49 = vrot.slane %v24916_v0, %v24703_v39  ;;  %15757 = vrcp.f32 %v12866_v31  ;;  %v10689_v18 = vsub.f32 %v24919_v36, %v22621_v48  ;;  %v12096_v13 = vmul.f32 %v11952_v19, %v10688_v2 }
 0x8ea   : > { %v15754_v51 = vpop.eup %15753  ;;  %v12414_v56 = vmul.f32 %v24917_v59, %v12094_v15  ;;  %15759 = vrcp.f32 %v12867_v26  ;;  %v11969_v11 = vcombine.low %v11961_v63, %v11968_v61  ;;  %v24920_v14 = vrot.slane %v24915_v28, %v24701_v12 }
 0x8eb   : > { %v12415_v40 = vmul.f32 %v24918_v49, %v12095_v58  ;;  %v15756_v37 = vpop.eup %15755  ;;  %v12868_v60 = vadd.f32 1.0, %v15754_v51  ;;  %v12642_v39 = vrot.slane %v24915_v28, %v24709_v20  ;;  %v24921_v38 = vrot.slane %v24916_v0, %v24709_v20 }
 0x8ec   : > { %v12869_v17 = vadd.f32 1.0, %v15756_v37  ;;  %v22690_v4 = vadd.f32 %v24920_v14, %v12414_v56  ;;  %v12329_v6 = vrot.slane %v24916_v0, %v24711_v44  ;;  %13366 = vrot.lane.b32.xlu0 %v22665_v55, %s15868_s26  ;;  %v12097_v12 = vmul.f32 %v11969_v11, %v10689_v18  ;;  %v13377_v33 = vpop.permute.xlu1 %13376  ;;  %v13343_v37 = vpop.permute.xlu0 %13342  ;;  %v24923_v14 = vld [vmem:[#allocation72_spill] sm:$0xff] }
 0x8ed   : > { %15761 = vrcp.f32 %v12868_v60  ;;  %v12416_v9 = vmul.f32 %v24921_v38, %v12096_v13  ;;  %v22697_v48 = vadd.f32 %v12635_v52, %v12415_v40  ;;  %v12649_v20 = vrot.slane %v24915_v28, %v24711_v44 }
 0x8ee   : > { %15763 = vrcp.f32 %v12869_v17  ;;  %v14525_v57 = vmul.f32 -1.442695, %v22690_v4  ;;  %v12417_v62 = vmul.f32 %v12329_v6, %v12097_v12  ;;  %v13423_v60 = vsel %vm3959_vm2, %v22685_v50, %v13361_v35 }
 0x8ef   : > { %v22704_v10 = vadd.f32 %v12642_v39, %v12416_v9  ;;  %v14526_v3 = vmul.f32 -1.442695, %v22697_v48  ;;  %v13443_v39 = vmul.f32 %v13423_v60, %v24923_v14 }
 0x8f0   : > { %15765 = vpow2.f32 %v14525_v57  ;;  %13382 = vrot.lane.b32.xlu0 %v22667_v43, %s15868_s26  ;;  %v22712_v2 = vadd.f32 %v12649_v20, %v12417_v62  ;;  %v13393_v19 = vpop.permute.xlu1 %13392  ;;  %v13359_v57 = vpop.permute.xlu0 %13358 }
 0x8f1   : > { %15767 = vpow2.f32 %v14526_v3  ;;  %v14527_v54 = vmul.f32 -1.442695, %v22704_v10  ;;  %v13422_v62 = vsel %vm3959_vm2, %v13343_v37, %v13359_v57 }
 0x8f2   : > { %v14528_v15 = vmul.f32 -1.442695, %v22712_v2 }
 0x8f3   : > { %15769 = vpow2.f32 %v14527_v54  ;;  %v15758_v58 = vpop.eup %15757 }
 0x8f4   : > { %v15760_v45 = vpop.eup %15759  ;;  %13398 = vrot.lane.b32.xlu0 %v22669_v29, %s15868_s26  ;;  %v12962_v44 = vmul.f32 %v15758_v58, %v22569_v25  ;;  %15771 = vpow2.f32 %v14528_v15  ;;  %v13473_v36 = vpop.permute.xlu1 %13472  ;;  %v13439_v58 = vmul.f32 %v13422_v62, %v24923_v14  ;;  %v15788_v25 = vld [vmem:[%s16402_s27 + $0x38] sm:$0xff] }
 0x8f5   : > { %v12963_v26 = vmul.f32 %v15760_v45, %v22574_v53  ;;  %v13415_v45 = vsel %vm3959_vm2, %v13361_v35, %v13377_v33 }
 0x8f7   : > { %v15762_v31 = vpop.eup %15761  ;;  %v13274_v52 = vcombine.low %v12962_v44, %v12963_v26  ;;  %v13275_v61 = vcombine.high %v12962_v44, %v12963_v26  ;;  %v13375_v44 = vpop.permute.xlu0 %13374 }
 0x8f8   : > { %v15764_v63 = vpop.eup %15763  ;;  %v12964_v51 = vmul.f32 %v15762_v31, %v22612_v7  ;;  %v13489_v3 = vpop.permute.xlu1 %13488  ;;  %v15229_v31 = vpack.c.bf16 %v13443_v39, %v13439_v58 }
 0x8f9   : > { %v12965_v28 = vmul.f32 %v15764_v63, %v22617_v8  ;;  %v13284_v53 = vrot.slane %v13274_v52, %v24658_v30  ;;  %v13291_v8 = vrot.slane %v13275_v61, %v24658_v30  ;;  %v13551_v54 = vsel %vm4045_vm3, %v13473_v36, %v13489_v3  ;;  %v24924_v61 = vld [vmem:[#allocation67_spill] sm:$0xff] }
 0x8fa   : > { %v15766_v0 = vpop.eup %15765  ;;  %v13414_v63 = vsel %vm3959_vm2, %v13359_v57, %v13375_v44  ;;  %15230 = vmatprep.subr.bf16.mxu0 %v15229_v31 }
 0x8fb   : > { %v15768_v59 = vpop.eup %15767  ;;  %v13276_v56 = vcombine.low %v12964_v51, %v12965_v28  ;;  %v12862_v49 = vadd.f32 1.0, %v15766_v0  ;;  %v13277_v40 = vcombine.high %v12964_v51, %v12965_v28  ;;  %v13407_v51 = vsel %vm3959_vm2, %v13377_v33, %v13393_v19  ;;  %v24926_v33 = vld [vmem:[#allocation73_spill] sm:$0xff]  ;;  %v13391_v60 = vpop.permute.xlu0 %13390 }
 0x8fc   : > { %v12863_v18 = vadd.f32 1.0, %v15768_v59  ;;  %v13505_v26 = vpop.permute.xlu1 %13504  ;;  %v13431_v28 = vsel %vm3959_vm2, %v13393_v19, %v22685_v50  ;;  %v13444_v0 = vmul.f32 %v13415_v45, %v24924_v61  ;;  %v13440_v59 = vmul.f32 %v13414_v63, %v24924_v61 }
 0x8fd   : > { %v15770_v13 = vpop.eup %15769  ;;  %v13298_v7 = vrot.slane %v13276_v56, %v24658_v30  ;;  %15773 = vrcp.f32 %v12862_v49  ;;  %v13305_v17 = vrot.slane %v13277_v40, %v24658_v30  ;;  %v22755_v52 = vsel %vm4045_vm3, %v13489_v3, %v13505_v26  ;;  %v24925_v56 = vld [vmem:[#allocation47_spill] sm:$0xff] }
 0x8fe   : > { %v12864_v11 = vadd.f32 1.0, %v15770_v13  ;;  %15775 = vrcp.f32 %v12863_v18  ;;  %v15772_v20 = vpop.eup %15771  ;;  %v13442_v49 = vmul.f32 %v13431_v28, %v24925_v56  ;;  %v13445_v40 = vmul.f32 %v13407_v51, %v24926_v33 }
 0x8ff   : > { %v22729_v38 = vcombine.low %v13284_v53, %v13298_v7  ;;  %v22731_v9 = vcombine.high %v13284_v53, %v13298_v7  ;;  %v22733_v6 = vcombine.low %v13291_v8, %v13305_v17  ;;  %v22735_v12 = vcombine.high %v13291_v8, %v13305_v17 }
 0x900   : > { %15777 = vrcp.f32 %v12864_v11  ;;  %v12865_v15 = vadd.f32 1.0, %v15772_v20  ;;  %v13521_v53 = vpop.permute.xlu1 %13520  ;;  %v13406_v18 = vsel %vm3959_vm2, %v13375_v44, %v13391_v60  ;;  %v13430_v13 = vsel %vm3959_vm2, %v13391_v60, %v13343_v37  ;;  %v13471_v20 = vpop.permute.xlu0 %13470 }
 0x901   : > { %13356 = vrot.lane.b32.xlu1 %v22729_v38, %s15868_s26  ;;  %v13535_v7 = vsel %vm4045_vm3, %v13505_v26, %v13521_v53  ;;  %v13438_v17 = vmul.f32 %v13430_v13, %v24925_v56  ;;  %v13441_v11 = vmul.f32 %v13406_v18, %v24926_v33  ;;  %v15279_v45 = vpack.c.bf16 %v13444_v0, %v13440_v59 }
 0x902   : > { %15779 = vrcp.f32 %v12865_v15 }
 0x903   : > { %v15231_v37 = vpack.c.bf16 %v13442_v49, %v13438_v17  ;;  %v15277_v15 = vpack.c.bf16 %v13445_v40, %v13441_v11  ;;  %v24928_v17 = vld [vmem:[#allocation69_spill] sm:$0xff] }
 0x904   : > { %v22779_v62 = vpop.permute.xlu1 %13348  ;;  %v13487_v26 = vpop.permute.xlu0 %13486  ;;  %v22822_v11 = vmul.f32 %v13535_v7, %v24928_v17 }
 0x905   : > { %13372 = vrot.lane.b32.xlu1 %v22731_v9, %s15868_s26  ;;  %15232 = vmatpush1.bf16.msra.mxu0 %v15231_v37 }
 0x906   : > { %15278 = vmatprep.subr.bf16.mxu1 %v15277_v15 }
 0x907   : > { %v15774_v35 = vpop.eup %15773  ;;  %15280 = vmatpush1.bf16.msra.mxu1 %v15279_v45 }
 0x908   : > { %v15776_v50 = vpop.eup %15775  ;;  %v12958_v19 = vmul.f32 %v15774_v35, %v22690_v4  ;;  %v22777_v4 = vsel %vm4045_vm3, %v13521_v53, %v13473_v36  ;;  %v24927_v36 = vld [vmem:[#allocation78_spill] sm:$0xff]  ;;  %v22788_v63 = vpop.permute.xlu1 %13364 }
 0x909   : > { %v12959_v8 = vmul.f32 %v15776_v50, %v22697_v48  ;;  %13388 = vrot.lane.b32.xlu1 %v22733_v6, %s15868_s26  ;;  %v22786_v31 = vmul.f32 %v13551_v54, %v24927_v36  ;;  %v13503_v40 = vpop.permute.xlu0 %13502 }
 0x90a   : > { %v15778_v39 = vpop.eup %15777  ;;  %v13542_v13 = vsel %vm4045_vm3, %v13487_v26, %v13503_v40 }
 0x90b   : > { %v13238_v57 = vcombine.low %v12958_v19, %v12959_v8  ;;  %v13239_v3 = vcombine.high %v12958_v19, %v12959_v8  ;;  %v12960_v48 = vmul.f32 %v15778_v39, %v22704_v10  ;;  %v13550_v10 = vsel %vm4045_vm3, %v13471_v20, %v13487_v26 }
 0x90c   : > { %v15780_v58 = vpop.eup %15779  ;;  %v22795_v35 = vmul.f32 %v13550_v10, %v24927_v36  ;;  %v13381_v60 = vpop.permute.xlu1 %13380  ;;  %v13425_v10 = vsel %vm3959_vm2, %v22779_v62, %v22788_v63 }
 0x90d   : > { %13404 = vrot.lane.b32.xlu1 %v22735_v12, %s15868_s26  ;;  %v12961_v44 = vmul.f32 %v15780_v58, %v22712_v2  ;;  %v13248_v2 = vrot.slane %v13238_v57, %v24658_v30  ;;  %v13255_v54 = vrot.slane %v13239_v3, %v24658_v30  ;;  %v13519_v39 = vpop.permute.xlu0 %13518 }
 0x90e   : > { %v13558_v15 = vsel %vm4045_vm3, %v13519_v39, %v13471_v20 }
 0x90f   : > { %v13240_v51 = vcombine.low %v12960_v48, %v12961_v44  ;;  %v13241_v28 = vcombine.high %v12960_v48, %v12961_v44  ;;  %v13534_v48 = vsel %vm4045_vm3, %v13503_v40, %v13519_v39 }
 0x910   : > { %v13397_v57 = vpop.permute.xlu1 %13396  ;;  %v22835_v7 = vmul.f32 %v13534_v48, %v24928_v17 }
 0x911   : > { %13480 = vrot.lane.b32.xlu1 %v22484_v27, %s24798_s30  ;;  %v13262_v0 = vrot.slane %v13240_v51, %v24658_v30  ;;  %v13269_v59 = vrot.slane %v13241_v28, %v24658_v30 }
 0x913   : > { %v22803_v53 = vcombine.low %v13248_v2, %v13262_v0  ;;  %v22805_v50 = vcombine.high %v13248_v2, %v13262_v0  ;;  %v22807_v19 = vcombine.low %v13255_v54, %v13269_v59  ;;  %v22809_v18 = vcombine.high %v13255_v54, %v13269_v59  ;;  %v24929_v2 = vld [vmem:[#allocation66_spill] sm:$0xff]  ;;  %v24930_v59 = vld [vmem:[#allocation79_spill] sm:$0xff] }
 0x914   : > { %v13477_v45 = vpop.permute.xlu1 %13476  ;;  %v22863_v0 = vmul.f32 %v22755_v52, %v24929_v2  ;;  %v22866_v54 = vmul.f32 %v13542_v13, %v24929_v2  ;;  %v22870_v40 = vmul.f32 %v22777_v4, %v24930_v59  ;;  %v22873_v39 = vmul.f32 %v13558_v15, %v24930_v59 }
 0x915   : > { %13496 = vrot.lane.b32.xlu1 %v22486_v32, %s24798_s30  ;;  %13354 = vrot.lane.b32.xlu0 %v22803_v53, %s15868_s26 }
 0x917   : > { %v13347_v51 = vpop.permute.xlu0 %13346 }
 0x918   : > { %v13493_v20 = vpop.permute.xlu1 %13492 }
 0x919   : > { %13512 = vrot.lane.b32.xlu1 %v22488_v41, %s24798_s30  ;;  %13370 = vrot.lane.b32.xlu0 %v22805_v50, %s15868_s26  ;;  %v13553_v44 = vsel %vm4045_vm3, %v13477_v45, %v13493_v20 }
 0x91b   : > { %v13363_v58 = vpop.permute.xlu0 %13362 }
 0x91c   : > { %v13509_v26 = vpop.permute.xlu1 %13508  ;;  %v13424_v4 = vsel %vm3959_vm2, %v13347_v51, %v13363_v58 }
 0x91d   : > { %13528 = vrot.lane.b32.xlu1 %v22490_v22, %s24798_s30  ;;  %13386 = vrot.lane.b32.xlu0 %v22807_v19, %s15868_s26  ;;  %v13545_v28 = vsel %vm4045_vm3, %v13493_v20, %v13509_v26  ;;  %v13451_v20 = vmul.f32 %v13425_v10, %v24923_v14  ;;  %v13447_v13 = vmul.f32 %v13424_v4, %v24923_v14  ;;  %v12983_v4 = vld [vmem:[%s23423_s9 + $0x8] sm:$0xff] }
 0x91f   : > { %v13379_v10 = vpop.permute.xlu0 %13378  ;;  %v15233_v37 = vpack.c.bf16 %v13451_v20, %v13447_v13  ;;  %v13417_v20 = vsel %vm3959_vm2, %v22788_v63, %v13381_v60  ;;  %v12985_v63 = vld [vmem:[%s23423_s9 + $0x18] sm:$0xff] }
 0x920   : > { %v13525_v48 = vpop.permute.xlu1 %13524  ;;  %v13416_v13 = vsel %vm3959_vm2, %v13363_v58, %v13379_v10 }
 0x921   : > { %13484 = vrot.lane.b32.xlu1 %v22729_v38, %s24798_s30  ;;  %13402 = vrot.lane.b32.xlu0 %v22809_v18, %s15868_s26  ;;  %v13537_v49 = vsel %vm4045_vm3, %v13509_v26, %v13525_v48  ;;  %v13561_v52 = vsel %vm4045_vm3, %v13525_v48, %v13477_v45  ;;  %v13409_v45 = vsel %vm3959_vm2, %v13381_v60, %v13397_v57 }
 0x922   : > { %v13433_v48 = vsel %vm3959_vm2, %v13397_v57, %v22779_v62  ;;  %15234 = vmatprep.subr.bf16.mxu0 %v15233_v37  ;;  %v13453_v15 = vmul.f32 %v13409_v45, %v24926_v33  ;;  %v13452_v60 = vmul.f32 %v13417_v20, %v24924_v61  ;;  %v13448_v37 = vmul.f32 %v13416_v13, %v24924_v61 }
 0x923   : > { %v13450_v26 = vmul.f32 %v13433_v48, %v24925_v56  ;;  %v13395_v62 = vpop.permute.xlu0 %13394  ;;  %v22929_v20 = vmul.f32 %v13553_v44, %v24927_v36  ;;  %v12967_v44 = vld [vmem:[%s23422_s8 + $0x8] sm:$0xff] }
 0x924   : > { %v13408_v57 = vsel %vm3959_vm2, %v13379_v10, %v13395_v62  ;;  %v13432_v3 = vsel %vm3959_vm2, %v13395_v62, %v13347_v51  ;;  %v12987_v51 = vld [vmem:[%s23423_s9 + $0x28] sm:$0xff]  ;;  %v15283_v62 = vpack.c.bf16 %v13452_v60, %v13448_v37  ;;  %14533 = vmatprep.mubr.msk.f32.mxu0 %vm13638_vm13, %v12967_v44  ;;  %14541 = vmatprep.mubr.msk.f32.mxu1 %vm13638_vm13, %v12967_v44 }
 0x925   : > { %13500 = vrot.lane.b32.xlu1 %v22731_v9, %s24798_s30  ;;  %13478 = vrot.lane.b32.xlu0 %v22663_v1, %s24798_s30  ;;  %v13446_v58 = vmul.f32 %v13432_v3, %v24925_v56  ;;  %v13449_v45 = vmul.f32 %v13408_v57, %v24926_v33  ;;  %24931 = vst [vmem:[#allocation119_spill] sm:$0xff] %v22929_v20 }
 0x927   : > { %v15235_v48 = vpack.c.bf16 %v13450_v26, %v13446_v58  ;;  %v13475_v10 = vpop.permute.xlu0 %13474  ;;  %v12989_v26 = vld [vmem:[%s23423_s9 + $0x38] sm:$0xff]  ;;  %v13898_v58 = vld [vmem:[%s23425_s11 + $0x8] sm:$0xff] }
 0x929   : > { %13516 = vrot.lane.b32.xlu1 %v22733_v6, %s24798_s30  ;;  %13494 = vrot.lane.b32.xlu0 %v22665_v55, %s24798_s30 }
 0x92a   : > { %15236 = vmatpush1.bf16.msra.mxu0 %v15235_v48  ;;  %v22965_v48 = vmul.f32 %v13561_v52, %v24930_v59 }
 0x92b   : > { %v13491_v3 = vpop.permute.xlu0 %13490 }
 0x92c   : > { %24934 = vst [vmem:[#allocation144_spill] sm:$0xff] %v22965_v48 }
 0x92d   : > { %13532 = vrot.lane.b32.xlu1 %v22735_v12, %s24798_s30  ;;  %13510 = vrot.lane.b32.xlu0 %v22667_v43, %s24798_s30 }
 0x92f   : > { %v13507_v60 = vpop.permute.xlu0 %13506 }
 0x930   : > { %v13544_v37 = vsel %vm4045_vm3, %v13491_v3, %v13507_v60 }
 0x931   : > { %13605 = vperm.xlu1 %15490, %v12983_v4   ;;  %13526 = vrot.lane.b32.xlu0 %v22669_v29, %s24798_s30  ;;  %v15281_v4 = vpack.c.bf16 %v13453_v15, %v13449_v45  ;;  %v13552_v15 = vsel %vm4045_vm3, %v13475_v10, %v13491_v3  ;;  %v22959_v45 = vmul.f32 %v13544_v37, %v24929_v2  ;;  %v12984_v37 = vld [vmem:[%s23423_s9 + $0x10] sm:$0xff] }
 0x932   : > { %v22939_v13 = vmul.f32 %v13552_v15, %v24927_v36 }
 0x933   : > { %15282 = vmatprep.subr.bf16.mxu1 %v15281_v4  ;;  %v13523_v4 = vpop.permute.xlu0 %13522 }
 0x934   : > { %15284 = vmatpush1.bf16.msra.mxu1 %v15283_v62  ;;  %24932 = vst [vmem:[#allocation115_spill] sm:$0xff] %v22939_v13  ;;  %v13536_v62 = vsel %vm4045_vm3, %v13507_v60, %v13523_v4  ;;  %v13560_v3 = vsel %vm4045_vm3, %v13523_v4, %v13475_v10  ;;  %v13902_v60 = vld [vmem:[%s23425_s11 + $0x28] sm:$0xff]  ;;  %v12986_v4 = vld [vmem:[%s23423_s9 + $0x20] sm:$0xff] }
 0x935   : > { %13615 = vperm.xlu1 %15490, %v12985_v63   ;;  %13482 = vrot.lane.b32.xlu0 %v22803_v53, %s24798_s30  ;;  %v22947_v63 = vmul.f32 %v13545_v28, %v24929_v2  ;;  %v22962_v28 = vmul.f32 %v13537_v49, %v24928_v17  ;;  %v13900_v49 = vld [vmem:[%s23425_s11 + $0x18] sm:$0xff]  ;;  %v22979_v52 = vmul.f32 %v13536_v62, %v24928_v17  ;;  %v12988_v62 = vld [vmem:[%s23423_s9 + $0x30] sm:$0xff] }
 0x936   : > { %v22982_v15 = vmul.f32 %v13560_v3, %v24930_v59 }
 0x937   : > { %24933 = vst [vmem:[#allocation146_spill] sm:$0xff] %v22962_v28  ;;  %24935 = vst [vmem:[#allocation148_spill] sm:$0xff] %v22979_v52 }
 0x938   : > { %24936 = vst [vmem:[#allocation154_spill] sm:$0xff] %v22982_v15  ;;  %v13353_v3 = vpop.permute.xlu1 %13352 }
 0x939   : > { %13625 = vperm.xlu1 %15490, %v12987_v51   ;;  %13498 = vrot.lane.b32.xlu0 %v22805_v50, %s24798_s30 }
 0x93d   : > { %13635 = vperm.xlu1 %15490, %v12989_v26   ;;  %13514 = vrot.lane.b32.xlu0 %v22807_v19, %s24798_s30  ;;  %v12982_v26 = vld [vmem:[%s23423_s9] sm:$0xff] }
 0x941   : > { %13912 = vperm.xlu1 %15490, %v13898_v58   ;;  %13530 = vrot.lane.b32.xlu0 %v22809_v18, %s24798_s30  ;;  %v13904_v58 = vld [vmem:[%s23425_s11 + $0x38] sm:$0xff]  ;;  %s23325_s30 = scalar_lea.vmem [#allocation4], %s14371_s29  ;;  %s24963_s29 = sadd.s32 4294967295, %s15863_s24  }
 0x942   : > { %s14572_s1 = sshll.u32 %s24963_s29, 9  ;;  %s14274_s28 = sshll.u32 %s23325_s30, 4  ;;  %s23366_s28 = int_to_ptr.vmem [resolvable:$true] %s14274_s28 }
 0x943   : > { %s23364_s19 = scalar_lea.hbm %s23430_s16, %s14572_s1  ;;  %s15801_s0 = scalar_lea.vmem %s23366_s28, 4096 }
 0x944   : > { %p15802_p13 = scmp.ne.s32.totalorder %s23366_s28, %s15801_s0  ;;  %p15808_p2 = scmp.lt.s32.totalorder %s23366_s28, %s15806_s18 }
 0x945   : > { %13922 = vperm.xlu1 %15490, %v13900_v49   ;;  %13600 = vperm.xlu0 %15489, %v12982_v26   ;;  %v13897_v49 = vld [vmem:[%s23425_s11] sm:$0xff]  ;;  %v13369_v26 = vpop.permute.xlu1 %13368 }
 0x946   : > { %p15803_p0 = pnand %p15802_p13, %p16006_p6 }
 0x948   : > { %p15804_p1 = pneg %p15803_p0 }
 0x949   : > { %13932 = vperm.xlu1 %15490, %v13902_v60   ;;  %13610 = vperm.xlu0 %15489, %v12984_v37   ;;  %v13899_v60 = vld [vmem:[%s23425_s11 + $0x10] sm:$0xff]  ;;  %v13901_v37 = vld [vmem:[%s23425_s11 + $0x20] sm:$0xff] }
 0x94d   : > { %13942 = vperm.xlu1 %15490, %v13904_v58   ;;  %13620 = vperm.xlu0 %15489, %v12986_v4   ;;  %v13385_v4 = vpop.permute.xlu1 %13384 }
 0x94e   : > { %v13419_v28 = vsel %vm3959_vm2, %v13369_v26, %v13385_v4 }
 0x951   : > { %13630 = vperm.xlu0 %15489, %v12988_v62   ;;  %v13427_v62 = vsel %vm3959_vm2, %v13353_v3, %v13369_v26  ;;  %v13401_v51 = vpop.permute.xlu1 %13400 }
 0x952   : > { %v13459_v10 = vmul.f32 %v13427_v62, %v24923_v14  ;;  %v13411_v52 = vsel %vm3959_vm2, %v13385_v4, %v13401_v51 }
 0x955   : > { %13907 = vperm.xlu0 %15489, %v13897_v49   ;;  %v13903_v49 = vld [vmem:[%s23425_s11 + $0x30] sm:$0xff] }
 0x959   : > { %13917 = vperm.xlu0 %15489, %v13899_v60  }
 0x95a   : > { %v13351_v58 = vpop.permute.xlu0 %13350 }
 0x95d   : > { %13927 = vperm.xlu0 %15489, %v13901_v37   ;;  %v13435_v37 = vsel %vm3959_vm2, %v13401_v51, %v13353_v3 }
 0x95e   : > { %v13367_v57 = vpop.permute.xlu0 %13366 }
 0x95f   : > { %v13426_v60 = vsel %vm3959_vm2, %v13351_v58, %v13367_v57 }
 0x960   : > { %v13455_v44 = vmul.f32 %v13426_v60, %v24923_v14  ;;  %v13461_v60 = vmul.f32 %v13411_v52, %v24926_v33 }
 0x961   : > { %13937 = vperm.xlu0 %15489, %v13903_v49   ;;  %v13458_v49 = vmul.f32 %v13435_v37, %v24925_v56 }
 0x962   : > { %v13383_v8 = vpop.permute.xlu0 %13382  ;;  %v15237_v30 = vpack.c.bf16 %v13459_v10, %v13455_v44  ;;  %v13460_v10 = vmul.f32 %v13419_v28, %v24924_v61 }
 0x963   : > { %v13418_v62 = vsel %vm3959_vm2, %v13367_v57, %v13383_v8 }
 0x964   : > { %15238 = vmatprep.subr.bf16.mxu0 %v15237_v30  ;;  %v13456_v44 = vmul.f32 %v13418_v62, %v24924_v61 }
 0x966   : > { %v13399_v13 = vpop.permute.xlu0 %13398  ;;  %v15287_v4 = vpack.c.bf16 %v13460_v10, %v13456_v44 }
 0x967   : > { %v13410_v20 = vsel %vm3959_vm2, %v13383_v8, %v13399_v13  ;;  %v13434_v51 = vsel %vm3959_vm2, %v13399_v13, %v13351_v58 }
 0x968   : > { %v13454_v3 = vmul.f32 %v13434_v51, %v24925_v56  ;;  %v13457_v57 = vmul.f32 %v13410_v20, %v24926_v33 }
 0x96a   : > { %v15239_v30 = vpack.c.bf16 %v13458_v49, %v13454_v3  ;;  %v15285_v26 = vpack.c.bf16 %v13461_v60, %v13457_v57 }
 0x96c   : > { %15240 = vmatpush1.bf16.msra.mxu0 %v15239_v30  ;;  %15286 = vmatprep.subr.bf16.mxu1 %v15285_v26 }
 0x96d   : > { %15288 = vmatpush1.bf16.msra.mxu1 %v15287_v4 }
 0x973   : > { %v13357_v52 = vpop.permute.xlu1 %13356 }
 0x977   : > { %v13373_v28 = vpop.permute.xlu1 %13372 }
 0x978   : > { %v13429_v13 = vsel %vm3959_vm2, %v13357_v52, %v13373_v28 }
 0x979   : > { %v13467_v20 = vmul.f32 %v13429_v13, %v24923_v14 }
 0x97b   : > { %v13389_v37 = vpop.permute.xlu1 %13388 }
 0x97c   : > { %v13421_v26 = vsel %vm3959_vm2, %v13373_v28, %v13389_v37 }
 0x97f   : > { %v13405_v62 = vpop.permute.xlu1 %13404 }
 0x980   : > { %v13413_v57 = vsel %vm3959_vm2, %v13389_v37, %v13405_v62  ;;  %v13437_v30 = vsel %vm3959_vm2, %v13405_v62, %v13357_v52 }
 0x981   : > { %v13466_v13 = vmul.f32 %v13437_v30, %v24925_v56 }
 0x983   : > { %v23042_v15 = vpop.permute.xlu1 %13480 }
 0x987   : > { %v13355_v8 = vpop.permute.xlu0 %13354  ;;  %v23046_v58 = vpop.permute.xlu1 %13496 }
 0x98b   : > { %v13371_v49 = vpop.permute.xlu0 %13370  ;;  %v23052_v44 = vpop.permute.xlu1 %13512 }
 0x98c   : > { %v13428_v60 = vsel %vm3959_vm2, %v13355_v8, %v13371_v49 }
 0x98d   : > { %v13463_v10 = vmul.f32 %v13428_v60, %v24923_v14  ;;  %v13469_v14 = vmul.f32 %v13413_v57, %v24926_v33 }
 0x98f   : > { %v13387_v51 = vpop.permute.xlu0 %13386  ;;  %v15241_v3 = vpack.c.bf16 %v13467_v20, %v13463_v10  ;;  %v13468_v20 = vmul.f32 %v13421_v26, %v24924_v61  ;;  %v13529_v28 = vpop.permute.xlu1 %13528  ;;  %v15245_v26 = vpack.c.bf16 %v21889_v21, %v22014_v47  ;;  %v24938_v21 = vld [vmem:[#allocation118_spill] sm:$0xff]  ;;  %v24939_v47 = vld [vmem:[#allocation45_spill] sm:$0xff] }
 0x990   : > { %v13420_v4 = vsel %vm3959_vm2, %v13371_v49, %v13387_v51 }
 0x991   : > { %15242 = vmatprep.subr.bf16.mxu0 %v15241_v3  ;;  %v13464_v10 = vmul.f32 %v13420_v4, %v24924_v61  ;;  %v15293_v61 = vpack.c.bf16 %v21895_v16, %v22018_v5  ;;  %v24940_v5 = vld [vmem:[#allocation57_spill] sm:$0xff] }
 0x993   : > { %v13403_v60 = vpop.permute.xlu0 %13402  ;;  %v15291_v57 = vpack.c.bf16 %v13468_v20, %v13464_v10  ;;  %v24943_v20 = vld [vmem:[#allocation43_spill] sm:$0xff] }
 0x994   : > { %v13412_v48 = vsel %vm3959_vm2, %v13387_v51, %v13403_v60  ;;  %v13436_v52 = vsel %vm3959_vm2, %v13403_v60, %v13355_v8  ;;  %v13485_v8 = vpop.permute.xlu1 %13484 }
 0x995   : > { %v13462_v37 = vmul.f32 %v13436_v52, %v24925_v56  ;;  %v13465_v62 = vmul.f32 %v13412_v48, %v24926_v33  ;;  %v15247_v56 = vpack.c.bf16 %v21885_v23, %v22012_v46  ;;  %v15249_v33 = vpack.c.bf16 %v22147_v42, %v22316_v34  ;;  %v24937_v48 = vld [vmem:[#allocation56_spill] sm:$0xff] }
 0x996   : > { %v15295_v4 = vpack.c.bf16 %v24937_v48, %v22016_v24  ;;  %v15253_v23 = vpack.c.bf16 %v22486_v32, %v22665_v55  ;;  %v24942_v46 = vld [vmem:[#allocation116_spill] sm:$0xff]  ;;  %v15301_v24 = vpack.c.bf16 %v22490_v22, %v22669_v29  ;;  %v15255_v52 = vpack.c.bf16 %v22484_v27, %v22663_v1 }
 0x997   : > { %v15243_v49 = vpack.c.bf16 %v13466_v13, %v13462_v37  ;;  %v13479_v3 = vpop.permute.xlu0 %13478  ;;  %v15289_v30 = vpack.c.bf16 %v13469_v14, %v13465_v62  ;;  %v15297_v13 = vpack.c.bf16 %v24939_v47, %v24938_v21  ;;  %v24941_v14 = vld [vmem:[#allocation41_spill] sm:$0xff]  ;;  %v15299_v42 = vpack.c.bf16 %v24943_v20, %v24942_v46  ;;  %v24956_v21 = vld [vmem:[#allocation119_spill] sm:$0xff] }
 0x998   : > { %v15251_v60 = vpack.c.bf16 %v24941_v14, %v24940_v5  ;;  %v13501_v34 = vpop.permute.xlu1 %13500  ;;  %v15303_v37 = vpack.c.bf16 %v22488_v41, %v22667_v43  ;;  %v24944_v32 = vpack.c.bf16 %v22731_v9, %v22805_v50  ;;  %v24945_v22 = vpack.c.bf16 %v22735_v12, %v22809_v18  ;;  %v24957_v47 = vld [vmem:[#allocation115_spill] sm:$0xff] }
 0x999   : > { %15244 = vmatpush1.bf16.msra.mxu0 %v15243_v49  ;;  %15290 = vmatprep.subr.bf16.mxu1 %v15289_v30  ;;  %v13547_v27 = vsel %vm4045_vm3, %v23046_v58, %v23052_v44  ;;  %v24946_v1 = vpack.c.bf16 %v22729_v38, %v22803_v53  ;;  %v13563_v43 = vsel %vm4045_vm3, %v13529_v28, %v23042_v15 }
 0x99a   : > { %15246 = vmatprep.subr.bf16.mxu0 %v15245_v26  ;;  %15292 = vmatpush1.bf16.msra.mxu1 %v15291_v57  ;;  %v24947_v12 = vpack.c.bf16 %v22863_v0, %v22866_v54  ;;  %v24948_v50 = vpack.c.bf16 %v22733_v6, %v22807_v19  ;;  %v13555_v38 = vsel %vm4045_vm3, %v23042_v15, %v23046_v58 }
 0x99b   : > { %15294 = vmatprep.subr.bf16.mxu1 %v15293_v61  ;;  %v13495_v51 = vpop.permute.xlu0 %13494  ;;  %v13539_v18 = vsel %vm4045_vm3, %v23052_v44, %v13529_v28  ;;  %v24949_v0 = vpack.c.bf16 %v22870_v40, %v22873_v39  ;;  %v13587_v6 = vmul.f32 %v13547_v27, %v24929_v2  ;;  %v13589_v58 = vmul.f32 %v13563_v43, %v24930_v59  ;;  %v24954_v61 = vld [vmem:[#allocation154_spill] sm:$0xff]  ;;  %v15787_v43 = vld [vmem:[%s16402_s27 + $0x18] sm:$0xff] }
 0x99c   : > { %v13517_v55 = vpop.permute.xlu1 %13516  ;;  %v13554_v53 = vsel %vm4045_vm3, %v13479_v3, %v13495_v51  ;;  %v24950_v40 = vpack.c.bf16 %v22786_v31, %v22795_v35  ;;  %v13586_v39 = vmul.f32 %v13555_v38, %v24927_v36  ;;  %v24951_v30 = vpack.c.bf16 %v22947_v63, %v22959_v45  ;;  %v24953_v35 = vld [vmem:[#allocation144_spill] sm:$0xff]  ;;  %v15792_v38 = vld [vmem:[%s16402_s27 + $0x30] sm:$0xff] }
 0x99d   : > { %15248 = vmatpush1.bf16.msra.mxu0 %v15247_v56  ;;  %v13549_v62 = vsel %vm4045_vm3, %v13501_v34, %v13517_v55  ;;  %v13582_v28 = vmul.f32 %v13554_v53, %v24927_v36  ;;  %v24952_v57 = vpack.c.bf16 %v22822_v11, %v22835_v7  ;;  %v13557_v26 = vsel %vm4045_vm3, %v13485_v8, %v13501_v34 }
 0x99e   : > { %15250 = vmatprep.subr.bf16.mxu0 %v15249_v33  ;;  %15296 = vmatpush1.bf16.msra.mxu1 %v15295_v4  ;;  %v13595_v31 = vmul.f32 %v13549_v62, %v24929_v2  ;;  %v13594_v14 = vmul.f32 %v13557_v26, %v24927_v36  ;;  %v15796_v62 = vld [vmem:[%s16402_s27 + $0x78] sm:$0xff] }
 0x99f   : > { %15298 = vmatprep.subr.bf16.mxu1 %v15297_v13  ;;  %v13511_v16 = vpop.permute.xlu0 %13510  ;;  %v24958_v13 = vpack.c.bf16 %v24956_v21, %v24957_v47  ;;  %v15271_v5 = vpack.c.bf16 %v13586_v39, %v13582_v28  ;;  %v15799_v28 = vld [vmem:[%s16402_s27 + $0x50] sm:$0xff]  ;;  %v12973_v26 = vld [vmem:[%s23422_s8 + $0x38] sm:$0xff] }
 0x9a0   : > { %v13546_v41 = vsel %vm4045_vm3, %v13495_v51, %v13511_v16  ;;  %v13533_v15 = vpop.permute.xlu1 %13532  ;;  %v24955_v51 = vpack.c.bf16 %v24953_v35, %v24954_v61  ;;  %v12975_v35 = vld [vmem:[%s23422_s8 + $0x48] sm:$0xff]  ;;  %v12974_v61 = vld [vmem:[%s23422_s8 + $0x40] sm:$0xff]  ;;  %v13891_v21 = vld [vmem:[%s23424_s10 + $0x10] sm:$0xff] }
 0x9a1   : > { %15252 = vmatpush1.bf16.msra.mxu0 %v15251_v60  ;;  %v13583_v19 = vmul.f32 %v13546_v41, %v24929_v2  ;;  %v13541_v33 = vsel %vm4045_vm3, %v13517_v55, %v13533_v15  ;;  %v13565_v63 = vsel %vm4045_vm3, %v13533_v15, %v13485_v8  ;;  %v24959_v8 = vld [vmem:[#allocation146_spill] sm:$0xff]  ;;  %v24960_v60 = vld [vmem:[#allocation148_spill] sm:$0xff]  ;;  %v15786_v55 = vld [vmem:[%s16402_s27 + $0x28] sm:$0xff] }
 0x9a2   : > { %15254 = vmatprep.subr.bf16.mxu0 %v15253_v23  ;;  %15300 = vmatpush1.bf16.msra.mxu1 %v15299_v42  ;;  %v24961_v23 = vpack.c.bf16 %v24959_v8, %v24960_v60  ;;  %v13596_v20 = vmul.f32 %v13541_v33, %v24928_v17  ;;  %v12979_v33 = vld [vmem:[%s23422_s8 + $0x68] sm:$0xff]  ;;  %v13892_v47 = vld [vmem:[%s23424_s10 + $0x18] sm:$0xff] }
 0x9a3   : > { %15302 = vmatprep.subr.bf16.mxu1 %v15301_v24  ;;  %v13527_v10 = vpop.permute.xlu0 %13526  ;;  %v15269_v48 = vpack.c.bf16 %v13587_v6, %v13583_v19  ;;  %v15795_v19 = vld [vmem:[%s16402_s27 + $0x58] sm:$0xff] }
 0x9a4   : > { %v13562_v9 = vsel %vm4045_vm3, %v13527_v10, %v13479_v3  ;;  %v13538_v49 = vsel %vm4045_vm3, %v13511_v16, %v13527_v10  ;;  %v13588_v3 = vmul.f32 %v13539_v18, %v24928_v17  ;;  %v12969_v18 = vld [vmem:[%s23422_s8 + $0x18] sm:$0xff]  ;;  %v15337_v15 = vpack.c.bf16 %v15796_v62, %v15795_v19 }
 0x9a5   : > { %15256 = vmatpush1.bf16.msra.mxu0 %v15255_v52  ;;  %v13585_v44 = vmul.f32 %v13562_v9, %v24930_v59  ;;  %v13584_v45 = vmul.f32 %v13538_v49, %v24928_v17  ;;  %v15790_v9 = vld [vmem:[%s16402_s27 + $0x20] sm:$0xff]  ;;  %v12971_v49 = vld [vmem:[%s23422_s8 + $0x28] sm:$0xff] }
 0x9a6   : > { %15258 = vmatprep.subr.bf16.mxu0 %v24944_v32  ;;  %15304 = vmatpush1.bf16.msra.mxu1 %v15303_v37  ;;  %v15785_v32 = vld [vmem:[%s16402_s27 + $0x8] sm:$0xff] }
 0x9a7   : > { %15306 = vmatprep.subr.bf16.mxu1 %v24945_v22  ;;  %v13483_v29 = vpop.permute.xlu0 %13482  ;;  %v15317_v16 = vpack.c.bf16 %v13589_v58, %v13585_v44  ;;  %v15319_v24 = vpack.c.bf16 %v13588_v3, %v13584_v45  ;;  %v15325_v22 = vpack.c.bf16 %v15786_v55, %v15785_v32  ;;  %v12968_v58 = vld [vmem:[%s23422_s8 + $0x10] sm:$0xff]  ;;  %v15797_v44 = vld [vmem:[%s16402_s27 + $0x40] sm:$0xff]  ;;  %v12981_v45 = vld [vmem:[%s23422_s8 + $0x78] sm:$0xff] }
 0x9a8   : > { %v15800_v3 = vld [vmem:[%s16402_s27 + $0x70] sm:$0xff] }
 0x9a9   : > { %15260 = vmatpush1.bf16.msra.mxu0 %v24946_v1 }
 0x9aa   : > { %15262 = vmatprep.subr.bf16.mxu0 %v24947_v12  ;;  %15308 = vmatpush1.bf16.msra.mxu1 %v24948_v50  ;;  %v15791_v50 = vld [vmem:[%s16402_s27 + $0x10] sm:$0xff] }
 0x9ab   : > { %15310 = vmatprep.subr.bf16.mxu1 %v24949_v0  ;;  %v13499_v54 = vpop.permute.xlu0 %13498  ;;  %v15335_v53 = vpack.c.bf16 %v15792_v38, %v15791_v50  ;;  %v15793_v0 = vld [vmem:[%s16402_s27 + $0x48] sm:$0xff] }
 0x9ac   : > { %v13556_v11 = vsel %vm4045_vm3, %v13483_v29, %v13499_v54 }
 0x9ad   : > { %15264 = vmatpush1.bf16.msra.mxu0 %v24950_v40  ;;  %v13590_v46 = vmul.f32 %v13556_v11, %v24927_v36  ;;  %v15798_v40 = vld [vmem:[%s16402_s27 + $0x60] sm:$0xff]  ;;  %v12980_v11 = vld [vmem:[%s23422_s8 + $0x70] sm:$0xff] }
 0x9ae   : > { %15266 = vmatprep.subr.bf16.mxu0 %v24951_v30  ;;  %15312 = vmatpush1.bf16.msra.mxu1 %v24952_v57  ;;  %v15331_v39 = vpack.c.bf16 %v15798_v40, %v15797_v44  ;;  %v15339_v30 = vpack.c.bf16 %v15800_v3, %v15799_v28  ;;  %v12970_v57 = vld [vmem:[%s23422_s8 + $0x20] sm:$0xff] }
 0x9af   : > { %15314 = vmatprep.subr.bf16.mxu1 %v24955_v51  ;;  %v13515_v56 = vpop.permute.xlu0 %13514  ;;  %v15275_v27 = vpack.c.bf16 %v13594_v14, %v13590_v46  ;;  %v12977_v51 = vld [vmem:[%s23422_s8 + $0x58] sm:$0xff] }
 0x9b0   : > { %v13548_v7 = vsel %vm4045_vm3, %v13499_v54, %v13515_v56  ;;  %v15794_v54 = vld [vmem:[%s16402_s27 + $0x68] sm:$0xff]  ;;  %v13896_v14 = vld [vmem:[%s23424_s10 + $0x38] sm:$0xff]  ;;  %v13606_v60 = vpop.permute.xlu1 %13605 }
 0x9b1   : > { %v13591_v4 = vmul.f32 %v13548_v7, %v24929_v2  ;;  %15268 = vmatpush1.bf16.msra.mxu0 %v24958_v13  ;;  %v13597_v2 = vmul.f32 %v13565_v63, %v24930_v59  ;;  %v15329_v6 = vpack.c.bf16 %v15794_v54, %v15793_v0  ;;  %v12978_v63 = vld [vmem:[%s23422_s8 + $0x60] sm:$0xff]  ;;  %v24962_v7 = vmov 0.0  }
 0x9b2   : > { %15270 = vmatprep.subr.bf16.mxu0 %v15269_v48  ;;  %15316 = vmatpush1.bf16.msra.mxu1 %v24961_v23  ;;  %v13889_v48 = vld [vmem:[%s23424_s10] sm:$0xff] }
 0x9b3   : > { %15318 = vmatprep.subr.bf16.mxu1 %v15317_v16  ;;  %v13531_v42 = vpop.permute.xlu0 %13530  ;;  %v15273_v34 = vpack.c.bf16 %v13595_v31, %v13591_v4  ;;  %v12972_v31 = vld [vmem:[%s23422_s8 + $0x30] sm:$0xff]  ;;  %v13890_v4 = vld [vmem:[%s23424_s10 + $0x8] sm:$0xff]  ;;  %v13893_v13 = vld [vmem:[%s23424_s10 + $0x20] sm:$0xff] }
 0x9b4   : > { %v13540_v10 = vsel %vm4045_vm3, %v13515_v56, %v13531_v42  ;;  %v13564_v52 = vsel %vm4045_vm3, %v13531_v42, %v13483_v29  ;;  %v15789_v29 = vld [vmem:[%s16402_s27] sm:$0xff]  ;;  %v12976_v56 = vld [vmem:[%s23422_s8 + $0x50] sm:$0xff]  ;;  %v13894_v16 = vld [vmem:[%s23424_s10 + $0x28] sm:$0xff]  ;;  %v13616_v46 = vpop.permute.xlu1 %13615  ;;  %s15807_s27 = scalar_lea.vmem %s15806_s18, 8192 }
 0x9b5   : > { %v13592_v37 = vmul.f32 %v13540_v10, %v24928_v17  ;;  %v13593_v36 = vmul.f32 %v13564_v52, %v24930_v59  ;;  %15272 = vmatpush1.bf16.msra.mxu0 %v15271_v5  ;;  %v15333_v17 = vpack.c.bf16 %v15788_v25, %v15787_v43  ;;  %v12966_v59 = vld [vmem:[%s23422_s8] sm:$0xff]  ;;  %v15327_v12 = vpack.c.bf16 %v15790_v9, %v15789_v29  ;;  %v13895_v5 = vld [vmem:[%s23424_s10 + $0x30] sm:$0xff]  ;;  %p15809_p3 = scmp.lt.s32.totalorder %s15807_s27, %s15801_s0 }
 0x9b6   : > { %15274 = vmatprep.subr.bf16.mxu0 %v15273_v34  ;;  %15320 = vmatpush1.bf16.msra.mxu1 %v15319_v24 }
 0x9b7   : > { %v15323_v41 = vpack.c.bf16 %v13596_v20, %v13592_v37  ;;  %v15321_v1 = vpack.c.bf16 %v13597_v2, %v13593_v36  ;;  %p15810_p4 = por %p15809_p3, %p15808_p2 }
 0x9b8   : > { %v23317_v2 = vpop.permute.xlu1 %13625 }
 0x9b9   : > { %15276 = vmatpush1.bf16.msra.mxu0 %v15275_v27  ;;  %15322 = vmatprep.subr.bf16.mxu1 %v15321_v1  ;;  %p15811_p5 = pnand %p15810_p4, %p15804_p1 }
 0x9ba   : > { %15324 = vmatpush1.bf16.msra.mxu1 %v15323_v41  ;;  %15326 = vmatprep.subr.bf16.mxu0 %v15325_v22 }
 0x9bb   : > { %15334 = vmatprep.subr.bf16.mxu1 %v15333_v17 }
 0x9bc   : > { %13728 = vmatmul.mubr.f32.vlgmr.msra.gmra.mrb[80].mxu0 %v12966_v59  ;;  %v23321_v34 = vpop.permute.xlu1 %13635 }
 0x9bd   : > { %13841 = vmatmul.mubr.f32.vlgmr.msra.gmra.mrb[80].mxu1 %v12966_v59  ;;  %15328 = vmatpush1.bf16.msra.mxu0 %v15327_v12 }
 0x9be   : > { %15336 = vmatpush1.bf16.msra.mxu1 %v15335_v53  ;;  %14534 = vmatprep.mubr.msk.f32.mxu0 %vm13638_vm13, %v12969_v18 }
 0x9bf   : > { %14542 = vmatprep.mubr.msk.f32.mxu1 %vm13638_vm13, %v12969_v18  ;;  %15330 = vmatprep.subr.bf16.mxu0 %v15329_v6 }
 0x9c0   : > { %13734 = vmatmul.mubr.f32.gmra.mrb[82].mxu0 %v12968_v58  ;;  %15338 = vmatprep.subr.bf16.mxu1 %v15337_v15  ;;  %v13913_v52 = vpop.permute.xlu1 %13912 }
 0x9c1   : > { %13847 = vmatmul.mubr.f32.gmra.mrb[82].mxu1 %v12968_v58  ;;  %14535 = vmatprep.mubr.msk.f32.mxu0 %vm13638_vm13, %v12971_v49  ;;  %v15345_v1 = vadd.f32 %v13913_v52, %v13606_v60 }
 0x9c2   : > { %14543 = vmatprep.mubr.msk.f32.mxu1 %vm13638_vm13, %v12971_v49  ;;  %15332 = vmatpush1.bf16.msra.mxu0 %v15331_v39 }
 0x9c3   : > { %15340 = vmatpush1.bf16.msra.mxu1 %v15339_v30 }
 0x9c4   : > { %13740 = vmatmul.mubr.f32.gmra.mrb[84].mxu0 %v12970_v57  ;;  %v13601_v8 = vpop.permute.xlu0 %13600  ;;  %v13923_v0 = vpop.permute.xlu1 %13922 }
 0x9c5   : > { %13853 = vmatmul.mubr.f32.gmra.mrb[84].mxu1 %v12970_v57  ;;  %14536 = vmatprep.mubr.msk.f32.mxu0 %vm13638_vm13, %v12973_v26  ;;  %v15353_v44 = vadd.f32 %v13923_v0, %v13616_v46 }
 0x9c6   : > { %14544 = vmatprep.mubr.msk.f32.mxu1 %vm13638_vm13, %v12973_v26 }
 0x9c8   : > { %13746 = vmatmul.mubr.f32.gmra.mrb[86].mxu0 %v12972_v31  ;;  %v13611_v23 = vpop.permute.xlu0 %13610 }
 0x9c9   : > { %13859 = vmatmul.mubr.f32.gmra.mrb[86].mxu1 %v12972_v31  ;;  %14537 = vmatprep.mubr.msk.f32.mxu0 %vm13638_vm13, %v12975_v35 }
 0x9ca   : > { %14545 = vmatprep.mubr.msk.f32.mxu1 %vm13638_vm13, %v12975_v35 }
 0x9cc   : > { %13752 = vmatmul.mubr.f32.gmra.mrb[88].mxu0 %v12974_v61  ;;  %v13621_v20 = vpop.permute.xlu0 %13620 }
 0x9cd   : > { %13865 = vmatmul.mubr.f32.gmra.mrb[88].mxu1 %v12974_v61  ;;  %14538 = vmatprep.mubr.msk.f32.mxu0 %vm13638_vm13, %v12977_v51 }
 0x9ce   : > { %14546 = vmatprep.mubr.msk.f32.mxu1 %vm13638_vm13, %v12977_v51 }
 0x9d0   : > { %13758 = vmatmul.mubr.f32.gmra.mrb[90].mxu0 %v12976_v56  ;;  %v23319_v42 = vpop.permute.xlu0 %13630 }
 0x9d1   : > { %13871 = vmatmul.mubr.f32.gmra.mrb[90].mxu1 %v12976_v56  ;;  %14539 = vmatprep.mubr.msk.f32.mxu0 %vm13638_vm13, %v12979_v33  ;;  %v13933_v56 = vpop.permute.xlu1 %13932 }
 0x9d2   : > { %14547 = vmatprep.mubr.msk.f32.mxu1 %vm13638_vm13, %v12979_v33 }
 0x9d4   : > { %13764 = vmatmul.mubr.f32.gmra.mrb[92].mxu0 %v12978_v63  ;;  %v13908_v24 = vpop.permute.xlu0 %13907 }
 0x9d5   : > { %13877 = vmatmul.mubr.f32.gmra.mrb[92].mxu1 %v12978_v63  ;;  %14540 = vmatprep.mubr.msk.f32.mxu0 %vm13638_vm13, %v12981_v45  ;;  %v15341_v10 = vadd.f32 %v13908_v24, %v13601_v8  ;;  %v13943_v24 = vpop.permute.xlu1 %13942 }
 0x9d6   : > { %14548 = vmatprep.mubr.msk.f32.mxu1 %vm13638_vm13, %v12981_v45 }
 0x9d8   : > { %13770 = vmatmul.mubr.f32.gmra.mrb[94].mxu0 %v12980_v11  ;;  %v13918_v25 = vpop.permute.xlu0 %13917 }
 0x9d9   : > { %13883 = vmatmul.mubr.f32.gmra.mrb[94].mxu1 %v12980_v11  ;;  %14034 = vmatprep.mubr.f32.mxu0 %v24962_v7  ;;  %v15349_v53 = vadd.f32 %v13918_v25, %v13611_v23 }
 0x9da   : > { %14147 = vmatprep.mubr.f32.mxu1 %v24962_v7 }
 0x9dc   : > { %14549 = vmatmul.mubr.msk.f32.vlgmr.msra.gmra.mrb[80].mxu0 %vm13945_vm14, %v13889_v48  ;;  %v13928_v39 = vpop.permute.xlu0 %13927 }
 0x9dd   : > { %14557 = vmatmul.mubr.msk.f32.vlgmr.msra.gmra.mrb[80].mxu1 %vm13945_vm14, %v13889_v48  ;;  %14040 = vmatprep.mubr.f32.mxu0 %v24962_v7  ;;  %v15357_v61 = vadd.f32 %v13928_v39, %v13621_v20 }
 0x9de   : > { %14153 = vmatprep.mubr.f32.mxu1 %v24962_v7 }
 0x9e0   : > { %14550 = vmatmul.mubr.msk.f32.gmra.mrb[82].mxu0 %vm13945_vm14, %v13890_v4 }
 0x9e1   : > { %14558 = vmatmul.mubr.msk.f32.gmra.mrb[82].mxu1 %vm13945_vm14, %v13890_v4  ;;  %14046 = vmatprep.mubr.f32.mxu0 %v24962_v7 }
 0x9e2   : > { %14159 = vmatprep.mubr.f32.mxu1 %v24962_v7 }
 0x9e4   : > { %14551 = vmatmul.mubr.msk.f32.gmra.mrb[84].mxu0 %vm13945_vm14, %v13891_v21 }
 0x9e5   : > { %14559 = vmatmul.mubr.msk.f32.gmra.mrb[84].mxu1 %vm13945_vm14, %v13891_v21  ;;  %14052 = vmatprep.mubr.f32.mxu0 %v24962_v7  ;;  %v15361_v21 = vadd.f32 %v13933_v56, %v23317_v2 }
 0x9e6   : > { %14165 = vmatprep.mubr.f32.mxu1 %v24962_v7 }
 0x9e8   : > { %14552 = vmatmul.mubr.msk.f32.gmra.mrb[86].mxu0 %vm13945_vm14, %v13892_v47 }
 0x9e9   : > { %14560 = vmatmul.mubr.msk.f32.gmra.mrb[86].mxu1 %vm13945_vm14, %v13892_v47  ;;  %14058 = vmatprep.mubr.f32.mxu0 %v24962_v7 }
 0x9ea   : > { %14171 = vmatprep.mubr.f32.mxu1 %v24962_v7 }
 0x9ec   : > { %14553 = vmatmul.mubr.msk.f32.gmra.mrb[88].mxu0 %vm13945_vm14, %v13893_v13 }
 0x9ed   : > { %14561 = vmatmul.mubr.msk.f32.gmra.mrb[88].mxu1 %vm13945_vm14, %v13893_v13  ;;  %14064 = vmatprep.mubr.f32.mxu0 %v24962_v7  ;;  %v13938_v13 = vpop.permute.xlu0 %13937 }
 0x9ee   : > { %14177 = vmatprep.mubr.f32.mxu1 %v24962_v7  ;;  %v15365_v20 = vadd.f32 %v13938_v13, %v23319_v42  ;;  %v15369_v42 = vadd.f32 %v13943_v24, %v23321_v34 }
 0x9f0   : > { %14554 = vmatmul.mubr.msk.f32.gmra.mrb[90].mxu0 %vm13945_vm14, %v13894_v16 }
 0x9f1   : > { %14562 = vmatmul.mubr.msk.f32.gmra.mrb[90].mxu1 %vm13945_vm14, %v13894_v16  ;;  %14070 = vmatprep.mubr.f32.mxu0 %v24962_v7 }
 0x9f2   : > { %14183 = vmatprep.mubr.f32.mxu1 %v24962_v7 }
 0x9f4   : > { %14555 = vmatmul.mubr.msk.f32.gmra.mrb[92].mxu0 %vm13945_vm14, %v13895_v5 }
 0x9f5   : > { %14563 = vmatmul.mubr.msk.f32.gmra.mrb[92].mxu1 %vm13945_vm14, %v13895_v5  ;;  %14076 = vmatprep.mubr.f32.mxu0 %v24962_v7 }
 0x9f6   : > { %14189 = vmatprep.mubr.f32.mxu1 %v24962_v7 }
 0x9f8   : > { %14556 = vmatmul.mubr.msk.f32.gmra.mrb[94].mxu0 %vm13945_vm14, %v13896_v14 }
 0x9f9   : > { %14564 = vmatmul.mubr.msk.f32.gmra.mrb[94].mxu1 %vm13945_vm14, %v13896_v14 }
 0xaaf   : > { %v14036_v37 = vpop.f32.mrb[80].mxu0 }
 0xab0   : > { %v15342_v36 = vadd.f32 %v15341_v10, %v14036_v37  ;;  %v14038_v32 = vpop.f32.mrb[81].mxu0  ;;  %v14149_v55 = vpop.f32.mrb[80].mxu1 }
 0xab1   : > { %v15344_v22 = vadd.f32 %v15341_v10, %v14038_v32  ;;  %v15374_v27 = vadd.f32 %v15341_v10, %v14149_v55  ;;  %v14151_v41 = vpop.f32.mrb[81].mxu1 }
 0xab2   : > { %14228 = vst [vmem:[%s23325_s30] sm:$0xff] %v15342_v36  ;;  %v15376_v43 = vadd.f32 %v15341_v10, %v14151_v41 }
 0xab3   : > { %14229 = vst [vmem:[%s23325_s30 + $0x8] sm:$0xff] %v15344_v22  ;;  %14230 = vst [vmem:[%s23325_s30 + $0x10] sm:$0xff] %v15374_v27  ;;  %v14042_v17 = vpop.f32.mrb[82].mxu0 }
 0xab4   : > { %14231 = vst [vmem:[%s23325_s30 + $0x18] sm:$0xff] %v15376_v43  ;;  %v15346_v59 = vadd.f32 %v15345_v1, %v14042_v17  ;;  %v14044_v29 = vpop.f32.mrb[83].mxu0  ;;  %v14155_v9 = vpop.f32.mrb[82].mxu1 }
 0xab5   : > { %v15348_v12 = vadd.f32 %v15345_v1, %v14044_v29  ;;  %v15378_v50 = vadd.f32 %v15345_v1, %v14155_v9  ;;  %v14157_v38 = vpop.f32.mrb[83].mxu1 }
 0xab6   : > { %14232 = vst [vmem:[%s23325_s30 + $0x20] sm:$0xff] %v15346_v59  ;;  %v15380_v18 = vadd.f32 %v15345_v1, %v14157_v38 }
 0xab7   : > { %14233 = vst [vmem:[%s23325_s30 + $0x28] sm:$0xff] %v15348_v12  ;;  %14234 = vst [vmem:[%s23325_s30 + $0x30] sm:$0xff] %v15378_v50  ;;  %v14048_v54 = vpop.f32.mrb[84].mxu0 }
 0xab8   : > { %14235 = vst [vmem:[%s23325_s30 + $0x38] sm:$0xff] %v15380_v18  ;;  %v15350_v6 = vadd.f32 %v15349_v53, %v14048_v54  ;;  %v14050_v19 = vpop.f32.mrb[85].mxu0  ;;  %v14161_v62 = vpop.f32.mrb[84].mxu1 }
 0xab9   : > { %v15352_v15 = vadd.f32 %v15349_v53, %v14050_v19  ;;  %v15382_v58 = vadd.f32 %v15349_v53, %v14161_v62  ;;  %v14163_v49 = vpop.f32.mrb[85].mxu1 }
 0xaba   : > { %14236 = vst [vmem:[%s23325_s30 + $0x40] sm:$0xff] %v15350_v6  ;;  %v15384_v40 = vadd.f32 %v15349_v53, %v14163_v49 }
 0xabb   : > { %14237 = vst [vmem:[%s23325_s30 + $0x48] sm:$0xff] %v15352_v15  ;;  %14238 = vst [vmem:[%s23325_s30 + $0x50] sm:$0xff] %v15382_v58  ;;  %v14054_v28 = vpop.f32.mrb[86].mxu0 }
 0xabc   : > { %14239 = vst [vmem:[%s23325_s30 + $0x58] sm:$0xff] %v15384_v40  ;;  %v15354_v3 = vadd.f32 %v15353_v44, %v14054_v28  ;;  %v14056_v30 = vpop.f32.mrb[87].mxu0  ;;  %v14167_v57 = vpop.f32.mrb[86].mxu1 }
 0xabd   : > { %v15356_v26 = vadd.f32 %v15353_v44, %v14056_v30  ;;  %v15386_v31 = vadd.f32 %v15353_v44, %v14167_v57  ;;  %v14169_v35 = vpop.f32.mrb[87].mxu1 }
 0xabe   : > { %14240 = vst [vmem:[%s23325_s30 + $0x60] sm:$0xff] %v15354_v3  ;;  %v15388_v51 = vadd.f32 %v15353_v44, %v14169_v35 }
 0xabf   : > { %14241 = vst [vmem:[%s23325_s30 + $0x68] sm:$0xff] %v15356_v26  ;;  %14242 = vst [vmem:[%s23325_s30 + $0x70] sm:$0xff] %v15386_v31  ;;  %v14060_v33 = vpop.f32.mrb[88].mxu0 }
 0xac0   : > { %14243 = vst [vmem:[%s23325_s30 + $0x78] sm:$0xff] %v15388_v51  ;;  %v15358_v63 = vadd.f32 %v15357_v61, %v14060_v33  ;;  %v14062_v45 = vpop.f32.mrb[89].mxu0  ;;  %v14173_v11 = vpop.f32.mrb[88].mxu1 }
 0xac1   : > { %v15360_v7 = vadd.f32 %v15357_v61, %v14062_v45  ;;  %v15390_v48 = vadd.f32 %v15357_v61, %v14173_v11  ;;  %v14175_v4 = vpop.f32.mrb[89].mxu1 }
 0xac2   : > { %14244 = vst [vmem:[%s23325_s30 + $0x80] sm:$0xff] %v15358_v63  ;;  %v15392_v47 = vadd.f32 %v15357_v61, %v14175_v4 }
 0xac3   : > { %14245 = vst [vmem:[%s23325_s30 + $0x88] sm:$0xff] %v15360_v7  ;;  %14246 = vst [vmem:[%s23325_s30 + $0x90] sm:$0xff] %v15390_v48  ;;  %v14066_v16 = vpop.f32.mrb[90].mxu0 }
 0xac4   : > { %14247 = vst [vmem:[%s23325_s30 + $0x98] sm:$0xff] %v15392_v47  ;;  %v15362_v5 = vadd.f32 %v15361_v21, %v14066_v16  ;;  %v14068_v14 = vpop.f32.mrb[91].mxu0  ;;  %v14179_v8 = vpop.f32.mrb[90].mxu1 }
 0xac5   : > { %v15364_v60 = vadd.f32 %v15361_v21, %v14068_v14  ;;  %v15394_v23 = vadd.f32 %v15361_v21, %v14179_v8  ;;  %v14181_v46 = vpop.f32.mrb[91].mxu1 }
 0xac6   : > { %14248 = vst [vmem:[%s23325_s30 + $0xa0] sm:$0xff] %v15362_v5  ;;  %v15396_v2 = vadd.f32 %v15361_v21, %v14181_v46 }
 0xac7   : > { %14249 = vst [vmem:[%s23325_s30 + $0xa8] sm:$0xff] %v15364_v60  ;;  %14250 = vst [vmem:[%s23325_s30 + $0xb0] sm:$0xff] %v15394_v23  ;;  %v14072_v10 = vpop.f32.mrb[92].mxu0 }
 0xac8   : > { %14251 = vst [vmem:[%s23325_s30 + $0xb8] sm:$0xff] %v15396_v2  ;;  %v15366_v52 = vadd.f32 %v15365_v20, %v14072_v10  ;;  %v14074_v37 = vpop.f32.mrb[93].mxu0  ;;  %v14185_v36 = vpop.f32.mrb[92].mxu1 }
 0xac9   : > { %v15368_v32 = vadd.f32 %v15365_v20, %v14074_v37  ;;  %v15398_v55 = vadd.f32 %v15365_v20, %v14185_v36  ;;  %v14187_v22 = vpop.f32.mrb[93].mxu1 }
 0xaca   : > { %14252 = vst [vmem:[%s23325_s30 + $0xc0] sm:$0xff] %v15366_v52  ;;  %v15400_v27 = vadd.f32 %v15365_v20, %v14187_v22 }
 0xacb   : > { %14253 = vst [vmem:[%s23325_s30 + $0xc8] sm:$0xff] %v15368_v32  ;;  %14254 = vst [vmem:[%s23325_s30 + $0xd0] sm:$0xff] %v15398_v55  ;;  %v14078_v41 = vpop.f32.mrb[94].mxu0 }
 0xacc   : > { %14255 = vst [vmem:[%s23325_s30 + $0xd8] sm:$0xff] %v15400_v27  ;;  %v15370_v1 = vadd.f32 %v15369_v42, %v14078_v41  ;;  %v14080_v43 = vpop.f32.mrb[95].mxu0  ;;  %v14191_v25 = vpop.f32.mrb[94].mxu1 }
 0xacd   : > { %v15372_v34 = vadd.f32 %v15369_v42, %v14080_v43  ;;  %v15402_v17 = vadd.f32 %v15369_v42, %v14191_v25  ;;  %v14193_v59 = vpop.f32.mrb[95].mxu1 }
 0xace   : > { %14256 = vst [vmem:[%s23325_s30 + $0xe0] sm:$0xff] %v15370_v1  ;;  %v15404_v29 = vadd.f32 %v15369_v42, %v14193_v59 }
 0xacf   : > { %14257 = vst [vmem:[%s23325_s30 + $0xe8] sm:$0xff] %v15372_v34  ;;  %14258 = vst [vmem:[%s23325_s30 + $0xf0] sm:$0xff] %v15402_v17 }
 0xad0   : > { %14259 = vst [vmem:[%s23325_s30 + $0xf8] sm:$0xff] %v15404_v29 }
 0xad1   : > { %15814 = shalt.err (!%p15811_p5)
}
 0xad2   : > { %s15815_s30 = scalar_lea.hbm %s23364_s19, 4096  ;;  %s15819_s26 = scalar_lea.hbm %s23430_s16, 8192 }
 0xad3   : > { %p15816_p7 = scmp.ne.s32.totalorder %s23364_s19, %s15815_s30  ;;  %p15820_p12 = scmp.lt.u32.totalorder %s23364_s19, %s23430_s16 }
 0xad4   : > { %p15821_p13 = scmp.lt.u32.totalorder %s15819_s26, %s15815_s30  ;;  %p15823_p1 = scmp.lt.u32.totalorder %s15815_s30, %s23364_s19 }
 0xad5   : > { %p15817_p10 = pnand %p15816_p7, %p16006_p6 }
 0xad6   : > { %p15822_p0 = por %p15821_p13, %p15820_p12 }
 0xad7   : > { %p15818_p11 = pneg %p15817_p10 }
 0xad8   : > { %p15824_p2 = por %p15823_p1, %p15822_p0 }
 0xada   : > { %p15825_p3 = pnand %p15824_p2, %p15818_p11 }
 0xadc   : > { %15828 = shalt.err (!%p15825_p3)
}
 0xadd   : > { %s15876_s0 = smov 512   ;;  %s15877_s18 = smov 1024  }
 0xade   : > { %s15878_s27 = smov 32  }
 0xadf   : > { %15437 = dma.vmem_to_hbm [thread:$0]  (%p16006_p6), %s23366_s28, 4096, %s23364_s19, %s14261_s23, %s15876_s0, %s15877_s18, %s15878_s27  }
 0xae0 PF: > { %s14289_s1 = sand.u32 1, %s15851_s21   ;;  %p15440_p4 = pnand %p14362_p9, %p16010_p8 }
 0xae1   : > { %s14290_s30 = scalar_lea.sflag [#allocation5], %s14289_s1 }
 0xae2   : > { %15846 = dma.done.wait (!%p15440_p4), %s14290_s30, 4096  }
 0xae3   : > { %15848 = vsyncadd (!%p15440_p4), %s14290_s30, 4294963200  ;;  %s24965_s24 = sld [smem:[#allocation9_spill]]  ;;  %s24966_s21 = sld [smem:[#allocation7_spill]] }
 0xae4   : > { %s24967_s22 = sld [smem:[#allocation8_spill]]  ;;  %s24968_s23 = sld [smem:[#allocation10_spill]] }
 0xae9   : > { %p26_p5 = scmp.ge.s32.totalorder %s24965_s24, 4  }
 0xaeb   :  { %28 = sbr.rel (!%p26_p5) target bundleno = 6 (0x6), region = 178 }
 0xaf2   :  { %14295 = vsyncpa [#allocation5], 1 }
 0xaf3   :  { %14297 = vsyncpa [#allocation5 + $0x1], 1 }

</bundles_post_ra>
